<compile_context>
chip_gen: v7x
topology: tpu7x:2x2x1
jax: 0.10.0
libtpu: 0.0.40
codegen_flags: <defaults>
</compile_context>

<pallas_src>
import functools

import jax
import jax.numpy as jnp
from jax.experimental import pallas as pl
from jax.experimental.pallas import tpu as pltpu

_BN_EPS = 1e-5


# --------------------------------------------------------------------------
# Tiled fused matmul kernels: bf16 matmul -> f32 acc -> +shift [+res] [ReLU]
# --------------------------------------------------------------------------
def _mm_kernel(x_ref, w_ref, b_ref, o_ref, acc_ref, *, relu):
    @pl.when(pl.program_id(2) == 0)
    def _():
        acc_ref[...] = jnp.zeros_like(acc_ref)

    acc_ref[...] += jnp.dot(x_ref[...], w_ref[...],
                            preferred_element_type=jnp.float32)

    @pl.when(pl.program_id(2) == pl.num_programs(2) - 1)
    def _():
        acc = acc_ref[...] + b_ref[...]
        if relu:
            acc = jnp.maximum(acc, 0.0)
        o_ref[...] = acc.astype(o_ref.dtype)


def _mm_res_kernel(x_ref, w_ref, b_ref, r_ref, o_ref, acc_ref, *, relu):
    @pl.when(pl.program_id(2) == 0)
    def _():
        acc_ref[...] = jnp.zeros_like(acc_ref)

    acc_ref[...] += jnp.dot(x_ref[...], w_ref[...],
                            preferred_element_type=jnp.float32)

    @pl.when(pl.program_id(2) == pl.num_programs(2) - 1)
    def _():
        acc = acc_ref[...] + b_ref[...] + r_ref[...].astype(jnp.float32)
        if relu:
            acc = jnp.maximum(acc, 0.0)
        o_ref[...] = acc.astype(o_ref.dtype)


def _round_up(x, m):
    return (x + m - 1) // m * m


def _pick_tiles(M, K, N):
    """Pick (padded dim, tile) per axis; tiles always divide the padded dim."""
    if M <= 256:
        Mp, tm = _round_up(M, 8), _round_up(M, 8)
    else:
        Mp, tm = _round_up(M, 256), 256
    if N <= 256:
        Np, tn = _round_up(N, 128), _round_up(N, 128)
    else:
        Np, tn = _round_up(N, 256), 256
    Kp = _round_up(K, 128)
    if Kp <= 2048:
        tk = Kp                       # keep full-K resident: single reduction step
    elif Kp % 512 == 0:
        tk = 512
    elif Kp % 256 == 0:
        tk = 256
    else:
        tk = 128
    return Mp, tm, Kp, tk, Np, tn


def _pad2(a, rows, cols, dtype):
    a = a.astype(dtype)
    pr, pc = rows - a.shape[0], cols - a.shape[1]
    if pr or pc:
        a = jnp.pad(a, ((0, pr), (0, pc)))
    return a


def fused_matmul(x, w, shift, residual=None, relu=True, out_dtype=jnp.bfloat16):
    """(M,K)@(K,N) + shift [+residual] [->ReLU]; tiled bf16 MXU, f32 accumulate."""
    M, K = x.shape
    Kw, N = w.shape
    assert K == Kw, (K, Kw)
    Mp, tm, Kp, tk, Np, tn = _pick_tiles(M, K, N)

    x_p = _pad2(x, Mp, Kp, jnp.bfloat16)
    w_p = _pad2(w, Kp, Np, jnp.bfloat16)
    b_p = _pad2(shift.reshape(1, N), 1, Np, jnp.float32)

    grid = (Mp // tm, Np // tn, Kp // tk)
    in_specs = [
        pl.BlockSpec((tm, tk), lambda i, j, k: (i, k)),
        pl.BlockSpec((tk, tn), lambda i, j, k: (k, j)),
        pl.BlockSpec((1, tn), lambda i, j, k: (0, j)),
    ]
    args = [x_p, w_p, b_p]
    if residual is not None:
        args.append(_pad2(residual, Mp, Np, jnp.bfloat16))
        in_specs.append(pl.BlockSpec((tm, tn), lambda i, j, k: (i, j)))
        kernel = functools.partial(_mm_res_kernel, relu=relu)
    else:
        kernel = functools.partial(_mm_kernel, relu=relu)

    out = pl.pallas_call(
        kernel,
        out_shape=jax.ShapeDtypeStruct((Mp, Np), out_dtype),
        grid_spec=pltpu.PrefetchScalarGridSpec(
            num_scalar_prefetch=0,
            grid=grid,
            in_specs=in_specs,
            out_specs=pl.BlockSpec((tm, tn), lambda i, j, k: (i, j)),
            scratch_shapes=[pltpu.VMEM((tm, tn), jnp.float32)],
        ),
        compiler_params=pltpu.CompilerParams(
            dimension_semantics=("parallel", "parallel", "arbitrary")),
    )(*args)
    return out[:M, :N]


# --------------------------------------------------------------------------
# Conv / pooling glue (layout ops in XLA; all FLOPs go through fused_matmul)
# --------------------------------------------------------------------------
def _im2col(x, kh, kw, stride, pad):
    """x: (N,H,W,C) bf16 -> ((N*OH*OW, KH*KW*C), OH, OW). Patch order (kh,kw,c)."""
    xp = jnp.pad(x, ((0, 0), (pad, pad), (pad, pad), (0, 0)))
    N, Hp, Wp, C = xp.shape
    oh = (Hp - kh) // stride + 1
    ow = (Wp - kw) // stride + 1
    patches = []
    for i in range(kh):
        for j in range(kw):
            patches.append(xp[:, i:i + stride * oh:stride, j:j + stride * ow:stride, :])
    cols = jnp.stack(patches, axis=3)                 # (N, oh, ow, kh*kw, C)
    return cols.reshape(N * oh * ow, kh * kw * C), oh, ow


def conv_bn_act(x, p, stride, pad, relu=True, residual=None):
    """Fused conv + folded-BN (+residual) (+ReLU). x NHWC bf16 -> NHWC bf16."""
    N = x.shape[0]
    cout = p["wmat"].shape[1]
    cols, oh, ow = _im2col(x, p["kh"], p["kw"], stride, pad)
    res = None if residual is None else residual.reshape(N * oh * ow, cout)
    out = fused_matmul(cols, p["wmat"], p["shift"], residual=res, relu=relu,
                       out_dtype=jnp.bfloat16)
    return out.reshape(N, oh, ow, cout)


def maxpool_3x3_s2_p1(x):
    """MaxPool2d(kernel_size=3, stride=2, padding=1) on NHWC."""
    N, H, W, C = x.shape
    xp = jnp.pad(x, ((0, 0), (1, 1), (1, 1), (0, 0)),
                 constant_values=jnp.array(-jnp.inf, x.dtype))
    oh = (H + 2 - 3) // 2 + 1
    ow = (W + 2 - 3) // 2 + 1
    vals = []
    for i in range(3):
        for j in range(3):
            vals.append(xp[:, i:i + 2 * oh:2, j:j + 2 * ow:2, :])
    return jnp.max(jnp.stack(vals, axis=0), axis=0)


# --------------------------------------------------------------------------
# Parameter construction: BN scale folded into bf16 weight matrices at init
# --------------------------------------------------------------------------
def _conv_bn_params(key, kh, kw, cin, cout):
    kw_key, kb_key = jax.random.split(key)
    fan_in = kh * kw * cin
    w = jax.random.normal(kw_key, (kh, kw, cin, cout), jnp.float32) * (2.0 / fan_in) ** 0.5
    b = jax.random.normal(kb_key, (cout,), jnp.float32) * 0.01
    # Inference-mode BN: mean=0, var=1, gamma=1, beta=0.
    gamma = jnp.ones((cout,), jnp.float32)
    beta = jnp.zeros((cout,), jnp.float32)
    mean = jnp.zeros((cout,), jnp.float32)
    var = jnp.ones((cout,), jnp.float32)
    scale = gamma / jnp.sqrt(var + _BN_EPS)
    shift = beta - mean * scale + b * scale
    wmat = (w * scale[None, None, None, :]).reshape(kh * kw * cin, cout).astype(jnp.bfloat16)
    return dict(wmat=wmat, shift=shift.astype(jnp.float32), kh=kh, kw=kw)


def _block_init(key, cin, cout, stride):
    keys = jax.random.split(key, 3)
    p = dict(
        conv1=_conv_bn_params(keys[0], 3, 3, cin, cout),
        conv2=_conv_bn_params(keys[1], 3, 3, cout, cout),
        stride=stride,
    )
    if stride != 1:  # downsample: Conv2d(3x3, stride=2, pad=1) + BN (per the module)
        p["down"] = _conv_bn_params(keys[2], 3, 3, cin, cout)
    return p


def init_resnet18(key, num_classes=10, image_channels=3):
    keys = jax.random.split(key, 10)
    params = {"stem": _conv_bn_params(keys[0], 7, 7, image_channels, 64)}
    cfgs = [(64, 64, 1), (64, 128, 2), (128, 256, 2), (256, 512, 2)]
    ki = 1
    for li, (cin, cout, stride) in enumerate(cfgs, start=1):
        params[f"layer{li}"] = [
            _block_init(keys[ki], cin, cout, stride),
            _block_init(keys[ki + 1], cout, cout, 1),
        ]
        ki += 2
    kfc_w, kfc_b = jax.random.split(keys[9])
    params["fc_w"] = (jax.random.normal(kfc_w, (512, num_classes), jnp.float32)
                      * (1.0 / 512) ** 0.5).astype(jnp.bfloat16)
    params["fc_b"] = jax.random.normal(kfc_b, (num_classes,), jnp.float32) * 0.01
    return params


# --------------------------------------------------------------------------
# Forward pass
# --------------------------------------------------------------------------
def block_forward(x, p):
    identity = x
    out = conv_bn_act(x, p["conv1"], stride=p["stride"], pad=1, relu=True)
    # TODO(synk): F.dropout2d paths (spatial=True) not implemented; module defaults disable them.
    if "down" in p:
        identity = conv_bn_act(identity, p["down"], stride=2, pad=1, relu=False)
    # conv2 -> bn2 -> (+identity) -> relu fused in one Pallas kernel.
    out = conv_bn_act(out, p["conv2"], stride=1, pad=1, relu=True, residual=identity)
    return out


def resnet18_forward(params, x_nchw):
    x = jnp.transpose(x_nchw, (0, 2, 3, 1)).astype(jnp.bfloat16)  # NCHW -> NHWC bf16
    x = conv_bn_act(x, params["stem"], stride=2, pad=3, relu=True)
    x = maxpool_3x3_s2_p1(x)
    for li in range(1, 5):
        for bp in params[f"layer{li}"]:
            x = block_forward(x, bp)
    x = jnp.mean(x.astype(jnp.float32), axis=(1, 2))  # AdaptiveAvgPool2d((1,1)) + flatten
    out = fused_matmul(x, params["fc_w"], params["fc_b"], relu=False,
                       out_dtype=jnp.float32)
    return out


# --------------------------------------------------------------------------
if __name__ == "__main__":
    key = jax.random.PRNGKey(0)
    pkey, xkey = jax.random.split(key)
    params = init_resnet18(pkey, num_classes=10, image_channels=3)
    x = jax.random.normal(xkey, (2, 3, 32, 32), jnp.float32)  # NCHW like PyTorch

    # Close over params so static metadata (kh/kw/stride) stays Python-level.
    fwd = jax.jit(lambda inp: resnet18_forward(params, inp))
    out = jax.block_until_ready(fwd(x))
    assert out.shape == (2, 10), out.shape
    assert bool(jnp.all(jnp.isfinite(out)))
    print("KERNEL_OK")
</pallas_src>

<mosaic_0001>
module attributes {stable_mosaic.version = 11 : i64} {
  func.func @_mm_kernel(%arg0: i32, %arg1: i32, %arg2: i32, %arg3: memref<256x256xbf16, #tpu.memory_space<vmem>>, %arg4: memref<256x128xbf16, #tpu.memory_space<vmem>>, %arg5: memref<1x128xf32, #tpu.memory_space<vmem>>, %arg6: memref<256x128xbf16, #tpu.memory_space<vmem>>, %arg7: memref<256x128xf32, #tpu.memory_space<vmem>>) attributes {dimension_semantics = [#tpu.dimension_semantics<parallel>, #tpu.dimension_semantics<parallel>, #tpu.dimension_semantics<arbitrary>], iteration_bounds = array<i64: 2, 1, 1>, scalar_prefetch = 0 : i64, scratch_operands = 1 : i64, tpu.core_type = #tpu.core_type<tc>, window_params = [{transform_indices = @transform_0, window_bounds = array<i64: 256, 256>}, {transform_indices = @transform_1, window_bounds = array<i64: 256, 128>}, {transform_indices = @transform_2, window_bounds = array<i64: 1, 128>}, {transform_indices = @transform_3, window_bounds = array<i64: 256, 128>}]} {
    %c0_i32 = arith.constant 0 : i32
    %0 = arith.cmpi eq, %arg2, %c0_i32 : i32
    %1 = arith.extui %0 : i1 to i32
    %c0_i32_0 = arith.constant 0 : i32
    %2 = arith.cmpi ne, %1, %c0_i32_0 : i32
    scf.if %2 {
      %cst_10 = arith.constant 0.000000e+00 : f32
      %12 = vector.broadcast %cst_10 : f32 to vector<256x128xf32>
      %c0_11 = arith.constant 0 : index
      %c0_12 = arith.constant 0 : index
      %13 = vector.load %arg7[%c0_11, %c0_12] : memref<256x128xf32, #tpu.memory_space<vmem>>, vector<256x128xf32>
      tpu.vector_store %arg7[%c0_11, %c0_12], %12 {strides = array<i32>} : memref<256x128xf32, #tpu.memory_space<vmem>>, vector<256x128xf32>,
    } else {
    }
    %c0 = arith.constant 0 : index
    %c0_1 = arith.constant 0 : index
    %3 = vector.load %arg7[%c0, %c0_1] : memref<256x128xf32, #tpu.memory_space<vmem>>, vector<256x128xf32>
    %c0_2 = arith.constant 0 : index
    %c0_3 = arith.constant 0 : index
    %4 = vector.load %arg3[%c0_2, %c0_3] : memref<256x256xbf16, #tpu.memory_space<vmem>>, vector<256x256xbf16>
    %c0_4 = arith.constant 0 : index
    %c0_5 = arith.constant 0 : index
    %5 = vector.load %arg4[%c0_4, %c0_5] : memref<256x128xbf16, #tpu.memory_space<vmem>>, vector<256x128xbf16>
    %cst = arith.constant dense<0.000000e+00> : vector<256x128xf32>
    %6 = tpu.matmul %4, %5, %cst {dimension_numbers = #tpu.dot_dimension_numbers<[1], [0], [0], [1], [0, 0, 1, 1], [], []>} : vector<256x256xbf16>, vector<256x128xbf16>, vector<256x128xf32> -> vector<256x128xf32>
    %7 = arith.addf %3, %6 : vector<256x128xf32>
    %c0_6 = arith.constant 0 : index
    %c0_7 = arith.constant 0 : index
    %8 = vector.load %arg7[%c0_6, %c0_7] : memref<256x128xf32, #tpu.memory_space<vmem>>, vector<256x128xf32>
    tpu.vector_store %arg7[%c0_6, %c0_7], %7 {strides = array<i32>} : memref<256x128xf32, #tpu.memory_space<vmem>>, vector<256x128xf32>,
    %c0_i32_8 = arith.constant 0 : i32
    %9 = arith.cmpi eq, %arg2, %c0_i32_8 : i32
    %10 = arith.extui %9 : i1 to i32
    %c0_i32_9 = arith.constant 0 : i32
    %11 = arith.cmpi ne, %10, %c0_i32_9 : i32
    scf.if %11 {
      %c0_10 = arith.constant 0 : index
      %c0_11 = arith.constant 0 : index
      %12 = vector.load %arg7[%c0_10, %c0_11] : memref<256x128xf32, #tpu.memory_space<vmem>>, vector<256x128xf32>
      %c0_12 = arith.constant 0 : index
      %c0_13 = arith.constant 0 : index
      %13 = vector.load %arg5[%c0_12, %c0_13] : memref<1x128xf32, #tpu.memory_space<vmem>>, vector<1x128xf32>
      %14 = vector.broadcast %13 : vector<1x128xf32> to vector<256x128xf32>
      %15 = arith.addf %12, %14 : vector<256x128xf32>
      %cst_14 = arith.constant 0.000000e+00 : f32
      %16 = vector.broadcast %cst_14 : f32 to vector<256x128xf32>
      %17 = arith.maximumf %15, %16 : vector<256x128xf32>
      %18 = arith.truncf %17 : vector<256x128xf32> to vector<256x128xbf16>
      %c0_15 = arith.constant 0 : index
      %c0_16 = arith.constant 0 : index
      %19 = vector.load %arg6[%c0_15, %c0_16] : memref<256x128xbf16, #tpu.memory_space<vmem>>, vector<256x128xbf16>
      tpu.vector_store %arg6[%c0_15, %c0_16], %18 {strides = array<i32>} : memref<256x128xbf16, #tpu.memory_space<vmem>>, vector<256x128xbf16>,
    } else {
    }
    return
  }
  func.func @transform_0(%arg0: i32, %arg1: i32, %arg2: i32) -> (i32, i32) {
    %c0_i32 = arith.constant 0 : i32
    return %arg0, %arg2 : i32, i32
  }
  func.func @transform_1(%arg0: i32, %arg1: i32, %arg2: i32) -> (i32, i32) {
    %c0_i32 = arith.constant 0 : i32
    return %arg2, %arg1 : i32, i32
  }
  func.func @transform_2(%arg0: i32, %arg1: i32, %arg2: i32) -> (i32, i32) {
    %c0_i32 = arith.constant 0 : i32
    %c0_i32_0 = arith.constant 0 : i32
    return %c0_i32, %arg1 : i32, i32
  }
  func.func @transform_3(%arg0: i32, %arg1: i32, %arg2: i32) -> (i32, i32) {
    %c0_i32 = arith.constant 0 : i32
    return %arg0, %arg1 : i32, i32
  }
}

module attributes {stable_mosaic.version = 11 : i64} {
  func.func @_mm_kernel(%arg0: i32, %arg1: i32, %arg2: i32, %arg3: memref<128x640xbf16, #tpu.memory_space<vmem>>, %arg4: memref<640x128xbf16, #tpu.memory_space<vmem>>, %arg5: memref<1x128xf32, #tpu.memory_space<vmem>>, %arg6: memref<128x128xbf16, #tpu.memory_space<vmem>>, %arg7: memref<128x128xf32, #tpu.memory_space<vmem>>) attributes {dimension_semantics = [#tpu.dimension_semantics<parallel>, #tpu.dimension_semantics<parallel>, #tpu.dimension_semantics<arbitrary>], iteration_bounds = array<i64: 1, 1, 1>, scalar_prefetch = 0 : i64, scratch_operands = 1 : i64, tpu.core_type = #tpu.core_type<tc>, window_params = [{transform_indices = @transform_0, window_bounds = array<i64: 128, 640>}, {transform_indices = @transform_1, window_bounds = array<i64: 640, 128>}, {transform_indices = @transform_2, window_bounds = array<i64: 1, 128>}, {transform_indices = @transform_3, window_bounds = array<i64: 128, 128>}]} {
    %c0_i32 = arith.constant 0 : i32
    %0 = arith.cmpi eq, %arg2, %c0_i32 : i32
    %1 = arith.extui %0 : i1 to i32
    %c0_i32_0 = arith.constant 0 : i32
    %2 = arith.cmpi ne, %1, %c0_i32_0 : i32
    scf.if %2 {
      %cst_10 = arith.constant 0.000000e+00 : f32
      %12 = vector.broadcast %cst_10 : f32 to vector<128x128xf32>
      %c0_11 = arith.constant 0 : index
      %c0_12 = arith.constant 0 : index
      %13 = vector.load %arg7[%c0_11, %c0_12] : memref<128x128xf32, #tpu.memory_space<vmem>>, vector<128x128xf32>
      tpu.vector_store %arg7[%c0_11, %c0_12], %12 {strides = array<i32>} : memref<128x128xf32, #tpu.memory_space<vmem>>, vector<128x128xf32>,
    } else {
    }
    %c0 = arith.constant 0 : index
    %c0_1 = arith.constant 0 : index
    %3 = vector.load %arg7[%c0, %c0_1] : memref<128x128xf32, #tpu.memory_space<vmem>>, vector<128x128xf32>
    %c0_2 = arith.constant 0 : index
    %c0_3 = arith.constant 0 : index
    %4 = vector.load %arg3[%c0_2, %c0_3] : memref<128x640xbf16, #tpu.memory_space<vmem>>, vector<128x640xbf16>
    %c0_4 = arith.constant 0 : index
    %c0_5 = arith.constant 0 : index
    %5 = vector.load %arg4[%c0_4, %c0_5] : memref<640x128xbf16, #tpu.memory_space<vmem>>, vector<640x128xbf16>
    %cst = arith.constant dense<0.000000e+00> : vector<128x128xf32>
    %6 = tpu.matmul %4, %5, %cst {dimension_numbers = #tpu.dot_dimension_numbers<[1], [0], [0], [1], [0, 0, 1, 1], [], []>} : vector<128x640xbf16>, vector<640x128xbf16>, vector<128x128xf32> -> vector<128x128xf32>
    %7 = arith.addf %3, %6 : vector<128x128xf32>
    %c0_6 = arith.constant 0 : index
    %c0_7 = arith.constant 0 : index
    %8 = vector.load %arg7[%c0_6, %c0_7] : memref<128x128xf32, #tpu.memory_space<vmem>>, vector<128x128xf32>
    tpu.vector_store %arg7[%c0_6, %c0_7], %7 {strides = array<i32>} : memref<128x128xf32, #tpu.memory_space<vmem>>, vector<128x128xf32>,
    %c0_i32_8 = arith.constant 0 : i32
    %9 = arith.cmpi eq, %arg2, %c0_i32_8 : i32
    %10 = arith.extui %9 : i1 to i32
    %c0_i32_9 = arith.constant 0 : i32
    %11 = arith.cmpi ne, %10, %c0_i32_9 : i32
    scf.if %11 {
      %c0_10 = arith.constant 0 : index
      %c0_11 = arith.constant 0 : index
      %12 = vector.load %arg7[%c0_10, %c0_11] : memref<128x128xf32, #tpu.memory_space<vmem>>, vector<128x128xf32>
      %c0_12 = arith.constant 0 : index
      %c0_13 = arith.constant 0 : index
      %13 = vector.load %arg5[%c0_12, %c0_13] : memref<1x128xf32, #tpu.memory_space<vmem>>, vector<1x128xf32>
      %14 = vector.broadcast %13 : vector<1x128xf32> to vector<128x128xf32>
      %15 = arith.addf %12, %14 : vector<128x128xf32>
      %cst_14 = arith.constant 0.000000e+00 : f32
      %16 = vector.broadcast %cst_14 : f32 to vector<128x128xf32>
      %17 = arith.maximumf %15, %16 : vector<128x128xf32>
      %18 = arith.truncf %17 : vector<128x128xf32> to vector<128x128xbf16>
      %c0_15 = arith.constant 0 : index
      %c0_16 = arith.constant 0 : index
      %19 = vector.load %arg6[%c0_15, %c0_16] : memref<128x128xbf16, #tpu.memory_space<vmem>>, vector<128x128xbf16>
      tpu.vector_store %arg6[%c0_15, %c0_16], %18 {strides = array<i32>} : memref<128x128xbf16, #tpu.memory_space<vmem>>, vector<128x128xbf16>,
    } else {
    }
    return
  }
  func.func @transform_0(%arg0: i32, %arg1: i32, %arg2: i32) -> (i32, i32) {
    %c0_i32 = arith.constant 0 : i32
    return %arg0, %arg2 : i32, i32
  }
  func.func @transform_1(%arg0: i32, %arg1: i32, %arg2: i32) -> (i32, i32) {
    %c0_i32 = arith.constant 0 : i32
    return %arg2, %arg1 : i32, i32
  }
  func.func @transform_2(%arg0: i32, %arg1: i32, %arg2: i32) -> (i32, i32) {
    %c0_i32 = arith.constant 0 : i32
    %c0_i32_0 = arith.constant 0 : i32
    return %c0_i32, %arg1 : i32, i32
  }
  func.func @transform_3(%arg0: i32, %arg1: i32, %arg2: i32) -> (i32, i32) {
    %c0_i32 = arith.constant 0 : i32
    return %arg0, %arg1 : i32, i32
  }
}

module attributes {stable_mosaic.version = 11 : i64} {
  func.func @_mm_res_kernel(%arg0: i32, %arg1: i32, %arg2: i32, %arg3: memref<128x640xbf16, #tpu.memory_space<vmem>>, %arg4: memref<640x128xbf16, #tpu.memory_space<vmem>>, %arg5: memref<1x128xf32, #tpu.memory_space<vmem>>, %arg6: memref<128x128xbf16, #tpu.memory_space<vmem>>, %arg7: memref<128x128xbf16, #tpu.memory_space<vmem>>, %arg8: memref<128x128xf32, #tpu.memory_space<vmem>>) attributes {dimension_semantics = [#tpu.dimension_semantics<parallel>, #tpu.dimension_semantics<parallel>, #tpu.dimension_semantics<arbitrary>], iteration_bounds = array<i64: 1, 1, 1>, scalar_prefetch = 0 : i64, scratch_operands = 1 : i64, tpu.core_type = #tpu.core_type<tc>, window_params = [{transform_indices = @transform_0, window_bounds = array<i64: 128, 640>}, {transform_indices = @transform_1, window_bounds = array<i64: 640, 128>}, {transform_indices = @transform_2, window_bounds = array<i64: 1, 128>}, {transform_indices = @transform_3, window_bounds = array<i64: 128, 128>}, {transform_indices = @transform_4, window_bounds = array<i64: 128, 128>}]} {
    %c0_i32 = arith.constant 0 : i32
    %0 = arith.cmpi eq, %arg2, %c0_i32 : i32
    %1 = arith.extui %0 : i1 to i32
    %c0_i32_0 = arith.constant 0 : i32
    %2 = arith.cmpi ne, %1, %c0_i32_0 : i32
    scf.if %2 {
      %cst_10 = arith.constant 0.000000e+00 : f32
      %12 = vector.broadcast %cst_10 : f32 to vector<128x128xf32>
      %c0_11 = arith.constant 0 : index
      %c0_12 = arith.constant 0 : index
      %13 = vector.load %arg8[%c0_11, %c0_12] : memref<128x128xf32, #tpu.memory_space<vmem>>, vector<128x128xf32>
      tpu.vector_store %arg8[%c0_11, %c0_12], %12 {strides = array<i32>} : memref<128x128xf32, #tpu.memory_space<vmem>>, vector<128x128xf32>,
    } else {
    }
    %c0 = arith.constant 0 : index
    %c0_1 = arith.constant 0 : index
    %3 = vector.load %arg8[%c0, %c0_1] : memref<128x128xf32, #tpu.memory_space<vmem>>, vector<128x128xf32>
    %c0_2 = arith.constant 0 : index
    %c0_3 = arith.constant 0 : index
    %4 = vector.load %arg3[%c0_2, %c0_3] : memref<128x640xbf16, #tpu.memory_space<vmem>>, vector<128x640xbf16>
    %c0_4 = arith.constant 0 : index
    %c0_5 = arith.constant 0 : index
    %5 = vector.load %arg4[%c0_4, %c0_5] : memref<640x128xbf16, #tpu.memory_space<vmem>>, vector<640x128xbf16>
    %cst = arith.constant dense<0.000000e+00> : vector<128x128xf32>
    %6 = tpu.matmul %4, %5, %cst {dimension_numbers = #tpu.dot_dimension_numbers<[1], [0], [0], [1], [0, 0, 1, 1], [], []>} : vector<128x640xbf16>, vector<640x128xbf16>, vector<128x128xf32> -> vector<128x128xf32>
    %7 = arith.addf %3, %6 : vector<128x128xf32>
    %c0_6 = arith.constant 0 : index
    %c0_7 = arith.constant 0 : index
    %8 = vector.load %arg8[%c0_6, %c0_7] : memref<128x128xf32, #tpu.memory_space<vmem>>, vector<128x128xf32>
    tpu.vector_store %arg8[%c0_6, %c0_7], %7 {strides = array<i32>} : memref<128x128xf32, #tpu.memory_space<vmem>>, vector<128x128xf32>,
    %c0_i32_8 = arith.constant 0 : i32
    %9 = arith.cmpi eq, %arg2, %c0_i32_8 : i32
    %10 = arith.extui %9 : i1 to i32
    %c0_i32_9 = arith.constant 0 : i32
    %11 = arith.cmpi ne, %10, %c0_i32_9 : i32
    scf.if %11 {
      %c0_10 = arith.constant 0 : index
      %c0_11 = arith.constant 0 : index
      %12 = vector.load %arg8[%c0_10, %c0_11] : memref<128x128xf32, #tpu.memory_space<vmem>>, vector<128x128xf32>
      %c0_12 = arith.constant 0 : index
      %c0_13 = arith.constant 0 : index
      %13 = vector.load %arg5[%c0_12, %c0_13] : memref<1x128xf32, #tpu.memory_space<vmem>>, vector<1x128xf32>
      %14 = vector.broadcast %13 : vector<1x128xf32> to vector<128x128xf32>
      %15 = arith.addf %12, %14 : vector<128x128xf32>
      %c0_14 = arith.constant 0 : index
      %c0_15 = arith.constant 0 : index
      %16 = vector.load %arg6[%c0_14, %c0_15] : memref<128x128xbf16, #tpu.memory_space<vmem>>, vector<128x128xbf16>
      %17 = arith.extf %16 : vector<128x128xbf16> to vector<128x128xf32>
      %18 = arith.addf %15, %17 : vector<128x128xf32>
      %cst_16 = arith.constant 0.000000e+00 : f32
      %19 = vector.broadcast %cst_16 : f32 to vector<128x128xf32>
      %20 = arith.maximumf %18, %19 : vector<128x128xf32>
      %21 = arith.truncf %20 : vector<128x128xf32> to vector<128x128xbf16>
      %c0_17 = arith.constant 0 : index
      %c0_18 = arith.constant 0 : index
      %22 = vector.load %arg7[%c0_17, %c0_18] : memref<128x128xbf16, #tpu.memory_space<vmem>>, vector<128x128xbf16>
      tpu.vector_store %arg7[%c0_17, %c0_18], %21 {strides = array<i32>} : memref<128x128xbf16, #tpu.memory_space<vmem>>, vector<128x128xbf16>,
    } else {
    }
    return
  }
  func.func @transform_0(%arg0: i32, %arg1: i32, %arg2: i32) -> (i32, i32) {
    %c0_i32 = arith.constant 0 : i32
    return %arg0, %arg2 : i32, i32
  }
  func.func @transform_1(%arg0: i32, %arg1: i32, %arg2: i32) -> (i32, i32) {
    %c0_i32 = arith.constant 0 : i32
    return %arg2, %arg1 : i32, i32
  }
  func.func @transform_2(%arg0: i32, %arg1: i32, %arg2: i32) -> (i32, i32) {
    %c0_i32 = arith.constant 0 : i32
    %c0_i32_0 = arith.constant 0 : i32
    return %c0_i32, %arg1 : i32, i32
  }
  func.func @transform_3(%arg0: i32, %arg1: i32, %arg2: i32) -> (i32, i32) {
    %c0_i32 = arith.constant 0 : i32
    return %arg0, %arg1 : i32, i32
  }
  func.func @transform_4(%arg0: i32, %arg1: i32, %arg2: i32) -> (i32, i32) {
    %c0_i32 = arith.constant 0 : i32
    return %arg0, %arg1 : i32, i32
  }
}

module attributes {stable_mosaic.version = 11 : i64} {
  func.func @_mm_kernel(%arg0: i32, %arg1: i32, %arg2: i32, %arg3: memref<32x640xbf16, #tpu.memory_space<vmem>>, %arg4: memref<640x128xbf16, #tpu.memory_space<vmem>>, %arg5: memref<1x128xf32, #tpu.memory_space<vmem>>, %arg6: memref<32x128xbf16, #tpu.memory_space<vmem>>, %arg7: memref<32x128xf32, #tpu.memory_space<vmem>>) attributes {dimension_semantics = [#tpu.dimension_semantics<parallel>, #tpu.dimension_semantics<parallel>, #tpu.dimension_semantics<arbitrary>], iteration_bounds = array<i64: 1, 1, 1>, scalar_prefetch = 0 : i64, scratch_operands = 1 : i64, tpu.core_type = #tpu.core_type<tc>, window_params = [{transform_indices = @transform_0, window_bounds = array<i64: 32, 640>}, {transform_indices = @transform_1, window_bounds = array<i64: 640, 128>}, {transform_indices = @transform_2, window_bounds = array<i64: 1, 128>}, {transform_indices = @transform_3, window_bounds = array<i64: 32, 128>}]} {
    %c0_i32 = arith.constant 0 : i32
    %0 = arith.cmpi eq, %arg2, %c0_i32 : i32
    %1 = arith.extui %0 : i1 to i32
    %c0_i32_0 = arith.constant 0 : i32
    %2 = arith.cmpi ne, %1, %c0_i32_0 : i32
    scf.if %2 {
      %cst_10 = arith.constant 0.000000e+00 : f32
      %12 = vector.broadcast %cst_10 : f32 to vector<32x128xf32>
      %c0_11 = arith.constant 0 : index
      %c0_12 = arith.constant 0 : index
      %13 = vector.load %arg7[%c0_11, %c0_12] : memref<32x128xf32, #tpu.memory_space<vmem>>, vector<32x128xf32>
      tpu.vector_store %arg7[%c0_11, %c0_12], %12 {strides = array<i32>} : memref<32x128xf32, #tpu.memory_space<vmem>>, vector<32x128xf32>,
    } else {
    }
    %c0 = arith.constant 0 : index
    %c0_1 = arith.constant 0 : index
    %3 = vector.load %arg7[%c0, %c0_1] : memref<32x128xf32, #tpu.memory_space<vmem>>, vector<32x128xf32>
    %c0_2 = arith.constant 0 : index
    %c0_3 = arith.constant 0 : index
    %4 = vector.load %arg3[%c0_2, %c0_3] : memref<32x640xbf16, #tpu.memory_space<vmem>>, vector<32x640xbf16>
    %c0_4 = arith.constant 0 : index
    %c0_5 = arith.constant 0 : index
    %5 = vector.load %arg4[%c0_4, %c0_5] : memref<640x128xbf16, #tpu.memory_space<vmem>>, vector<640x128xbf16>
    %cst = arith.constant dense<0.000000e+00> : vector<32x128xf32>
    %6 = tpu.matmul %4, %5, %cst {dimension_numbers = #tpu.dot_dimension_numbers<[1], [0], [0], [1], [0, 0, 1, 1], [], []>} : vector<32x640xbf16>, vector<640x128xbf16>, vector<32x128xf32> -> vector<32x128xf32>
    %7 = arith.addf %3, %6 : vector<32x128xf32>
    %c0_6 = arith.constant 0 : index
    %c0_7 = arith.constant 0 : index
    %8 = vector.load %arg7[%c0_6, %c0_7] : memref<32x128xf32, #tpu.memory_space<vmem>>, vector<32x128xf32>
    tpu.vector_store %arg7[%c0_6, %c0_7], %7 {strides = array<i32>} : memref<32x128xf32, #tpu.memory_space<vmem>>, vector<32x128xf32>,
    %c0_i32_8 = arith.constant 0 : i32
    %9 = arith.cmpi eq, %arg2, %c0_i32_8 : i32
    %10 = arith.extui %9 : i1 to i32
    %c0_i32_9 = arith.constant 0 : i32
    %11 = arith.cmpi ne, %10, %c0_i32_9 : i32
    scf.if %11 {
      %c0_10 = arith.constant 0 : index
      %c0_11 = arith.constant 0 : index
      %12 = vector.load %arg7[%c0_10, %c0_11] : memref<32x128xf32, #tpu.memory_space<vmem>>, vector<32x128xf32>
      %c0_12 = arith.constant 0 : index
      %c0_13 = arith.constant 0 : index
      %13 = vector.load %arg5[%c0_12, %c0_13] : memref<1x128xf32, #tpu.memory_space<vmem>>, vector<1x128xf32>
      %14 = vector.broadcast %13 : vector<1x128xf32> to vector<32x128xf32>
      %15 = arith.addf %12, %14 : vector<32x128xf32>
      %cst_14 = arith.constant 0.000000e+00 : f32
      %16 = vector.broadcast %cst_14 : f32 to vector<32x128xf32>
      %17 = arith.maximumf %15, %16 : vector<32x128xf32>
      %18 = arith.truncf %17 : vector<32x128xf32> to vector<32x128xbf16>
      %c0_15 = arith.constant 0 : index
      %c0_16 = arith.constant 0 : index
      %19 = vector.load %arg6[%c0_15, %c0_16] : memref<32x128xbf16, #tpu.memory_space<vmem>>, vector<32x128xbf16>
      tpu.vector_store %arg6[%c0_15, %c0_16], %18 {strides = array<i32>} : memref<32x128xbf16, #tpu.memory_space<vmem>>, vector<32x128xbf16>,
    } else {
    }
    return
  }
  func.func @transform_0(%arg0: i32, %arg1: i32, %arg2: i32) -> (i32, i32) {
    %c0_i32 = arith.constant 0 : i32
    return %arg0, %arg2 : i32, i32
  }
  func.func @transform_1(%arg0: i32, %arg1: i32, %arg2: i32) -> (i32, i32) {
    %c0_i32 = arith.constant 0 : i32
    return %arg2, %arg1 : i32, i32
  }
  func.func @transform_2(%arg0: i32, %arg1: i32, %arg2: i32) -> (i32, i32) {
    %c0_i32 = arith.constant 0 : i32
    %c0_i32_0 = arith.constant 0 : i32
    return %c0_i32, %arg1 : i32, i32
  }
  func.func @transform_3(%arg0: i32, %arg1: i32, %arg2: i32) -> (i32, i32) {
    %c0_i32 = arith.constant 0 : i32
    return %arg0, %arg1 : i32, i32
  }
}

module attributes {stable_mosaic.version = 11 : i64} {
  func.func @_mm_kernel(%arg0: i32, %arg1: i32, %arg2: i32, %arg3: memref<32x640xbf16, #tpu.memory_space<vmem>>, %arg4: memref<640x128xbf16, #tpu.memory_space<vmem>>, %arg5: memref<1x128xf32, #tpu.memory_space<vmem>>, %arg6: memref<32x128xbf16, #tpu.memory_space<vmem>>, %arg7: memref<32x128xf32, #tpu.memory_space<vmem>>) attributes {dimension_semantics = [#tpu.dimension_semantics<parallel>, #tpu.dimension_semantics<parallel>, #tpu.dimension_semantics<arbitrary>], iteration_bounds = array<i64: 1, 1, 1>, scalar_prefetch = 0 : i64, scratch_operands = 1 : i64, tpu.core_type = #tpu.core_type<tc>, window_params = [{transform_indices = @transform_0, window_bounds = array<i64: 32, 640>}, {transform_indices = @transform_1, window_bounds = array<i64: 640, 128>}, {transform_indices = @transform_2, window_bounds = array<i64: 1, 128>}, {transform_indices = @transform_3, window_bounds = array<i64: 32, 128>}]} {
    %c0_i32 = arith.constant 0 : i32
    %0 = arith.cmpi eq, %arg2, %c0_i32 : i32
    %1 = arith.extui %0 : i1 to i32
    %c0_i32_0 = arith.constant 0 : i32
    %2 = arith.cmpi ne, %1, %c0_i32_0 : i32
    scf.if %2 {
      %cst_10 = arith.constant 0.000000e+00 : f32
      %12 = vector.broadcast %cst_10 : f32 to vector<32x128xf32>
      %c0_11 = arith.constant 0 : index
      %c0_12 = arith.constant 0 : index
      %13 = vector.load %arg7[%c0_11, %c0_12] : memref<32x128xf32, #tpu.memory_space<vmem>>, vector<32x128xf32>
      tpu.vector_store %arg7[%c0_11, %c0_12], %12 {strides = array<i32>} : memref<32x128xf32, #tpu.memory_space<vmem>>, vector<32x128xf32>,
    } else {
    }
    %c0 = arith.constant 0 : index
    %c0_1 = arith.constant 0 : index
    %3 = vector.load %arg7[%c0, %c0_1] : memref<32x128xf32, #tpu.memory_space<vmem>>, vector<32x128xf32>
    %c0_2 = arith.constant 0 : index
    %c0_3 = arith.constant 0 : index
    %4 = vector.load %arg3[%c0_2, %c0_3] : memref<32x640xbf16, #tpu.memory_space<vmem>>, vector<32x640xbf16>
    %c0_4 = arith.constant 0 : index
    %c0_5 = arith.constant 0 : index
    %5 = vector.load %arg4[%c0_4, %c0_5] : memref<640x128xbf16, #tpu.memory_space<vmem>>, vector<640x128xbf16>
    %cst = arith.constant dense<0.000000e+00> : vector<32x128xf32>
    %6 = tpu.matmul %4, %5, %cst {dimension_numbers = #tpu.dot_dimension_numbers<[1], [0], [0], [1], [0, 0, 1, 1], [], []>} : vector<32x640xbf16>, vector<640x128xbf16>, vector<32x128xf32> -> vector<32x128xf32>
    %7 = arith.addf %3, %6 : vector<32x128xf32>
    %c0_6 = arith.constant 0 : index
    %c0_7 = arith.constant 0 : index
    %8 = vector.load %arg7[%c0_6, %c0_7] : memref<32x128xf32, #tpu.memory_space<vmem>>, vector<32x128xf32>
    tpu.vector_store %arg7[%c0_6, %c0_7], %7 {strides = array<i32>} : memref<32x128xf32, #tpu.memory_space<vmem>>, vector<32x128xf32>,
    %c0_i32_8 = arith.constant 0 : i32
    %9 = arith.cmpi eq, %arg2, %c0_i32_8 : i32
    %10 = arith.extui %9 : i1 to i32
    %c0_i32_9 = arith.constant 0 : i32
    %11 = arith.cmpi ne, %10, %c0_i32_9 : i32
    scf.if %11 {
      %c0_10 = arith.constant 0 : index
      %c0_11 = arith.constant 0 : index
      %12 = vector.load %arg7[%c0_10, %c0_11] : memref<32x128xf32, #tpu.memory_space<vmem>>, vector<32x128xf32>
      %c0_12 = arith.constant 0 : index
      %c0_13 = arith.constant 0 : index
      %13 = vector.load %arg5[%c0_12, %c0_13] : memref<1x128xf32, #tpu.memory_space<vmem>>, vector<1x128xf32>
      %14 = vector.broadcast %13 : vector<1x128xf32> to vector<32x128xf32>
      %15 = arith.addf %12, %14 : vector<32x128xf32>
      %16 = arith.truncf %15 : vector<32x128xf32> to vector<32x128xbf16>
      %c0_14 = arith.constant 0 : index
      %c0_15 = arith.constant 0 : index
      %17 = vector.load %arg6[%c0_14, %c0_15] : memref<32x128xbf16, #tpu.memory_space<vmem>>, vector<32x128xbf16>
      tpu.vector_store %arg6[%c0_14, %c0_15], %16 {strides = array<i32>} : memref<32x128xbf16, #tpu.memory_space<vmem>>, vector<32x128xbf16>,
    } else {
    }
    return
  }
  func.func @transform_0(%arg0: i32, %arg1: i32, %arg2: i32) -> (i32, i32) {
    %c0_i32 = arith.constant 0 : i32
    return %arg0, %arg2 : i32, i32
  }
  func.func @transform_1(%arg0: i32, %arg1: i32, %arg2: i32) -> (i32, i32) {
    %c0_i32 = arith.constant 0 : i32
    return %arg2, %arg1 : i32, i32
  }
  func.func @transform_2(%arg0: i32, %arg1: i32, %arg2: i32) -> (i32, i32) {
    %c0_i32 = arith.constant 0 : i32
    %c0_i32_0 = arith.constant 0 : i32
    return %c0_i32, %arg1 : i32, i32
  }
  func.func @transform_3(%arg0: i32, %arg1: i32, %arg2: i32) -> (i32, i32) {
    %c0_i32 = arith.constant 0 : i32
    return %arg0, %arg1 : i32, i32
  }
}

module attributes {stable_mosaic.version = 11 : i64} {
  func.func @_mm_res_kernel(%arg0: i32, %arg1: i32, %arg2: i32, %arg3: memref<32x1152xbf16, #tpu.memory_space<vmem>>, %arg4: memref<1152x128xbf16, #tpu.memory_space<vmem>>, %arg5: memref<1x128xf32, #tpu.memory_space<vmem>>, %arg6: memref<32x128xbf16, #tpu.memory_space<vmem>>, %arg7: memref<32x128xbf16, #tpu.memory_space<vmem>>, %arg8: memref<32x128xf32, #tpu.memory_space<vmem>>) attributes {dimension_semantics = [#tpu.dimension_semantics<parallel>, #tpu.dimension_semantics<parallel>, #tpu.dimension_semantics<arbitrary>], iteration_bounds = array<i64: 1, 1, 1>, scalar_prefetch = 0 : i64, scratch_operands = 1 : i64, tpu.core_type = #tpu.core_type<tc>, window_params = [{transform_indices = @transform_0, window_bounds = array<i64: 32, 1152>}, {transform_indices = @transform_1, window_bounds = array<i64: 1152, 128>}, {transform_indices = @transform_2, window_bounds = array<i64: 1, 128>}, {transform_indices = @transform_3, window_bounds = array<i64: 32, 128>}, {transform_indices = @transform_4, window_bounds = array<i64: 32, 128>}]} {
    %c0_i32 = arith.constant 0 : i32
    %0 = arith.cmpi eq, %arg2, %c0_i32 : i32
    %1 = arith.extui %0 : i1 to i32
    %c0_i32_0 = arith.constant 0 : i32
    %2 = arith.cmpi ne, %1, %c0_i32_0 : i32
    scf.if %2 {
      %cst_10 = arith.constant 0.000000e+00 : f32
      %12 = vector.broadcast %cst_10 : f32 to vector<32x128xf32>
      %c0_11 = arith.constant 0 : index
      %c0_12 = arith.constant 0 : index
      %13 = vector.load %arg8[%c0_11, %c0_12] : memref<32x128xf32, #tpu.memory_space<vmem>>, vector<32x128xf32>
      tpu.vector_store %arg8[%c0_11, %c0_12], %12 {strides = array<i32>} : memref<32x128xf32, #tpu.memory_space<vmem>>, vector<32x128xf32>,
    } else {
    }
    %c0 = arith.constant 0 : index
    %c0_1 = arith.constant 0 : index
    %3 = vector.load %arg8[%c0, %c0_1] : memref<32x128xf32, #tpu.memory_space<vmem>>, vector<32x128xf32>
    %c0_2 = arith.constant 0 : index
    %c0_3 = arith.constant 0 : index
    %4 = vector.load %arg3[%c0_2, %c0_3] : memref<32x1152xbf16, #tpu.memory_space<vmem>>, vector<32x1152xbf16>
    %c0_4 = arith.constant 0 : index
    %c0_5 = arith.constant 0 : index
    %5 = vector.load %arg4[%c0_4, %c0_5] : memref<1152x128xbf16, #tpu.memory_space<vmem>>, vector<1152x128xbf16>
    %cst = arith.constant dense<0.000000e+00> : vector<32x128xf32>
    %6 = tpu.matmul %4, %5, %cst {dimension_numbers = #tpu.dot_dimension_numbers<[1], [0], [0], [1], [0, 0, 1, 1], [], []>} : vector<32x1152xbf16>, vector<1152x128xbf16>, vector<32x128xf32> -> vector<32x128xf32>
    %7 = arith.addf %3, %6 : vector<32x128xf32>
    %c0_6 = arith.constant 0 : index
    %c0_7 = arith.constant 0 : index
    %8 = vector.load %arg8[%c0_6, %c0_7] : memref<32x128xf32, #tpu.memory_space<vmem>>, vector<32x128xf32>
    tpu.vector_store %arg8[%c0_6, %c0_7], %7 {strides = array<i32>} : memref<32x128xf32, #tpu.memory_space<vmem>>, vector<32x128xf32>,
    %c0_i32_8 = arith.constant 0 : i32
    %9 = arith.cmpi eq, %arg2, %c0_i32_8 : i32
    %10 = arith.extui %9 : i1 to i32
    %c0_i32_9 = arith.constant 0 : i32
    %11 = arith.cmpi ne, %10, %c0_i32_9 : i32
    scf.if %11 {
      %c0_10 = arith.constant 0 : index
      %c0_11 = arith.constant 0 : index
      %12 = vector.load %arg8[%c0_10, %c0_11] : memref<32x128xf32, #tpu.memory_space<vmem>>, vector<32x128xf32>
      %c0_12 = arith.constant 0 : index
      %c0_13 = arith.constant 0 : index
      %13 = vector.load %arg5[%c0_12, %c0_13] : memref<1x128xf32, #tpu.memory_space<vmem>>, vector<1x128xf32>
      %14 = vector.broadcast %13 : vector<1x128xf32> to vector<32x128xf32>
      %15 = arith.addf %12, %14 : vector<32x128xf32>
      %c0_14 = arith.constant 0 : index
      %c0_15 = arith.constant 0 : index
      %16 = vector.load %arg6[%c0_14, %c0_15] : memref<32x128xbf16, #tpu.memory_space<vmem>>, vector<32x128xbf16>
      %17 = arith.extf %16 : vector<32x128xbf16> to vector<32x128xf32>
      %18 = arith.addf %15, %17 : vector<32x128xf32>
      %cst_16 = arith.constant 0.000000e+00 : f32
      %19 = vector.broadcast %cst_16 : f32 to vector<32x128xf32>
      %20 = arith.maximumf %18, %19 : vector<32x128xf32>
      %21 = arith.truncf %20 : vector<32x128xf32> to vector<32x128xbf16>
      %c0_17 = arith.constant 0 : index
      %c0_18 = arith.constant 0 : index
      %22 = vector.load %arg7[%c0_17, %c0_18] : memref<32x128xbf16, #tpu.memory_space<vmem>>, vector<32x128xbf16>
      tpu.vector_store %arg7[%c0_17, %c0_18], %21 {strides = array<i32>} : memref<32x128xbf16, #tpu.memory_space<vmem>>, vector<32x128xbf16>,
    } else {
    }
    return
  }
  func.func @transform_0(%arg0: i32, %arg1: i32, %arg2: i32) -> (i32, i32) {
    %c0_i32 = arith.constant 0 : i32
    return %arg0, %arg2 : i32, i32
  }
  func.func @transform_1(%arg0: i32, %arg1: i32, %arg2: i32) -> (i32, i32) {
    %c0_i32 = arith.constant 0 : i32
    return %arg2, %arg1 : i32, i32
  }
  func.func @transform_2(%arg0: i32, %arg1: i32, %arg2: i32) -> (i32, i32) {
    %c0_i32 = arith.constant 0 : i32
    %c0_i32_0 = arith.constant 0 : i32
    return %c0_i32, %arg1 : i32, i32
  }
  func.func @transform_3(%arg0: i32, %arg1: i32, %arg2: i32) -> (i32, i32) {
    %c0_i32 = arith.constant 0 : i32
    return %arg0, %arg1 : i32, i32
  }
  func.func @transform_4(%arg0: i32, %arg1: i32, %arg2: i32) -> (i32, i32) {
    %c0_i32 = arith.constant 0 : i32
    return %arg0, %arg1 : i32, i32
  }
}

module attributes {stable_mosaic.version = 11 : i64} {
  func.func @_mm_kernel(%arg0: i32, %arg1: i32, %arg2: i32, %arg3: memref<32x1152xbf16, #tpu.memory_space<vmem>>, %arg4: memref<1152x128xbf16, #tpu.memory_space<vmem>>, %arg5: memref<1x128xf32, #tpu.memory_space<vmem>>, %arg6: memref<32x128xbf16, #tpu.memory_space<vmem>>, %arg7: memref<32x128xf32, #tpu.memory_space<vmem>>) attributes {dimension_semantics = [#tpu.dimension_semantics<parallel>, #tpu.dimension_semantics<parallel>, #tpu.dimension_semantics<arbitrary>], iteration_bounds = array<i64: 1, 1, 1>, scalar_prefetch = 0 : i64, scratch_operands = 1 : i64, tpu.core_type = #tpu.core_type<tc>, window_params = [{transform_indices = @transform_0, window_bounds = array<i64: 32, 1152>}, {transform_indices = @transform_1, window_bounds = array<i64: 1152, 128>}, {transform_indices = @transform_2, window_bounds = array<i64: 1, 128>}, {transform_indices = @transform_3, window_bounds = array<i64: 32, 128>}]} {
    %c0_i32 = arith.constant 0 : i32
    %0 = arith.cmpi eq, %arg2, %c0_i32 : i32
    %1 = arith.extui %0 : i1 to i32
    %c0_i32_0 = arith.constant 0 : i32
    %2 = arith.cmpi ne, %1, %c0_i32_0 : i32
    scf.if %2 {
      %cst_10 = arith.constant 0.000000e+00 : f32
      %12 = vector.broadcast %cst_10 : f32 to vector<32x128xf32>
      %c0_11 = arith.constant 0 : index
      %c0_12 = arith.constant 0 : index
      %13 = vector.load %arg7[%c0_11, %c0_12] : memref<32x128xf32, #tpu.memory_space<vmem>>, vector<32x128xf32>
      tpu.vector_store %arg7[%c0_11, %c0_12], %12 {strides = array<i32>} : memref<32x128xf32, #tpu.memory_space<vmem>>, vector<32x128xf32>,
    } else {
    }
    %c0 = arith.constant 0 : index
    %c0_1 = arith.constant 0 : index
    %3 = vector.load %arg7[%c0, %c0_1] : memref<32x128xf32, #tpu.memory_space<vmem>>, vector<32x128xf32>
    %c0_2 = arith.constant 0 : index
    %c0_3 = arith.constant 0 : index
    %4 = vector.load %arg3[%c0_2, %c0_3] : memref<32x1152xbf16, #tpu.memory_space<vmem>>, vector<32x1152xbf16>
    %c0_4 = arith.constant 0 : index
    %c0_5 = arith.constant 0 : index
    %5 = vector.load %arg4[%c0_4, %c0_5] : memref<1152x128xbf16, #tpu.memory_space<vmem>>, vector<1152x128xbf16>
    %cst = arith.constant dense<0.000000e+00> : vector<32x128xf32>
    %6 = tpu.matmul %4, %5, %cst {dimension_numbers = #tpu.dot_dimension_numbers<[1], [0], [0], [1], [0, 0, 1, 1], [], []>} : vector<32x1152xbf16>, vector<1152x128xbf16>, vector<32x128xf32> -> vector<32x128xf32>
    %7 = arith.addf %3, %6 : vector<32x128xf32>
    %c0_6 = arith.constant 0 : index
    %c0_7 = arith.constant 0 : index
    %8 = vector.load %arg7[%c0_6, %c0_7] : memref<32x128xf32, #tpu.memory_space<vmem>>, vector<32x128xf32>
    tpu.vector_store %arg7[%c0_6, %c0_7], %7 {strides = array<i32>} : memref<32x128xf32, #tpu.memory_space<vmem>>, vector<32x128xf32>,
    %c0_i32_8 = arith.constant 0 : i32
    %9 = arith.cmpi eq, %arg2, %c0_i32_8 : i32
    %10 = arith.extui %9 : i1 to i32
    %c0_i32_9 = arith.constant 0 : i32
    %11 = arith.cmpi ne, %10, %c0_i32_9 : i32
    scf.if %11 {
      %c0_10 = arith.constant 0 : index
      %c0_11 = arith.constant 0 : index
      %12 = vector.load %arg7[%c0_10, %c0_11] : memref<32x128xf32, #tpu.memory_space<vmem>>, vector<32x128xf32>
      %c0_12 = arith.constant 0 : index
      %c0_13 = arith.constant 0 : index
      %13 = vector.load %arg5[%c0_12, %c0_13] : memref<1x128xf32, #tpu.memory_space<vmem>>, vector<1x128xf32>
      %14 = vector.broadcast %13 : vector<1x128xf32> to vector<32x128xf32>
      %15 = arith.addf %12, %14 : vector<32x128xf32>
      %cst_14 = arith.constant 0.000000e+00 : f32
      %16 = vector.broadcast %cst_14 : f32 to vector<32x128xf32>
      %17 = arith.maximumf %15, %16 : vector<32x128xf32>
      %18 = arith.truncf %17 : vector<32x128xf32> to vector<32x128xbf16>
      %c0_15 = arith.constant 0 : index
      %c0_16 = arith.constant 0 : index
      %19 = vector.load %arg6[%c0_15, %c0_16] : memref<32x128xbf16, #tpu.memory_space<vmem>>, vector<32x128xbf16>
      tpu.vector_store %arg6[%c0_15, %c0_16], %18 {strides = array<i32>} : memref<32x128xbf16, #tpu.memory_space<vmem>>, vector<32x128xbf16>,
    } else {
    }
    return
  }
  func.func @transform_0(%arg0: i32, %arg1: i32, %arg2: i32) -> (i32, i32) {
    %c0_i32 = arith.constant 0 : i32
    return %arg0, %arg2 : i32, i32
  }
  func.func @transform_1(%arg0: i32, %arg1: i32, %arg2: i32) -> (i32, i32) {
    %c0_i32 = arith.constant 0 : i32
    return %arg2, %arg1 : i32, i32
  }
  func.func @transform_2(%arg0: i32, %arg1: i32, %arg2: i32) -> (i32, i32) {
    %c0_i32 = arith.constant 0 : i32
    %c0_i32_0 = arith.constant 0 : i32
    return %c0_i32, %arg1 : i32, i32
  }
  func.func @transform_3(%arg0: i32, %arg1: i32, %arg2: i32) -> (i32, i32) {
    %c0_i32 = arith.constant 0 : i32
    return %arg0, %arg1 : i32, i32
  }
}

module attributes {stable_mosaic.version = 11 : i64} {
  func.func @_mm_kernel(%arg0: i32, %arg1: i32, %arg2: i32, %arg3: memref<8x1152xbf16, #tpu.memory_space<vmem>>, %arg4: memref<1152x256xbf16, #tpu.memory_space<vmem>>, %arg5: memref<1x256xf32, #tpu.memory_space<vmem>>, %arg6: memref<8x256xbf16, #tpu.memory_space<vmem>>, %arg7: memref<8x256xf32, #tpu.memory_space<vmem>>) attributes {dimension_semantics = [#tpu.dimension_semantics<parallel>, #tpu.dimension_semantics<parallel>, #tpu.dimension_semantics<arbitrary>], iteration_bounds = array<i64: 1, 1, 1>, scalar_prefetch = 0 : i64, scratch_operands = 1 : i64, tpu.core_type = #tpu.core_type<tc>, window_params = [{transform_indices = @transform_0, window_bounds = array<i64: 8, 1152>}, {transform_indices = @transform_1, window_bounds = array<i64: 1152, 256>}, {transform_indices = @transform_2, window_bounds = array<i64: 1, 256>}, {transform_indices = @transform_3, window_bounds = array<i64: 8, 256>}]} {
    %c0_i32 = arith.constant 0 : i32
    %0 = arith.cmpi eq, %arg2, %c0_i32 : i32
    %1 = arith.extui %0 : i1 to i32
    %c0_i32_0 = arith.constant 0 : i32
    %2 = arith.cmpi ne, %1, %c0_i32_0 : i32
    scf.if %2 {
      %cst_10 = arith.constant 0.000000e+00 : f32
      %12 = vector.broadcast %cst_10 : f32 to vector<8x256xf32>
      %c0_11 = arith.constant 0 : index
      %c0_12 = arith.constant 0 : index
      %13 = vector.load %arg7[%c0_11, %c0_12] : memref<8x256xf32, #tpu.memory_space<vmem>>, vector<8x256xf32>
      tpu.vector_store %arg7[%c0_11, %c0_12], %12 {strides = array<i32>} : memref<8x256xf32, #tpu.memory_space<vmem>>, vector<8x256xf32>,
    } else {
    }
    %c0 = arith.constant 0 : index
    %c0_1 = arith.constant 0 : index
    %3 = vector.load %arg7[%c0, %c0_1] : memref<8x256xf32, #tpu.memory_space<vmem>>, vector<8x256xf32>
    %c0_2 = arith.constant 0 : index
    %c0_3 = arith.constant 0 : index
    %4 = vector.load %arg3[%c0_2, %c0_3] : memref<8x1152xbf16, #tpu.memory_space<vmem>>, vector<8x1152xbf16>
    %c0_4 = arith.constant 0 : index
    %c0_5 = arith.constant 0 : index
    %5 = vector.load %arg4[%c0_4, %c0_5] : memref<1152x256xbf16, #tpu.memory_space<vmem>>, vector<1152x256xbf16>
    %cst = arith.constant dense<0.000000e+00> : vector<8x256xf32>
    %6 = tpu.matmul %4, %5, %cst {dimension_numbers = #tpu.dot_dimension_numbers<[1], [0], [0], [1], [0, 0, 1, 1], [], []>} : vector<8x1152xbf16>, vector<1152x256xbf16>, vector<8x256xf32> -> vector<8x256xf32>
    %7 = arith.addf %3, %6 : vector<8x256xf32>
    %c0_6 = arith.constant 0 : index
    %c0_7 = arith.constant 0 : index
    %8 = vector.load %arg7[%c0_6, %c0_7] : memref<8x256xf32, #tpu.memory_space<vmem>>, vector<8x256xf32>
    tpu.vector_store %arg7[%c0_6, %c0_7], %7 {strides = array<i32>} : memref<8x256xf32, #tpu.memory_space<vmem>>, vector<8x256xf32>,
    %c0_i32_8 = arith.constant 0 : i32
    %9 = arith.cmpi eq, %arg2, %c0_i32_8 : i32
    %10 = arith.extui %9 : i1 to i32
    %c0_i32_9 = arith.constant 0 : i32
    %11 = arith.cmpi ne, %10, %c0_i32_9 : i32
    scf.if %11 {
      %c0_10 = arith.constant 0 : index
      %c0_11 = arith.constant 0 : index
      %12 = vector.load %arg7[%c0_10, %c0_11] : memref<8x256xf32, #tpu.memory_space<vmem>>, vector<8x256xf32>
      %c0_12 = arith.constant 0 : index
      %c0_13 = arith.constant 0 : index
      %13 = vector.load %arg5[%c0_12, %c0_13] : memref<1x256xf32, #tpu.memory_space<vmem>>, vector<1x256xf32>
      %14 = vector.broadcast %13 : vector<1x256xf32> to vector<8x256xf32>
      %15 = arith.addf %12, %14 : vector<8x256xf32>
      %cst_14 = arith.constant 0.000000e+00 : f32
      %16 = vector.broadcast %cst_14 : f32 to vector<8x256xf32>
      %17 = arith.maximumf %15, %16 : vector<8x256xf32>
      %18 = arith.truncf %17 : vector<8x256xf32> to vector<8x256xbf16>
      %c0_15 = arith.constant 0 : index
      %c0_16 = arith.constant 0 : index
      %19 = vector.load %arg6[%c0_15, %c0_16] : memref<8x256xbf16, #tpu.memory_space<vmem>>, vector<8x256xbf16>
      tpu.vector_store %arg6[%c0_15, %c0_16], %18 {strides = array<i32>} : memref<8x256xbf16, #tpu.memory_space<vmem>>, vector<8x256xbf16>,
    } else {
    }
    return
  }
  func.func @transform_0(%arg0: i32, %arg1: i32, %arg2: i32) -> (i32, i32) {
    %c0_i32 = arith.constant 0 : i32
    return %arg0, %arg2 : i32, i32
  }
  func.func @transform_1(%arg0: i32, %arg1: i32, %arg2: i32) -> (i32, i32) {
    %c0_i32 = arith.constant 0 : i32
    return %arg2, %arg1 : i32, i32
  }
  func.func @transform_2(%arg0: i32, %arg1: i32, %arg2: i32) -> (i32, i32) {
    %c0_i32 = arith.constant 0 : i32
    %c0_i32_0 = arith.constant 0 : i32
    return %c0_i32, %arg1 : i32, i32
  }
  func.func @transform_3(%arg0: i32, %arg1: i32, %arg2: i32) -> (i32, i32) {
    %c0_i32 = arith.constant 0 : i32
    return %arg0, %arg1 : i32, i32
  }
}

module attributes {stable_mosaic.version = 11 : i64} {
  func.func @_mm_kernel(%arg0: i32, %arg1: i32, %arg2: i32, %arg3: memref<8x1152xbf16, #tpu.memory_space<vmem>>, %arg4: memref<1152x256xbf16, #tpu.memory_space<vmem>>, %arg5: memref<1x256xf32, #tpu.memory_space<vmem>>, %arg6: memref<8x256xbf16, #tpu.memory_space<vmem>>, %arg7: memref<8x256xf32, #tpu.memory_space<vmem>>) attributes {dimension_semantics = [#tpu.dimension_semantics<parallel>, #tpu.dimension_semantics<parallel>, #tpu.dimension_semantics<arbitrary>], iteration_bounds = array<i64: 1, 1, 1>, scalar_prefetch = 0 : i64, scratch_operands = 1 : i64, tpu.core_type = #tpu.core_type<tc>, window_params = [{transform_indices = @transform_0, window_bounds = array<i64: 8, 1152>}, {transform_indices = @transform_1, window_bounds = array<i64: 1152, 256>}, {transform_indices = @transform_2, window_bounds = array<i64: 1, 256>}, {transform_indices = @transform_3, window_bounds = array<i64: 8, 256>}]} {
    %c0_i32 = arith.constant 0 : i32
    %0 = arith.cmpi eq, %arg2, %c0_i32 : i32
    %1 = arith.extui %0 : i1 to i32
    %c0_i32_0 = arith.constant 0 : i32
    %2 = arith.cmpi ne, %1, %c0_i32_0 : i32
    scf.if %2 {
      %cst_10 = arith.constant 0.000000e+00 : f32
      %12 = vector.broadcast %cst_10 : f32 to vector<8x256xf32>
      %c0_11 = arith.constant 0 : index
      %c0_12 = arith.constant 0 : index
      %13 = vector.load %arg7[%c0_11, %c0_12] : memref<8x256xf32, #tpu.memory_space<vmem>>, vector<8x256xf32>
      tpu.vector_store %arg7[%c0_11, %c0_12], %12 {strides = array<i32>} : memref<8x256xf32, #tpu.memory_space<vmem>>, vector<8x256xf32>,
    } else {
    }
    %c0 = arith.constant 0 : index
    %c0_1 = arith.constant 0 : index
    %3 = vector.load %arg7[%c0, %c0_1] : memref<8x256xf32, #tpu.memory_space<vmem>>, vector<8x256xf32>
    %c0_2 = arith.constant 0 : index
    %c0_3 = arith.constant 0 : index
    %4 = vector.load %arg3[%c0_2, %c0_3] : memref<8x1152xbf16, #tpu.memory_space<vmem>>, vector<8x1152xbf16>
    %c0_4 = arith.constant 0 : index
    %c0_5 = arith.constant 0 : index
    %5 = vector.load %arg4[%c0_4, %c0_5] : memref<1152x256xbf16, #tpu.memory_space<vmem>>, vector<1152x256xbf16>
    %cst = arith.constant dense<0.000000e+00> : vector<8x256xf32>
    %6 = tpu.matmul %4, %5, %cst {dimension_numbers = #tpu.dot_dimension_numbers<[1], [0], [0], [1], [0, 0, 1, 1], [], []>} : vector<8x1152xbf16>, vector<1152x256xbf16>, vector<8x256xf32> -> vector<8x256xf32>
    %7 = arith.addf %3, %6 : vector<8x256xf32>
    %c0_6 = arith.constant 0 : index
    %c0_7 = arith.constant 0 : index
    %8 = vector.load %arg7[%c0_6, %c0_7] : memref<8x256xf32, #tpu.memory_space<vmem>>, vector<8x256xf32>
    tpu.vector_store %arg7[%c0_6, %c0_7], %7 {strides = array<i32>} : memref<8x256xf32, #tpu.memory_space<vmem>>, vector<8x256xf32>,
    %c0_i32_8 = arith.constant 0 : i32
    %9 = arith.cmpi eq, %arg2, %c0_i32_8 : i32
    %10 = arith.extui %9 : i1 to i32
    %c0_i32_9 = arith.constant 0 : i32
    %11 = arith.cmpi ne, %10, %c0_i32_9 : i32
    scf.if %11 {
      %c0_10 = arith.constant 0 : index
      %c0_11 = arith.constant 0 : index
      %12 = vector.load %arg7[%c0_10, %c0_11] : memref<8x256xf32, #tpu.memory_space<vmem>>, vector<8x256xf32>
      %c0_12 = arith.constant 0 : index
      %c0_13 = arith.constant 0 : index
      %13 = vector.load %arg5[%c0_12, %c0_13] : memref<1x256xf32, #tpu.memory_space<vmem>>, vector<1x256xf32>
      %14 = vector.broadcast %13 : vector<1x256xf32> to vector<8x256xf32>
      %15 = arith.addf %12, %14 : vector<8x256xf32>
      %16 = arith.truncf %15 : vector<8x256xf32> to vector<8x256xbf16>
      %c0_14 = arith.constant 0 : index
      %c0_15 = arith.constant 0 : index
      %17 = vector.load %arg6[%c0_14, %c0_15] : memref<8x256xbf16, #tpu.memory_space<vmem>>, vector<8x256xbf16>
      tpu.vector_store %arg6[%c0_14, %c0_15], %16 {strides = array<i32>} : memref<8x256xbf16, #tpu.memory_space<vmem>>, vector<8x256xbf16>,
    } else {
    }
    return
  }
  func.func @transform_0(%arg0: i32, %arg1: i32, %arg2: i32) -> (i32, i32) {
    %c0_i32 = arith.constant 0 : i32
    return %arg0, %arg2 : i32, i32
  }
  func.func @transform_1(%arg0: i32, %arg1: i32, %arg2: i32) -> (i32, i32) {
    %c0_i32 = arith.constant 0 : i32
    return %arg2, %arg1 : i32, i32
  }
  func.func @transform_2(%arg0: i32, %arg1: i32, %arg2: i32) -> (i32, i32) {
    %c0_i32 = arith.constant 0 : i32
    %c0_i32_0 = arith.constant 0 : i32
    return %c0_i32, %arg1 : i32, i32
  }
  func.func @transform_3(%arg0: i32, %arg1: i32, %arg2: i32) -> (i32, i32) {
    %c0_i32 = arith.constant 0 : i32
    return %arg0, %arg1 : i32, i32
  }
}

module attributes {stable_mosaic.version = 11 : i64} {
  func.func @_mm_res_kernel(%arg0: i32, %arg1: i32, %arg2: i32, %arg3: memref<8x256xbf16, #tpu.memory_space<vmem>>, %arg4: memref<256x256xbf16, #tpu.memory_space<vmem>>, %arg5: memref<1x256xf32, #tpu.memory_space<vmem>>, %arg6: memref<8x256xbf16, #tpu.memory_space<vmem>>, %arg7: memref<8x256xbf16, #tpu.memory_space<vmem>>, %arg8: memref<8x256xf32, #tpu.memory_space<vmem>>) attributes {dimension_semantics = [#tpu.dimension_semantics<parallel>, #tpu.dimension_semantics<parallel>, #tpu.dimension_semantics<arbitrary>], iteration_bounds = array<i64: 1, 1, 9>, scalar_prefetch = 0 : i64, scratch_operands = 1 : i64, tpu.core_type = #tpu.core_type<tc>, window_params = [{transform_indices = @transform_0, window_bounds = array<i64: 8, 256>}, {transform_indices = @transform_1, window_bounds = array<i64: 256, 256>}, {transform_indices = @transform_2, window_bounds = array<i64: 1, 256>}, {transform_indices = @transform_3, window_bounds = array<i64: 8, 256>}, {transform_indices = @transform_4, window_bounds = array<i64: 8, 256>}]} {
    %c0_i32 = arith.constant 0 : i32
    %0 = arith.cmpi eq, %arg2, %c0_i32 : i32
    %1 = arith.extui %0 : i1 to i32
    %c0_i32_0 = arith.constant 0 : i32
    %2 = arith.cmpi ne, %1, %c0_i32_0 : i32
    scf.if %2 {
      %cst_9 = arith.constant 0.000000e+00 : f32
      %12 = vector.broadcast %cst_9 : f32 to vector<8x256xf32>
      %c0_10 = arith.constant 0 : index
      %c0_11 = arith.constant 0 : index
      %13 = vector.load %arg8[%c0_10, %c0_11] : memref<8x256xf32, #tpu.memory_space<vmem>>, vector<8x256xf32>
      tpu.vector_store %arg8[%c0_10, %c0_11], %12 {strides = array<i32>} : memref<8x256xf32, #tpu.memory_space<vmem>>, vector<8x256xf32>,
    } else {
    }
    %c0 = arith.constant 0 : index
    %c0_1 = arith.constant 0 : index
    %3 = vector.load %arg8[%c0, %c0_1] : memref<8x256xf32, #tpu.memory_space<vmem>>, vector<8x256xf32>
    %c0_2 = arith.constant 0 : index
    %c0_3 = arith.constant 0 : index
    %4 = vector.load %arg3[%c0_2, %c0_3] : memref<8x256xbf16, #tpu.memory_space<vmem>>, vector<8x256xbf16>
    %c0_4 = arith.constant 0 : index
    %c0_5 = arith.constant 0 : index
    %5 = vector.load %arg4[%c0_4, %c0_5] : memref<256x256xbf16, #tpu.memory_space<vmem>>, vector<256x256xbf16>
    %cst = arith.constant dense<0.000000e+00> : vector<8x256xf32>
    %6 = tpu.matmul %4, %5, %cst {dimension_numbers = #tpu.dot_dimension_numbers<[1], [0], [0], [1], [0, 0, 1, 1], [], []>} : vector<8x256xbf16>, vector<256x256xbf16>, vector<8x256xf32> -> vector<8x256xf32>
    %7 = arith.addf %3, %6 : vector<8x256xf32>
    %c0_6 = arith.constant 0 : index
    %c0_7 = arith.constant 0 : index
    %8 = vector.load %arg8[%c0_6, %c0_7] : memref<8x256xf32, #tpu.memory_space<vmem>>, vector<8x256xf32>
    tpu.vector_store %arg8[%c0_6, %c0_7], %7 {strides = array<i32>} : memref<8x256xf32, #tpu.memory_space<vmem>>, vector<8x256xf32>,
    %c8_i32 = arith.constant 8 : i32
    %9 = arith.cmpi eq, %arg2, %c8_i32 : i32
    %10 = arith.extui %9 : i1 to i32
    %c0_i32_8 = arith.constant 0 : i32
    %11 = arith.cmpi ne, %10, %c0_i32_8 : i32
    scf.if %11 {
      %c0_9 = arith.constant 0 : index
      %c0_10 = arith.constant 0 : index
      %12 = vector.load %arg8[%c0_9, %c0_10] : memref<8x256xf32, #tpu.memory_space<vmem>>, vector<8x256xf32>
      %c0_11 = arith.constant 0 : index
      %c0_12 = arith.constant 0 : index
      %13 = vector.load %arg5[%c0_11, %c0_12] : memref<1x256xf32, #tpu.memory_space<vmem>>, vector<1x256xf32>
      %14 = vector.broadcast %13 : vector<1x256xf32> to vector<8x256xf32>
      %15 = arith.addf %12, %14 : vector<8x256xf32>
      %c0_13 = arith.constant 0 : index
      %c0_14 = arith.constant 0 : index
      %16 = vector.load %arg6[%c0_13, %c0_14] : memref<8x256xbf16, #tpu.memory_space<vmem>>, vector<8x256xbf16>
      %17 = arith.extf %16 : vector<8x256xbf16> to vector<8x256xf32>
      %18 = arith.addf %15, %17 : vector<8x256xf32>
      %cst_15 = arith.constant 0.000000e+00 : f32
      %19 = vector.broadcast %cst_15 : f32 to vector<8x256xf32>
      %20 = arith.maximumf %18, %19 : vector<8x256xf32>
      %21 = arith.truncf %20 : vector<8x256xf32> to vector<8x256xbf16>
      %c0_16 = arith.constant 0 : index
      %c0_17 = arith.constant 0 : index
      %22 = vector.load %arg7[%c0_16, %c0_17] : memref<8x256xbf16, #tpu.memory_space<vmem>>, vector<8x256xbf16>
      tpu.vector_store %arg7[%c0_16, %c0_17], %21 {strides = array<i32>} : memref<8x256xbf16, #tpu.memory_space<vmem>>, vector<8x256xbf16>,
    } else {
    }
    return
  }
  func.func @transform_0(%arg0: i32, %arg1: i32, %arg2: i32) -> (i32, i32) {
    %c0_i32 = arith.constant 0 : i32
    return %arg0, %arg2 : i32, i32
  }
  func.func @transform_1(%arg0: i32, %arg1: i32, %arg2: i32) -> (i32, i32) {
    %c0_i32 = arith.constant 0 : i32
    return %arg2, %arg1 : i32, i32
  }
  func.func @transform_2(%arg0: i32, %arg1: i32, %arg2: i32) -> (i32, i32) {
    %c0_i32 = arith.constant 0 : i32
    %c0_i32_0 = arith.constant 0 : i32
    return %c0_i32, %arg1 : i32, i32
  }
  func.func @transform_3(%arg0: i32, %arg1: i32, %arg2: i32) -> (i32, i32) {
    %c0_i32 = arith.constant 0 : i32
    return %arg0, %arg1 : i32, i32
  }
  func.func @transform_4(%arg0: i32, %arg1: i32, %arg2: i32) -> (i32, i32) {
    %c0_i32 = arith.constant 0 : i32
    return %arg0, %arg1 : i32, i32
  }
}

module attributes {stable_mosaic.version = 11 : i64} {
  func.func @_mm_kernel(%arg0: i32, %arg1: i32, %arg2: i32, %arg3: memref<8x256xbf16, #tpu.memory_space<vmem>>, %arg4: memref<256x256xbf16, #tpu.memory_space<vmem>>, %arg5: memref<1x256xf32, #tpu.memory_space<vmem>>, %arg6: memref<8x256xbf16, #tpu.memory_space<vmem>>, %arg7: memref<8x256xf32, #tpu.memory_space<vmem>>) attributes {dimension_semantics = [#tpu.dimension_semantics<parallel>, #tpu.dimension_semantics<parallel>, #tpu.dimension_semantics<arbitrary>], iteration_bounds = array<i64: 1, 1, 9>, scalar_prefetch = 0 : i64, scratch_operands = 1 : i64, tpu.core_type = #tpu.core_type<tc>, window_params = [{transform_indices = @transform_0, window_bounds = array<i64: 8, 256>}, {transform_indices = @transform_1, window_bounds = array<i64: 256, 256>}, {transform_indices = @transform_2, window_bounds = array<i64: 1, 256>}, {transform_indices = @transform_3, window_bounds = array<i64: 8, 256>}]} {
    %c0_i32 = arith.constant 0 : i32
    %0 = arith.cmpi eq, %arg2, %c0_i32 : i32
    %1 = arith.extui %0 : i1 to i32
    %c0_i32_0 = arith.constant 0 : i32
    %2 = arith.cmpi ne, %1, %c0_i32_0 : i32
    scf.if %2 {
      %cst_9 = arith.constant 0.000000e+00 : f32
      %12 = vector.broadcast %cst_9 : f32 to vector<8x256xf32>
      %c0_10 = arith.constant 0 : index
      %c0_11 = arith.constant 0 : index
      %13 = vector.load %arg7[%c0_10, %c0_11] : memref<8x256xf32, #tpu.memory_space<vmem>>, vector<8x256xf32>
      tpu.vector_store %arg7[%c0_10, %c0_11], %12 {strides = array<i32>} : memref<8x256xf32, #tpu.memory_space<vmem>>, vector<8x256xf32>,
    } else {
    }
    %c0 = arith.constant 0 : index
    %c0_1 = arith.constant 0 : index
    %3 = vector.load %arg7[%c0, %c0_1] : memref<8x256xf32, #tpu.memory_space<vmem>>, vector<8x256xf32>
    %c0_2 = arith.constant 0 : index
    %c0_3 = arith.constant 0 : index
    %4 = vector.load %arg3[%c0_2, %c0_3] : memref<8x256xbf16, #tpu.memory_space<vmem>>, vector<8x256xbf16>
    %c0_4 = arith.constant 0 : index
    %c0_5 = arith.constant 0 : index
    %5 = vector.load %arg4[%c0_4, %c0_5] : memref<256x256xbf16, #tpu.memory_space<vmem>>, vector<256x256xbf16>
    %cst = arith.constant dense<0.000000e+00> : vector<8x256xf32>
    %6 = tpu.matmul %4, %5, %cst {dimension_numbers = #tpu.dot_dimension_numbers<[1], [0], [0], [1], [0, 0, 1, 1], [], []>} : vector<8x256xbf16>, vector<256x256xbf16>, vector<8x256xf32> -> vector<8x256xf32>
    %7 = arith.addf %3, %6 : vector<8x256xf32>
    %c0_6 = arith.constant 0 : index
    %c0_7 = arith.constant 0 : index
    %8 = vector.load %arg7[%c0_6, %c0_7] : memref<8x256xf32, #tpu.memory_space<vmem>>, vector<8x256xf32>
    tpu.vector_store %arg7[%c0_6, %c0_7], %7 {strides = array<i32>} : memref<8x256xf32, #tpu.memory_space<vmem>>, vector<8x256xf32>,
    %c8_i32 = arith.constant 8 : i32
    %9 = arith.cmpi eq, %arg2, %c8_i32 : i32
    %10 = arith.extui %9 : i1 to i32
    %c0_i32_8 = arith.constant 0 : i32
    %11 = arith.cmpi ne, %10, %c0_i32_8 : i32
    scf.if %11 {
      %c0_9 = arith.constant 0 : index
      %c0_10 = arith.constant 0 : index
      %12 = vector.load %arg7[%c0_9, %c0_10] : memref<8x256xf32, #tpu.memory_space<vmem>>, vector<8x256xf32>
      %c0_11 = arith.constant 0 : index
      %c0_12 = arith.constant 0 : index
      %13 = vector.load %arg5[%c0_11, %c0_12] : memref<1x256xf32, #tpu.memory_space<vmem>>, vector<1x256xf32>
      %14 = vector.broadcast %13 : vector<1x256xf32> to vector<8x256xf32>
      %15 = arith.addf %12, %14 : vector<8x256xf32>
      %cst_13 = arith.constant 0.000000e+00 : f32
      %16 = vector.broadcast %cst_13 : f32 to vector<8x256xf32>
      %17 = arith.maximumf %15, %16 : vector<8x256xf32>
      %18 = arith.truncf %17 : vector<8x256xf32> to vector<8x256xbf16>
      %c0_14 = arith.constant 0 : index
      %c0_15 = arith.constant 0 : index
      %19 = vector.load %arg6[%c0_14, %c0_15] : memref<8x256xbf16, #tpu.memory_space<vmem>>, vector<8x256xbf16>
      tpu.vector_store %arg6[%c0_14, %c0_15], %18 {strides = array<i32>} : memref<8x256xbf16, #tpu.memory_space<vmem>>, vector<8x256xbf16>,
    } else {
    }
    return
  }
  func.func @transform_0(%arg0: i32, %arg1: i32, %arg2: i32) -> (i32, i32) {
    %c0_i32 = arith.constant 0 : i32
    return %arg0, %arg2 : i32, i32
  }
  func.func @transform_1(%arg0: i32, %arg1: i32, %arg2: i32) -> (i32, i32) {
    %c0_i32 = arith.constant 0 : i32
    return %arg2, %arg1 : i32, i32
  }
  func.func @transform_2(%arg0: i32, %arg1: i32, %arg2: i32) -> (i32, i32) {
    %c0_i32 = arith.constant 0 : i32
    %c0_i32_0 = arith.constant 0 : i32
    return %c0_i32, %arg1 : i32, i32
  }
  func.func @transform_3(%arg0: i32, %arg1: i32, %arg2: i32) -> (i32, i32) {
    %c0_i32 = arith.constant 0 : i32
    return %arg0, %arg1 : i32, i32
  }
}

module attributes {stable_mosaic.version = 11 : i64} {
  func.func @_mm_kernel(%arg0: i32, %arg1: i32, %arg2: i32, %arg3: memref<8x256xbf16, #tpu.memory_space<vmem>>, %arg4: memref<256x256xbf16, #tpu.memory_space<vmem>>, %arg5: memref<1x256xf32, #tpu.memory_space<vmem>>, %arg6: memref<8x256xbf16, #tpu.memory_space<vmem>>, %arg7: memref<8x256xf32, #tpu.memory_space<vmem>>) attributes {dimension_semantics = [#tpu.dimension_semantics<parallel>, #tpu.dimension_semantics<parallel>, #tpu.dimension_semantics<arbitrary>], iteration_bounds = array<i64: 1, 2, 9>, scalar_prefetch = 0 : i64, scratch_operands = 1 : i64, tpu.core_type = #tpu.core_type<tc>, window_params = [{transform_indices = @transform_0, window_bounds = array<i64: 8, 256>}, {transform_indices = @transform_1, window_bounds = array<i64: 256, 256>}, {transform_indices = @transform_2, window_bounds = array<i64: 1, 256>}, {transform_indices = @transform_3, window_bounds = array<i64: 8, 256>}]} {
    %c0_i32 = arith.constant 0 : i32
    %0 = arith.cmpi eq, %arg2, %c0_i32 : i32
    %1 = arith.extui %0 : i1 to i32
    %c0_i32_0 = arith.constant 0 : i32
    %2 = arith.cmpi ne, %1, %c0_i32_0 : i32
    scf.if %2 {
      %cst_9 = arith.constant 0.000000e+00 : f32
      %12 = vector.broadcast %cst_9 : f32 to vector<8x256xf32>
      %c0_10 = arith.constant 0 : index
      %c0_11 = arith.constant 0 : index
      %13 = vector.load %arg7[%c0_10, %c0_11] : memref<8x256xf32, #tpu.memory_space<vmem>>, vector<8x256xf32>
      tpu.vector_store %arg7[%c0_10, %c0_11], %12 {strides = array<i32>} : memref<8x256xf32, #tpu.memory_space<vmem>>, vector<8x256xf32>,
    } else {
    }
    %c0 = arith.constant 0 : index
    %c0_1 = arith.constant 0 : index
    %3 = vector.load %arg7[%c0, %c0_1] : memref<8x256xf32, #tpu.memory_space<vmem>>, vector<8x256xf32>
    %c0_2 = arith.constant 0 : index
    %c0_3 = arith.constant 0 : index
    %4 = vector.load %arg3[%c0_2, %c0_3] : memref<8x256xbf16, #tpu.memory_space<vmem>>, vector<8x256xbf16>
    %c0_4 = arith.constant 0 : index
    %c0_5 = arith.constant 0 : index
    %5 = vector.load %arg4[%c0_4, %c0_5] : memref<256x256xbf16, #tpu.memory_space<vmem>>, vector<256x256xbf16>
    %cst = arith.constant dense<0.000000e+00> : vector<8x256xf32>
    %6 = tpu.matmul %4, %5, %cst {dimension_numbers = #tpu.dot_dimension_numbers<[1], [0], [0], [1], [0, 0, 1, 1], [], []>} : vector<8x256xbf16>, vector<256x256xbf16>, vector<8x256xf32> -> vector<8x256xf32>
    %7 = arith.addf %3, %6 : vector<8x256xf32>
    %c0_6 = arith.constant 0 : index
    %c0_7 = arith.constant 0 : index
    %8 = vector.load %arg7[%c0_6, %c0_7] : memref<8x256xf32, #tpu.memory_space<vmem>>, vector<8x256xf32>
    tpu.vector_store %arg7[%c0_6, %c0_7], %7 {strides = array<i32>} : memref<8x256xf32, #tpu.memory_space<vmem>>, vector<8x256xf32>,
    %c8_i32 = arith.constant 8 : i32
    %9 = arith.cmpi eq, %arg2, %c8_i32 : i32
    %10 = arith.extui %9 : i1 to i32
    %c0_i32_8 = arith.constant 0 : i32
    %11 = arith.cmpi ne, %10, %c0_i32_8 : i32
    scf.if %11 {
      %c0_9 = arith.constant 0 : index
      %c0_10 = arith.constant 0 : index
      %12 = vector.load %arg7[%c0_9, %c0_10] : memref<8x256xf32, #tpu.memory_space<vmem>>, vector<8x256xf32>
      %c0_11 = arith.constant 0 : index
      %c0_12 = arith.constant 0 : index
      %13 = vector.load %arg5[%c0_11, %c0_12] : memref<1x256xf32, #tpu.memory_space<vmem>>, vector<1x256xf32>
      %14 = vector.broadcast %13 : vector<1x256xf32> to vector<8x256xf32>
      %15 = arith.addf %12, %14 : vector<8x256xf32>
      %cst_13 = arith.constant 0.000000e+00 : f32
      %16 = vector.broadcast %cst_13 : f32 to vector<8x256xf32>
      %17 = arith.maximumf %15, %16 : vector<8x256xf32>
      %18 = arith.truncf %17 : vector<8x256xf32> to vector<8x256xbf16>
      %c0_14 = arith.constant 0 : index
      %c0_15 = arith.constant 0 : index
      %19 = vector.load %arg6[%c0_14, %c0_15] : memref<8x256xbf16, #tpu.memory_space<vmem>>, vector<8x256xbf16>
      tpu.vector_store %arg6[%c0_14, %c0_15], %18 {strides = array<i32>} : memref<8x256xbf16, #tpu.memory_space<vmem>>, vector<8x256xbf16>,
    } else {
    }
    return
  }
  func.func @transform_0(%arg0: i32, %arg1: i32, %arg2: i32) -> (i32, i32) {
    %c0_i32 = arith.constant 0 : i32
    return %arg0, %arg2 : i32, i32
  }
  func.func @transform_1(%arg0: i32, %arg1: i32, %arg2: i32) -> (i32, i32) {
    %c0_i32 = arith.constant 0 : i32
    return %arg2, %arg1 : i32, i32
  }
  func.func @transform_2(%arg0: i32, %arg1: i32, %arg2: i32) -> (i32, i32) {
    %c0_i32 = arith.constant 0 : i32
    %c0_i32_0 = arith.constant 0 : i32
    return %c0_i32, %arg1 : i32, i32
  }
  func.func @transform_3(%arg0: i32, %arg1: i32, %arg2: i32) -> (i32, i32) {
    %c0_i32 = arith.constant 0 : i32
    return %arg0, %arg1 : i32, i32
  }
}

module attributes {stable_mosaic.version = 11 : i64} {
  func.func @_mm_kernel(%arg0: i32, %arg1: i32, %arg2: i32, %arg3: memref<8x256xbf16, #tpu.memory_space<vmem>>, %arg4: memref<256x256xbf16, #tpu.memory_space<vmem>>, %arg5: memref<1x256xf32, #tpu.memory_space<vmem>>, %arg6: memref<8x256xbf16, #tpu.memory_space<vmem>>, %arg7: memref<8x256xf32, #tpu.memory_space<vmem>>) attributes {dimension_semantics = [#tpu.dimension_semantics<parallel>, #tpu.dimension_semantics<parallel>, #tpu.dimension_semantics<arbitrary>], iteration_bounds = array<i64: 1, 2, 9>, scalar_prefetch = 0 : i64, scratch_operands = 1 : i64, tpu.core_type = #tpu.core_type<tc>, window_params = [{transform_indices = @transform_0, window_bounds = array<i64: 8, 256>}, {transform_indices = @transform_1, window_bounds = array<i64: 256, 256>}, {transform_indices = @transform_2, window_bounds = array<i64: 1, 256>}, {transform_indices = @transform_3, window_bounds = array<i64: 8, 256>}]} {
    %c0_i32 = arith.constant 0 : i32
    %0 = arith.cmpi eq, %arg2, %c0_i32 : i32
    %1 = arith.extui %0 : i1 to i32
    %c0_i32_0 = arith.constant 0 : i32
    %2 = arith.cmpi ne, %1, %c0_i32_0 : i32
    scf.if %2 {
      %cst_9 = arith.constant 0.000000e+00 : f32
      %12 = vector.broadcast %cst_9 : f32 to vector<8x256xf32>
      %c0_10 = arith.constant 0 : index
      %c0_11 = arith.constant 0 : index
      %13 = vector.load %arg7[%c0_10, %c0_11] : memref<8x256xf32, #tpu.memory_space<vmem>>, vector<8x256xf32>
      tpu.vector_store %arg7[%c0_10, %c0_11], %12 {strides = array<i32>} : memref<8x256xf32, #tpu.memory_space<vmem>>, vector<8x256xf32>,
    } else {
    }
    %c0 = arith.constant 0 : index
    %c0_1 = arith.constant 0 : index
    %3 = vector.load %arg7[%c0, %c0_1] : memref<8x256xf32, #tpu.memory_space<vmem>>, vector<8x256xf32>
    %c0_2 = arith.constant 0 : index
    %c0_3 = arith.constant 0 : index
    %4 = vector.load %arg3[%c0_2, %c0_3] : memref<8x256xbf16, #tpu.memory_space<vmem>>, vector<8x256xbf16>
    %c0_4 = arith.constant 0 : index
    %c0_5 = arith.constant 0 : index
    %5 = vector.load %arg4[%c0_4, %c0_5] : memref<256x256xbf16, #tpu.memory_space<vmem>>, vector<256x256xbf16>
    %cst = arith.constant dense<0.000000e+00> : vector<8x256xf32>
    %6 = tpu.matmul %4, %5, %cst {dimension_numbers = #tpu.dot_dimension_numbers<[1], [0], [0], [1], [0, 0, 1, 1], [], []>} : vector<8x256xbf16>, vector<256x256xbf16>, vector<8x256xf32> -> vector<8x256xf32>
    %7 = arith.addf %3, %6 : vector<8x256xf32>
    %c0_6 = arith.constant 0 : index
    %c0_7 = arith.constant 0 : index
    %8 = vector.load %arg7[%c0_6, %c0_7] : memref<8x256xf32, #tpu.memory_space<vmem>>, vector<8x256xf32>
    tpu.vector_store %arg7[%c0_6, %c0_7], %7 {strides = array<i32>} : memref<8x256xf32, #tpu.memory_space<vmem>>, vector<8x256xf32>,
    %c8_i32 = arith.constant 8 : i32
    %9 = arith.cmpi eq, %arg2, %c8_i32 : i32
    %10 = arith.extui %9 : i1 to i32
    %c0_i32_8 = arith.constant 0 : i32
    %11 = arith.cmpi ne, %10, %c0_i32_8 : i32
    scf.if %11 {
      %c0_9 = arith.constant 0 : index
      %c0_10 = arith.constant 0 : index
      %12 = vector.load %arg7[%c0_9, %c0_10] : memref<8x256xf32, #tpu.memory_space<vmem>>, vector<8x256xf32>
      %c0_11 = arith.constant 0 : index
      %c0_12 = arith.constant 0 : index
      %13 = vector.load %arg5[%c0_11, %c0_12] : memref<1x256xf32, #tpu.memory_space<vmem>>, vector<1x256xf32>
      %14 = vector.broadcast %13 : vector<1x256xf32> to vector<8x256xf32>
      %15 = arith.addf %12, %14 : vector<8x256xf32>
      %16 = arith.truncf %15 : vector<8x256xf32> to vector<8x256xbf16>
      %c0_13 = arith.constant 0 : index
      %c0_14 = arith.constant 0 : index
      %17 = vector.load %arg6[%c0_13, %c0_14] : memref<8x256xbf16, #tpu.memory_space<vmem>>, vector<8x256xbf16>
      tpu.vector_store %arg6[%c0_13, %c0_14], %16 {strides = array<i32>} : memref<8x256xbf16, #tpu.memory_space<vmem>>, vector<8x256xbf16>,
    } else {
    }
    return
  }
  func.func @transform_0(%arg0: i32, %arg1: i32, %arg2: i32) -> (i32, i32) {
    %c0_i32 = arith.constant 0 : i32
    return %arg0, %arg2 : i32, i32
  }
  func.func @transform_1(%arg0: i32, %arg1: i32, %arg2: i32) -> (i32, i32) {
    %c0_i32 = arith.constant 0 : i32
    return %arg2, %arg1 : i32, i32
  }
  func.func @transform_2(%arg0: i32, %arg1: i32, %arg2: i32) -> (i32, i32) {
    %c0_i32 = arith.constant 0 : i32
    %c0_i32_0 = arith.constant 0 : i32
    return %c0_i32, %arg1 : i32, i32
  }
  func.func @transform_3(%arg0: i32, %arg1: i32, %arg2: i32) -> (i32, i32) {
    %c0_i32 = arith.constant 0 : i32
    return %arg0, %arg1 : i32, i32
  }
}

module attributes {stable_mosaic.version = 11 : i64} {
  func.func @_mm_res_kernel(%arg0: i32, %arg1: i32, %arg2: i32, %arg3: memref<8x512xbf16, #tpu.memory_space<vmem>>, %arg4: memref<512x256xbf16, #tpu.memory_space<vmem>>, %arg5: memref<1x256xf32, #tpu.memory_space<vmem>>, %arg6: memref<8x256xbf16, #tpu.memory_space<vmem>>, %arg7: memref<8x256xbf16, #tpu.memory_space<vmem>>, %arg8: memref<8x256xf32, #tpu.memory_space<vmem>>) attributes {dimension_semantics = [#tpu.dimension_semantics<parallel>, #tpu.dimension_semantics<parallel>, #tpu.dimension_semantics<arbitrary>], iteration_bounds = array<i64: 1, 2, 9>, scalar_prefetch = 0 : i64, scratch_operands = 1 : i64, tpu.core_type = #tpu.core_type<tc>, window_params = [{transform_indices = @transform_0, window_bounds = array<i64: 8, 512>}, {transform_indices = @transform_1, window_bounds = array<i64: 512, 256>}, {transform_indices = @transform_2, window_bounds = array<i64: 1, 256>}, {transform_indices = @transform_3, window_bounds = array<i64: 8, 256>}, {transform_indices = @transform_4, window_bounds = array<i64: 8, 256>}]} {
    %c0_i32 = arith.constant 0 : i32
    %0 = arith.cmpi eq, %arg2, %c0_i32 : i32
    %1 = arith.extui %0 : i1 to i32
    %c0_i32_0 = arith.constant 0 : i32
    %2 = arith.cmpi ne, %1, %c0_i32_0 : i32
    scf.if %2 {
      %cst_9 = arith.constant 0.000000e+00 : f32
      %12 = vector.broadcast %cst_9 : f32 to vector<8x256xf32>
      %c0_10 = arith.constant 0 : index
      %c0_11 = arith.constant 0 : index
      %13 = vector.load %arg8[%c0_10, %c0_11] : memref<8x256xf32, #tpu.memory_space<vmem>>, vector<8x256xf32>
      tpu.vector_store %arg8[%c0_10, %c0_11], %12 {strides = array<i32>} : memref<8x256xf32, #tpu.memory_space<vmem>>, vector<8x256xf32>,
    } else {
    }
    %c0 = arith.constant 0 : index
    %c0_1 = arith.constant 0 : index
    %3 = vector.load %arg8[%c0, %c0_1] : memref<8x256xf32, #tpu.memory_space<vmem>>, vector<8x256xf32>
    %c0_2 = arith.constant 0 : index
    %c0_3 = arith.constant 0 : index
    %4 = vector.load %arg3[%c0_2, %c0_3] : memref<8x512xbf16, #tpu.memory_space<vmem>>, vector<8x512xbf16>
    %c0_4 = arith.constant 0 : index
    %c0_5 = arith.constant 0 : index
    %5 = vector.load %arg4[%c0_4, %c0_5] : memref<512x256xbf16, #tpu.memory_space<vmem>>, vector<512x256xbf16>
    %cst = arith.constant dense<0.000000e+00> : vector<8x256xf32>
    %6 = tpu.matmul %4, %5, %cst {dimension_numbers = #tpu.dot_dimension_numbers<[1], [0], [0], [1], [0, 0, 1, 1], [], []>} : vector<8x512xbf16>, vector<512x256xbf16>, vector<8x256xf32> -> vector<8x256xf32>
    %7 = arith.addf %3, %6 : vector<8x256xf32>
    %c0_6 = arith.constant 0 : index
    %c0_7 = arith.constant 0 : index
    %8 = vector.load %arg8[%c0_6, %c0_7] : memref<8x256xf32, #tpu.memory_space<vmem>>, vector<8x256xf32>
    tpu.vector_store %arg8[%c0_6, %c0_7], %7 {strides = array<i32>} : memref<8x256xf32, #tpu.memory_space<vmem>>, vector<8x256xf32>,
    %c8_i32 = arith.constant 8 : i32
    %9 = arith.cmpi eq, %arg2, %c8_i32 : i32
    %10 = arith.extui %9 : i1 to i32
    %c0_i32_8 = arith.constant 0 : i32
    %11 = arith.cmpi ne, %10, %c0_i32_8 : i32
    scf.if %11 {
      %c0_9 = arith.constant 0 : index
      %c0_10 = arith.constant 0 : index
      %12 = vector.load %arg8[%c0_9, %c0_10] : memref<8x256xf32, #tpu.memory_space<vmem>>, vector<8x256xf32>
      %c0_11 = arith.constant 0 : index
      %c0_12 = arith.constant 0 : index
      %13 = vector.load %arg5[%c0_11, %c0_12] : memref<1x256xf32, #tpu.memory_space<vmem>>, vector<1x256xf32>
      %14 = vector.broadcast %13 : vector<1x256xf32> to vector<8x256xf32>
      %15 = arith.addf %12, %14 : vector<8x256xf32>
      %c0_13 = arith.constant 0 : index
      %c0_14 = arith.constant 0 : index
      %16 = vector.load %arg6[%c0_13, %c0_14] : memref<8x256xbf16, #tpu.memory_space<vmem>>, vector<8x256xbf16>
      %17 = arith.extf %16 : vector<8x256xbf16> to vector<8x256xf32>
      %18 = arith.addf %15, %17 : vector<8x256xf32>
      %cst_15 = arith.constant 0.000000e+00 : f32
      %19 = vector.broadcast %cst_15 : f32 to vector<8x256xf32>
      %20 = arith.maximumf %18, %19 : vector<8x256xf32>
      %21 = arith.truncf %20 : vector<8x256xf32> to vector<8x256xbf16>
      %c0_16 = arith.constant 0 : index
      %c0_17 = arith.constant 0 : index
      %22 = vector.load %arg7[%c0_16, %c0_17] : memref<8x256xbf16, #tpu.memory_space<vmem>>, vector<8x256xbf16>
      tpu.vector_store %arg7[%c0_16, %c0_17], %21 {strides = array<i32>} : memref<8x256xbf16, #tpu.memory_space<vmem>>, vector<8x256xbf16>,
    } else {
    }
    return
  }
  func.func @transform_0(%arg0: i32, %arg1: i32, %arg2: i32) -> (i32, i32) {
    %c0_i32 = arith.constant 0 : i32
    return %arg0, %arg2 : i32, i32
  }
  func.func @transform_1(%arg0: i32, %arg1: i32, %arg2: i32) -> (i32, i32) {
    %c0_i32 = arith.constant 0 : i32
    return %arg2, %arg1 : i32, i32
  }
  func.func @transform_2(%arg0: i32, %arg1: i32, %arg2: i32) -> (i32, i32) {
    %c0_i32 = arith.constant 0 : i32
    %c0_i32_0 = arith.constant 0 : i32
    return %c0_i32, %arg1 : i32, i32
  }
  func.func @transform_3(%arg0: i32, %arg1: i32, %arg2: i32) -> (i32, i32) {
    %c0_i32 = arith.constant 0 : i32
    return %arg0, %arg1 : i32, i32
  }
  func.func @transform_4(%arg0: i32, %arg1: i32, %arg2: i32) -> (i32, i32) {
    %c0_i32 = arith.constant 0 : i32
    return %arg0, %arg1 : i32, i32
  }
}

module attributes {stable_mosaic.version = 11 : i64} {
  func.func @_mm_kernel(%arg0: i32, %arg1: i32, %arg2: i32, %arg3: memref<8x512xbf16, #tpu.memory_space<vmem>>, %arg4: memref<512x256xbf16, #tpu.memory_space<vmem>>, %arg5: memref<1x256xf32, #tpu.memory_space<vmem>>, %arg6: memref<8x256xbf16, #tpu.memory_space<vmem>>, %arg7: memref<8x256xf32, #tpu.memory_space<vmem>>) attributes {dimension_semantics = [#tpu.dimension_semantics<parallel>, #tpu.dimension_semantics<parallel>, #tpu.dimension_semantics<arbitrary>], iteration_bounds = array<i64: 1, 2, 9>, scalar_prefetch = 0 : i64, scratch_operands = 1 : i64, tpu.core_type = #tpu.core_type<tc>, window_params = [{transform_indices = @transform_0, window_bounds = array<i64: 8, 512>}, {transform_indices = @transform_1, window_bounds = array<i64: 512, 256>}, {transform_indices = @transform_2, window_bounds = array<i64: 1, 256>}, {transform_indices = @transform_3, window_bounds = array<i64: 8, 256>}]} {
    %c0_i32 = arith.constant 0 : i32
    %0 = arith.cmpi eq, %arg2, %c0_i32 : i32
    %1 = arith.extui %0 : i1 to i32
    %c0_i32_0 = arith.constant 0 : i32
    %2 = arith.cmpi ne, %1, %c0_i32_0 : i32
    scf.if %2 {
      %cst_9 = arith.constant 0.000000e+00 : f32
      %12 = vector.broadcast %cst_9 : f32 to vector<8x256xf32>
      %c0_10 = arith.constant 0 : index
      %c0_11 = arith.constant 0 : index
      %13 = vector.load %arg7[%c0_10, %c0_11] : memref<8x256xf32, #tpu.memory_space<vmem>>, vector<8x256xf32>
      tpu.vector_store %arg7[%c0_10, %c0_11], %12 {strides = array<i32>} : memref<8x256xf32, #tpu.memory_space<vmem>>, vector<8x256xf32>,
    } else {
    }
    %c0 = arith.constant 0 : index
    %c0_1 = arith.constant 0 : index
    %3 = vector.load %arg7[%c0, %c0_1] : memref<8x256xf32, #tpu.memory_space<vmem>>, vector<8x256xf32>
    %c0_2 = arith.constant 0 : index
    %c0_3 = arith.constant 0 : index
    %4 = vector.load %arg3[%c0_2, %c0_3] : memref<8x512xbf16, #tpu.memory_space<vmem>>, vector<8x512xbf16>
    %c0_4 = arith.constant 0 : index
    %c0_5 = arith.constant 0 : index
    %5 = vector.load %arg4[%c0_4, %c0_5] : memref<512x256xbf16, #tpu.memory_space<vmem>>, vector<512x256xbf16>
    %cst = arith.constant dense<0.000000e+00> : vector<8x256xf32>
    %6 = tpu.matmul %4, %5, %cst {dimension_numbers = #tpu.dot_dimension_numbers<[1], [0], [0], [1], [0, 0, 1, 1], [], []>} : vector<8x512xbf16>, vector<512x256xbf16>, vector<8x256xf32> -> vector<8x256xf32>
    %7 = arith.addf %3, %6 : vector<8x256xf32>
    %c0_6 = arith.constant 0 : index
    %c0_7 = arith.constant 0 : index
    %8 = vector.load %arg7[%c0_6, %c0_7] : memref<8x256xf32, #tpu.memory_space<vmem>>, vector<8x256xf32>
    tpu.vector_store %arg7[%c0_6, %c0_7], %7 {strides = array<i32>} : memref<8x256xf32, #tpu.memory_space<vmem>>, vector<8x256xf32>,
    %c8_i32 = arith.constant 8 : i32
    %9 = arith.cmpi eq, %arg2, %c8_i32 : i32
    %10 = arith.extui %9 : i1 to i32
    %c0_i32_8 = arith.constant 0 : i32
    %11 = arith.cmpi ne, %10, %c0_i32_8 : i32
    scf.if %11 {
      %c0_9 = arith.constant 0 : index
      %c0_10 = arith.constant 0 : index
      %12 = vector.load %arg7[%c0_9, %c0_10] : memref<8x256xf32, #tpu.memory_space<vmem>>, vector<8x256xf32>
      %c0_11 = arith.constant 0 : index
      %c0_12 = arith.constant 0 : index
      %13 = vector.load %arg5[%c0_11, %c0_12] : memref<1x256xf32, #tpu.memory_space<vmem>>, vector<1x256xf32>
      %14 = vector.broadcast %13 : vector<1x256xf32> to vector<8x256xf32>
      %15 = arith.addf %12, %14 : vector<8x256xf32>
      %cst_13 = arith.constant 0.000000e+00 : f32
      %16 = vector.broadcast %cst_13 : f32 to vector<8x256xf32>
      %17 = arith.maximumf %15, %16 : vector<8x256xf32>
      %18 = arith.truncf %17 : vector<8x256xf32> to vector<8x256xbf16>
      %c0_14 = arith.constant 0 : index
      %c0_15 = arith.constant 0 : index
      %19 = vector.load %arg6[%c0_14, %c0_15] : memref<8x256xbf16, #tpu.memory_space<vmem>>, vector<8x256xbf16>
      tpu.vector_store %arg6[%c0_14, %c0_15], %18 {strides = array<i32>} : memref<8x256xbf16, #tpu.memory_space<vmem>>, vector<8x256xbf16>,
    } else {
    }
    return
  }
  func.func @transform_0(%arg0: i32, %arg1: i32, %arg2: i32) -> (i32, i32) {
    %c0_i32 = arith.constant 0 : i32
    return %arg0, %arg2 : i32, i32
  }
  func.func @transform_1(%arg0: i32, %arg1: i32, %arg2: i32) -> (i32, i32) {
    %c0_i32 = arith.constant 0 : i32
    return %arg2, %arg1 : i32, i32
  }
  func.func @transform_2(%arg0: i32, %arg1: i32, %arg2: i32) -> (i32, i32) {
    %c0_i32 = arith.constant 0 : i32
    %c0_i32_0 = arith.constant 0 : i32
    return %c0_i32, %arg1 : i32, i32
  }
  func.func @transform_3(%arg0: i32, %arg1: i32, %arg2: i32) -> (i32, i32) {
    %c0_i32 = arith.constant 0 : i32
    return %arg0, %arg1 : i32, i32
  }
}

module attributes {stable_mosaic.version = 11 : i64} {
  func.func @_mm_kernel(%arg0: i32, %arg1: i32, %arg2: i32, %arg3: memref<8x512xbf16, #tpu.memory_space<vmem>>, %arg4: memref<512x128xbf16, #tpu.memory_space<vmem>>, %arg5: memref<1x128xf32, #tpu.memory_space<vmem>>, %arg6: memref<8x128xf32, #tpu.memory_space<vmem>>, %arg7: memref<8x128xf32, #tpu.memory_space<vmem>>) attributes {dimension_semantics = [#tpu.dimension_semantics<parallel>, #tpu.dimension_semantics<parallel>, #tpu.dimension_semantics<arbitrary>], iteration_bounds = array<i64: 1, 1, 1>, scalar_prefetch = 0 : i64, scratch_operands = 1 : i64, tpu.core_type = #tpu.core_type<tc>, window_params = [{transform_indices = @transform_0, window_bounds = array<i64: 8, 512>}, {transform_indices = @transform_1, window_bounds = array<i64: 512, 128>}, {transform_indices = @transform_2, window_bounds = array<i64: 1, 128>}, {transform_indices = @transform_3, window_bounds = array<i64: 8, 128>}]} {
    %c0_i32 = arith.constant 0 : i32
    %0 = arith.cmpi eq, %arg2, %c0_i32 : i32
    %1 = arith.extui %0 : i1 to i32
    %c0_i32_0 = arith.constant 0 : i32
    %2 = arith.cmpi ne, %1, %c0_i32_0 : i32
    scf.if %2 {
      %cst_10 = arith.constant 0.000000e+00 : f32
      %12 = vector.broadcast %cst_10 : f32 to vector<8x128xf32>
      %c0_11 = arith.constant 0 : index
      %c0_12 = arith.constant 0 : index
      %13 = vector.load %arg7[%c0_11, %c0_12] : memref<8x128xf32, #tpu.memory_space<vmem>>, vector<8x128xf32>
      tpu.vector_store %arg7[%c0_11, %c0_12], %12 {strides = array<i32>} : memref<8x128xf32, #tpu.memory_space<vmem>>, vector<8x128xf32>,
    } else {
    }
    %c0 = arith.constant 0 : index
    %c0_1 = arith.constant 0 : index
    %3 = vector.load %arg7[%c0, %c0_1] : memref<8x128xf32, #tpu.memory_space<vmem>>, vector<8x128xf32>
    %c0_2 = arith.constant 0 : index
    %c0_3 = arith.constant 0 : index
    %4 = vector.load %arg3[%c0_2, %c0_3] : memref<8x512xbf16, #tpu.memory_space<vmem>>, vector<8x512xbf16>
    %c0_4 = arith.constant 0 : index
    %c0_5 = arith.constant 0 : index
    %5 = vector.load %arg4[%c0_4, %c0_5] : memref<512x128xbf16, #tpu.memory_space<vmem>>, vector<512x128xbf16>
    %cst = arith.constant dense<0.000000e+00> : vector<8x128xf32>
    %6 = tpu.matmul %4, %5, %cst {dimension_numbers = #tpu.dot_dimension_numbers<[1], [0], [0], [1], [0, 0, 1, 1], [], []>} : vector<8x512xbf16>, vector<512x128xbf16>, vector<8x128xf32> -> vector<8x128xf32>
    %7 = arith.addf %3, %6 : vector<8x128xf32>
    %c0_6 = arith.constant 0 : index
    %c0_7 = arith.constant 0 : index
    %8 = vector.load %arg7[%c0_6, %c0_7] : memref<8x128xf32, #tpu.memory_space<vmem>>, vector<8x128xf32>
    tpu.vector_store %arg7[%c0_6, %c0_7], %7 {strides = array<i32>} : memref<8x128xf32, #tpu.memory_space<vmem>>, vector<8x128xf32>,
    %c0_i32_8 = arith.constant 0 : i32
    %9 = arith.cmpi eq, %arg2, %c0_i32_8 : i32
    %10 = arith.extui %9 : i1 to i32
    %c0_i32_9 = arith.constant 0 : i32
    %11 = arith.cmpi ne, %10, %c0_i32_9 : i32
    scf.if %11 {
      %c0_10 = arith.constant 0 : index
      %c0_11 = arith.constant 0 : index
      %12 = vector.load %arg7[%c0_10, %c0_11] : memref<8x128xf32, #tpu.memory_space<vmem>>, vector<8x128xf32>
      %c0_12 = arith.constant 0 : index
      %c0_13 = arith.constant 0 : index
      %13 = vector.load %arg5[%c0_12, %c0_13] : memref<1x128xf32, #tpu.memory_space<vmem>>, vector<1x128xf32>
      %14 = vector.broadcast %13 : vector<1x128xf32> to vector<8x128xf32>
      %15 = arith.addf %12, %14 : vector<8x128xf32>
      %c0_14 = arith.constant 0 : index
      %c0_15 = arith.constant 0 : index
      %16 = vector.load %arg6[%c0_14, %c0_15] : memref<8x128xf32, #tpu.memory_space<vmem>>, vector<8x128xf32>
      tpu.vector_store %arg6[%c0_14, %c0_15], %15 {strides = array<i32>} : memref<8x128xf32, #tpu.memory_space<vmem>>, vector<8x128xf32>,
    } else {
    }
    return
  }
  func.func @transform_0(%arg0: i32, %arg1: i32, %arg2: i32) -> (i32, i32) {
    %c0_i32 = arith.constant 0 : i32
    return %arg0, %arg2 : i32, i32
  }
  func.func @transform_1(%arg0: i32, %arg1: i32, %arg2: i32) -> (i32, i32) {
    %c0_i32 = arith.constant 0 : i32
    return %arg2, %arg1 : i32, i32
  }
  func.func @transform_2(%arg0: i32, %arg1: i32, %arg2: i32) -> (i32, i32) {
    %c0_i32 = arith.constant 0 : i32
    %c0_i32_0 = arith.constant 0 : i32
    return %c0_i32, %arg1 : i32, i32
  }
  func.func @transform_3(%arg0: i32, %arg1: i32, %arg2: i32) -> (i32, i32) {
    %c0_i32 = arith.constant 0 : i32
    return %arg0, %arg1 : i32, i32
  }
}

</mosaic_0001>

<bundles_post_ra>
// kernel: _lambda_.21
= control target key start
LH: loop header
LB: loop body
LE: loop exit
PB: predicated region body
PF: predicated region fallthrough
CT: control target
= control target key end

     0   :  { %s1744_s12 = smov 0   ;;  %s1746_s13 = smov 0   ;;  %s1918_s0 = inlined_call_operand.vmem [shape: bf16[512,256], index: 0, kind: input, shape index: {}]   ;;  %s1919_s1 = inlined_call_operand.vmem [shape: bf16[256,128], index: 1, kind: input, shape index: {}]   ;;  %s1920_s2 = inlined_call_operand.vmem [shape: f32[1,128], index: 2, kind: input, shape index: {}]   ;;  %s1921_s3 = inlined_call_operand.vmem [shape: bf16[512,128], index: 3, kind: output, shape index: {}]  }
   0x1   :  { %s1748_s14 = smov 0  }
   0x2 LB: > { %s32_s15 = sadd.s32 1, %s1718_s13  ;;  %p1267_p0 = scmp.ge.s32.totalorder %s1722_s14, 1  ;;  %s1722_s14 = sphi %s1748_s14, %s13_s14   ;;  %s1718_s13 = sphi %s1746_s13, %s1923_s13   ;;  %s1714_s12 = sphi %s1744_s12, %s1922_s12  }
   0x3   : > { %p34_p1 = scmp.ge.s32.totalorder %s32_s15, 2  ;;  %p191_p2 = scmp.lt.s32.totalorder %s1722_s14, 3 }
   0x5   : > { %s1925_s15 = smov (%p34_p1, %s32_s15), 0  ;;  %p192_p3 = pnand %p1267_p0, %p191_p2 }
   0x6   : > { %v1636_v0 = vld [vmem:[%s1919_s1 + $0x40] sm:$0xff] (!%p192_p3)   ;;  %s1268_s18 = sshll.u32 (!%p192_p3), %s1714_s12, 5  ;;  %v1638_v2 = vld [vmem:[%s1919_s1 + $0x48] sm:$0xff] (!%p192_p3)   ;;  %v1640_v4 = vld [vmem:[%s1919_s1 + $0x50] sm:$0xff] (!%p192_p3)  }
   0x7   : > { %195 = sbr.rel (%p192_p3) target bundleno = 320 (0x140), region = 32  ;;  %v1637_v1 = vld [vmem:[%s1919_s1] sm:$0xff] (!%p192_p3)   ;;  %1484 = vmatprep.subr.bf16.mxu0 (!%p192_p3), %v1636_v0  ;;  %1596 = vmatprep.subr.bf16.mxu1 (!%p192_p3), %v1636_v0  ;;  %v1639_v3 = vld [vmem:[%s1919_s1 + $0x8] sm:$0xff] (!%p192_p3)   ;;  %p236_p4 = scmp.lt.s32.totalorder (!%p192_p3), %s1268_s18, 63  ;;  %v1641_v5 = vld [vmem:[%s1919_s1 + $0x10] sm:$0xff] (!%p192_p3)  }
   0x8   : > { %1485 = vmatpush3.bf16.msra.mxu0 (!%p192_p3), %v1637_v1  ;;  %1604 = vmatpush3.bf16.msra.mxu1 (!%p192_p3), %v1637_v1  ;;  %v1642_v6 = vld [vmem:[%s1919_s1 + $0x58] sm:$0xff] (!%p192_p3)   ;;  %v1644_v8 = vld [vmem:[%s1919_s1 + $0x60] sm:$0xff] (!%p192_p3)   ;;  %v1646_v10 = vld [vmem:[%s1919_s1 + $0x68] sm:$0xff] (!%p192_p3)  }
   0x9   : > { %1486 = vmatprep.subr.bf16.mxu0 (!%p192_p3), %v1638_v2  ;;  %1597 = vmatprep.subr.bf16.mxu1 (!%p192_p3), %v1638_v2  ;;  %v1643_v7 = vld [vmem:[%s1919_s1 + $0x18] sm:$0xff] (!%p192_p3)   ;;  %v1645_v9 = vld [vmem:[%s1919_s1 + $0x20] sm:$0xff] (!%p192_p3)   ;;  %v1647_v13 = vld [vmem:[%s1919_s1 + $0x28] sm:$0xff] (!%p192_p3)  }
   0xa   : > { %v1648_v14 = vld [vmem:[%s1919_s1 + $0x70] sm:$0xff] (!%p192_p3)   ;;  %v1650_v16 = vld [vmem:[%s1919_s1 + $0x78] sm:$0xff] (!%p192_p3)   ;;  %v1853_v51 = vld [vmem:[%s1920_s2] ss:$0 sm:$0xff] (!%p192_p3) }
   0xb   : > { %v1649_v15 = vld [vmem:[%s1919_s1 + $0x30] sm:$0xff] (!%p192_p3)   ;;  %v1651_v17 = vld [vmem:[%s1919_s1 + $0x38] sm:$0xff] (!%p192_p3)  }
   0xc   : > { %1487 = vmatpush3.bf16.msra.mxu0 (!%p192_p3), %v1639_v3  ;;  %1605 = vmatpush3.bf16.msra.mxu1 (!%p192_p3), %v1639_v3 }
   0xd   : > { %1488 = vmatprep.subr.bf16.mxu0 (!%p192_p3), %v1640_v4  ;;  %1598 = vmatprep.subr.bf16.mxu1 (!%p192_p3), %v1640_v4 }
   0xe   : > { %s1927_s18 = smov (!%p236_p4, %s1268_s18), 63 }
   0xf   : > { %s1356_s6 = sshll.u32 %s1927_s18, 3  ;;  %s1272_s5 = sshll.u32 %s1927_s18, 2 }
  0x10   : > { %1489 = vmatpush3.bf16.msra.mxu0 %v1641_v5  ;;  %1606 = vmatpush3.bf16.msra.mxu1 %v1641_v5  ;;  %s1795_s11 = scalar_lea.vmem %s1918_s0, %s1356_s6  ;;  %s1863_s8 = scalar_lea.vmem %s1921_s3, %s1272_s5 }
  0x11   : > { %1490 = vmatprep.subr.bf16.mxu0 %v1642_v6  ;;  %1599 = vmatprep.subr.bf16.mxu1 %v1642_v6  ;;  %v1654_v11 = vld [vmem:[%s1795_s11 + $0x4] ss:$8 sps:$4 sm:$0xff]   ;;  %v1652_v18 = vld [vmem:[%s1795_s11] ss:$8 sps:$4 sm:$0xff]   ;;  %v1658_v20 = vld [vmem:[%s1795_s11 + $0x14] ss:$8 sps:$4 sm:$0xff]  }
  0x12   : > { %v1657_v12 = vld [vmem:[%s1795_s11 + $0x84] ss:$8 sps:$4 sm:$0xff]   ;;  %688 = vmatprep.mubr.bf16.mxu0 %v1654_v11  ;;  %v1655_v19 = vld [vmem:[%s1795_s11 + $0x80] ss:$8 sps:$4 sm:$0xff]   ;;  %v1660_v21 = vld [vmem:[%s1795_s11 + $0x94] ss:$8 sps:$4 sm:$0xff]  }
  0x13   : > { %752 = vmatprep.mubr.bf16.mxu1 %v1657_v12  ;;  %v1662_v22 = vld [vmem:[%s1795_s11 + $0x10] ss:$8 sps:$4 sm:$0xff]   ;;  %v1664_v24 = vld [vmem:[%s1795_s11 + $0x24] ss:$8 sps:$4 sm:$0xff]   ;;  %v1668_v26 = vld [vmem:[%s1795_s11 + $0x20] ss:$8 sps:$4 sm:$0xff]  }
  0x14   : > { %1491 = vmatpush3.bf16.msra.mxu0 %v1643_v7  ;;  %1607 = vmatpush3.bf16.msra.mxu1 %v1643_v7  ;;  %v1663_v23 = vld [vmem:[%s1795_s11 + $0x90] ss:$8 sps:$4 sm:$0xff]   ;;  %v1666_v25 = vld [vmem:[%s1795_s11 + $0xa4] ss:$8 sps:$4 sm:$0xff]   ;;  %v1669_v27 = vld [vmem:[%s1795_s11 + $0xa0] ss:$8 sps:$4 sm:$0xff]  }
  0x15   : > { %1492 = vmatprep.subr.bf16.mxu0 %v1644_v8  ;;  %1600 = vmatprep.subr.bf16.mxu1 %v1644_v8  ;;  %v1670_v28 = vld [vmem:[%s1795_s11 + $0x34] ss:$8 sps:$4 sm:$0xff]   ;;  %v1674_v30 = vld [vmem:[%s1795_s11 + $0x30] ss:$8 sps:$4 sm:$0xff]   ;;  %v1676_v32 = vld [vmem:[%s1795_s11 + $0x44] ss:$8 sps:$4 sm:$0xff]  }
  0x16   : > { %v1672_v29 = vld [vmem:[%s1795_s11 + $0xb4] ss:$8 sps:$4 sm:$0xff]   ;;  %v1675_v31 = vld [vmem:[%s1795_s11 + $0xb0] ss:$8 sps:$4 sm:$0xff]   ;;  %v1678_v33 = vld [vmem:[%s1795_s11 + $0xc4] ss:$8 sps:$4 sm:$0xff]  }
  0x17   : > { %v1680_v34 = vld [vmem:[%s1795_s11 + $0x40] ss:$8 sps:$4 sm:$0xff]   ;;  %v1682_v36 = vld [vmem:[%s1795_s11 + $0x54] ss:$8 sps:$4 sm:$0xff]   ;;  %v1686_v38 = vld [vmem:[%s1795_s11 + $0x50] ss:$8 sps:$4 sm:$0xff]  }
  0x18   : > { %1493 = vmatpush3.bf16.msra.mxu0 %v1645_v9  ;;  %1608 = vmatpush3.bf16.msra.mxu1 %v1645_v9  ;;  %v1681_v35 = vld [vmem:[%s1795_s11 + $0xc0] ss:$8 sps:$4 sm:$0xff]   ;;  %v1684_v37 = vld [vmem:[%s1795_s11 + $0xd4] ss:$8 sps:$4 sm:$0xff]   ;;  %v1687_v39 = vld [vmem:[%s1795_s11 + $0xd0] ss:$8 sps:$4 sm:$0xff]  }
  0x19   : > { %1494 = vmatprep.subr.bf16.mxu0 %v1646_v10  ;;  %1601 = vmatprep.subr.bf16.mxu1 %v1646_v10  ;;  %v1688_v40 = vld [vmem:[%s1795_s11 + $0x64] ss:$8 sps:$4 sm:$0xff]   ;;  %v1692_v42 = vld [vmem:[%s1795_s11 + $0x60] ss:$8 sps:$4 sm:$0xff]   ;;  %v1694_v44 = vld [vmem:[%s1795_s11 + $0x74] ss:$8 sps:$4 sm:$0xff]  }
  0x1a   : > { %v1690_v41 = vld [vmem:[%s1795_s11 + $0xe4] ss:$8 sps:$4 sm:$0xff]   ;;  %v1693_v43 = vld [vmem:[%s1795_s11 + $0xe0] ss:$8 sps:$4 sm:$0xff]   ;;  %v1696_v45 = vld [vmem:[%s1795_s11 + $0xf4] ss:$8 sps:$4 sm:$0xff]  }
  0x1b   : > { %v1698_v46 = vld [vmem:[%s1795_s11 + $0x70] ss:$8 sps:$4 sm:$0xff]  }
  0x1c   : > { %1495 = vmatpush3.bf16.msra.mxu0 %v1647_v13  ;;  %1609 = vmatpush3.bf16.msra.mxu1 %v1647_v13  ;;  %v1699_v47 = vld [vmem:[%s1795_s11 + $0xf0] ss:$8 sps:$4 sm:$0xff]  }
  0x1d   : > { %1496 = vmatprep.subr.bf16.mxu0 %v1648_v14  ;;  %1602 = vmatprep.subr.bf16.mxu1 %v1648_v14 }
  0x20   : > { %1497 = vmatpush3.bf16.msra.mxu0 %v1649_v15  ;;  %1610 = vmatpush3.bf16.msra.mxu1 %v1649_v15 }
  0x21   : > { %1498 = vmatprep.subr.bf16.mxu0 %v1650_v16  ;;  %1603 = vmatprep.subr.bf16.mxu1 %v1650_v16 }
  0x24   : > { %1499 = vmatpush3.bf16.msra.mxu0 %v1651_v17  ;;  %1611 = vmatpush3.bf16.msra.mxu1 %v1651_v17 }
  0x27   : > { %689 = vmatmul.mubr.bf16.vlgmr.msra.gmra.mrb[0].mxu0 %v1652_v18  ;;  %753 = vmatmul.mubr.bf16.vlgmr.msra.gmra.mrb[0].mxu1 %v1655_v19 }
  0x28   : > { %696 = vmatprep.mubr.bf16.mxu0 %v1658_v20  ;;  %760 = vmatprep.mubr.bf16.mxu1 %v1660_v21 }
  0x2f   : > { %697 = vmatmul.mubr.bf16.gmra.mrb[4].mxu0 %v1662_v22  ;;  %761 = vmatmul.mubr.bf16.gmra.mrb[4].mxu1 %v1663_v23 }
  0x30   : > { %704 = vmatprep.mubr.bf16.mxu0 %v1664_v24  ;;  %768 = vmatprep.mubr.bf16.mxu1 %v1666_v25 }
  0x37   : > { %705 = vmatmul.mubr.bf16.gmra.mrb[8].mxu0 %v1668_v26  ;;  %769 = vmatmul.mubr.bf16.gmra.mrb[8].mxu1 %v1669_v27 }
  0x38   : > { %712 = vmatprep.mubr.bf16.mxu0 %v1670_v28  ;;  %776 = vmatprep.mubr.bf16.mxu1 %v1672_v29 }
  0x3f   : > { %713 = vmatmul.mubr.bf16.gmra.mrb[12].mxu0 %v1674_v30  ;;  %777 = vmatmul.mubr.bf16.gmra.mrb[12].mxu1 %v1675_v31 }
  0x40   : > { %720 = vmatprep.mubr.bf16.mxu0 %v1676_v32  ;;  %784 = vmatprep.mubr.bf16.mxu1 %v1678_v33 }
  0x47   : > { %721 = vmatmul.mubr.bf16.gmra.mrb[16].mxu0 %v1680_v34  ;;  %785 = vmatmul.mubr.bf16.gmra.mrb[16].mxu1 %v1681_v35 }
  0x48   : > { %728 = vmatprep.mubr.bf16.mxu0 %v1682_v36  ;;  %792 = vmatprep.mubr.bf16.mxu1 %v1684_v37 }
  0x4f   : > { %729 = vmatmul.mubr.bf16.gmra.mrb[20].mxu0 %v1686_v38  ;;  %793 = vmatmul.mubr.bf16.gmra.mrb[20].mxu1 %v1687_v39 }
  0x50   : > { %736 = vmatprep.mubr.bf16.mxu0 %v1688_v40  ;;  %800 = vmatprep.mubr.bf16.mxu1 %v1690_v41 }
  0x57   : > { %737 = vmatmul.mubr.bf16.gmra.mrb[24].mxu0 %v1692_v42  ;;  %801 = vmatmul.mubr.bf16.gmra.mrb[24].mxu1 %v1693_v43 }
  0x58   : > { %744 = vmatprep.mubr.bf16.mxu0 %v1694_v44  ;;  %808 = vmatprep.mubr.bf16.mxu1 %v1696_v45 }
  0x5f   : > { %745 = vmatmul.mubr.bf16.gmra.mrb[28].mxu0 %v1698_v46  ;;  %809 = vmatmul.mubr.bf16.gmra.mrb[28].mxu1 %v1699_v47 }
  0xfa   : > { %v1500_v48 = vpop.f32.mrb[0].mxu0  ;;  %v1548_v49 = vpop.f32.mrb[0].mxu1 }
  0xfb   : > { %v1501_v50 = vpop.f32.mrb[1].mxu0  ;;  %v1549_v52 = vpop.f32.mrb[1].mxu1 }
  0xfc   : > { %v1502_v53 = vadd.f32 %v1501_v50, %v1500_v48  ;;  %v1550_v54 = vadd.f32 %v1549_v52, %v1548_v49  ;;  %v1503_v55 = vpop.f32.mrb[2].mxu0  ;;  %v1551_v56 = vpop.f32.mrb[2].mxu1 }
  0xfd   : > { %v1504_v57 = vpop.f32.mrb[3].mxu0  ;;  %v1552_v58 = vpop.f32.mrb[3].mxu1 }
  0xfe   : > { %v923_v59 = vadd.f32 %v1502_v53, %v1853_v51  ;;  %v939_v60 = vadd.f32 %v1550_v54, %v1853_v51  ;;  %v1505_v61 = vadd.f32 %v1504_v57, %v1503_v55  ;;  %v1553_v62 = vadd.f32 %v1552_v58, %v1551_v56 }
 0x100   : > { %v924_v63 = vadd.f32 %v1505_v61, %v1853_v51  ;;  %v940_v0 = vadd.f32 %v1553_v62, %v1853_v51  ;;  %v955_v1 = vmax.f32 %v923_v59, 0.0  ;;  %v971_v2 = vmax.f32 %v939_v60, 0.0 }
 0x102   : > { %v956_v3 = vmax.f32 %v924_v63, 0.0  ;;  %v972_v4 = vmax.f32 %v940_v0, 0.0  ;;  %v1506_v5 = vpop.f32.mrb[4].mxu0  ;;  %v1554_v6 = vpop.f32.mrb[4].mxu1 }
 0x103   : > { %v1507_v7 = vpop.f32.mrb[5].mxu0  ;;  %v1555_v8 = vpop.f32.mrb[5].mxu1 }
 0x104   : > { %v1392_v9 = vpack.c.bf16 %v956_v3, %v955_v1  ;;  %v1432_v10 = vpack.c.bf16 %v972_v4, %v971_v2  ;;  %v1508_v11 = vadd.f32 %v1507_v7, %v1506_v5  ;;  %v1556_v12 = vadd.f32 %v1555_v8, %v1554_v6  ;;  %v1509_v13 = vpop.f32.mrb[6].mxu0  ;;  %v1557_v14 = vpop.f32.mrb[6].mxu1 }
 0x105   : > { %v1510_v15 = vpop.f32.mrb[7].mxu0  ;;  %v1558_v16 = vpop.f32.mrb[7].mxu1 }
 0x106   : > { %1393 = vst [vmem:[%s1863_s8] sm:$0xff] %v1392_v9   ;;  %1476 = vst [vmem:[%s1863_s8 + $0x40] sm:$0xff] %v1432_v10   ;;  %v925_v17 = vadd.f32 %v1508_v11, %v1853_v51  ;;  %v941_v18 = vadd.f32 %v1556_v12, %v1853_v51  ;;  %v1511_v19 = vadd.f32 %v1510_v15, %v1509_v13 }
 0x107   : > { %v1559_v20 = vadd.f32 %v1558_v16, %v1557_v14 }
 0x108   : > { %v926_v21 = vadd.f32 %v1511_v19, %v1853_v51  ;;  %v957_v23 = vmax.f32 %v925_v17, 0.0  ;;  %v973_v24 = vmax.f32 %v941_v18, 0.0 }
 0x109   : > { %v942_v22 = vadd.f32 %v1559_v20, %v1853_v51 }
 0x10a   : > { %v958_v25 = vmax.f32 %v926_v21, 0.0  ;;  %v1512_v27 = vpop.f32.mrb[8].mxu0  ;;  %v1560_v28 = vpop.f32.mrb[8].mxu1 }
 0x10b   : > { %v974_v26 = vmax.f32 %v942_v22, 0.0  ;;  %v1513_v29 = vpop.f32.mrb[9].mxu0  ;;  %v1561_v30 = vpop.f32.mrb[9].mxu1 }
 0x10c   : > { %v1397_v31 = vpack.c.bf16 %v958_v25, %v957_v23  ;;  %v1514_v33 = vadd.f32 %v1513_v29, %v1512_v27  ;;  %v1562_v34 = vadd.f32 %v1561_v30, %v1560_v28  ;;  %v1515_v35 = vpop.f32.mrb[10].mxu0  ;;  %v1563_v36 = vpop.f32.mrb[10].mxu1 }
 0x10d   : > { %v1437_v32 = vpack.c.bf16 %v974_v26, %v973_v24  ;;  %v1516_v37 = vpop.f32.mrb[11].mxu0  ;;  %v1564_v38 = vpop.f32.mrb[11].mxu1 }
 0x10e   : > { %1469 = vst [vmem:[%s1863_s8 + $0x8] sm:$0xff] %v1397_v31   ;;  %v927_v39 = vadd.f32 %v1514_v33, %v1853_v51  ;;  %v943_v40 = vadd.f32 %v1562_v34, %v1853_v51  ;;  %v1517_v41 = vadd.f32 %v1516_v37, %v1515_v35  ;;  %v1565_v42 = vadd.f32 %v1564_v38, %v1563_v36 }
 0x10f   : > { %1477 = vst [vmem:[%s1863_s8 + $0x48] sm:$0xff] %v1437_v32  }
 0x110   : > { %v928_v43 = vadd.f32 %v1517_v41, %v1853_v51  ;;  %v944_v44 = vadd.f32 %v1565_v42, %v1853_v51  ;;  %v959_v45 = vmax.f32 %v927_v39, 0.0  ;;  %v975_v46 = vmax.f32 %v943_v40, 0.0 }
 0x112   : > { %v960_v47 = vmax.f32 %v928_v43, 0.0  ;;  %v976_v48 = vmax.f32 %v944_v44, 0.0  ;;  %v1518_v49 = vpop.f32.mrb[12].mxu0  ;;  %v1566_v50 = vpop.f32.mrb[12].mxu1 }
 0x113   : > { %v1519_v52 = vpop.f32.mrb[13].mxu0  ;;  %v1567_v53 = vpop.f32.mrb[13].mxu1 }
 0x114   : > { %v1402_v54 = vpack.c.bf16 %v960_v47, %v959_v45  ;;  %v1442_v55 = vpack.c.bf16 %v976_v48, %v975_v46  ;;  %v1520_v56 = vadd.f32 %v1519_v52, %v1518_v49  ;;  %v1568_v57 = vadd.f32 %v1567_v53, %v1566_v50  ;;  %v1521_v58 = vpop.f32.mrb[14].mxu0  ;;  %v1569_v59 = vpop.f32.mrb[14].mxu1 }
 0x115   : > { %v1522_v60 = vpop.f32.mrb[15].mxu0  ;;  %v1570_v61 = vpop.f32.mrb[15].mxu1 }
 0x116   : > { %1470 = vst [vmem:[%s1863_s8 + $0x10] sm:$0xff] %v1402_v54   ;;  %1478 = vst [vmem:[%s1863_s8 + $0x50] sm:$0xff] %v1442_v55   ;;  %v929_v62 = vadd.f32 %v1520_v56, %v1853_v51  ;;  %v945_v63 = vadd.f32 %v1568_v57, %v1853_v51  ;;  %v1523_v0 = vadd.f32 %v1522_v60, %v1521_v58 }
 0x117   : > { %v1571_v1 = vadd.f32 %v1570_v61, %v1569_v59 }
 0x118   : > { %v930_v2 = vadd.f32 %v1523_v0, %v1853_v51  ;;  %v961_v4 = vmax.f32 %v929_v62, 0.0  ;;  %v977_v5 = vmax.f32 %v945_v63, 0.0 }
 0x119   : > { %v946_v3 = vadd.f32 %v1571_v1, %v1853_v51 }
 0x11a   : > { %v962_v6 = vmax.f32 %v930_v2, 0.0  ;;  %v1524_v8 = vpop.f32.mrb[16].mxu0  ;;  %v1572_v9 = vpop.f32.mrb[16].mxu1 }
 0x11b   : > { %v978_v7 = vmax.f32 %v946_v3, 0.0  ;;  %v1525_v10 = vpop.f32.mrb[17].mxu0  ;;  %v1573_v11 = vpop.f32.mrb[17].mxu1 }
 0x11c   : > { %v1407_v12 = vpack.c.bf16 %v962_v6, %v961_v4  ;;  %v1526_v14 = vadd.f32 %v1525_v10, %v1524_v8  ;;  %v1574_v15 = vadd.f32 %v1573_v11, %v1572_v9  ;;  %v1527_v16 = vpop.f32.mrb[18].mxu0  ;;  %v1575_v17 = vpop.f32.mrb[18].mxu1 }
 0x11d   : > { %v1447_v13 = vpack.c.bf16 %v978_v7, %v977_v5  ;;  %v1528_v18 = vpop.f32.mrb[19].mxu0  ;;  %v1576_v19 = vpop.f32.mrb[19].mxu1 }
 0x11e   : > { %1471 = vst [vmem:[%s1863_s8 + $0x18] sm:$0xff] %v1407_v12   ;;  %v931_v20 = vadd.f32 %v1526_v14, %v1853_v51  ;;  %v947_v21 = vadd.f32 %v1574_v15, %v1853_v51  ;;  %v1529_v22 = vadd.f32 %v1528_v18, %v1527_v16  ;;  %v1577_v23 = vadd.f32 %v1576_v19, %v1575_v17 }
 0x11f   : > { %1479 = vst [vmem:[%s1863_s8 + $0x58] sm:$0xff] %v1447_v13  }
 0x120   : > { %v932_v24 = vadd.f32 %v1529_v22, %v1853_v51  ;;  %v948_v25 = vadd.f32 %v1577_v23, %v1853_v51  ;;  %v963_v26 = vmax.f32 %v931_v20, 0.0  ;;  %v979_v27 = vmax.f32 %v947_v21, 0.0 }
 0x122   : > { %v964_v28 = vmax.f32 %v932_v24, 0.0  ;;  %v980_v29 = vmax.f32 %v948_v25, 0.0  ;;  %v1530_v30 = vpop.f32.mrb[20].mxu0  ;;  %v1578_v31 = vpop.f32.mrb[20].mxu1 }
 0x123   : > { %v1531_v32 = vpop.f32.mrb[21].mxu0  ;;  %v1579_v33 = vpop.f32.mrb[21].mxu1 }
 0x124   : > { %v1412_v34 = vpack.c.bf16 %v964_v28, %v963_v26  ;;  %v1452_v35 = vpack.c.bf16 %v980_v29, %v979_v27  ;;  %v1532_v36 = vadd.f32 %v1531_v32, %v1530_v30  ;;  %v1580_v37 = vadd.f32 %v1579_v33, %v1578_v31  ;;  %v1533_v38 = vpop.f32.mrb[22].mxu0  ;;  %v1581_v39 = vpop.f32.mrb[22].mxu1 }
 0x125   : > { %v1534_v40 = vpop.f32.mrb[23].mxu0  ;;  %v1582_v41 = vpop.f32.mrb[23].mxu1 }
 0x126   : > { %1472 = vst [vmem:[%s1863_s8 + $0x20] sm:$0xff] %v1412_v34   ;;  %1480 = vst [vmem:[%s1863_s8 + $0x60] sm:$0xff] %v1452_v35   ;;  %v933_v42 = vadd.f32 %v1532_v36, %v1853_v51  ;;  %v949_v43 = vadd.f32 %v1580_v37, %v1853_v51  ;;  %v1535_v44 = vadd.f32 %v1534_v40, %v1533_v38 }
 0x127   : > { %v1583_v45 = vadd.f32 %v1582_v41, %v1581_v39 }
 0x128   : > { %v934_v46 = vadd.f32 %v1535_v44, %v1853_v51  ;;  %v965_v48 = vmax.f32 %v933_v42, 0.0  ;;  %v981_v49 = vmax.f32 %v949_v43, 0.0 }
 0x129   : > { %v950_v47 = vadd.f32 %v1583_v45, %v1853_v51 }
 0x12a   : > { %v966_v50 = vmax.f32 %v934_v46, 0.0  ;;  %v1536_v53 = vpop.f32.mrb[24].mxu0  ;;  %v1584_v54 = vpop.f32.mrb[24].mxu1 }
 0x12b   : > { %v982_v52 = vmax.f32 %v950_v47, 0.0  ;;  %v1537_v55 = vpop.f32.mrb[25].mxu0  ;;  %v1585_v56 = vpop.f32.mrb[25].mxu1 }
 0x12c   : > { %v1417_v57 = vpack.c.bf16 %v966_v50, %v965_v48  ;;  %v1538_v59 = vadd.f32 %v1537_v55, %v1536_v53  ;;  %v1586_v60 = vadd.f32 %v1585_v56, %v1584_v54  ;;  %v1539_v61 = vpop.f32.mrb[26].mxu0  ;;  %v1587_v62 = vpop.f32.mrb[26].mxu1 }
 0x12d   : > { %v1457_v58 = vpack.c.bf16 %v982_v52, %v981_v49  ;;  %v1540_v63 = vpop.f32.mrb[27].mxu0  ;;  %v1588_v0 = vpop.f32.mrb[27].mxu1 }
 0x12e   : > { %1473 = vst [vmem:[%s1863_s8 + $0x28] sm:$0xff] %v1417_v57   ;;  %v935_v1 = vadd.f32 %v1538_v59, %v1853_v51  ;;  %v951_v2 = vadd.f32 %v1586_v60, %v1853_v51  ;;  %v1541_v3 = vadd.f32 %v1540_v63, %v1539_v61  ;;  %v1589_v4 = vadd.f32 %v1588_v0, %v1587_v62 }
 0x12f   : > { %1481 = vst [vmem:[%s1863_s8 + $0x68] sm:$0xff] %v1457_v58  }
 0x130   : > { %v936_v5 = vadd.f32 %v1541_v3, %v1853_v51  ;;  %v952_v6 = vadd.f32 %v1589_v4, %v1853_v51  ;;  %v967_v7 = vmax.f32 %v935_v1, 0.0  ;;  %v983_v8 = vmax.f32 %v951_v2, 0.0 }
 0x132   : > { %v968_v9 = vmax.f32 %v936_v5, 0.0  ;;  %v984_v10 = vmax.f32 %v952_v6, 0.0  ;;  %v1542_v11 = vpop.f32.mrb[28].mxu0  ;;  %v1590_v12 = vpop.f32.mrb[28].mxu1 }
 0x133   : > { %v1543_v13 = vpop.f32.mrb[29].mxu0  ;;  %v1591_v14 = vpop.f32.mrb[29].mxu1 }
 0x134   : > { %v1422_v15 = vpack.c.bf16 %v968_v9, %v967_v7  ;;  %v1462_v16 = vpack.c.bf16 %v984_v10, %v983_v8  ;;  %v1544_v17 = vadd.f32 %v1543_v13, %v1542_v11  ;;  %v1592_v18 = vadd.f32 %v1591_v14, %v1590_v12  ;;  %v1545_v19 = vpop.f32.mrb[30].mxu0  ;;  %v1593_v20 = vpop.f32.mrb[30].mxu1 }
 0x135   : > { %v1546_v21 = vpop.f32.mrb[31].mxu0  ;;  %v1594_v22 = vpop.f32.mrb[31].mxu1 }
 0x136   : > { %1474 = vst [vmem:[%s1863_s8 + $0x30] sm:$0xff] %v1422_v15   ;;  %1482 = vst [vmem:[%s1863_s8 + $0x70] sm:$0xff] %v1462_v16   ;;  %v937_v23 = vadd.f32 %v1544_v17, %v1853_v51  ;;  %v953_v24 = vadd.f32 %v1592_v18, %v1853_v51  ;;  %v1547_v25 = vadd.f32 %v1546_v21, %v1545_v19 }
 0x137   : > { %v1595_v26 = vadd.f32 %v1594_v22, %v1593_v20 }
 0x138   : > { %v938_v27 = vadd.f32 %v1547_v25, %v1853_v51  ;;  %v969_v29 = vmax.f32 %v937_v23, 0.0  ;;  %v985_v30 = vmax.f32 %v953_v24, 0.0 }
 0x139   : > { %v954_v28 = vadd.f32 %v1595_v26, %v1853_v51 }
 0x13a   : > { %v970_v31 = vmax.f32 %v938_v27, 0.0 }
 0x13b   : > { %v986_v32 = vmax.f32 %v954_v28, 0.0 }
 0x13c   : > { %v1427_v33 = vpack.c.bf16 %v970_v31, %v969_v29 }
 0x13d   : > { %v1467_v34 = vpack.c.bf16 %v986_v32, %v985_v30 }
 0x13e   : > { %1475 = vst [vmem:[%s1863_s8 + $0x38] sm:$0xff] %v1427_v33  }
 0x13f   : > { %1483 = vst [vmem:[%s1863_s8 + $0x78] sm:$0xff] %v1467_v34  }
 0x140 PF: > { %s13_s14 = sadd.s32 1, %s1722_s14   ;;  %s1922_s12 = smov %s1718_s13 }
 0x141   : > { %p10_p5 = scmp.ge.s32.totalorder %s13_s14, 4   ;;  %s1923_s13 = smov %s1925_s15 }
 0x143   :  { %12 = sbr.rel (!%p10_p5) target bundleno = 2 (0x2), region = 76 }

// kernel: _lambda_.22
= control target key start
LH: loop header
LB: loop body
LE: loop exit
PB: predicated region body
PF: predicated region fallthrough
CT: control target
= control target key end

     0   :  { %s1878_s1 = inlined_call_operand.vmem [shape: bf16[640,128], index: 1, kind: input, shape index: {}]   ;;  %s1879_s0 = inlined_call_operand.vmem [shape: bf16[128,640], index: 0, kind: input, shape index: {}]   ;;  %s1880_s2 = inlined_call_operand.vmem [shape: f32[1,128], index: 2, kind: input, shape index: {}]   ;;  %s1881_s3 = inlined_call_operand.vmem [shape: bf16[128,128], index: 3, kind: output, shape index: {}]  }
   0x1   :  { %v1444_v0 = vld [vmem:[%s1878_s1 + $0x40] sm:$0xff]   ;;  %v1448_v4 = vld [vmem:[%s1878_s1 + $0x48] sm:$0xff]   ;;  %v1452_v8 = vld [vmem:[%s1878_s1 + $0x50] sm:$0xff]  }
   0x2   :  { %v1445_v1 = vld [vmem:[%s1878_s1 + $0xc0] sm:$0xff]   ;;  %1252 = vmatprep.subr.bf16.mxu0 %v1444_v0  ;;  %v1449_v5 = vld [vmem:[%s1878_s1 + $0xc8] sm:$0xff]   ;;  %v1453_v9 = vld [vmem:[%s1878_s1 + $0xd0] sm:$0xff]  }
   0x3   :  { %v1446_v2 = vld [vmem:[%s1878_s1] sm:$0xff]   ;;  %1316 = vmatprep.subr.bf16.mxu1 %v1445_v1  ;;  %v1450_v6 = vld [vmem:[%s1878_s1 + $0x8] sm:$0xff]   ;;  %v1454_v10 = vld [vmem:[%s1878_s1 + $0x10] sm:$0xff]  }
   0x4   :  { %v1447_v3 = vld [vmem:[%s1878_s1 + $0x80] sm:$0xff]   ;;  %1253 = vmatpush3.bf16.msra.mxu0 %v1446_v2  ;;  %v1451_v7 = vld [vmem:[%s1878_s1 + $0x88] sm:$0xff]   ;;  %v1455_v11 = vld [vmem:[%s1878_s1 + $0x90] sm:$0xff]  }
   0x5   :  { %1317 = vmatpush3.bf16.msra.mxu1 %v1447_v3  ;;  %1254 = vmatprep.subr.bf16.mxu0 %v1448_v4  ;;  %v1456_v12 = vld [vmem:[%s1878_s1 + $0x58] sm:$0xff]   ;;  %v1460_v16 = vld [vmem:[%s1878_s1 + $0x60] sm:$0xff]   ;;  %v1464_v20 = vld [vmem:[%s1878_s1 + $0x68] sm:$0xff]  }
   0x6   :  { %1318 = vmatprep.subr.bf16.mxu1 %v1449_v5  ;;  %v1457_v13 = vld [vmem:[%s1878_s1 + $0xd8] sm:$0xff]   ;;  %v1461_v17 = vld [vmem:[%s1878_s1 + $0xe0] sm:$0xff]   ;;  %v1465_v21 = vld [vmem:[%s1878_s1 + $0xe8] sm:$0xff]  }
   0x7   :  { %v1458_v14 = vld [vmem:[%s1878_s1 + $0x18] sm:$0xff]   ;;  %v1462_v18 = vld [vmem:[%s1878_s1 + $0x20] sm:$0xff]   ;;  %v1466_v22 = vld [vmem:[%s1878_s1 + $0x28] sm:$0xff]  }
   0x8   :  { %1255 = vmatpush3.bf16.msra.mxu0 %v1450_v6  ;;  %v1459_v15 = vld [vmem:[%s1878_s1 + $0x98] sm:$0xff]   ;;  %v1463_v19 = vld [vmem:[%s1878_s1 + $0xa0] sm:$0xff]   ;;  %v1467_v23 = vld [vmem:[%s1878_s1 + $0xa8] sm:$0xff]  }
   0x9   :  { %1319 = vmatpush3.bf16.msra.mxu1 %v1451_v7  ;;  %1256 = vmatprep.subr.bf16.mxu0 %v1452_v8  ;;  %v1468_v24 = vld [vmem:[%s1878_s1 + $0x70] sm:$0xff]   ;;  %v1472_v28 = vld [vmem:[%s1878_s1 + $0x78] sm:$0xff]   ;;  %v1481_v35 = vld [vmem:[%s1879_s0 + $0xc] ss:$20 sps:$4 sm:$0xff]  }
   0xa   :  { %1320 = vmatprep.subr.bf16.mxu1 %v1453_v9  ;;  %v1469_v25 = vld [vmem:[%s1878_s1 + $0xf0] sm:$0xff]   ;;  %v1473_v29 = vld [vmem:[%s1878_s1 + $0xf8] sm:$0xff]   ;;  %v1482_v36 = vld [vmem:[%s1878_s1 + $0x100] sm:$0xff]   ;;  %756 = vmatprep.mubr.bf16.mxu1 %v1481_v35 }
   0xb   :  { %v1470_v26 = vld [vmem:[%s1878_s1 + $0x30] sm:$0xff]   ;;  %v1474_v30 = vld [vmem:[%s1878_s1 + $0x38] sm:$0xff]   ;;  %v1483_v37 = vld [vmem:[%s1879_s0 + $0x2c] ss:$20 sps:$4 sm:$0xff]  }
   0xc   :  { %1257 = vmatpush3.bf16.msra.mxu0 %v1454_v10  ;;  %v1471_v27 = vld [vmem:[%s1878_s1 + $0xb0] sm:$0xff]   ;;  %v1475_v31 = vld [vmem:[%s1878_s1 + $0xb8] sm:$0xff]   ;;  %v1489_v39 = vld [vmem:[%s1878_s1 + $0x108] sm:$0xff]  }
   0xd   :  { %1321 = vmatpush3.bf16.msra.mxu1 %v1455_v11  ;;  %1258 = vmatprep.subr.bf16.mxu0 %v1456_v12  ;;  %v1476_v32 = vld [vmem:[%s1879_s0] ss:$20 sps:$4 sm:$0xff]   ;;  %v1478_v33 = vld [vmem:[%s1879_s0 + $0x4] ss:$20 sps:$4 sm:$0xff]   ;;  %v1479_v34 = vld [vmem:[%s1879_s0 + $0x8] ss:$20 sps:$4 sm:$0xff]  }
   0xe   :  { %1322 = vmatprep.subr.bf16.mxu1 %v1457_v13  ;;  %659 = vmatprep.mubr.bf16.mxu0 %v1478_v33  ;;  %v1485_v38 = vld [vmem:[%s1879_s0 + $0x34] ss:$20 sps:$4 sm:$0xff]   ;;  %v1488_v41 = vld [vmem:[%s1879_s0 + $0x30] ss:$20 sps:$4 sm:$0xff]   ;;  %v1503_v45 = vld [vmem:[%s1878_s1 + $0x118] sm:$0xff]  }
   0xf   :  { %v1487_v40 = vld [vmem:[%s1879_s0 + $0x28] ss:$20 sps:$4 sm:$0xff]   ;;  %v1496_v44 = vld [vmem:[%s1878_s1 + $0x110] sm:$0xff]   ;;  %v1495_v47 = vld [vmem:[%s1879_s0 + $0x58] ss:$20 sps:$4 sm:$0xff]  }
  0x10   :  { %1259 = vmatpush3.bf16.msra.mxu0 %v1458_v14  ;;  %v1490_v42 = vld [vmem:[%s1879_s0 + $0x54] ss:$20 sps:$4 sm:$0xff]   ;;  %v1492_v43 = vld [vmem:[%s1879_s0 + $0x5c] ss:$20 sps:$4 sm:$0xff]   ;;  %v1499_v49 = vld [vmem:[%s1879_s0 + $0x84] ss:$20 sps:$4 sm:$0xff]  }
  0x11   :  { %1323 = vmatpush3.bf16.msra.mxu1 %v1459_v15  ;;  %1260 = vmatprep.subr.bf16.mxu0 %v1460_v16  ;;  %v1494_v46 = vld [vmem:[%s1879_s0 + $0x50] ss:$20 sps:$4 sm:$0xff]   ;;  %v1517_v51 = vld [vmem:[%s1878_s1 + $0x128] sm:$0xff]   ;;  %v1502_v53 = vld [vmem:[%s1879_s0 + $0x80] ss:$20 sps:$4 sm:$0xff]  }
  0x12   :  { %1324 = vmatprep.subr.bf16.mxu1 %v1461_v17  ;;  %v1497_v48 = vld [vmem:[%s1879_s0 + $0x7c] ss:$20 sps:$4 sm:$0xff]   ;;  %v1510_v50 = vld [vmem:[%s1878_s1 + $0x120] sm:$0xff]   ;;  %v1501_v52 = vld [vmem:[%s1879_s0 + $0x78] ss:$20 sps:$4 sm:$0xff]  }
  0x13   :  { %v1504_v54 = vld [vmem:[%s1879_s0 + $0xa4] ss:$20 sps:$4 sm:$0xff]   ;;  %v1524_v55 = vld [vmem:[%s1878_s1 + $0x130] sm:$0xff]   ;;  %v1506_v56 = vld [vmem:[%s1879_s0 + $0xac] ss:$20 sps:$4 sm:$0xff]  }
  0x14   :  { %1261 = vmatpush3.bf16.msra.mxu0 %v1462_v18  ;;  %v1531_v57 = vld [vmem:[%s1878_s1 + $0x138] sm:$0xff]   ;;  %v1508_v58 = vld [vmem:[%s1879_s0 + $0xa0] ss:$20 sps:$4 sm:$0xff]   ;;  %v1516_v63 = vld [vmem:[%s1879_s0 + $0xd0] ss:$20 sps:$4 sm:$0xff]  }
  0x15   :  { %1325 = vmatpush3.bf16.msra.mxu1 %v1463_v19  ;;  %1262 = vmatprep.subr.bf16.mxu0 %v1464_v20  ;;  %v1509_v59 = vld [vmem:[%s1879_s0 + $0xa8] ss:$20 sps:$4 sm:$0xff]   ;;  %v1511_v60 = vld [vmem:[%s1879_s0 + $0xcc] ss:$20 sps:$4 sm:$0xff]   ;;  %v1522_v2 = vld [vmem:[%s1879_s0 + $0xf0] ss:$20 sps:$4 sm:$0xff]  }
  0x16   :  { %1326 = vmatprep.subr.bf16.mxu1 %v1465_v21  ;;  %v1513_v61 = vld [vmem:[%s1879_s0 + $0xd4] ss:$20 sps:$4 sm:$0xff]   ;;  %v1520_v1 = vld [vmem:[%s1879_s0 + $0xfc] ss:$20 sps:$4 sm:$0xff]   ;;  %v1523_v3 = vld [vmem:[%s1879_s0 + $0xf8] ss:$20 sps:$4 sm:$0xff]  }
  0x17   :  { %v1515_v62 = vld [vmem:[%s1879_s0 + $0xc8] ss:$20 sps:$4 sm:$0xff]   ;;  %v1527_v5 = vld [vmem:[%s1879_s0 + $0x124] ss:$20 sps:$4 sm:$0xff]   ;;  %v1530_v7 = vld [vmem:[%s1879_s0 + $0x120] ss:$20 sps:$4 sm:$0xff]  }
  0x18   :  { %1263 = vmatpush3.bf16.msra.mxu0 %v1466_v22  ;;  %v1518_v0 = vld [vmem:[%s1879_s0 + $0xf4] ss:$20 sps:$4 sm:$0xff]   ;;  %v1525_v4 = vld [vmem:[%s1879_s0 + $0x11c] ss:$20 sps:$4 sm:$0xff]   ;;  %v1529_v6 = vld [vmem:[%s1879_s0 + $0x118] ss:$20 sps:$4 sm:$0xff]  }
  0x19   :  { %1327 = vmatpush3.bf16.msra.mxu1 %v1467_v23  ;;  %1264 = vmatprep.subr.bf16.mxu0 %v1468_v24  ;;  %v1532_v8 = vld [vmem:[%s1879_s0 + $0x10] ss:$20 sps:$4 sm:$0xff]   ;;  %v1534_v10 = vld [vmem:[%s1879_s0 + $0x38] ss:$20 sps:$4 sm:$0xff]   ;;  %v1536_v12 = vld [vmem:[%s1879_s0 + $0x60] ss:$20 sps:$4 sm:$0xff]  }
  0x1a   :  { %1328 = vmatprep.subr.bf16.mxu1 %v1469_v25  ;;  %v1533_v9 = vld [vmem:[%s1879_s0 + $0xb0] ss:$20 sps:$4 sm:$0xff]   ;;  %v1535_v11 = vld [vmem:[%s1879_s0 + $0xd8] ss:$20 sps:$4 sm:$0xff]   ;;  %v1537_v13 = vld [vmem:[%s1879_s0 + $0x100] ss:$20 sps:$4 sm:$0xff]  }
  0x1b   :  { %v1538_v14 = vld [vmem:[%s1879_s0 + $0x88] ss:$20 sps:$4 sm:$0xff]  }
  0x1c   :  { %1265 = vmatpush3.bf16.msra.mxu0 %v1470_v26  ;;  %v1539_v15 = vld [vmem:[%s1879_s0 + $0x128] ss:$20 sps:$4 sm:$0xff]  }
  0x1d   :  { %1329 = vmatpush3.bf16.msra.mxu1 %v1471_v27  ;;  %1266 = vmatprep.subr.bf16.mxu0 %v1472_v28 }
  0x1e   :  { %1330 = vmatprep.subr.bf16.mxu1 %v1473_v29 }
  0x20   :  { %1267 = vmatpush3.bf16.msra.mxu0 %v1474_v30 }
  0x21   :  { %1331 = vmatpush3.bf16.msra.mxu1 %v1475_v31  ;;  %1396 = vmatprep.subr.bf16.mxu0 %v1482_v36 }
  0x22   :  { %1428 = vmatprep.subr.bf16.mxu1 %v1482_v36 }
  0x23   :  { %660 = vmatmul.mubr.bf16.vlgmr.msra.gmra.mrb[0].mxu0 %v1476_v32 }
  0x24   :  { %757 = vmatmul.mubr.bf16.vlgmr.msra.gmra.mrb[0].mxu1 %v1479_v34  ;;  %1397 = vmatpush3.bf16.msra.mxu0 %v1482_v36 }
  0x25   :  { %1436 = vmatpush3.bf16.msra.mxu1 %v1482_v36  ;;  %667 = vmatprep.mubr.bf16.mxu0 %v1483_v37 }
  0x26   :  { %764 = vmatprep.mubr.bf16.mxu1 %v1485_v38  ;;  %1398 = vmatprep.subr.bf16.mxu0 %v1489_v39 }
  0x27   :  { %1429 = vmatprep.subr.bf16.mxu1 %v1489_v39 }
  0x28   :  { %1399 = vmatpush3.bf16.msra.mxu0 %v1489_v39 }
  0x29   :  { %1437 = vmatpush3.bf16.msra.mxu1 %v1489_v39  ;;  %1400 = vmatprep.subr.bf16.mxu0 %v1496_v44 }
  0x2a   :  { %1430 = vmatprep.subr.bf16.mxu1 %v1496_v44 }
  0x2b   :  { %668 = vmatmul.mubr.bf16.gmra.mrb[4].mxu0 %v1487_v40 }
  0x2c   :  { %765 = vmatmul.mubr.bf16.gmra.mrb[4].mxu1 %v1488_v41  ;;  %675 = vmatprep.mubr.bf16.mxu0 %v1490_v42 }
  0x2d   :  { %772 = vmatprep.mubr.bf16.mxu1 %v1492_v43  ;;  %1401 = vmatpush3.bf16.msra.mxu0 %v1496_v44 }
  0x2e   :  { %1438 = vmatpush3.bf16.msra.mxu1 %v1496_v44  ;;  %1402 = vmatprep.subr.bf16.mxu0 %v1503_v45 }
  0x2f   :  { %1431 = vmatprep.subr.bf16.mxu1 %v1503_v45 }
  0x31   :  { %1403 = vmatpush3.bf16.msra.mxu0 %v1503_v45 }
  0x32   :  { %1439 = vmatpush3.bf16.msra.mxu1 %v1503_v45  ;;  %1404 = vmatprep.subr.bf16.mxu0 %v1510_v50 }
  0x33   :  { %676 = vmatmul.mubr.bf16.gmra.mrb[8].mxu0 %v1494_v46  ;;  %1432 = vmatprep.subr.bf16.mxu1 %v1510_v50 }
  0x34   :  { %773 = vmatmul.mubr.bf16.gmra.mrb[8].mxu1 %v1495_v47  ;;  %683 = vmatprep.mubr.bf16.mxu0 %v1497_v48 }
  0x35   :  { %780 = vmatprep.mubr.bf16.mxu1 %v1499_v49  ;;  %1405 = vmatpush3.bf16.msra.mxu0 %v1510_v50 }
  0x36   :  { %1440 = vmatpush3.bf16.msra.mxu1 %v1510_v50  ;;  %1406 = vmatprep.subr.bf16.mxu0 %v1517_v51 }
  0x37   :  { %1433 = vmatprep.subr.bf16.mxu1 %v1517_v51 }
  0x39   :  { %1407 = vmatpush3.bf16.msra.mxu0 %v1517_v51 }
  0x3a   :  { %1441 = vmatpush3.bf16.msra.mxu1 %v1517_v51  ;;  %1408 = vmatprep.subr.bf16.mxu0 %v1524_v55 }
  0x3b   :  { %684 = vmatmul.mubr.bf16.gmra.mrb[12].mxu0 %v1501_v52  ;;  %1434 = vmatprep.subr.bf16.mxu1 %v1524_v55 }
  0x3c   :  { %781 = vmatmul.mubr.bf16.gmra.mrb[12].mxu1 %v1502_v53  ;;  %691 = vmatprep.mubr.bf16.mxu0 %v1504_v54 }
  0x3d   :  { %788 = vmatprep.mubr.bf16.mxu1 %v1506_v56  ;;  %1409 = vmatpush3.bf16.msra.mxu0 %v1524_v55 }
  0x3e   :  { %1442 = vmatpush3.bf16.msra.mxu1 %v1524_v55  ;;  %1410 = vmatprep.subr.bf16.mxu0 %v1531_v57 }
  0x3f   :  { %1435 = vmatprep.subr.bf16.mxu1 %v1531_v57 }
  0x41   :  { %1411 = vmatpush3.bf16.msra.mxu0 %v1531_v57 }
  0x42   :  { %1443 = vmatpush3.bf16.msra.mxu1 %v1531_v57 }
  0x43   :  { %692 = vmatmul.mubr.bf16.gmra.mrb[16].mxu0 %v1508_v58 }
  0x44   :  { %789 = vmatmul.mubr.bf16.gmra.mrb[16].mxu1 %v1509_v59  ;;  %699 = vmatprep.mubr.bf16.mxu0 %v1511_v60 }
  0x45   :  { %796 = vmatprep.mubr.bf16.mxu1 %v1513_v61 }
  0x4b   :  { %700 = vmatmul.mubr.bf16.gmra.mrb[20].mxu0 %v1515_v62 }
  0x4c   :  { %797 = vmatmul.mubr.bf16.gmra.mrb[20].mxu1 %v1516_v63  ;;  %707 = vmatprep.mubr.bf16.mxu0 %v1518_v0 }
  0x4d   :  { %804 = vmatprep.mubr.bf16.mxu1 %v1520_v1 }
  0x53   :  { %708 = vmatmul.mubr.bf16.gmra.mrb[24].mxu0 %v1522_v2 }
  0x54   :  { %805 = vmatmul.mubr.bf16.gmra.mrb[24].mxu1 %v1523_v3  ;;  %715 = vmatprep.mubr.bf16.mxu0 %v1525_v4 }
  0x55   :  { %812 = vmatprep.mubr.bf16.mxu1 %v1527_v5 }
  0x5b   :  { %716 = vmatmul.mubr.bf16.gmra.mrb[28].mxu0 %v1529_v6 }
  0x5c   :  { %813 = vmatmul.mubr.bf16.gmra.mrb[28].mxu1 %v1530_v7  ;;  %1412 = vmatprep.mubr.bf16.mxu0 %v1532_v8 }
  0x5d   :  { %1420 = vmatprep.mubr.bf16.mxu1 %v1533_v9 }
  0x63   :  { %1413 = vmatmul.mubr.bf16.vlgmr.msra.gmra.mrb[32].mxu0 %v1534_v10 }
  0x64   :  { %1421 = vmatmul.mubr.bf16.vlgmr.msra.gmra.mrb[32].mxu1 %v1535_v11  ;;  %1416 = vmatprep.mubr.bf16.mxu0 %v1536_v12 }
  0x65   :  { %1424 = vmatprep.mubr.bf16.mxu1 %v1537_v13 }
  0x6b   :  { %1417 = vmatmul.mubr.bf16.gmra.mrb[36].mxu0 %v1538_v14 }
  0x6c   :  { %1425 = vmatmul.mubr.bf16.gmra.mrb[36].mxu1 %v1539_v15 }
  0xf6   :  { %v1268_v16 = vpop.f32.mrb[0].mxu0 }
  0xf7   :  { %v1332_v17 = vpop.f32.mrb[0].mxu1  ;;  %v1269_v18 = vpop.f32.mrb[1].mxu0 }
  0xf8   :  { %v1270_v19 = vadd.f32 %v1269_v18, %v1268_v16  ;;  %v1333_v20 = vpop.f32.mrb[1].mxu1  ;;  %v1271_v21 = vpop.f32.mrb[2].mxu0 }
  0xf9   :  { %v1334_v22 = vadd.f32 %v1333_v20, %v1332_v17  ;;  %v1335_v23 = vpop.f32.mrb[2].mxu1  ;;  %v1272_v24 = vpop.f32.mrb[3].mxu0 }
  0xfa   :  { %v1273_v25 = vadd.f32 %v1272_v24, %v1271_v21  ;;  %v1336_v26 = vpop.f32.mrb[3].mxu1 }
  0xfb   :  { %v1337_v27 = vadd.f32 %v1336_v26, %v1335_v23  ;;  %v1800_v28 = vadd.f32 %v1334_v22, %v1270_v19 }
  0xfd   :  { %v1802_v29 = vadd.f32 %v1337_v27, %v1273_v25 }
  0xfe   :  { %v1274_v30 = vpop.f32.mrb[4].mxu0 }
  0xff   :  { %v1338_v31 = vpop.f32.mrb[4].mxu1  ;;  %v1275_v32 = vpop.f32.mrb[5].mxu0 }
 0x100   :  { %v1276_v33 = vadd.f32 %v1275_v32, %v1274_v30  ;;  %v1339_v34 = vpop.f32.mrb[5].mxu1  ;;  %v1277_v35 = vpop.f32.mrb[6].mxu0 }
 0x101   :  { %v1340_v36 = vadd.f32 %v1339_v34, %v1338_v31  ;;  %v1341_v37 = vpop.f32.mrb[6].mxu1  ;;  %v1278_v38 = vpop.f32.mrb[7].mxu0 }
 0x102   :  { %v1279_v39 = vadd.f32 %v1278_v38, %v1277_v35  ;;  %v1342_v40 = vpop.f32.mrb[7].mxu1 }
 0x103   :  { %v1343_v41 = vadd.f32 %v1342_v40, %v1341_v37  ;;  %v1804_v42 = vadd.f32 %v1340_v36, %v1276_v33 }
 0x105   :  { %v1806_v43 = vadd.f32 %v1343_v41, %v1279_v39 }
 0x106   :  { %v1280_v44 = vpop.f32.mrb[8].mxu0 }
 0x107   :  { %v1344_v45 = vpop.f32.mrb[8].mxu1  ;;  %v1281_v46 = vpop.f32.mrb[9].mxu0 }
 0x108   :  { %v1282_v47 = vadd.f32 %v1281_v46, %v1280_v44  ;;  %v1345_v48 = vpop.f32.mrb[9].mxu1  ;;  %v1283_v49 = vpop.f32.mrb[10].mxu0 }
 0x109   :  { %v1346_v50 = vadd.f32 %v1345_v48, %v1344_v45  ;;  %v1347_v51 = vpop.f32.mrb[10].mxu1  ;;  %v1284_v52 = vpop.f32.mrb[11].mxu0 }
 0x10a   :  { %v1285_v53 = vadd.f32 %v1284_v52, %v1283_v49  ;;  %v1348_v54 = vpop.f32.mrb[11].mxu1 }
 0x10b   :  { %v1349_v55 = vadd.f32 %v1348_v54, %v1347_v51  ;;  %v1808_v56 = vadd.f32 %v1346_v50, %v1282_v47 }
 0x10d   :  { %v1810_v57 = vadd.f32 %v1349_v55, %v1285_v53 }
 0x10e   :  { %v1286_v58 = vpop.f32.mrb[12].mxu0 }
 0x10f   :  { %v1350_v59 = vpop.f32.mrb[12].mxu1  ;;  %v1287_v60 = vpop.f32.mrb[13].mxu0 }
 0x110   :  { %v1288_v61 = vadd.f32 %v1287_v60, %v1286_v58  ;;  %v1351_v62 = vpop.f32.mrb[13].mxu1  ;;  %v1289_v63 = vpop.f32.mrb[14].mxu0 }
 0x111   :  { %v1352_v0 = vadd.f32 %v1351_v62, %v1350_v59  ;;  %v1353_v1 = vpop.f32.mrb[14].mxu1  ;;  %v1290_v2 = vpop.f32.mrb[15].mxu0 }
 0x112   :  { %v1291_v3 = vadd.f32 %v1290_v2, %v1289_v63  ;;  %v1354_v4 = vpop.f32.mrb[15].mxu1 }
 0x113   :  { %v1355_v5 = vadd.f32 %v1354_v4, %v1353_v1  ;;  %v1812_v6 = vadd.f32 %v1352_v0, %v1288_v61 }
 0x115   :  { %v1814_v7 = vadd.f32 %v1355_v5, %v1291_v3 }
 0x116   :  { %v1292_v8 = vpop.f32.mrb[16].mxu0 }
 0x117   :  { %v1356_v9 = vpop.f32.mrb[16].mxu1  ;;  %v1293_v10 = vpop.f32.mrb[17].mxu0 }
 0x118   :  { %v1294_v11 = vadd.f32 %v1293_v10, %v1292_v8  ;;  %v1357_v12 = vpop.f32.mrb[17].mxu1  ;;  %v1295_v13 = vpop.f32.mrb[18].mxu0 }
 0x119   :  { %v1358_v14 = vadd.f32 %v1357_v12, %v1356_v9  ;;  %v1359_v15 = vpop.f32.mrb[18].mxu1  ;;  %v1296_v16 = vpop.f32.mrb[19].mxu0  ;;  %v1825_v9 = vld [vmem:[%s1880_s2] ss:$0 sm:$0xff] }
 0x11a   :  { %v1297_v17 = vadd.f32 %v1296_v16, %v1295_v13  ;;  %v1360_v18 = vpop.f32.mrb[19].mxu1 }
 0x11b   :  { %v1361_v19 = vadd.f32 %v1360_v18, %v1359_v15  ;;  %v791_v20 = vadd.f32 %v1358_v14, %v1294_v11 }
 0x11d   :  { %v1816_v21 = vadd.f32 %v1361_v19, %v1297_v17 }
 0x11e   :  { %v1298_v22 = vpop.f32.mrb[20].mxu0 }
 0x11f   :  { %v1362_v23 = vpop.f32.mrb[20].mxu1  ;;  %v1299_v24 = vpop.f32.mrb[21].mxu0 }
 0x120   :  { %v1300_v25 = vadd.f32 %v1299_v24, %v1298_v22  ;;  %v1363_v26 = vpop.f32.mrb[21].mxu1  ;;  %v1301_v27 = vpop.f32.mrb[22].mxu0 }
 0x121   :  { %v1364_v30 = vadd.f32 %v1363_v26, %v1362_v23  ;;  %v1365_v31 = vpop.f32.mrb[22].mxu1  ;;  %v1302_v32 = vpop.f32.mrb[23].mxu0 }
 0x122   :  { %v1303_v33 = vadd.f32 %v1302_v32, %v1301_v27  ;;  %v1366_v34 = vpop.f32.mrb[23].mxu1 }
 0x123   :  { %v1367_v35 = vadd.f32 %v1366_v34, %v1365_v31  ;;  %v799_v36 = vadd.f32 %v1364_v30, %v1300_v25 }
 0x125   :  { %v802_v37 = vadd.f32 %v1367_v35, %v1303_v33 }
 0x126   :  { %v1304_v38 = vpop.f32.mrb[24].mxu0 }
 0x127   :  { %v1368_v39 = vpop.f32.mrb[24].mxu1  ;;  %v1305_v40 = vpop.f32.mrb[25].mxu0 }
 0x128   :  { %v1306_v41 = vadd.f32 %v1305_v40, %v1304_v38  ;;  %v1369_v44 = vpop.f32.mrb[25].mxu1  ;;  %v1307_v45 = vpop.f32.mrb[26].mxu0 }
 0x129   :  { %v1370_v46 = vadd.f32 %v1369_v44, %v1368_v39  ;;  %v1371_v47 = vpop.f32.mrb[26].mxu1  ;;  %v1308_v48 = vpop.f32.mrb[27].mxu0 }
 0x12a   :  { %v1309_v49 = vadd.f32 %v1308_v48, %v1307_v45  ;;  %v1372_v50 = vpop.f32.mrb[27].mxu1 }
 0x12b   :  { %v1373_v51 = vadd.f32 %v1372_v50, %v1371_v47  ;;  %v1818_v52 = vadd.f32 %v1370_v46, %v1306_v41 }
 0x12d   :  { %v1820_v53 = vadd.f32 %v1373_v51, %v1309_v49 }
 0x12e   :  { %v1310_v54 = vpop.f32.mrb[28].mxu0 }
 0x12f   :  { %v1374_v55 = vpop.f32.mrb[28].mxu1  ;;  %v1311_v58 = vpop.f32.mrb[29].mxu0 }
 0x130   :  { %v1312_v59 = vadd.f32 %v1311_v58, %v1310_v54  ;;  %v1375_v60 = vpop.f32.mrb[29].mxu1  ;;  %v1313_v61 = vpop.f32.mrb[30].mxu0 }
 0x131   :  { %v1376_v62 = vadd.f32 %v1375_v60, %v1374_v55  ;;  %v1377_v63 = vpop.f32.mrb[30].mxu1  ;;  %v1314_v0 = vpop.f32.mrb[31].mxu0 }
 0x132   :  { %v1315_v1 = vadd.f32 %v1314_v0, %v1313_v61  ;;  %v1378_v2 = vpop.f32.mrb[31].mxu1 }
 0x133   :  { %v1379_v3 = vadd.f32 %v1378_v2, %v1377_v63  ;;  %v815_v4 = vadd.f32 %v1376_v62, %v1312_v59 }
 0x135   :  { %v818_v5 = vadd.f32 %v1379_v3, %v1315_v1 }
 0x136   :  { %v1414_v8 = vpop.f32.mrb[32].mxu0 }
 0x137   :  { %v864_v10 = vadd.f32 %v1414_v8, %v1804_v42  ;;  %v1422_v11 = vpop.f32.mrb[32].mxu1  ;;  %v855_v12 = vpop.f32.mrb[33].mxu0 }
 0x138   :  { %v896_v13 = vadd.f32 %v1422_v11, %v799_v36  ;;  %v856_v14 = vadd.f32 %v855_v12, %v1800_v28  ;;  %v887_v15 = vpop.f32.mrb[33].mxu1  ;;  %v1415_v16 = vpop.f32.mrb[34].mxu0 }
 0x139   :  { %v978_v17 = vadd.f32 %v1825_v9, %v864_v10  ;;  %v888_v18 = vadd.f32 %v887_v15, %v791_v20  ;;  %v867_v19 = vadd.f32 %v1415_v16, %v1806_v43  ;;  %v1423_v22 = vpop.f32.mrb[34].mxu1  ;;  %v858_v23 = vpop.f32.mrb[35].mxu0 }
 0x13a   :  { %v986_v24 = vadd.f32 %v1825_v9, %v896_v13  ;;  %v976_v25 = vadd.f32 %v1825_v9, %v856_v14  ;;  %v899_v26 = vadd.f32 %v1423_v22, %v802_v37  ;;  %v859_v42 = vadd.f32 %v858_v23, %v1802_v29  ;;  %v890_v27 = vpop.f32.mrb[35].mxu1 }
 0x13b   :  { %v984_v30 = vadd.f32 %v1825_v9, %v888_v18  ;;  %v979_v28 = vadd.f32 %v1825_v9, %v867_v19  ;;  %v891_v31 = vadd.f32 %v890_v27, %v1816_v21  ;;  %v994_v32 = vmax.f32 %v978_v17, 0.0 }
 0x13c   :  { %v987_v20 = vadd.f32 %v1825_v9, %v899_v26  ;;  %v977_v43 = vadd.f32 %v1825_v9, %v859_v42  ;;  %v1002_v35 = vmax.f32 %v986_v24, 0.0  ;;  %v992_v36 = vmax.f32 %v976_v25, 0.0 }
 0x13d   :  { %v995_v33 = vmax.f32 %v979_v28, 0.0  ;;  %v985_v34 = vadd.f32 %v1825_v9, %v891_v31  ;;  %v1000_v39 = vmax.f32 %v984_v30, 0.0 }
 0x13e   :  { %v1003_v37 = vmax.f32 %v987_v20, 0.0  ;;  %v993_v38 = vmax.f32 %v977_v43, 0.0  ;;  %v1418_v29 = vpop.f32.mrb[36].mxu0 }
 0x13f   :  { %v1213_v40 = vpack.c.bf16 %v995_v33, %v994_v32  ;;  %v1001_v41 = vmax.f32 %v985_v34, 0.0  ;;  %v880_v44 = vadd.f32 %v1418_v29, %v1812_v6  ;;  %v1426_v45 = vpop.f32.mrb[36].mxu1  ;;  %v871_v21 = vpop.f32.mrb[37].mxu0 }
 0x140   :  { %v1233_v46 = vpack.c.bf16 %v1003_v37, %v1002_v35  ;;  %v1208_v47 = vpack.c.bf16 %v993_v38, %v992_v36  ;;  %v912_v48 = vadd.f32 %v1426_v45, %v815_v4  ;;  %v872_v49 = vadd.f32 %v871_v21, %v1808_v56  ;;  %v903_v50 = vpop.f32.mrb[37].mxu1  ;;  %v1419_v51 = vpop.f32.mrb[38].mxu0 }
 0x141   :  { %1245 = vst [vmem:[%s1881_s3 + $0x8] sm:$0xff] %v1213_v40   ;;  %v1228_v54 = vpack.c.bf16 %v1001_v41, %v1000_v39  ;;  %v982_v55 = vadd.f32 %v1825_v9, %v880_v44  ;;  %v904_v58 = vadd.f32 %v903_v50, %v1818_v52  ;;  %v883_v6 = vadd.f32 %v1419_v51, %v1814_v7  ;;  %v1427_v59 = vpop.f32.mrb[38].mxu1  ;;  %v874_v60 = vpop.f32.mrb[39].mxu0 }
 0x142   :  { %1249 = vst [vmem:[%s1881_s3 + $0x28] sm:$0xff] %v1233_v46   ;;  %1209 = vst [vmem:[%s1881_s3] sm:$0xff] %v1208_v47   ;;  %v990_v56 = vadd.f32 %v1825_v9, %v912_v48  ;;  %v980_v61 = vadd.f32 %v1825_v9, %v872_v49  ;;  %v915_v62 = vadd.f32 %v1427_v59, %v818_v5  ;;  %v906_v52 = vpop.f32.mrb[39].mxu1 }
 0x143   :  { %v875_v63 = vadd.f32 %v874_v60, %v1810_v57  ;;  %1248 = vst [vmem:[%s1881_s3 + $0x20] sm:$0xff] %v1228_v54   ;;  %v988_v7 = vadd.f32 %v1825_v9, %v904_v58  ;;  %v983_v0 = vadd.f32 %v1825_v9, %v883_v6  ;;  %v907_v1 = vadd.f32 %v906_v52, %v1820_v53 }
 0x144   :  { %v991_v2 = vadd.f32 %v1825_v9, %v915_v62  ;;  %v998_v4 = vmax.f32 %v982_v55, 0.0  ;;  %v1006_v57 = vmax.f32 %v990_v56, 0.0  ;;  %v996_v10 = vmax.f32 %v980_v61, 0.0 }
 0x145   :  { %v981_v3 = vadd.f32 %v1825_v9, %v875_v63  ;;  %v999_v8 = vmax.f32 %v983_v0, 0.0  ;;  %v989_v5 = vadd.f32 %v1825_v9, %v907_v1  ;;  %v1004_v13 = vmax.f32 %v988_v7, 0.0 }
 0x146   :  { %v1007_v11 = vmax.f32 %v991_v2, 0.0 }
 0x147   :  { %v997_v12 = vmax.f32 %v981_v3, 0.0  ;;  %v1223_v14 = vpack.c.bf16 %v999_v8, %v998_v4  ;;  %v1005_v15 = vmax.f32 %v989_v5, 0.0 }
 0x148   :  { %v1243_v16 = vpack.c.bf16 %v1007_v11, %v1006_v57 }
 0x149   :  { %v1218_v17 = vpack.c.bf16 %v997_v12, %v996_v10  ;;  %1247 = vst [vmem:[%s1881_s3 + $0x18] sm:$0xff] %v1223_v14   ;;  %v1238_v53 = vpack.c.bf16 %v1005_v15, %v1004_v13 }
 0x14a   :  { %1251 = vst [vmem:[%s1881_s3 + $0x38] sm:$0xff] %v1243_v16  }
 0x14b   :  { %1246 = vst [vmem:[%s1881_s3 + $0x10] sm:$0xff] %v1218_v17   ;;  %1250 = vst [vmem:[%s1881_s3 + $0x30] sm:$0xff] %v1238_v53  }

// kernel: _lambda_.23
= control target key start
LH: loop header
LB: loop body
LE: loop exit
PB: predicated region body
PF: predicated region fallthrough
CT: control target
= control target key end

     0   :  { %s2033_s1 = inlined_call_operand.vmem [shape: bf16[640,128], index: 1, kind: input, shape index: {}]   ;;  %s2034_s0 = inlined_call_operand.vmem [shape: bf16[128,640], index: 0, kind: input, shape index: {}]   ;;  %s2035_s3 = inlined_call_operand.vmem [shape: bf16[128,128], index: 3, kind: input, shape index: {}]   ;;  %s2036_s2 = inlined_call_operand.vmem [shape: f32[1,128], index: 2, kind: input, shape index: {}]   ;;  %s2037_s4 = inlined_call_operand.vmem [shape: bf16[128,128], index: 4, kind: output, shape index: {}]  }
   0x1   :  { %v1534_v0 = vld [vmem:[%s2033_s1 + $0x40] sm:$0xff]   ;;  %v1538_v4 = vld [vmem:[%s2033_s1 + $0x48] sm:$0xff]   ;;  %v1542_v8 = vld [vmem:[%s2033_s1 + $0x50] sm:$0xff]  }
   0x2   :  { %v1535_v1 = vld [vmem:[%s2033_s1 + $0xc0] sm:$0xff]   ;;  %1342 = vmatprep.subr.bf16.mxu0 %v1534_v0  ;;  %v1539_v5 = vld [vmem:[%s2033_s1 + $0xc8] sm:$0xff]   ;;  %v1543_v9 = vld [vmem:[%s2033_s1 + $0xd0] sm:$0xff]  }
   0x3   :  { %v1536_v2 = vld [vmem:[%s2033_s1] sm:$0xff]   ;;  %1406 = vmatprep.subr.bf16.mxu1 %v1535_v1  ;;  %v1540_v6 = vld [vmem:[%s2033_s1 + $0x8] sm:$0xff]   ;;  %v1544_v10 = vld [vmem:[%s2033_s1 + $0x10] sm:$0xff]  }
   0x4   :  { %v1537_v3 = vld [vmem:[%s2033_s1 + $0x80] sm:$0xff]   ;;  %1343 = vmatpush3.bf16.msra.mxu0 %v1536_v2  ;;  %v1541_v7 = vld [vmem:[%s2033_s1 + $0x88] sm:$0xff]   ;;  %v1545_v11 = vld [vmem:[%s2033_s1 + $0x90] sm:$0xff]  }
   0x5   :  { %1407 = vmatpush3.bf16.msra.mxu1 %v1537_v3  ;;  %1344 = vmatprep.subr.bf16.mxu0 %v1538_v4  ;;  %v1546_v12 = vld [vmem:[%s2033_s1 + $0x58] sm:$0xff]   ;;  %v1550_v16 = vld [vmem:[%s2033_s1 + $0x60] sm:$0xff]   ;;  %v1554_v20 = vld [vmem:[%s2033_s1 + $0x68] sm:$0xff]  }
   0x6   :  { %1408 = vmatprep.subr.bf16.mxu1 %v1539_v5  ;;  %v1547_v13 = vld [vmem:[%s2033_s1 + $0xd8] sm:$0xff]   ;;  %v1551_v17 = vld [vmem:[%s2033_s1 + $0xe0] sm:$0xff]   ;;  %v1555_v21 = vld [vmem:[%s2033_s1 + $0xe8] sm:$0xff]  }
   0x7   :  { %v1548_v14 = vld [vmem:[%s2033_s1 + $0x18] sm:$0xff]   ;;  %v1552_v18 = vld [vmem:[%s2033_s1 + $0x20] sm:$0xff]   ;;  %v1556_v22 = vld [vmem:[%s2033_s1 + $0x28] sm:$0xff]  }
   0x8   :  { %1345 = vmatpush3.bf16.msra.mxu0 %v1540_v6  ;;  %v1549_v15 = vld [vmem:[%s2033_s1 + $0x98] sm:$0xff]   ;;  %v1553_v19 = vld [vmem:[%s2033_s1 + $0xa0] sm:$0xff]   ;;  %v1557_v23 = vld [vmem:[%s2033_s1 + $0xa8] sm:$0xff]  }
   0x9   :  { %1409 = vmatpush3.bf16.msra.mxu1 %v1541_v7  ;;  %1346 = vmatprep.subr.bf16.mxu0 %v1542_v8  ;;  %v1558_v24 = vld [vmem:[%s2033_s1 + $0x70] sm:$0xff]   ;;  %v1562_v28 = vld [vmem:[%s2033_s1 + $0x78] sm:$0xff]   ;;  %v1571_v35 = vld [vmem:[%s2034_s0 + $0xc] ss:$20 sps:$4 sm:$0xff]  }
   0xa   :  { %1410 = vmatprep.subr.bf16.mxu1 %v1543_v9  ;;  %v1559_v25 = vld [vmem:[%s2033_s1 + $0xf0] sm:$0xff]   ;;  %v1563_v29 = vld [vmem:[%s2033_s1 + $0xf8] sm:$0xff]   ;;  %v1572_v36 = vld [vmem:[%s2033_s1 + $0x100] sm:$0xff]   ;;  %759 = vmatprep.mubr.bf16.mxu1 %v1571_v35 }
   0xb   :  { %v1560_v26 = vld [vmem:[%s2033_s1 + $0x30] sm:$0xff]   ;;  %v1564_v30 = vld [vmem:[%s2033_s1 + $0x38] sm:$0xff]   ;;  %v1573_v37 = vld [vmem:[%s2034_s0 + $0x2c] ss:$20 sps:$4 sm:$0xff]  }
   0xc   :  { %1347 = vmatpush3.bf16.msra.mxu0 %v1544_v10  ;;  %v1561_v27 = vld [vmem:[%s2033_s1 + $0xb0] sm:$0xff]   ;;  %v1565_v31 = vld [vmem:[%s2033_s1 + $0xb8] sm:$0xff]   ;;  %v1579_v39 = vld [vmem:[%s2033_s1 + $0x108] sm:$0xff]  }
   0xd   :  { %1411 = vmatpush3.bf16.msra.mxu1 %v1545_v11  ;;  %1348 = vmatprep.subr.bf16.mxu0 %v1546_v12  ;;  %v1566_v32 = vld [vmem:[%s2034_s0] ss:$20 sps:$4 sm:$0xff]   ;;  %v1568_v33 = vld [vmem:[%s2034_s0 + $0x4] ss:$20 sps:$4 sm:$0xff]   ;;  %v1569_v34 = vld [vmem:[%s2034_s0 + $0x8] ss:$20 sps:$4 sm:$0xff]  }
   0xe   :  { %1412 = vmatprep.subr.bf16.mxu1 %v1547_v13  ;;  %662 = vmatprep.mubr.bf16.mxu0 %v1568_v33  ;;  %v1575_v38 = vld [vmem:[%s2034_s0 + $0x34] ss:$20 sps:$4 sm:$0xff]   ;;  %v1578_v41 = vld [vmem:[%s2034_s0 + $0x30] ss:$20 sps:$4 sm:$0xff]   ;;  %v1593_v45 = vld [vmem:[%s2033_s1 + $0x118] sm:$0xff]  }
   0xf   :  { %v1577_v40 = vld [vmem:[%s2034_s0 + $0x28] ss:$20 sps:$4 sm:$0xff]   ;;  %v1586_v44 = vld [vmem:[%s2033_s1 + $0x110] sm:$0xff]   ;;  %v1585_v47 = vld [vmem:[%s2034_s0 + $0x58] ss:$20 sps:$4 sm:$0xff]  }
  0x10   :  { %1349 = vmatpush3.bf16.msra.mxu0 %v1548_v14  ;;  %v1580_v42 = vld [vmem:[%s2034_s0 + $0x54] ss:$20 sps:$4 sm:$0xff]   ;;  %v1582_v43 = vld [vmem:[%s2034_s0 + $0x5c] ss:$20 sps:$4 sm:$0xff]   ;;  %v1589_v49 = vld [vmem:[%s2034_s0 + $0x84] ss:$20 sps:$4 sm:$0xff]  }
  0x11   :  { %1413 = vmatpush3.bf16.msra.mxu1 %v1549_v15  ;;  %1350 = vmatprep.subr.bf16.mxu0 %v1550_v16  ;;  %v1584_v46 = vld [vmem:[%s2034_s0 + $0x50] ss:$20 sps:$4 sm:$0xff]   ;;  %v1607_v51 = vld [vmem:[%s2033_s1 + $0x128] sm:$0xff]   ;;  %v1592_v53 = vld [vmem:[%s2034_s0 + $0x80] ss:$20 sps:$4 sm:$0xff]  }
  0x12   :  { %1414 = vmatprep.subr.bf16.mxu1 %v1551_v17  ;;  %v1587_v48 = vld [vmem:[%s2034_s0 + $0x7c] ss:$20 sps:$4 sm:$0xff]   ;;  %v1600_v50 = vld [vmem:[%s2033_s1 + $0x120] sm:$0xff]   ;;  %v1591_v52 = vld [vmem:[%s2034_s0 + $0x78] ss:$20 sps:$4 sm:$0xff]  }
  0x13   :  { %v1594_v54 = vld [vmem:[%s2034_s0 + $0xa4] ss:$20 sps:$4 sm:$0xff]   ;;  %v1614_v55 = vld [vmem:[%s2033_s1 + $0x130] sm:$0xff]   ;;  %v1596_v56 = vld [vmem:[%s2034_s0 + $0xac] ss:$20 sps:$4 sm:$0xff]  }
  0x14   :  { %1351 = vmatpush3.bf16.msra.mxu0 %v1552_v18  ;;  %v1621_v57 = vld [vmem:[%s2033_s1 + $0x138] sm:$0xff]   ;;  %v1598_v58 = vld [vmem:[%s2034_s0 + $0xa0] ss:$20 sps:$4 sm:$0xff]   ;;  %v1606_v63 = vld [vmem:[%s2034_s0 + $0xd0] ss:$20 sps:$4 sm:$0xff]  }
  0x15   :  { %1415 = vmatpush3.bf16.msra.mxu1 %v1553_v19  ;;  %1352 = vmatprep.subr.bf16.mxu0 %v1554_v20  ;;  %v1599_v59 = vld [vmem:[%s2034_s0 + $0xa8] ss:$20 sps:$4 sm:$0xff]   ;;  %v1601_v60 = vld [vmem:[%s2034_s0 + $0xcc] ss:$20 sps:$4 sm:$0xff]   ;;  %v1612_v2 = vld [vmem:[%s2034_s0 + $0xf0] ss:$20 sps:$4 sm:$0xff]  }
  0x16   :  { %1416 = vmatprep.subr.bf16.mxu1 %v1555_v21  ;;  %v1603_v61 = vld [vmem:[%s2034_s0 + $0xd4] ss:$20 sps:$4 sm:$0xff]   ;;  %v1610_v1 = vld [vmem:[%s2034_s0 + $0xfc] ss:$20 sps:$4 sm:$0xff]   ;;  %v1613_v3 = vld [vmem:[%s2034_s0 + $0xf8] ss:$20 sps:$4 sm:$0xff]  }
  0x17   :  { %v1605_v62 = vld [vmem:[%s2034_s0 + $0xc8] ss:$20 sps:$4 sm:$0xff]   ;;  %v1617_v5 = vld [vmem:[%s2034_s0 + $0x124] ss:$20 sps:$4 sm:$0xff]   ;;  %v1620_v7 = vld [vmem:[%s2034_s0 + $0x120] ss:$20 sps:$4 sm:$0xff]  }
  0x18   :  { %1353 = vmatpush3.bf16.msra.mxu0 %v1556_v22  ;;  %v1608_v0 = vld [vmem:[%s2034_s0 + $0xf4] ss:$20 sps:$4 sm:$0xff]   ;;  %v1615_v4 = vld [vmem:[%s2034_s0 + $0x11c] ss:$20 sps:$4 sm:$0xff]   ;;  %v1619_v6 = vld [vmem:[%s2034_s0 + $0x118] ss:$20 sps:$4 sm:$0xff]  }
  0x19   :  { %1417 = vmatpush3.bf16.msra.mxu1 %v1557_v23  ;;  %1354 = vmatprep.subr.bf16.mxu0 %v1558_v24  ;;  %v1622_v8 = vld [vmem:[%s2034_s0 + $0x10] ss:$20 sps:$4 sm:$0xff]   ;;  %v1624_v10 = vld [vmem:[%s2034_s0 + $0x38] ss:$20 sps:$4 sm:$0xff]   ;;  %v1626_v12 = vld [vmem:[%s2034_s0 + $0x60] ss:$20 sps:$4 sm:$0xff]  }
  0x1a   :  { %1418 = vmatprep.subr.bf16.mxu1 %v1559_v25  ;;  %v1623_v9 = vld [vmem:[%s2034_s0 + $0xb0] ss:$20 sps:$4 sm:$0xff]   ;;  %v1625_v11 = vld [vmem:[%s2034_s0 + $0xd8] ss:$20 sps:$4 sm:$0xff]   ;;  %v1627_v13 = vld [vmem:[%s2034_s0 + $0x100] ss:$20 sps:$4 sm:$0xff]  }
  0x1b   :  { %v1628_v14 = vld [vmem:[%s2034_s0 + $0x88] ss:$20 sps:$4 sm:$0xff]  }
  0x1c   :  { %1355 = vmatpush3.bf16.msra.mxu0 %v1560_v26  ;;  %v1629_v15 = vld [vmem:[%s2034_s0 + $0x128] ss:$20 sps:$4 sm:$0xff]  }
  0x1d   :  { %1419 = vmatpush3.bf16.msra.mxu1 %v1561_v27  ;;  %1356 = vmatprep.subr.bf16.mxu0 %v1562_v28 }
  0x1e   :  { %1420 = vmatprep.subr.bf16.mxu1 %v1563_v29 }
  0x20   :  { %1357 = vmatpush3.bf16.msra.mxu0 %v1564_v30 }
  0x21   :  { %1421 = vmatpush3.bf16.msra.mxu1 %v1565_v31  ;;  %1486 = vmatprep.subr.bf16.mxu0 %v1572_v36 }
  0x22   :  { %1518 = vmatprep.subr.bf16.mxu1 %v1572_v36 }
  0x23   :  { %663 = vmatmul.mubr.bf16.vlgmr.msra.gmra.mrb[0].mxu0 %v1566_v32 }
  0x24   :  { %760 = vmatmul.mubr.bf16.vlgmr.msra.gmra.mrb[0].mxu1 %v1569_v34  ;;  %1487 = vmatpush3.bf16.msra.mxu0 %v1572_v36 }
  0x25   :  { %1526 = vmatpush3.bf16.msra.mxu1 %v1572_v36  ;;  %670 = vmatprep.mubr.bf16.mxu0 %v1573_v37 }
  0x26   :  { %767 = vmatprep.mubr.bf16.mxu1 %v1575_v38  ;;  %1488 = vmatprep.subr.bf16.mxu0 %v1579_v39 }
  0x27   :  { %1519 = vmatprep.subr.bf16.mxu1 %v1579_v39 }
  0x28   :  { %1489 = vmatpush3.bf16.msra.mxu0 %v1579_v39 }
  0x29   :  { %1527 = vmatpush3.bf16.msra.mxu1 %v1579_v39  ;;  %1490 = vmatprep.subr.bf16.mxu0 %v1586_v44 }
  0x2a   :  { %1520 = vmatprep.subr.bf16.mxu1 %v1586_v44 }
  0x2b   :  { %671 = vmatmul.mubr.bf16.gmra.mrb[4].mxu0 %v1577_v40 }
  0x2c   :  { %768 = vmatmul.mubr.bf16.gmra.mrb[4].mxu1 %v1578_v41  ;;  %678 = vmatprep.mubr.bf16.mxu0 %v1580_v42 }
  0x2d   :  { %775 = vmatprep.mubr.bf16.mxu1 %v1582_v43  ;;  %1491 = vmatpush3.bf16.msra.mxu0 %v1586_v44 }
  0x2e   :  { %1528 = vmatpush3.bf16.msra.mxu1 %v1586_v44  ;;  %1492 = vmatprep.subr.bf16.mxu0 %v1593_v45 }
  0x2f   :  { %1521 = vmatprep.subr.bf16.mxu1 %v1593_v45 }
  0x31   :  { %1493 = vmatpush3.bf16.msra.mxu0 %v1593_v45 }
  0x32   :  { %1529 = vmatpush3.bf16.msra.mxu1 %v1593_v45  ;;  %1494 = vmatprep.subr.bf16.mxu0 %v1600_v50 }
  0x33   :  { %679 = vmatmul.mubr.bf16.gmra.mrb[8].mxu0 %v1584_v46  ;;  %1522 = vmatprep.subr.bf16.mxu1 %v1600_v50 }
  0x34   :  { %776 = vmatmul.mubr.bf16.gmra.mrb[8].mxu1 %v1585_v47  ;;  %686 = vmatprep.mubr.bf16.mxu0 %v1587_v48 }
  0x35   :  { %783 = vmatprep.mubr.bf16.mxu1 %v1589_v49  ;;  %1495 = vmatpush3.bf16.msra.mxu0 %v1600_v50 }
  0x36   :  { %1530 = vmatpush3.bf16.msra.mxu1 %v1600_v50  ;;  %1496 = vmatprep.subr.bf16.mxu0 %v1607_v51 }
  0x37   :  { %1523 = vmatprep.subr.bf16.mxu1 %v1607_v51 }
  0x39   :  { %1497 = vmatpush3.bf16.msra.mxu0 %v1607_v51 }
  0x3a   :  { %1531 = vmatpush3.bf16.msra.mxu1 %v1607_v51  ;;  %1498 = vmatprep.subr.bf16.mxu0 %v1614_v55 }
  0x3b   :  { %687 = vmatmul.mubr.bf16.gmra.mrb[12].mxu0 %v1591_v52  ;;  %1524 = vmatprep.subr.bf16.mxu1 %v1614_v55 }
  0x3c   :  { %784 = vmatmul.mubr.bf16.gmra.mrb[12].mxu1 %v1592_v53  ;;  %694 = vmatprep.mubr.bf16.mxu0 %v1594_v54 }
  0x3d   :  { %791 = vmatprep.mubr.bf16.mxu1 %v1596_v56  ;;  %1499 = vmatpush3.bf16.msra.mxu0 %v1614_v55 }
  0x3e   :  { %1532 = vmatpush3.bf16.msra.mxu1 %v1614_v55  ;;  %1500 = vmatprep.subr.bf16.mxu0 %v1621_v57 }
  0x3f   :  { %1525 = vmatprep.subr.bf16.mxu1 %v1621_v57 }
  0x41   :  { %1501 = vmatpush3.bf16.msra.mxu0 %v1621_v57 }
  0x42   :  { %1533 = vmatpush3.bf16.msra.mxu1 %v1621_v57 }
  0x43   :  { %695 = vmatmul.mubr.bf16.gmra.mrb[16].mxu0 %v1598_v58 }
  0x44   :  { %792 = vmatmul.mubr.bf16.gmra.mrb[16].mxu1 %v1599_v59  ;;  %702 = vmatprep.mubr.bf16.mxu0 %v1601_v60 }
  0x45   :  { %799 = vmatprep.mubr.bf16.mxu1 %v1603_v61 }
  0x4b   :  { %703 = vmatmul.mubr.bf16.gmra.mrb[20].mxu0 %v1605_v62 }
  0x4c   :  { %800 = vmatmul.mubr.bf16.gmra.mrb[20].mxu1 %v1606_v63  ;;  %710 = vmatprep.mubr.bf16.mxu0 %v1608_v0 }
  0x4d   :  { %807 = vmatprep.mubr.bf16.mxu1 %v1610_v1 }
  0x53   :  { %711 = vmatmul.mubr.bf16.gmra.mrb[24].mxu0 %v1612_v2 }
  0x54   :  { %808 = vmatmul.mubr.bf16.gmra.mrb[24].mxu1 %v1613_v3  ;;  %718 = vmatprep.mubr.bf16.mxu0 %v1615_v4 }
  0x55   :  { %815 = vmatprep.mubr.bf16.mxu1 %v1617_v5 }
  0x5b   :  { %719 = vmatmul.mubr.bf16.gmra.mrb[28].mxu0 %v1619_v6 }
  0x5c   :  { %816 = vmatmul.mubr.bf16.gmra.mrb[28].mxu1 %v1620_v7  ;;  %1502 = vmatprep.mubr.bf16.mxu0 %v1622_v8 }
  0x5d   :  { %1510 = vmatprep.mubr.bf16.mxu1 %v1623_v9 }
  0x63   :  { %1503 = vmatmul.mubr.bf16.vlgmr.msra.gmra.mrb[32].mxu0 %v1624_v10 }
  0x64   :  { %1511 = vmatmul.mubr.bf16.vlgmr.msra.gmra.mrb[32].mxu1 %v1625_v11  ;;  %1506 = vmatprep.mubr.bf16.mxu0 %v1626_v12 }
  0x65   :  { %1514 = vmatprep.mubr.bf16.mxu1 %v1627_v13 }
  0x6b   :  { %1507 = vmatmul.mubr.bf16.gmra.mrb[36].mxu0 %v1628_v14 }
  0x6c   :  { %1515 = vmatmul.mubr.bf16.gmra.mrb[36].mxu1 %v1629_v15 }
  0xf6   :  { %v1358_v16 = vpop.f32.mrb[0].mxu0 }
  0xf7   :  { %v1422_v17 = vpop.f32.mrb[0].mxu1  ;;  %v1359_v18 = vpop.f32.mrb[1].mxu0 }
  0xf8   :  { %v1360_v19 = vadd.f32 %v1359_v18, %v1358_v16  ;;  %v1423_v20 = vpop.f32.mrb[1].mxu1  ;;  %v1361_v21 = vpop.f32.mrb[2].mxu0 }
  0xf9   :  { %v1424_v22 = vadd.f32 %v1423_v20, %v1422_v17  ;;  %v1425_v23 = vpop.f32.mrb[2].mxu1  ;;  %v1362_v24 = vpop.f32.mrb[3].mxu0 }
  0xfa   :  { %v1363_v25 = vadd.f32 %v1362_v24, %v1361_v21  ;;  %v1426_v26 = vpop.f32.mrb[3].mxu1 }
  0xfb   :  { %v1427_v27 = vadd.f32 %v1426_v26, %v1425_v23  ;;  %v1895_v28 = vadd.f32 %v1424_v22, %v1360_v19 }
  0xfd   :  { %v1897_v29 = vadd.f32 %v1427_v27, %v1363_v25 }
  0xfe   :  { %v1364_v30 = vpop.f32.mrb[4].mxu0 }
  0xff   :  { %v1428_v31 = vpop.f32.mrb[4].mxu1  ;;  %v1365_v32 = vpop.f32.mrb[5].mxu0 }
 0x100   :  { %v1366_v33 = vadd.f32 %v1365_v32, %v1364_v30  ;;  %v1429_v34 = vpop.f32.mrb[5].mxu1  ;;  %v1367_v35 = vpop.f32.mrb[6].mxu0 }
 0x101   :  { %v1430_v36 = vadd.f32 %v1429_v34, %v1428_v31  ;;  %v1431_v37 = vpop.f32.mrb[6].mxu1  ;;  %v1368_v38 = vpop.f32.mrb[7].mxu0 }
 0x102   :  { %v1369_v39 = vadd.f32 %v1368_v38, %v1367_v35  ;;  %v1432_v40 = vpop.f32.mrb[7].mxu1 }
 0x103   :  { %v1433_v41 = vadd.f32 %v1432_v40, %v1431_v37  ;;  %v1899_v42 = vadd.f32 %v1430_v36, %v1366_v33 }
 0x105   :  { %v1901_v43 = vadd.f32 %v1433_v41, %v1369_v39 }
 0x106   :  { %v1370_v44 = vpop.f32.mrb[8].mxu0 }
 0x107   :  { %v1434_v45 = vpop.f32.mrb[8].mxu1  ;;  %v1371_v46 = vpop.f32.mrb[9].mxu0 }
 0x108   :  { %v1372_v47 = vadd.f32 %v1371_v46, %v1370_v44  ;;  %v1435_v48 = vpop.f32.mrb[9].mxu1  ;;  %v1373_v49 = vpop.f32.mrb[10].mxu0 }
 0x109   :  { %v1436_v50 = vadd.f32 %v1435_v48, %v1434_v45  ;;  %v1437_v51 = vpop.f32.mrb[10].mxu1  ;;  %v1374_v52 = vpop.f32.mrb[11].mxu0 }
 0x10a   :  { %v1375_v53 = vadd.f32 %v1374_v52, %v1373_v49  ;;  %v1438_v54 = vpop.f32.mrb[11].mxu1 }
 0x10b   :  { %v1439_v55 = vadd.f32 %v1438_v54, %v1437_v51  ;;  %v1903_v56 = vadd.f32 %v1436_v50, %v1372_v47 }
 0x10d   :  { %v1905_v57 = vadd.f32 %v1439_v55, %v1375_v53 }
 0x10e   :  { %v1376_v58 = vpop.f32.mrb[12].mxu0 }
 0x10f   :  { %v1440_v59 = vpop.f32.mrb[12].mxu1  ;;  %v1377_v60 = vpop.f32.mrb[13].mxu0 }
 0x110   :  { %v1378_v61 = vadd.f32 %v1377_v60, %v1376_v58  ;;  %v1441_v62 = vpop.f32.mrb[13].mxu1  ;;  %v1379_v63 = vpop.f32.mrb[14].mxu0 }
 0x111   :  { %v1442_v0 = vadd.f32 %v1441_v62, %v1440_v59  ;;  %v1443_v1 = vpop.f32.mrb[14].mxu1  ;;  %v1380_v2 = vpop.f32.mrb[15].mxu0 }
 0x112   :  { %v1381_v3 = vadd.f32 %v1380_v2, %v1379_v63  ;;  %v1444_v4 = vpop.f32.mrb[15].mxu1 }
 0x113   :  { %v1445_v5 = vadd.f32 %v1444_v4, %v1443_v1  ;;  %v1907_v6 = vadd.f32 %v1442_v0, %v1378_v61  ;;  %v1332_v4 = vld [vmem:[%s2035_s3 + $0x28] sm:$0xff]  }
 0x115   :  { %v1909_v7 = vadd.f32 %v1445_v5, %v1381_v3  ;;  %v1328_v3 = vld [vmem:[%s2035_s3 + $0x8] sm:$0xff]  }
 0x116   :  { %v1382_v8 = vpop.f32.mrb[16].mxu0 }
 0x117   :  { %v1446_v9 = vpop.f32.mrb[16].mxu1  ;;  %v1383_v10 = vpop.f32.mrb[17].mxu0 }
 0x118   :  { %v1384_v11 = vadd.f32 %v1383_v10, %v1382_v8  ;;  %v1447_v12 = vpop.f32.mrb[17].mxu1  ;;  %v1385_v13 = vpop.f32.mrb[18].mxu0  ;;  %v1257_v8 = vld [vmem:[%s2035_s3] sm:$0xff]  }
 0x119   :  { %v1448_v14 = vadd.f32 %v1447_v12, %v1446_v9  ;;  %v1449_v15 = vpop.f32.mrb[18].mxu1  ;;  %v1386_v16 = vpop.f32.mrb[19].mxu0  ;;  %v1331_v9 = vld [vmem:[%s2035_s3 + $0x20] sm:$0xff]   ;;  %v1262_v12 = vunpack.c.l.bf16 %v1328_v3 }
 0x11a   :  { %v1387_v17 = vadd.f32 %v1386_v16, %v1385_v13  ;;  %v1450_v18 = vpop.f32.mrb[19].mxu1  ;;  %v1278_v13 = vunpack.c.l.bf16 %v1332_v4 }
 0x11b   :  { %v1451_v19 = vadd.f32 %v1450_v18, %v1449_v15  ;;  %v1911_v20 = vadd.f32 %v1448_v14, %v1384_v11  ;;  %v1938_v11 = vld [vmem:[%s2035_s3 + $0x18] sm:$0xff]   ;;  %v1948_v15 = vld [vmem:[%s2035_s3 + $0x10] sm:$0xff]   ;;  %v1955_v18 = vld [vmem:[%s2036_s2] ss:$0 sm:$0xff] }
 0x11c   :  { %v1943_v14 = vld [vmem:[%s2035_s3 + $0x38] sm:$0xff]  }
 0x11d   :  { %v1913_v21 = vadd.f32 %v1451_v19, %v1387_v17  ;;  %v1258_v19 = vunpack.c.l.bf16 %v1257_v8 }
 0x11e   :  { %v1388_v22 = vpop.f32.mrb[20].mxu0 }
 0x11f   :  { %v1452_v23 = vpop.f32.mrb[20].mxu1  ;;  %v1389_v24 = vpop.f32.mrb[21].mxu0 }
 0x120   :  { %v1390_v25 = vadd.f32 %v1389_v24, %v1388_v22  ;;  %v1453_v26 = vpop.f32.mrb[21].mxu1  ;;  %v1391_v27 = vpop.f32.mrb[22].mxu0  ;;  %v1274_v22 = vunpack.c.l.bf16 %v1331_v9  ;;  %v1279_v24 = vunpack.c.h.bf16 %v1332_v4 }
 0x121   :  { %v1454_v30 = vadd.f32 %v1453_v26, %v1452_v23  ;;  %v1455_v31 = vpop.f32.mrb[22].mxu1  ;;  %v1392_v32 = vpop.f32.mrb[23].mxu0  ;;  %v1263_v23 = vunpack.c.h.bf16 %v1328_v3 }
 0x122   :  { %v1393_v33 = vadd.f32 %v1392_v32, %v1391_v27  ;;  %v1456_v34 = vpop.f32.mrb[23].mxu1  ;;  %v1275_v32 = vunpack.c.h.bf16 %v1331_v9 }
 0x123   :  { %v1457_v35 = vadd.f32 %v1456_v34, %v1455_v31  ;;  %v802_v36 = vadd.f32 %v1454_v30, %v1390_v25  ;;  %v1960_v25 = vld [vmem:[%s2035_s3 + $0x30] sm:$0xff]   ;;  %v1259_v31 = vunpack.c.h.bf16 %v1257_v8 }
 0x125   :  { %v1915_v37 = vadd.f32 %v1457_v35, %v1393_v33  ;;  %v1270_v33 = vunpack.c.l.bf16 %v1938_v11 }
 0x126   :  { %v1394_v38 = vpop.f32.mrb[24].mxu0 }
 0x127   :  { %v1458_v39 = vpop.f32.mrb[24].mxu1  ;;  %v1395_v40 = vpop.f32.mrb[25].mxu0 }
 0x128   :  { %v1396_v41 = vadd.f32 %v1395_v40, %v1394_v38  ;;  %v1459_v44 = vpop.f32.mrb[25].mxu1  ;;  %v1397_v45 = vpop.f32.mrb[26].mxu0  ;;  %v1286_v40 = vunpack.c.l.bf16 %v1943_v14 }
 0x129   :  { %v1460_v46 = vadd.f32 %v1459_v44, %v1458_v39  ;;  %v1461_v47 = vpop.f32.mrb[26].mxu1  ;;  %v1398_v48 = vpop.f32.mrb[27].mxu0 }
 0x12a   :  { %v1399_v49 = vadd.f32 %v1398_v48, %v1397_v45  ;;  %v1462_v50 = vpop.f32.mrb[27].mxu1  ;;  %v1282_v48 = vunpack.c.l.bf16 %v1960_v25 }
 0x12b   :  { %v1463_v51 = vadd.f32 %v1462_v50, %v1461_v47  ;;  %v1917_v52 = vadd.f32 %v1460_v46, %v1396_v41  ;;  %v1266_v41 = vunpack.c.l.bf16 %v1948_v15 }
 0x12d   :  { %v1919_v53 = vadd.f32 %v1463_v51, %v1399_v49 }
 0x12e   :  { %v1400_v54 = vpop.f32.mrb[28].mxu0 }
 0x12f   :  { %v1464_v55 = vpop.f32.mrb[28].mxu1  ;;  %v1401_v58 = vpop.f32.mrb[29].mxu0 }
 0x130   :  { %v1402_v59 = vadd.f32 %v1401_v58, %v1400_v54  ;;  %v1465_v60 = vpop.f32.mrb[29].mxu1  ;;  %v1403_v61 = vpop.f32.mrb[30].mxu0 }
 0x131   :  { %v1466_v62 = vadd.f32 %v1465_v60, %v1464_v55  ;;  %v1467_v63 = vpop.f32.mrb[30].mxu1  ;;  %v1404_v0 = vpop.f32.mrb[31].mxu0 }
 0x132   :  { %v1405_v1 = vadd.f32 %v1404_v0, %v1403_v61  ;;  %v1468_v2 = vpop.f32.mrb[31].mxu1 }
 0x133   :  { %v1469_v5 = vadd.f32 %v1468_v2, %v1467_v63  ;;  %v1933_v10 = vadd.f32 %v1466_v62, %v1402_v59 }
 0x135   :  { %v1950_v16 = vadd.f32 %v1469_v5, %v1405_v1 }
 0x136   :  { %v1504_v17 = vpop.f32.mrb[32].mxu0 }
 0x137   :  { %v867_v26 = vadd.f32 %v1504_v17, %v1899_v42  ;;  %v1512_v27 = vpop.f32.mrb[32].mxu1  ;;  %v858_v30 = vpop.f32.mrb[33].mxu0 }
 0x138   :  { %v899_v34 = vadd.f32 %v1512_v27, %v802_v36  ;;  %v859_v35 = vadd.f32 %v858_v30, %v1895_v28  ;;  %v890_v38 = vpop.f32.mrb[33].mxu1  ;;  %v1505_v39 = vpop.f32.mrb[34].mxu0 }
 0x139   :  { %v981_v44 = vadd.f32 %v1955_v18, %v867_v26  ;;  %v891_v45 = vadd.f32 %v890_v38, %v1911_v20  ;;  %v870_v42 = vadd.f32 %v1505_v39, %v1901_v43  ;;  %v1513_v46 = vpop.f32.mrb[34].mxu1  ;;  %v861_v47 = vpop.f32.mrb[35].mxu0 }
 0x13a   :  { %v989_v36 = vadd.f32 %v1955_v18, %v899_v34  ;;  %v979_v28 = vadd.f32 %v1955_v18, %v859_v35  ;;  %v902_v49 = vadd.f32 %v1513_v46, %v1915_v37  ;;  %v862_v50 = vadd.f32 %v861_v47, %v1897_v29  ;;  %v893_v51 = vpop.f32.mrb[35].mxu1 }
 0x13b   :  { %v1029_v54 = vadd.f32 %v1262_v12, %v981_v44  ;;  %v987_v55 = vadd.f32 %v1955_v18, %v891_v45  ;;  %v982_v20 = vadd.f32 %v1955_v18, %v870_v42  ;;  %v894_v43 = vadd.f32 %v893_v51, %v1913_v21 }
 0x13c   :  { %v1037_v58 = vadd.f32 %v1278_v13, %v989_v36  ;;  %v1027_v59 = vadd.f32 %v1258_v19, %v979_v28  ;;  %v990_v60 = vadd.f32 %v1955_v18, %v902_v49  ;;  %v980_v61 = vadd.f32 %v1955_v18, %v862_v50 }
 0x13d   :  { %v1045_v62 = vmax.f32 %v1029_v54, 0.0  ;;  %v1035_v63 = vadd.f32 %v1274_v22, %v987_v55  ;;  %v1030_v0 = vadd.f32 %v1263_v23, %v982_v20  ;;  %v988_v37 = vadd.f32 %v1955_v18, %v894_v43 }
 0x13e   :  { %v1053_v29 = vmax.f32 %v1037_v58, 0.0  ;;  %v1043_v1 = vmax.f32 %v1027_v59, 0.0  ;;  %v1038_v2 = vadd.f32 %v1279_v24, %v990_v60  ;;  %v1028_v3 = vadd.f32 %v1259_v31, %v980_v61  ;;  %v1508_v4 = vpop.f32.mrb[36].mxu0 }
 0x13f   :  { %v1051_v5 = vmax.f32 %v1035_v63, 0.0  ;;  %v1046_v8 = vmax.f32 %v1030_v0, 0.0  ;;  %v1036_v9 = vadd.f32 %v1275_v32, %v988_v37  ;;  %v883_v21 = vadd.f32 %v1508_v4, %v1907_v6  ;;  %v1516_v12 = vpop.f32.mrb[36].mxu1  ;;  %v874_v13 = vpop.f32.mrb[37].mxu0 }
 0x140   :  { %v1054_v17 = vmax.f32 %v1038_v2, 0.0  ;;  %v1044_v19 = vmax.f32 %v1028_v3, 0.0  ;;  %v915_v26 = vadd.f32 %v1516_v12, %v1933_v10  ;;  %v875_v22 = vadd.f32 %v874_v13, %v1903_v56  ;;  %v906_v23 = vpop.f32.mrb[37].mxu1  ;;  %v1509_v27 = vpop.f32.mrb[38].mxu0 }
 0x141   :  { %v1296_v30 = vpack.c.bf16 %v1046_v8, %v1045_v62  ;;  %v1052_v34 = vmax.f32 %v1036_v9, 0.0  ;;  %v985_v24 = vadd.f32 %v1955_v18, %v883_v21  ;;  %v907_v31 = vadd.f32 %v906_v23, %v1917_v52  ;;  %v1517_v35 = vpop.f32.mrb[38].mxu1  ;;  %v877_v32 = vpop.f32.mrb[39].mxu0 }
 0x142   :  { %v1316_v38 = vpack.c.bf16 %v1054_v17, %v1053_v29  ;;  %v1291_v6 = vpack.c.bf16 %v1044_v19, %v1043_v1  ;;  %v993_v39 = vadd.f32 %v1955_v18, %v915_v26  ;;  %v983_v44 = vadd.f32 %v1955_v18, %v875_v22  ;;  %v909_v45 = vpop.f32.mrb[39].mxu1 }
 0x143   :  { %1335 = vst [vmem:[%s2037_s4 + $0x8] sm:$0xff] %v1296_v30   ;;  %v1311_v56 = vpack.c.bf16 %v1052_v34, %v1051_v5  ;;  %v991_v10 = vadd.f32 %v1955_v18, %v907_v31  ;;  %v886_v42 = vadd.f32 %v1509_v27, %v1909_v7  ;;  %v1271_v52 = vunpack.c.h.bf16 %v1938_v11 }
 0x144   :  { %1339 = vst [vmem:[%s2037_s4 + $0x28] sm:$0xff] %v1316_v38   ;;  %1292 = vst [vmem:[%s2037_s4] sm:$0xff] %v1291_v6   ;;  %v918_v46 = vadd.f32 %v1517_v35, %v1950_v16  ;;  %v1287_v47 = vunpack.c.h.bf16 %v1943_v14  ;;  %v878_v36 = vadd.f32 %v877_v32, %v1905_v57  ;;  %v1267_v28 = vunpack.c.h.bf16 %v1948_v15 }
 0x145   :  { %1338 = vst [vmem:[%s2037_s4 + $0x20] sm:$0xff] %v1311_v56   ;;  %v1033_v7 = vadd.f32 %v1270_v33, %v985_v24  ;;  %v986_v49 = vadd.f32 %v1955_v18, %v886_v42  ;;  %v910_v50 = vadd.f32 %v909_v45, %v1919_v53  ;;  %v1283_v51 = vunpack.c.h.bf16 %v1960_v25 }
 0x146   :  { %v1041_v16 = vadd.f32 %v1286_v40, %v993_v39  ;;  %v1031_v57 = vadd.f32 %v1266_v41, %v983_v44  ;;  %v994_v54 = vadd.f32 %v1955_v18, %v918_v46  ;;  %v984_v55 = vadd.f32 %v1955_v18, %v878_v36 }
 0x147   :  { %v1039_v11 = vadd.f32 %v1282_v48, %v991_v10  ;;  %v1034_v33 = vadd.f32 %v1271_v52, %v986_v49  ;;  %v992_v20 = vadd.f32 %v1955_v18, %v910_v50  ;;  %v1049_v58 = vmax.f32 %v1033_v7, 0.0 }
 0x148   :  { %v1042_v43 = vadd.f32 %v1287_v47, %v994_v54  ;;  %v1032_v53 = vadd.f32 %v1267_v28, %v984_v55  ;;  %v1057_v14 = vmax.f32 %v1041_v16, 0.0  ;;  %v1047_v40 = vmax.f32 %v1031_v57, 0.0 }
 0x149   :  { %v1050_v59 = vmax.f32 %v1034_v33, 0.0  ;;  %v1040_v60 = vadd.f32 %v1283_v51, %v992_v20  ;;  %v1055_v41 = vmax.f32 %v1039_v11, 0.0 }
 0x14a   :  { %v1058_v61 = vmax.f32 %v1042_v43, 0.0  ;;  %v1048_v15 = vmax.f32 %v1032_v53, 0.0 }
 0x14b   :  { %v1306_v62 = vpack.c.bf16 %v1050_v59, %v1049_v58  ;;  %v1056_v63 = vmax.f32 %v1040_v60, 0.0 }
 0x14c   :  { %v1326_v0 = vpack.c.bf16 %v1058_v61, %v1057_v14  ;;  %v1301_v37 = vpack.c.bf16 %v1048_v15, %v1047_v40 }
 0x14d   :  { %1337 = vst [vmem:[%s2037_s4 + $0x18] sm:$0xff] %v1306_v62   ;;  %v1321_v25 = vpack.c.bf16 %v1056_v63, %v1055_v41 }
 0x14e   :  { %1341 = vst [vmem:[%s2037_s4 + $0x38] sm:$0xff] %v1326_v0   ;;  %1336 = vst [vmem:[%s2037_s4 + $0x10] sm:$0xff] %v1301_v37  }
 0x14f   :  { %1340 = vst [vmem:[%s2037_s4 + $0x30] sm:$0xff] %v1321_v25  }

// kernel: _lambda_.26
= control target key start
LH: loop header
LB: loop body
LE: loop exit
PB: predicated region body
PF: predicated region fallthrough
CT: control target
= control target key end

     0   :  { %s1001_s1 = inlined_call_operand.vmem [shape: bf16[640,128], index: 1, kind: input, shape index: {}]   ;;  %s1002_s0 = inlined_call_operand.vmem [shape: bf16[32,640], index: 0, kind: input, shape index: {}]   ;;  %s1003_s2 = inlined_call_operand.vmem [shape: f32[1,128], index: 2, kind: input, shape index: {}]   ;;  %s1004_s3 = inlined_call_operand.vmem [shape: bf16[32,128], index: 3, kind: output, shape index: {}]  }
   0x1   :  { %v768_v0 = vld [vmem:[%s1001_s1 + $0x40] sm:$0xff]   ;;  %v772_v4 = vld [vmem:[%s1001_s1 + $0x48] sm:$0xff]   ;;  %v776_v8 = vld [vmem:[%s1001_s1 + $0x50] sm:$0xff]  }
   0x2   :  { %v769_v1 = vld [vmem:[%s1001_s1 + $0xc0] sm:$0xff]   ;;  %682 = vmatprep.subr.bf16.mxu0 %v768_v0  ;;  %v773_v5 = vld [vmem:[%s1001_s1 + $0xc8] sm:$0xff]   ;;  %v777_v9 = vld [vmem:[%s1001_s1 + $0xd0] sm:$0xff]  }
   0x3   :  { %v770_v2 = vld [vmem:[%s1001_s1] sm:$0xff]   ;;  %710 = vmatprep.subr.bf16.mxu1 %v769_v1  ;;  %v774_v6 = vld [vmem:[%s1001_s1 + $0x8] sm:$0xff]   ;;  %v778_v10 = vld [vmem:[%s1001_s1 + $0x10] sm:$0xff]  }
   0x4   :  { %v771_v3 = vld [vmem:[%s1001_s1 + $0x80] sm:$0xff]   ;;  %683 = vmatpush3.bf16.msra.mxu0 %v770_v2  ;;  %v775_v7 = vld [vmem:[%s1001_s1 + $0x88] sm:$0xff]   ;;  %v779_v11 = vld [vmem:[%s1001_s1 + $0x90] sm:$0xff]  }
   0x5   :  { %711 = vmatpush3.bf16.msra.mxu1 %v771_v3  ;;  %684 = vmatprep.subr.bf16.mxu0 %v772_v4  ;;  %v780_v12 = vld [vmem:[%s1001_s1 + $0x58] sm:$0xff]   ;;  %v784_v16 = vld [vmem:[%s1001_s1 + $0x60] sm:$0xff]   ;;  %v788_v20 = vld [vmem:[%s1001_s1 + $0x68] sm:$0xff]  }
   0x6   :  { %712 = vmatprep.subr.bf16.mxu1 %v773_v5  ;;  %v781_v13 = vld [vmem:[%s1001_s1 + $0xd8] sm:$0xff]   ;;  %v785_v17 = vld [vmem:[%s1001_s1 + $0xe0] sm:$0xff]   ;;  %v789_v21 = vld [vmem:[%s1001_s1 + $0xe8] sm:$0xff]  }
   0x7   :  { %v782_v14 = vld [vmem:[%s1001_s1 + $0x18] sm:$0xff]   ;;  %v786_v18 = vld [vmem:[%s1001_s1 + $0x20] sm:$0xff]   ;;  %v790_v22 = vld [vmem:[%s1001_s1 + $0x28] sm:$0xff]  }
   0x8   :  { %685 = vmatpush3.bf16.msra.mxu0 %v774_v6  ;;  %v783_v15 = vld [vmem:[%s1001_s1 + $0x98] sm:$0xff]   ;;  %v787_v19 = vld [vmem:[%s1001_s1 + $0xa0] sm:$0xff]   ;;  %v791_v23 = vld [vmem:[%s1001_s1 + $0xa8] sm:$0xff]  }
   0x9   :  { %713 = vmatpush3.bf16.msra.mxu1 %v775_v7  ;;  %686 = vmatprep.subr.bf16.mxu0 %v776_v8  ;;  %v792_v24 = vld [vmem:[%s1001_s1 + $0x70] sm:$0xff]   ;;  %v796_v28 = vld [vmem:[%s1001_s1 + $0x78] sm:$0xff]   ;;  %v805_v35 = vld [vmem:[%s1002_s0 + $0xc] ss:$20 sps:$4 sm:$0xff]  }
   0xa   :  { %714 = vmatprep.subr.bf16.mxu1 %v777_v9  ;;  %v793_v25 = vld [vmem:[%s1001_s1 + $0xf0] sm:$0xff]   ;;  %v797_v29 = vld [vmem:[%s1001_s1 + $0xf8] sm:$0xff]   ;;  %v806_v36 = vld [vmem:[%s1001_s1 + $0x100] sm:$0xff]   ;;  %492 = vmatprep.mubr.bf16.mxu1 %v805_v35 }
   0xb   :  { %v794_v26 = vld [vmem:[%s1001_s1 + $0x30] sm:$0xff]   ;;  %v798_v30 = vld [vmem:[%s1001_s1 + $0x38] sm:$0xff]   ;;  %v807_v37 = vld [vmem:[%s1001_s1 + $0x108] sm:$0xff]  }
   0xc   :  { %687 = vmatpush3.bf16.msra.mxu0 %v778_v10  ;;  %v795_v27 = vld [vmem:[%s1001_s1 + $0xb0] sm:$0xff]   ;;  %v799_v31 = vld [vmem:[%s1001_s1 + $0xb8] sm:$0xff]   ;;  %v811_v39 = vld [vmem:[%s1002_s0 + $0x2c] ss:$20 sps:$4 sm:$0xff]  }
   0xd   :  { %715 = vmatpush3.bf16.msra.mxu1 %v779_v11  ;;  %688 = vmatprep.subr.bf16.mxu0 %v780_v12  ;;  %v800_v32 = vld [vmem:[%s1002_s0] ss:$20 sps:$4 sm:$0xff]   ;;  %v802_v33 = vld [vmem:[%s1002_s0 + $0x4] ss:$20 sps:$4 sm:$0xff]   ;;  %v803_v34 = vld [vmem:[%s1002_s0 + $0x8] ss:$20 sps:$4 sm:$0xff]  }
   0xe   :  { %716 = vmatprep.subr.bf16.mxu1 %v781_v13  ;;  %443 = vmatprep.mubr.bf16.mxu0 %v802_v33  ;;  %v808_v38 = vld [vmem:[%s1001_s1 + $0x110] sm:$0xff]   ;;  %v809_v41 = vld [vmem:[%s1001_s1 + $0x118] sm:$0xff]   ;;  %v810_v45 = vld [vmem:[%s1001_s1 + $0x120] sm:$0xff]  }
   0xf   :  { %v813_v40 = vld [vmem:[%s1002_s0 + $0x34] ss:$20 sps:$4 sm:$0xff]   ;;  %v817_v43 = vld [vmem:[%s1002_s0 + $0x30] ss:$20 sps:$4 sm:$0xff]   ;;  %v819_v48 = vld [vmem:[%s1001_s1 + $0x138] sm:$0xff]  }
  0x10   :  { %689 = vmatpush3.bf16.msra.mxu0 %v782_v14  ;;  %v816_v42 = vld [vmem:[%s1002_s0 + $0x28] ss:$20 sps:$4 sm:$0xff]   ;;  %v820_v44 = vld [vmem:[%s1002_s0 + $0x10] ss:$20 sps:$4 sm:$0xff]   ;;  %v821_v49 = vld [vmem:[%s1002_s0 + $0x38] ss:$20 sps:$4 sm:$0xff]  }
  0x11   :  { %717 = vmatpush3.bf16.msra.mxu1 %v783_v15  ;;  %690 = vmatprep.subr.bf16.mxu0 %v784_v16  ;;  %v815_v46 = vld [vmem:[%s1001_s1 + $0x128] sm:$0xff]   ;;  %v818_v47 = vld [vmem:[%s1001_s1 + $0x130] sm:$0xff]   ;;  %v662_v15 = vld [vmem:[%s1003_s2] ss:$0 sm:$0xff] }
  0x12   :  { %718 = vmatprep.subr.bf16.mxu1 %v785_v17 }
  0x14   :  { %691 = vmatpush3.bf16.msra.mxu0 %v786_v18 }
  0x15   :  { %719 = vmatpush3.bf16.msra.mxu1 %v787_v19  ;;  %692 = vmatprep.subr.bf16.mxu0 %v788_v20 }
  0x16   :  { %720 = vmatprep.subr.bf16.mxu1 %v789_v21 }
  0x18   :  { %693 = vmatpush3.bf16.msra.mxu0 %v790_v22 }
  0x19   :  { %721 = vmatpush3.bf16.msra.mxu1 %v791_v23  ;;  %694 = vmatprep.subr.bf16.mxu0 %v792_v24 }
  0x1a   :  { %722 = vmatprep.subr.bf16.mxu1 %v793_v25 }
  0x1c   :  { %695 = vmatpush3.bf16.msra.mxu0 %v794_v26 }
  0x1d   :  { %723 = vmatpush3.bf16.msra.mxu1 %v795_v27  ;;  %696 = vmatprep.subr.bf16.mxu0 %v796_v28 }
  0x1e   :  { %724 = vmatprep.subr.bf16.mxu1 %v797_v29 }
  0x20   :  { %697 = vmatpush3.bf16.msra.mxu0 %v798_v30 }
  0x21   :  { %725 = vmatpush3.bf16.msra.mxu1 %v799_v31  ;;  %748 = vmatprep.subr.bf16.mxu0 %v806_v36 }
  0x23   :  { %444 = vmatmul.mubr.bf16.vlgmr.msra.gmra.mrb[0].mxu0 %v800_v32 }
  0x24   :  { %493 = vmatmul.mubr.bf16.vlgmr.msra.gmra.mrb[0].mxu1 %v803_v34  ;;  %749 = vmatpush3.bf16.msra.mxu0 %v806_v36 }
  0x25   :  { %750 = vmatprep.subr.bf16.mxu0 %v807_v37  ;;  %451 = vmatprep.mubr.bf16.mxu0 %v811_v39 }
  0x26   :  { %500 = vmatprep.mubr.bf16.mxu1 %v813_v40 }
  0x28   :  { %751 = vmatpush3.bf16.msra.mxu0 %v807_v37 }
  0x29   :  { %752 = vmatprep.subr.bf16.mxu0 %v808_v38 }
  0x2b   :  { %452 = vmatmul.mubr.bf16.gmra.mrb[4].mxu0 %v816_v42 }
  0x2c   :  { %501 = vmatmul.mubr.bf16.gmra.mrb[4].mxu1 %v817_v43  ;;  %753 = vmatpush3.bf16.msra.mxu0 %v808_v38 }
  0x2d   :  { %754 = vmatprep.subr.bf16.mxu0 %v809_v41  ;;  %764 = vmatprep.mubr.bf16.mxu0 %v820_v44 }
  0x30   :  { %755 = vmatpush3.bf16.msra.mxu0 %v809_v41 }
  0x31   :  { %756 = vmatprep.subr.bf16.mxu0 %v810_v45 }
  0x34   :  { %757 = vmatpush3.bf16.msra.mxu0 %v810_v45 }
  0x35   :  { %758 = vmatprep.subr.bf16.mxu0 %v815_v46 }
  0x38   :  { %759 = vmatpush3.bf16.msra.mxu0 %v815_v46 }
  0x39   :  { %760 = vmatprep.subr.bf16.mxu0 %v818_v47 }
  0x3c   :  { %761 = vmatpush3.bf16.msra.mxu0 %v818_v47 }
  0x3d   :  { %762 = vmatprep.subr.bf16.mxu0 %v819_v48 }
  0x40   :  { %763 = vmatpush3.bf16.msra.mxu0 %v819_v48 }
  0x43   :  { %765 = vmatmul.mubr.bf16.vlgmr.msra.gmra.mrb[8].mxu0 %v821_v49 }
  0xf6   :  { %v698_v50 = vpop.f32.mrb[0].mxu0 }
  0xf7   :  { %v726_v51 = vpop.f32.mrb[0].mxu1  ;;  %v699_v52 = vpop.f32.mrb[1].mxu0 }
  0xf8   :  { %v700_v53 = vadd.f32 %v699_v52, %v698_v50  ;;  %v727_v54 = vpop.f32.mrb[1].mxu1  ;;  %v701_v55 = vpop.f32.mrb[2].mxu0 }
  0xf9   :  { %v728_v56 = vadd.f32 %v727_v54, %v726_v51  ;;  %v729_v57 = vpop.f32.mrb[2].mxu1  ;;  %v702_v58 = vpop.f32.mrb[3].mxu0 }
  0xfa   :  { %v703_v59 = vadd.f32 %v702_v58, %v701_v55  ;;  %v730_v60 = vpop.f32.mrb[3].mxu1 }
  0xfb   :  { %v731_v61 = vadd.f32 %v730_v60, %v729_v57  ;;  %v495_v62 = vadd.f32 %v728_v56, %v700_v53 }
  0xfd   :  { %v498_v63 = vadd.f32 %v731_v61, %v703_v59 }
  0xfe   :  { %v704_v0 = vpop.f32.mrb[4].mxu0 }
  0xff   :  { %v732_v1 = vpop.f32.mrb[4].mxu1  ;;  %v705_v2 = vpop.f32.mrb[5].mxu0 }
 0x100   :  { %v706_v3 = vadd.f32 %v705_v2, %v704_v0  ;;  %v733_v4 = vpop.f32.mrb[5].mxu1  ;;  %v707_v5 = vpop.f32.mrb[6].mxu0 }
 0x101   :  { %v734_v6 = vadd.f32 %v733_v4, %v732_v1  ;;  %v735_v7 = vpop.f32.mrb[6].mxu1  ;;  %v708_v8 = vpop.f32.mrb[7].mxu0 }
 0x102   :  { %v709_v9 = vadd.f32 %v708_v8, %v707_v5  ;;  %v736_v10 = vpop.f32.mrb[7].mxu1 }
 0x103   :  { %v737_v11 = vadd.f32 %v736_v10, %v735_v7  ;;  %v503_v12 = vadd.f32 %v734_v6, %v706_v3 }
 0x105   :  { %v506_v13 = vadd.f32 %v737_v11, %v709_v9 }
 0x116   :  { %v766_v14 = vpop.f32.mrb[8].mxu0 }
 0x117   :  { %v552_v16 = vadd.f32 %v766_v14, %v503_v12  ;;  %v543_v17 = vpop.f32.mrb[9].mxu0 }
 0x118   :  { %v544_v18 = vadd.f32 %v543_v17, %v495_v62  ;;  %v767_v19 = vpop.f32.mrb[10].mxu0 }
 0x119   :  { %v582_v20 = vadd.f32 %v662_v15, %v552_v16  ;;  %v555_v21 = vadd.f32 %v767_v19, %v506_v13  ;;  %v546_v22 = vpop.f32.mrb[11].mxu0 }
 0x11a   :  { %v580_v23 = vadd.f32 %v662_v15, %v544_v18  ;;  %v547_v24 = vadd.f32 %v546_v22, %v498_v63 }
 0x11b   :  { %v583_v25 = vadd.f32 %v662_v15, %v555_v21  ;;  %v586_v27 = vmax.f32 %v582_v20, 0.0 }
 0x11c   :  { %v581_v26 = vadd.f32 %v662_v15, %v547_v24  ;;  %v584_v29 = vmax.f32 %v580_v23, 0.0 }
 0x11d   :  { %v587_v28 = vmax.f32 %v583_v25, 0.0 }
 0x11e   :  { %v585_v30 = vmax.f32 %v581_v26, 0.0 }
 0x11f   :  { %v679_v31 = vpack.c.bf16 %v587_v28, %v586_v27 }
 0x120   :  { %v674_v32 = vpack.c.bf16 %v585_v30, %v584_v29 }
 0x121   :  { %681 = vst [vmem:[%s1004_s3 + $0x8] sm:$0xff] %v679_v31  }
 0x122   :  { %675 = vst [vmem:[%s1004_s3] sm:$0xff] %v674_v32  }

// kernel: _lambda_.27
= control target key start
LH: loop header
LB: loop body
LE: loop exit
PB: predicated region body
PF: predicated region fallthrough
CT: control target
= control target key end

     0   :  { %s997_s1 = inlined_call_operand.vmem [shape: bf16[640,128], index: 1, kind: input, shape index: {}]   ;;  %s998_s0 = inlined_call_operand.vmem [shape: bf16[32,640], index: 0, kind: input, shape index: {}]   ;;  %s999_s2 = inlined_call_operand.vmem [shape: f32[1,128], index: 2, kind: input, shape index: {}]   ;;  %s1000_s3 = inlined_call_operand.vmem [shape: bf16[32,128], index: 3, kind: output, shape index: {}]  }
   0x1   :  { %v764_v0 = vld [vmem:[%s997_s1 + $0x40] sm:$0xff]   ;;  %v768_v4 = vld [vmem:[%s997_s1 + $0x48] sm:$0xff]   ;;  %v772_v8 = vld [vmem:[%s997_s1 + $0x50] sm:$0xff]  }
   0x2   :  { %v765_v1 = vld [vmem:[%s997_s1 + $0xc0] sm:$0xff]   ;;  %678 = vmatprep.subr.bf16.mxu0 %v764_v0  ;;  %v769_v5 = vld [vmem:[%s997_s1 + $0xc8] sm:$0xff]   ;;  %v773_v9 = vld [vmem:[%s997_s1 + $0xd0] sm:$0xff]  }
   0x3   :  { %v766_v2 = vld [vmem:[%s997_s1] sm:$0xff]   ;;  %706 = vmatprep.subr.bf16.mxu1 %v765_v1  ;;  %v770_v6 = vld [vmem:[%s997_s1 + $0x8] sm:$0xff]   ;;  %v774_v10 = vld [vmem:[%s997_s1 + $0x10] sm:$0xff]  }
   0x4   :  { %v767_v3 = vld [vmem:[%s997_s1 + $0x80] sm:$0xff]   ;;  %679 = vmatpush3.bf16.msra.mxu0 %v766_v2  ;;  %v771_v7 = vld [vmem:[%s997_s1 + $0x88] sm:$0xff]   ;;  %v775_v11 = vld [vmem:[%s997_s1 + $0x90] sm:$0xff]  }
   0x5   :  { %707 = vmatpush3.bf16.msra.mxu1 %v767_v3  ;;  %680 = vmatprep.subr.bf16.mxu0 %v768_v4  ;;  %v776_v12 = vld [vmem:[%s997_s1 + $0x58] sm:$0xff]   ;;  %v780_v16 = vld [vmem:[%s997_s1 + $0x60] sm:$0xff]   ;;  %v784_v20 = vld [vmem:[%s997_s1 + $0x68] sm:$0xff]  }
   0x6   :  { %708 = vmatprep.subr.bf16.mxu1 %v769_v5  ;;  %v777_v13 = vld [vmem:[%s997_s1 + $0xd8] sm:$0xff]   ;;  %v781_v17 = vld [vmem:[%s997_s1 + $0xe0] sm:$0xff]   ;;  %v785_v21 = vld [vmem:[%s997_s1 + $0xe8] sm:$0xff]  }
   0x7   :  { %v778_v14 = vld [vmem:[%s997_s1 + $0x18] sm:$0xff]   ;;  %v782_v18 = vld [vmem:[%s997_s1 + $0x20] sm:$0xff]   ;;  %v786_v22 = vld [vmem:[%s997_s1 + $0x28] sm:$0xff]  }
   0x8   :  { %681 = vmatpush3.bf16.msra.mxu0 %v770_v6  ;;  %v779_v15 = vld [vmem:[%s997_s1 + $0x98] sm:$0xff]   ;;  %v783_v19 = vld [vmem:[%s997_s1 + $0xa0] sm:$0xff]   ;;  %v787_v23 = vld [vmem:[%s997_s1 + $0xa8] sm:$0xff]  }
   0x9   :  { %709 = vmatpush3.bf16.msra.mxu1 %v771_v7  ;;  %682 = vmatprep.subr.bf16.mxu0 %v772_v8  ;;  %v788_v24 = vld [vmem:[%s997_s1 + $0x70] sm:$0xff]   ;;  %v792_v28 = vld [vmem:[%s997_s1 + $0x78] sm:$0xff]   ;;  %v801_v35 = vld [vmem:[%s998_s0 + $0xc] ss:$20 sps:$4 sm:$0xff]  }
   0xa   :  { %710 = vmatprep.subr.bf16.mxu1 %v773_v9  ;;  %v789_v25 = vld [vmem:[%s997_s1 + $0xf0] sm:$0xff]   ;;  %v793_v29 = vld [vmem:[%s997_s1 + $0xf8] sm:$0xff]   ;;  %v802_v36 = vld [vmem:[%s997_s1 + $0x100] sm:$0xff]   ;;  %492 = vmatprep.mubr.bf16.mxu1 %v801_v35 }
   0xb   :  { %v790_v26 = vld [vmem:[%s997_s1 + $0x30] sm:$0xff]   ;;  %v794_v30 = vld [vmem:[%s997_s1 + $0x38] sm:$0xff]   ;;  %v803_v37 = vld [vmem:[%s997_s1 + $0x108] sm:$0xff]  }
   0xc   :  { %683 = vmatpush3.bf16.msra.mxu0 %v774_v10  ;;  %v791_v27 = vld [vmem:[%s997_s1 + $0xb0] sm:$0xff]   ;;  %v795_v31 = vld [vmem:[%s997_s1 + $0xb8] sm:$0xff]   ;;  %v807_v39 = vld [vmem:[%s998_s0 + $0x2c] ss:$20 sps:$4 sm:$0xff]  }
   0xd   :  { %711 = vmatpush3.bf16.msra.mxu1 %v775_v11  ;;  %684 = vmatprep.subr.bf16.mxu0 %v776_v12  ;;  %v796_v32 = vld [vmem:[%s998_s0] ss:$20 sps:$4 sm:$0xff]   ;;  %v798_v33 = vld [vmem:[%s998_s0 + $0x4] ss:$20 sps:$4 sm:$0xff]   ;;  %v799_v34 = vld [vmem:[%s998_s0 + $0x8] ss:$20 sps:$4 sm:$0xff]  }
   0xe   :  { %712 = vmatprep.subr.bf16.mxu1 %v777_v13  ;;  %443 = vmatprep.mubr.bf16.mxu0 %v798_v33  ;;  %v804_v38 = vld [vmem:[%s997_s1 + $0x110] sm:$0xff]   ;;  %v805_v41 = vld [vmem:[%s997_s1 + $0x118] sm:$0xff]   ;;  %v806_v45 = vld [vmem:[%s997_s1 + $0x120] sm:$0xff]  }
   0xf   :  { %v809_v40 = vld [vmem:[%s998_s0 + $0x34] ss:$20 sps:$4 sm:$0xff]   ;;  %v813_v43 = vld [vmem:[%s998_s0 + $0x30] ss:$20 sps:$4 sm:$0xff]   ;;  %v815_v48 = vld [vmem:[%s997_s1 + $0x138] sm:$0xff]  }
  0x10   :  { %685 = vmatpush3.bf16.msra.mxu0 %v778_v14  ;;  %v812_v42 = vld [vmem:[%s998_s0 + $0x28] ss:$20 sps:$4 sm:$0xff]   ;;  %v816_v44 = vld [vmem:[%s998_s0 + $0x10] ss:$20 sps:$4 sm:$0xff]   ;;  %v817_v49 = vld [vmem:[%s998_s0 + $0x38] ss:$20 sps:$4 sm:$0xff]  }
  0x11   :  { %713 = vmatpush3.bf16.msra.mxu1 %v779_v15  ;;  %686 = vmatprep.subr.bf16.mxu0 %v780_v16  ;;  %v811_v46 = vld [vmem:[%s997_s1 + $0x128] sm:$0xff]   ;;  %v814_v47 = vld [vmem:[%s997_s1 + $0x130] sm:$0xff]  }
  0x12   :  { %714 = vmatprep.subr.bf16.mxu1 %v781_v17  ;;  %v658_v17 = vld [vmem:[%s999_s2] ss:$0 sm:$0xff] }
  0x14   :  { %687 = vmatpush3.bf16.msra.mxu0 %v782_v18 }
  0x15   :  { %715 = vmatpush3.bf16.msra.mxu1 %v783_v19  ;;  %688 = vmatprep.subr.bf16.mxu0 %v784_v20 }
  0x16   :  { %716 = vmatprep.subr.bf16.mxu1 %v785_v21 }
  0x18   :  { %689 = vmatpush3.bf16.msra.mxu0 %v786_v22 }
  0x19   :  { %717 = vmatpush3.bf16.msra.mxu1 %v787_v23  ;;  %690 = vmatprep.subr.bf16.mxu0 %v788_v24 }
  0x1a   :  { %718 = vmatprep.subr.bf16.mxu1 %v789_v25 }
  0x1c   :  { %691 = vmatpush3.bf16.msra.mxu0 %v790_v26 }
  0x1d   :  { %719 = vmatpush3.bf16.msra.mxu1 %v791_v27  ;;  %692 = vmatprep.subr.bf16.mxu0 %v792_v28 }
  0x1e   :  { %720 = vmatprep.subr.bf16.mxu1 %v793_v29 }
  0x20   :  { %693 = vmatpush3.bf16.msra.mxu0 %v794_v30 }
  0x21   :  { %721 = vmatpush3.bf16.msra.mxu1 %v795_v31  ;;  %744 = vmatprep.subr.bf16.mxu0 %v802_v36 }
  0x23   :  { %444 = vmatmul.mubr.bf16.vlgmr.msra.gmra.mrb[0].mxu0 %v796_v32 }
  0x24   :  { %493 = vmatmul.mubr.bf16.vlgmr.msra.gmra.mrb[0].mxu1 %v799_v34  ;;  %745 = vmatpush3.bf16.msra.mxu0 %v802_v36 }
  0x25   :  { %746 = vmatprep.subr.bf16.mxu0 %v803_v37  ;;  %451 = vmatprep.mubr.bf16.mxu0 %v807_v39 }
  0x26   :  { %500 = vmatprep.mubr.bf16.mxu1 %v809_v40 }
  0x28   :  { %747 = vmatpush3.bf16.msra.mxu0 %v803_v37 }
  0x29   :  { %748 = vmatprep.subr.bf16.mxu0 %v804_v38 }
  0x2b   :  { %452 = vmatmul.mubr.bf16.gmra.mrb[4].mxu0 %v812_v42 }
  0x2c   :  { %501 = vmatmul.mubr.bf16.gmra.mrb[4].mxu1 %v813_v43  ;;  %749 = vmatpush3.bf16.msra.mxu0 %v804_v38 }
  0x2d   :  { %750 = vmatprep.subr.bf16.mxu0 %v805_v41  ;;  %760 = vmatprep.mubr.bf16.mxu0 %v816_v44 }
  0x30   :  { %751 = vmatpush3.bf16.msra.mxu0 %v805_v41 }
  0x31   :  { %752 = vmatprep.subr.bf16.mxu0 %v806_v45 }
  0x34   :  { %753 = vmatpush3.bf16.msra.mxu0 %v806_v45 }
  0x35   :  { %754 = vmatprep.subr.bf16.mxu0 %v811_v46 }
  0x38   :  { %755 = vmatpush3.bf16.msra.mxu0 %v811_v46 }
  0x39   :  { %756 = vmatprep.subr.bf16.mxu0 %v814_v47 }
  0x3c   :  { %757 = vmatpush3.bf16.msra.mxu0 %v814_v47 }
  0x3d   :  { %758 = vmatprep.subr.bf16.mxu0 %v815_v48 }
  0x40   :  { %759 = vmatpush3.bf16.msra.mxu0 %v815_v48 }
  0x43   :  { %761 = vmatmul.mubr.bf16.vlgmr.msra.gmra.mrb[8].mxu0 %v817_v49 }
  0xf6   :  { %v694_v50 = vpop.f32.mrb[0].mxu0 }
  0xf7   :  { %v722_v51 = vpop.f32.mrb[0].mxu1  ;;  %v695_v52 = vpop.f32.mrb[1].mxu0 }
  0xf8   :  { %v696_v53 = vadd.f32 %v695_v52, %v694_v50  ;;  %v723_v54 = vpop.f32.mrb[1].mxu1  ;;  %v697_v55 = vpop.f32.mrb[2].mxu0 }
  0xf9   :  { %v724_v56 = vadd.f32 %v723_v54, %v722_v51  ;;  %v725_v57 = vpop.f32.mrb[2].mxu1  ;;  %v698_v58 = vpop.f32.mrb[3].mxu0 }
  0xfa   :  { %v699_v59 = vadd.f32 %v698_v58, %v697_v55  ;;  %v726_v60 = vpop.f32.mrb[3].mxu1 }
  0xfb   :  { %v727_v61 = vadd.f32 %v726_v60, %v725_v57  ;;  %v495_v62 = vadd.f32 %v724_v56, %v696_v53 }
  0xfd   :  { %v498_v63 = vadd.f32 %v727_v61, %v699_v59 }
  0xfe   :  { %v700_v0 = vpop.f32.mrb[4].mxu0 }
  0xff   :  { %v728_v1 = vpop.f32.mrb[4].mxu1  ;;  %v701_v2 = vpop.f32.mrb[5].mxu0 }
 0x100   :  { %v702_v3 = vadd.f32 %v701_v2, %v700_v0  ;;  %v729_v4 = vpop.f32.mrb[5].mxu1  ;;  %v703_v5 = vpop.f32.mrb[6].mxu0 }
 0x101   :  { %v730_v6 = vadd.f32 %v729_v4, %v728_v1  ;;  %v731_v7 = vpop.f32.mrb[6].mxu1  ;;  %v704_v8 = vpop.f32.mrb[7].mxu0 }
 0x102   :  { %v705_v9 = vadd.f32 %v704_v8, %v703_v5  ;;  %v732_v10 = vpop.f32.mrb[7].mxu1 }
 0x103   :  { %v733_v11 = vadd.f32 %v732_v10, %v731_v7  ;;  %v503_v12 = vadd.f32 %v730_v6, %v702_v3 }
 0x105   :  { %v506_v13 = vadd.f32 %v733_v11, %v705_v9 }
 0x116   :  { %v762_v14 = vpop.f32.mrb[8].mxu0 }
 0x117   :  { %v552_v15 = vadd.f32 %v762_v14, %v503_v12  ;;  %v543_v16 = vpop.f32.mrb[9].mxu0 }
 0x118   :  { %v544_v18 = vadd.f32 %v543_v16, %v495_v62  ;;  %v763_v19 = vpop.f32.mrb[10].mxu0 }
 0x119   :  { %v555_v20 = vadd.f32 %v763_v19, %v506_v13  ;;  %v546_v21 = vpop.f32.mrb[11].mxu0  ;;  %v582_v23 = vadd.f32 %v658_v17, %v552_v15 }
 0x11a   :  { %v547_v22 = vadd.f32 %v546_v21, %v498_v63  ;;  %v580_v25 = vadd.f32 %v658_v17, %v544_v18 }
 0x11b   :  { %v583_v24 = vadd.f32 %v658_v17, %v555_v20 }
 0x11c   :  { %v581_v26 = vadd.f32 %v658_v17, %v547_v22 }
 0x11d   :  { %v675_v27 = vpack.c.bf16 %v583_v24, %v582_v23 }
 0x11e   :  { %v670_v28 = vpack.c.bf16 %v581_v26, %v580_v25 }
 0x11f   :  { %677 = vst [vmem:[%s1000_s3 + $0x8] sm:$0xff] %v675_v27  }
 0x120   :  { %671 = vst [vmem:[%s1000_s3] sm:$0xff] %v670_v28  }

// kernel: _lambda_.28
= control target key start
LH: loop header
LB: loop body
LE: loop exit
PB: predicated region body
PF: predicated region fallthrough
CT: control target
= control target key end

     0   :  { %s1698_s1 = inlined_call_operand.vmem [shape: bf16[1152,128], index: 1, kind: input, shape index: {}]   ;;  %s1699_s0 = inlined_call_operand.vmem [shape: bf16[32,1152], index: 0, kind: input, shape index: {}]   ;;  %s1700_s3 = inlined_call_operand.vmem [shape: bf16[32,128], index: 3, kind: input, shape index: {}]   ;;  %s1701_s2 = inlined_call_operand.vmem [shape: f32[1,128], index: 2, kind: input, shape index: {}]   ;;  %s1702_s4 = inlined_call_operand.vmem [shape: bf16[32,128], index: 4, kind: output, shape index: {}]  }
   0x1   :  { %v1290_v0 = vld [vmem:[%s1698_s1 + $0x40] sm:$0xff]   ;;  %v1294_v4 = vld [vmem:[%s1698_s1 + $0x48] sm:$0xff]   ;;  %v1298_v8 = vld [vmem:[%s1698_s1 + $0x50] sm:$0xff]  }
   0x2   :  { %v1291_v1 = vld [vmem:[%s1698_s1 + $0xc0] sm:$0xff]   ;;  %1148 = vmatprep.subr.bf16.mxu0 %v1290_v0  ;;  %v1295_v5 = vld [vmem:[%s1698_s1 + $0xc8] sm:$0xff]   ;;  %v1299_v9 = vld [vmem:[%s1698_s1 + $0xd0] sm:$0xff]  }
   0x3   :  { %v1292_v2 = vld [vmem:[%s1698_s1] sm:$0xff]   ;;  %1176 = vmatprep.subr.bf16.mxu1 %v1291_v1  ;;  %v1296_v6 = vld [vmem:[%s1698_s1 + $0x8] sm:$0xff]   ;;  %v1300_v10 = vld [vmem:[%s1698_s1 + $0x10] sm:$0xff]  }
   0x4   :  { %v1293_v3 = vld [vmem:[%s1698_s1 + $0x80] sm:$0xff]   ;;  %1149 = vmatpush3.bf16.msra.mxu0 %v1292_v2  ;;  %v1297_v7 = vld [vmem:[%s1698_s1 + $0x88] sm:$0xff]   ;;  %v1301_v11 = vld [vmem:[%s1698_s1 + $0x90] sm:$0xff]  }
   0x5   :  { %1177 = vmatpush3.bf16.msra.mxu1 %v1293_v3  ;;  %1150 = vmatprep.subr.bf16.mxu0 %v1294_v4  ;;  %v1302_v12 = vld [vmem:[%s1698_s1 + $0x58] sm:$0xff]   ;;  %v1306_v16 = vld [vmem:[%s1698_s1 + $0x60] sm:$0xff]   ;;  %v1310_v20 = vld [vmem:[%s1698_s1 + $0x68] sm:$0xff]  }
   0x6   :  { %1178 = vmatprep.subr.bf16.mxu1 %v1295_v5  ;;  %v1303_v13 = vld [vmem:[%s1698_s1 + $0xd8] sm:$0xff]   ;;  %v1307_v17 = vld [vmem:[%s1698_s1 + $0xe0] sm:$0xff]   ;;  %v1311_v21 = vld [vmem:[%s1698_s1 + $0xe8] sm:$0xff]  }
   0x7   :  { %v1304_v14 = vld [vmem:[%s1698_s1 + $0x18] sm:$0xff]   ;;  %v1308_v18 = vld [vmem:[%s1698_s1 + $0x20] sm:$0xff]   ;;  %v1312_v22 = vld [vmem:[%s1698_s1 + $0x28] sm:$0xff]  }
   0x8   :  { %1151 = vmatpush3.bf16.msra.mxu0 %v1296_v6  ;;  %v1305_v15 = vld [vmem:[%s1698_s1 + $0x98] sm:$0xff]   ;;  %v1309_v19 = vld [vmem:[%s1698_s1 + $0xa0] sm:$0xff]   ;;  %v1313_v23 = vld [vmem:[%s1698_s1 + $0xa8] sm:$0xff]  }
   0x9   :  { %1179 = vmatpush3.bf16.msra.mxu1 %v1297_v7  ;;  %1152 = vmatprep.subr.bf16.mxu0 %v1298_v8  ;;  %v1314_v24 = vld [vmem:[%s1698_s1 + $0x70] sm:$0xff]   ;;  %v1318_v28 = vld [vmem:[%s1698_s1 + $0x78] sm:$0xff]   ;;  %v1322_v32 = vld [vmem:[%s1699_s0] ss:$36 sps:$4 sm:$0xff]  }
   0xa   :  { %1180 = vmatprep.subr.bf16.mxu1 %v1299_v9  ;;  %v1315_v25 = vld [vmem:[%s1698_s1 + $0xf0] sm:$0xff]   ;;  %v1319_v29 = vld [vmem:[%s1698_s1 + $0xf8] sm:$0xff]   ;;  %v1324_v33 = vld [vmem:[%s1699_s0 + $0x4] ss:$36 sps:$4 sm:$0xff]  }
   0xb   :  { %v1316_v26 = vld [vmem:[%s1698_s1 + $0x30] sm:$0xff]   ;;  %v1320_v30 = vld [vmem:[%s1698_s1 + $0x38] sm:$0xff]   ;;  %v1325_v34 = vld [vmem:[%s1699_s0 + $0x8] ss:$36 sps:$4 sm:$0xff]   ;;  %750 = vmatprep.mubr.bf16.mxu0 %v1324_v33 }
   0xc   :  { %1153 = vmatpush3.bf16.msra.mxu0 %v1300_v10  ;;  %v1317_v27 = vld [vmem:[%s1698_s1 + $0xb0] sm:$0xff]   ;;  %v1321_v31 = vld [vmem:[%s1698_s1 + $0xb8] sm:$0xff]   ;;  %v1328_v36 = vld [vmem:[%s1698_s1 + $0x140] sm:$0xff]  }
   0xd   :  { %1181 = vmatpush3.bf16.msra.mxu1 %v1301_v11  ;;  %1154 = vmatprep.subr.bf16.mxu0 %v1302_v12  ;;  %v1327_v35 = vld [vmem:[%s1699_s0 + $0xc] ss:$36 sps:$4 sm:$0xff]   ;;  %v1329_v37 = vld [vmem:[%s1698_s1 + $0x100] sm:$0xff]   ;;  %v1340_v48 = vld [vmem:[%s1698_s1 + $0x158] sm:$0xff]  }
   0xe   :  { %1182 = vmatprep.subr.bf16.mxu1 %v1303_v13  ;;  %799 = vmatprep.mubr.bf16.mxu1 %v1327_v35  ;;  %v1330_v38 = vld [vmem:[%s1698_s1 + $0x1c0] sm:$0xff]   ;;  %v1332_v40 = vld [vmem:[%s1698_s1 + $0x148] sm:$0xff]   ;;  %v1336_v44 = vld [vmem:[%s1698_s1 + $0x150] sm:$0xff]  }
   0xf   :  { %v1331_v39 = vld [vmem:[%s1698_s1 + $0x180] sm:$0xff]   ;;  %v1333_v41 = vld [vmem:[%s1698_s1 + $0x108] sm:$0xff]   ;;  %v1337_v45 = vld [vmem:[%s1698_s1 + $0x110] sm:$0xff]  }
  0x10   :  { %1155 = vmatpush3.bf16.msra.mxu0 %v1304_v14  ;;  %v1334_v42 = vld [vmem:[%s1698_s1 + $0x1c8] sm:$0xff]   ;;  %v1338_v46 = vld [vmem:[%s1698_s1 + $0x1d0] sm:$0xff]   ;;  %v1341_v49 = vld [vmem:[%s1698_s1 + $0x118] sm:$0xff]  }
  0x11   :  { %1183 = vmatpush3.bf16.msra.mxu1 %v1305_v15  ;;  %1156 = vmatprep.subr.bf16.mxu0 %v1306_v16  ;;  %v1335_v43 = vld [vmem:[%s1698_s1 + $0x188] sm:$0xff]   ;;  %v1339_v47 = vld [vmem:[%s1698_s1 + $0x190] sm:$0xff]   ;;  %v1342_v50 = vld [vmem:[%s1698_s1 + $0x1d8] sm:$0xff]  }
  0x12   :  { %1184 = vmatprep.subr.bf16.mxu1 %v1307_v17  ;;  %v1343_v51 = vld [vmem:[%s1698_s1 + $0x198] sm:$0xff]   ;;  %v1344_v52 = vld [vmem:[%s1698_s1 + $0x160] sm:$0xff]   ;;  %v1348_v56 = vld [vmem:[%s1698_s1 + $0x168] sm:$0xff]  }
  0x13   :  { %v1345_v53 = vld [vmem:[%s1698_s1 + $0x120] sm:$0xff]   ;;  %v1349_v57 = vld [vmem:[%s1699_s0 + $0x4c] ss:$36 sps:$4 sm:$0xff]   ;;  %v1351_v58 = vld [vmem:[%s1699_s0 + $0x54] ss:$36 sps:$4 sm:$0xff]  }
  0x14   :  { %1157 = vmatpush3.bf16.msra.mxu0 %v1308_v18  ;;  %v1346_v54 = vld [vmem:[%s1698_s1 + $0x1e0] sm:$0xff]   ;;  %v1353_v59 = vld [vmem:[%s1698_s1 + $0x128] sm:$0xff]   ;;  %v1355_v61 = vld [vmem:[%s1699_s0 + $0x50] ss:$36 sps:$4 sm:$0xff]  }
  0x15   :  { %1185 = vmatpush3.bf16.msra.mxu1 %v1309_v19  ;;  %1158 = vmatprep.subr.bf16.mxu0 %v1310_v20  ;;  %v1347_v55 = vld [vmem:[%s1698_s1 + $0x1a0] sm:$0xff]   ;;  %v1354_v60 = vld [vmem:[%s1699_s0 + $0x48] ss:$36 sps:$4 sm:$0xff]   ;;  %v1358_v0 = vld [vmem:[%s1698_s1 + $0x170] sm:$0xff]  }
  0x16   :  { %1186 = vmatprep.subr.bf16.mxu1 %v1311_v21  ;;  %v1356_v62 = vld [vmem:[%s1698_s1 + $0x1e8] sm:$0xff]   ;;  %v1359_v1 = vld [vmem:[%s1698_s1 + $0x130] sm:$0xff]   ;;  %v1362_v4 = vld [vmem:[%s1698_s1 + $0x178] sm:$0xff]  }
  0x17   :  { %v1357_v63 = vld [vmem:[%s1698_s1 + $0x1a8] sm:$0xff]   ;;  %v1360_v2 = vld [vmem:[%s1698_s1 + $0x1f0] sm:$0xff]   ;;  %v1363_v5 = vld [vmem:[%s1698_s1 + $0x138] sm:$0xff]  }
  0x18   :  { %1159 = vmatpush3.bf16.msra.mxu0 %v1312_v22  ;;  %v1361_v3 = vld [vmem:[%s1698_s1 + $0x1b0] sm:$0xff]   ;;  %v1364_v6 = vld [vmem:[%s1698_s1 + $0x1f8] sm:$0xff]   ;;  %v1369_v10 = vld [vmem:[%s1698_s1 + $0x200] sm:$0xff]  }
  0x19   :  { %1187 = vmatpush3.bf16.msra.mxu1 %v1313_v23  ;;  %1160 = vmatprep.subr.bf16.mxu0 %v1314_v24  ;;  %v1365_v7 = vld [vmem:[%s1699_s0 + $0x10] ss:$36 sps:$4 sm:$0xff]   ;;  %v1368_v9 = vld [vmem:[%s1698_s1 + $0x1b8] sm:$0xff]   ;;  %v1373_v13 = vld [vmem:[%s1698_s1 + $0x208] sm:$0xff]  }
  0x1a   :  { %1188 = vmatprep.subr.bf16.mxu1 %v1315_v25  ;;  %v1367_v8 = vld [vmem:[%s1699_s0 + $0x14] ss:$36 sps:$4 sm:$0xff]   ;;  %v1372_v12 = vld [vmem:[%s1699_s0 + $0x1c] ss:$36 sps:$4 sm:$0xff]   ;;  %v1378_v17 = vld [vmem:[%s1699_s0 + $0x64] ss:$36 sps:$4 sm:$0xff]  }
  0x1b   :  { %v1370_v11 = vld [vmem:[%s1699_s0 + $0x18] ss:$36 sps:$4 sm:$0xff]   ;;  %v1377_v16 = vld [vmem:[%s1698_s1 + $0x210] sm:$0xff]   ;;  %v1380_v18 = vld [vmem:[%s1699_s0 + $0x60] ss:$36 sps:$4 sm:$0xff]  }
  0x1c   :  { %1161 = vmatpush3.bf16.msra.mxu0 %v1316_v26  ;;  %v1374_v14 = vld [vmem:[%s1699_s0 + $0x5c] ss:$36 sps:$4 sm:$0xff]   ;;  %v1383_v22 = vld [vmem:[%s1698_s1 + $0x228] sm:$0xff]   ;;  %v1384_v23 = vld [vmem:[%s1698_s1 + $0x230] sm:$0xff]  }
  0x1d   :  { %1189 = vmatpush3.bf16.msra.mxu1 %v1317_v27  ;;  %1162 = vmatprep.subr.bf16.mxu0 %v1318_v28  ;;  %v1376_v15 = vld [vmem:[%s1699_s0 + $0x58] ss:$36 sps:$4 sm:$0xff]   ;;  %v1382_v20 = vld [vmem:[%s1698_s1 + $0x220] sm:$0xff]   ;;  %v1387_v25 = vld [vmem:[%s1699_s0 + $0x68] ss:$36 sps:$4 sm:$0xff]  }
  0x1e   :  { %1190 = vmatprep.subr.bf16.mxu1 %v1319_v29  ;;  %v1381_v19 = vld [vmem:[%s1698_s1 + $0x218] sm:$0xff]   ;;  %v1386_v21 = vld [vmem:[%s1699_s0 + $0x20] ss:$36 sps:$4 sm:$0xff]  }
  0x1f   :  { %v1385_v24 = vld [vmem:[%s1698_s1 + $0x238] sm:$0xff]  }
  0x20   :  { %1163 = vmatpush3.bf16.msra.mxu0 %v1320_v30 }
  0x21   :  { %1191 = vmatpush3.bf16.msra.mxu1 %v1321_v31  ;;  %1204 = vmatprep.subr.bf16.mxu0 %v1328_v36 }
  0x22   :  { %1232 = vmatprep.subr.bf16.mxu1 %v1330_v38 }
  0x23   :  { %751 = vmatmul.mubr.bf16.vlgmr.msra.gmra.mrb[0].mxu0 %v1322_v32 }
  0x24   :  { %800 = vmatmul.mubr.bf16.vlgmr.msra.gmra.mrb[0].mxu1 %v1325_v34  ;;  %1205 = vmatpush3.bf16.msra.mxu0 %v1329_v37 }
  0x25   :  { %1233 = vmatpush3.bf16.msra.mxu1 %v1331_v39  ;;  %1206 = vmatprep.subr.bf16.mxu0 %v1332_v40 }
  0x26   :  { %1234 = vmatprep.subr.bf16.mxu1 %v1334_v42  ;;  %758 = vmatprep.mubr.bf16.mxu0 %v1349_v57 }
  0x27   :  { %807 = vmatprep.mubr.bf16.mxu1 %v1351_v58 }
  0x28   :  { %1207 = vmatpush3.bf16.msra.mxu0 %v1333_v41 }
  0x29   :  { %1235 = vmatpush3.bf16.msra.mxu1 %v1335_v43  ;;  %1208 = vmatprep.subr.bf16.mxu0 %v1336_v44 }
  0x2a   :  { %1236 = vmatprep.subr.bf16.mxu1 %v1338_v46 }
  0x2b   :  { %759 = vmatmul.mubr.bf16.gmra.mrb[4].mxu0 %v1354_v60 }
  0x2c   :  { %1209 = vmatpush3.bf16.msra.mxu0 %v1337_v45  ;;  %808 = vmatmul.mubr.bf16.gmra.mrb[4].mxu1 %v1355_v61 }
  0x2d   :  { %1237 = vmatpush3.bf16.msra.mxu1 %v1339_v47  ;;  %1210 = vmatprep.subr.bf16.mxu0 %v1340_v48 }
  0x2e   :  { %1238 = vmatprep.subr.bf16.mxu1 %v1342_v50  ;;  %848 = vmatprep.mubr.bf16.mxu0 %v1367_v8 }
  0x2f   :  { %897 = vmatprep.mubr.bf16.mxu1 %v1372_v12 }
  0x30   :  { %1211 = vmatpush3.bf16.msra.mxu0 %v1341_v49 }
  0x31   :  { %1239 = vmatpush3.bf16.msra.mxu1 %v1343_v51  ;;  %1212 = vmatprep.subr.bf16.mxu0 %v1344_v52 }
  0x32   :  { %1240 = vmatprep.subr.bf16.mxu1 %v1346_v54 }
  0x34   :  { %1213 = vmatpush3.bf16.msra.mxu0 %v1345_v53 }
  0x35   :  { %1241 = vmatpush3.bf16.msra.mxu1 %v1347_v55  ;;  %1214 = vmatprep.subr.bf16.mxu0 %v1348_v56 }
  0x36   :  { %1242 = vmatprep.subr.bf16.mxu1 %v1356_v62 }
  0x38   :  { %1215 = vmatpush3.bf16.msra.mxu0 %v1353_v59 }
  0x39   :  { %1243 = vmatpush3.bf16.msra.mxu1 %v1357_v63  ;;  %1216 = vmatprep.subr.bf16.mxu0 %v1358_v0 }
  0x3a   :  { %1244 = vmatprep.subr.bf16.mxu1 %v1360_v2 }
  0x3c   :  { %1217 = vmatpush3.bf16.msra.mxu0 %v1359_v1 }
  0x3d   :  { %1245 = vmatpush3.bf16.msra.mxu1 %v1361_v3  ;;  %1218 = vmatprep.subr.bf16.mxu0 %v1362_v4 }
  0x3e   :  { %1246 = vmatprep.subr.bf16.mxu1 %v1364_v6 }
  0x40   :  { %1219 = vmatpush3.bf16.msra.mxu0 %v1363_v5 }
  0x41   :  { %1247 = vmatpush3.bf16.msra.mxu1 %v1368_v9  ;;  %1270 = vmatprep.subr.bf16.mxu0 %v1369_v10 }
  0x43   :  { %849 = vmatmul.mubr.bf16.vlgmr.msra.gmra.mrb[8].mxu0 %v1365_v7 }
  0x44   :  { %1271 = vmatpush3.bf16.msra.mxu0 %v1369_v10  ;;  %898 = vmatmul.mubr.bf16.vlgmr.msra.gmra.mrb[8].mxu1 %v1370_v11 }
  0x45   :  { %1272 = vmatprep.subr.bf16.mxu0 %v1373_v13  ;;  %856 = vmatprep.mubr.bf16.mxu0 %v1374_v14 }
  0x46   :  { %905 = vmatprep.mubr.bf16.mxu1 %v1378_v17 }
  0x48   :  { %1273 = vmatpush3.bf16.msra.mxu0 %v1373_v13 }
  0x49   :  { %1274 = vmatprep.subr.bf16.mxu0 %v1377_v16 }
  0x4b   :  { %857 = vmatmul.mubr.bf16.gmra.mrb[12].mxu0 %v1376_v15 }
  0x4c   :  { %1275 = vmatpush3.bf16.msra.mxu0 %v1377_v16  ;;  %906 = vmatmul.mubr.bf16.gmra.mrb[12].mxu1 %v1380_v18 }
  0x4d   :  { %1276 = vmatprep.subr.bf16.mxu0 %v1381_v19  ;;  %1286 = vmatprep.mubr.bf16.mxu0 %v1386_v21 }
  0x50   :  { %1277 = vmatpush3.bf16.msra.mxu0 %v1381_v19 }
  0x51   :  { %1278 = vmatprep.subr.bf16.mxu0 %v1382_v20 }
  0x54   :  { %1279 = vmatpush3.bf16.msra.mxu0 %v1382_v20 }
  0x55   :  { %1280 = vmatprep.subr.bf16.mxu0 %v1383_v22 }
  0x58   :  { %1281 = vmatpush3.bf16.msra.mxu0 %v1383_v22  ;;  %v1146_v22 = vld [vmem:[%s1700_s3 + $0x8] sm:$0xff]  }
  0x59   :  { %1282 = vmatprep.subr.bf16.mxu0 %v1384_v23 }
  0x5c   :  { %1283 = vmatpush3.bf16.msra.mxu0 %v1384_v23  ;;  %v1129_v23 = vld [vmem:[%s1700_s3] sm:$0xff]  }
  0x5d   :  { %1284 = vmatprep.subr.bf16.mxu0 %v1385_v24 }
  0x60   :  { %1285 = vmatpush3.bf16.msra.mxu0 %v1385_v24 }
  0x63   :  { %1287 = vmatmul.mubr.bf16.vlgmr.msra.gmra.mrb[16].mxu0 %v1387_v25  ;;  %v1119_v25 = vld [vmem:[%s1701_s2] ss:$0 sm:$0xff] }
  0xf6   :  { %v1164_v26 = vpop.f32.mrb[0].mxu0 }
  0xf7   :  { %v1192_v27 = vpop.f32.mrb[0].mxu1  ;;  %v1165_v28 = vpop.f32.mrb[1].mxu0 }
  0xf8   :  { %v1166_v29 = vadd.f32 %v1165_v28, %v1164_v26  ;;  %v1193_v30 = vpop.f32.mrb[1].mxu1  ;;  %v1167_v31 = vpop.f32.mrb[2].mxu0 }
  0xf9   :  { %v1194_v32 = vadd.f32 %v1193_v30, %v1192_v27  ;;  %v1195_v33 = vpop.f32.mrb[2].mxu1  ;;  %v1168_v34 = vpop.f32.mrb[3].mxu0  ;;  %v1134_v27 = vunpack.c.l.bf16 %v1146_v22  ;;  %v1130_v30 = vunpack.c.l.bf16 %v1129_v23 }
  0xfa   :  { %v1169_v35 = vadd.f32 %v1168_v34, %v1167_v31  ;;  %v1196_v36 = vpop.f32.mrb[3].mxu1  ;;  %v1135_v34 = vunpack.c.h.bf16 %v1146_v22 }
  0xfb   :  { %v802_v37 = vadd.f32 %v1194_v32, %v1166_v29  ;;  %v1197_v38 = vadd.f32 %v1196_v36, %v1195_v33 }
  0xfd   :  { %v805_v39 = vadd.f32 %v1197_v38, %v1169_v35  ;;  %v1131_v38 = vunpack.c.h.bf16 %v1129_v23 }
  0xfe   :  { %v1170_v40 = vpop.f32.mrb[4].mxu0 }
  0xff   :  { %v1198_v41 = vpop.f32.mrb[4].mxu1  ;;  %v1171_v42 = vpop.f32.mrb[5].mxu0 }
 0x100   :  { %v1199_v43 = vpop.f32.mrb[5].mxu1  ;;  %v1172_v44 = vadd.f32 %v1171_v42, %v1170_v40  ;;  %v1173_v46 = vpop.f32.mrb[6].mxu0 }
 0x101   :  { %v1200_v45 = vadd.f32 %v1199_v43, %v1198_v41  ;;  %v1201_v47 = vpop.f32.mrb[6].mxu1  ;;  %v1174_v48 = vpop.f32.mrb[7].mxu0 }
 0x102   :  { %v1202_v49 = vpop.f32.mrb[7].mxu1  ;;  %v1175_v51 = vadd.f32 %v1174_v48, %v1173_v46 }
 0x103   :  { %v810_v50 = vadd.f32 %v1200_v45, %v1172_v44  ;;  %v1203_v52 = vadd.f32 %v1202_v49, %v1201_v47 }
 0x105   :  { %v813_v53 = vadd.f32 %v1203_v52, %v1175_v51 }
 0x116   :  { %v1220_v54 = vpop.f32.mrb[8].mxu0 }
 0x117   :  { %v1221_v55 = vpop.f32.mrb[9].mxu0  ;;  %v1248_v58 = vpop.f32.mrb[8].mxu1 }
 0x118   :  { %v1222_v56 = vadd.f32 %v1221_v55, %v1220_v54  ;;  %v1223_v57 = vpop.f32.mrb[10].mxu0  ;;  %v1249_v62 = vpop.f32.mrb[9].mxu1 }
 0x119   :  { %v1224_v59 = vpop.f32.mrb[11].mxu0  ;;  %v1250_v63 = vadd.f32 %v1249_v62, %v1248_v58  ;;  %v1251_v0 = vpop.f32.mrb[10].mxu1 }
 0x11a   :  { %v851_v60 = vadd.f32 %v1222_v56, %v802_v37  ;;  %v1225_v61 = vadd.f32 %v1224_v59, %v1223_v57  ;;  %v1252_v2 = vpop.f32.mrb[11].mxu1 }
 0x11b   :  { %v1253_v3 = vadd.f32 %v1252_v2, %v1251_v0 }
 0x11c   :  { %v854_v1 = vadd.f32 %v1225_v61, %v805_v39  ;;  %v900_v4 = vadd.f32 %v1250_v63, %v851_v60 }
 0x11e   :  { %v1226_v5 = vpop.f32.mrb[12].mxu0  ;;  %v903_v7 = vadd.f32 %v1253_v3, %v854_v1 }
 0x11f   :  { %v1227_v6 = vpop.f32.mrb[13].mxu0  ;;  %v1254_v10 = vpop.f32.mrb[12].mxu1 }
 0x120   :  { %v1228_v8 = vadd.f32 %v1227_v6, %v1226_v5  ;;  %v1229_v9 = vpop.f32.mrb[14].mxu0  ;;  %v1255_v14 = vpop.f32.mrb[13].mxu1 }
 0x121   :  { %v1230_v11 = vpop.f32.mrb[15].mxu0  ;;  %v1256_v15 = vadd.f32 %v1255_v14, %v1254_v10  ;;  %v1257_v16 = vpop.f32.mrb[14].mxu1 }
 0x122   :  { %v859_v12 = vadd.f32 %v1228_v8, %v810_v50  ;;  %v1231_v13 = vadd.f32 %v1230_v11, %v1229_v9  ;;  %v1258_v18 = vpop.f32.mrb[15].mxu1 }
 0x123   :  { %v1259_v19 = vadd.f32 %v1258_v18, %v1257_v16 }
 0x124   :  { %v862_v17 = vadd.f32 %v1231_v13, %v813_v53  ;;  %v908_v20 = vadd.f32 %v1256_v15, %v859_v12 }
 0x126   :  { %v911_v21 = vadd.f32 %v1259_v19, %v862_v17 }
 0x136   :  { %v1288_v24 = vpop.f32.mrb[16].mxu0 }
 0x137   :  { %v957_v26 = vadd.f32 %v1288_v24, %v908_v20  ;;  %v948_v28 = vpop.f32.mrb[17].mxu0 }
 0x138   :  { %v949_v29 = vadd.f32 %v948_v28, %v900_v4  ;;  %v1289_v31 = vpop.f32.mrb[18].mxu0 }
 0x139   :  { %v987_v32 = vadd.f32 %v1119_v25, %v957_v26  ;;  %v960_v33 = vadd.f32 %v1289_v31, %v911_v21  ;;  %v951_v35 = vpop.f32.mrb[19].mxu0 }
 0x13a   :  { %v985_v36 = vadd.f32 %v1119_v25, %v949_v29  ;;  %v952_v37 = vadd.f32 %v951_v35, %v903_v7 }
 0x13b   :  { %v999_v39 = vadd.f32 %v1134_v27, %v987_v32  ;;  %v988_v40 = vadd.f32 %v1119_v25, %v960_v33 }
 0x13c   :  { %v997_v41 = vadd.f32 %v1130_v30, %v985_v36  ;;  %v986_v42 = vadd.f32 %v1119_v25, %v952_v37 }
 0x13d   :  { %v1000_v43 = vadd.f32 %v1135_v34, %v988_v40  ;;  %v1003_v45 = vmax.f32 %v999_v39, 0.0 }
 0x13e   :  { %v998_v44 = vadd.f32 %v1131_v38, %v986_v42  ;;  %v1001_v47 = vmax.f32 %v997_v41, 0.0 }
 0x13f   :  { %v1004_v46 = vmax.f32 %v1000_v43, 0.0 }
 0x140   :  { %v1002_v48 = vmax.f32 %v998_v44, 0.0 }
 0x141   :  { %v1144_v49 = vpack.c.bf16 %v1004_v46, %v1003_v45 }
 0x142   :  { %v1139_v50 = vpack.c.bf16 %v1002_v48, %v1001_v47 }
 0x143   :  { %1147 = vst [vmem:[%s1702_s4 + $0x8] sm:$0xff] %v1144_v49  }
 0x144   :  { %1140 = vst [vmem:[%s1702_s4] sm:$0xff] %v1139_v50  }

// kernel: _lambda_.29
= control target key start
LH: loop header
LB: loop body
LE: loop exit
PB: predicated region body
PF: predicated region fallthrough
CT: control target
= control target key end

     0   :  { %s1663_s1 = inlined_call_operand.vmem [shape: bf16[1152,128], index: 1, kind: input, shape index: {}]   ;;  %s1664_s0 = inlined_call_operand.vmem [shape: bf16[32,1152], index: 0, kind: input, shape index: {}]   ;;  %s1665_s2 = inlined_call_operand.vmem [shape: f32[1,128], index: 2, kind: input, shape index: {}]   ;;  %s1666_s3 = inlined_call_operand.vmem [shape: bf16[32,128], index: 3, kind: output, shape index: {}]  }
   0x1   :  { %v1266_v0 = vld [vmem:[%s1663_s1 + $0x40] sm:$0xff]   ;;  %v1270_v4 = vld [vmem:[%s1663_s1 + $0x48] sm:$0xff]   ;;  %v1274_v8 = vld [vmem:[%s1663_s1 + $0x50] sm:$0xff]  }
   0x2   :  { %v1267_v1 = vld [vmem:[%s1663_s1 + $0xc0] sm:$0xff]   ;;  %1124 = vmatprep.subr.bf16.mxu0 %v1266_v0  ;;  %v1271_v5 = vld [vmem:[%s1663_s1 + $0xc8] sm:$0xff]   ;;  %v1275_v9 = vld [vmem:[%s1663_s1 + $0xd0] sm:$0xff]  }
   0x3   :  { %v1268_v2 = vld [vmem:[%s1663_s1] sm:$0xff]   ;;  %1152 = vmatprep.subr.bf16.mxu1 %v1267_v1  ;;  %v1272_v6 = vld [vmem:[%s1663_s1 + $0x8] sm:$0xff]   ;;  %v1276_v10 = vld [vmem:[%s1663_s1 + $0x10] sm:$0xff]  }
   0x4   :  { %v1269_v3 = vld [vmem:[%s1663_s1 + $0x80] sm:$0xff]   ;;  %1125 = vmatpush3.bf16.msra.mxu0 %v1268_v2  ;;  %v1273_v7 = vld [vmem:[%s1663_s1 + $0x88] sm:$0xff]   ;;  %v1277_v11 = vld [vmem:[%s1663_s1 + $0x90] sm:$0xff]  }
   0x5   :  { %1153 = vmatpush3.bf16.msra.mxu1 %v1269_v3  ;;  %1126 = vmatprep.subr.bf16.mxu0 %v1270_v4  ;;  %v1278_v12 = vld [vmem:[%s1663_s1 + $0x58] sm:$0xff]   ;;  %v1282_v16 = vld [vmem:[%s1663_s1 + $0x60] sm:$0xff]   ;;  %v1286_v20 = vld [vmem:[%s1663_s1 + $0x68] sm:$0xff]  }
   0x6   :  { %1154 = vmatprep.subr.bf16.mxu1 %v1271_v5  ;;  %v1279_v13 = vld [vmem:[%s1663_s1 + $0xd8] sm:$0xff]   ;;  %v1283_v17 = vld [vmem:[%s1663_s1 + $0xe0] sm:$0xff]   ;;  %v1287_v21 = vld [vmem:[%s1663_s1 + $0xe8] sm:$0xff]  }
   0x7   :  { %v1280_v14 = vld [vmem:[%s1663_s1 + $0x18] sm:$0xff]   ;;  %v1284_v18 = vld [vmem:[%s1663_s1 + $0x20] sm:$0xff]   ;;  %v1288_v22 = vld [vmem:[%s1663_s1 + $0x28] sm:$0xff]  }
   0x8   :  { %1127 = vmatpush3.bf16.msra.mxu0 %v1272_v6  ;;  %v1281_v15 = vld [vmem:[%s1663_s1 + $0x98] sm:$0xff]   ;;  %v1285_v19 = vld [vmem:[%s1663_s1 + $0xa0] sm:$0xff]   ;;  %v1289_v23 = vld [vmem:[%s1663_s1 + $0xa8] sm:$0xff]  }
   0x9   :  { %1155 = vmatpush3.bf16.msra.mxu1 %v1273_v7  ;;  %1128 = vmatprep.subr.bf16.mxu0 %v1274_v8  ;;  %v1290_v24 = vld [vmem:[%s1663_s1 + $0x70] sm:$0xff]   ;;  %v1294_v28 = vld [vmem:[%s1663_s1 + $0x78] sm:$0xff]   ;;  %v1298_v32 = vld [vmem:[%s1664_s0] ss:$36 sps:$4 sm:$0xff]  }
   0xa   :  { %1156 = vmatprep.subr.bf16.mxu1 %v1275_v9  ;;  %v1291_v25 = vld [vmem:[%s1663_s1 + $0xf0] sm:$0xff]   ;;  %v1295_v29 = vld [vmem:[%s1663_s1 + $0xf8] sm:$0xff]   ;;  %v1300_v33 = vld [vmem:[%s1664_s0 + $0x4] ss:$36 sps:$4 sm:$0xff]  }
   0xb   :  { %v1292_v26 = vld [vmem:[%s1663_s1 + $0x30] sm:$0xff]   ;;  %v1296_v30 = vld [vmem:[%s1663_s1 + $0x38] sm:$0xff]   ;;  %v1301_v34 = vld [vmem:[%s1664_s0 + $0x8] ss:$36 sps:$4 sm:$0xff]   ;;  %747 = vmatprep.mubr.bf16.mxu0 %v1300_v33 }
   0xc   :  { %1129 = vmatpush3.bf16.msra.mxu0 %v1276_v10  ;;  %v1293_v27 = vld [vmem:[%s1663_s1 + $0xb0] sm:$0xff]   ;;  %v1297_v31 = vld [vmem:[%s1663_s1 + $0xb8] sm:$0xff]   ;;  %v1304_v36 = vld [vmem:[%s1663_s1 + $0x140] sm:$0xff]  }
   0xd   :  { %1157 = vmatpush3.bf16.msra.mxu1 %v1277_v11  ;;  %1130 = vmatprep.subr.bf16.mxu0 %v1278_v12  ;;  %v1303_v35 = vld [vmem:[%s1664_s0 + $0xc] ss:$36 sps:$4 sm:$0xff]   ;;  %v1305_v37 = vld [vmem:[%s1663_s1 + $0x100] sm:$0xff]   ;;  %v1316_v48 = vld [vmem:[%s1663_s1 + $0x158] sm:$0xff]  }
   0xe   :  { %1158 = vmatprep.subr.bf16.mxu1 %v1279_v13  ;;  %796 = vmatprep.mubr.bf16.mxu1 %v1303_v35  ;;  %v1306_v38 = vld [vmem:[%s1663_s1 + $0x1c0] sm:$0xff]   ;;  %v1308_v40 = vld [vmem:[%s1663_s1 + $0x148] sm:$0xff]   ;;  %v1312_v44 = vld [vmem:[%s1663_s1 + $0x150] sm:$0xff]  }
   0xf   :  { %v1307_v39 = vld [vmem:[%s1663_s1 + $0x180] sm:$0xff]   ;;  %v1309_v41 = vld [vmem:[%s1663_s1 + $0x108] sm:$0xff]   ;;  %v1313_v45 = vld [vmem:[%s1663_s1 + $0x110] sm:$0xff]  }
  0x10   :  { %1131 = vmatpush3.bf16.msra.mxu0 %v1280_v14  ;;  %v1310_v42 = vld [vmem:[%s1663_s1 + $0x1c8] sm:$0xff]   ;;  %v1314_v46 = vld [vmem:[%s1663_s1 + $0x1d0] sm:$0xff]   ;;  %v1317_v49 = vld [vmem:[%s1663_s1 + $0x118] sm:$0xff]  }
  0x11   :  { %1159 = vmatpush3.bf16.msra.mxu1 %v1281_v15  ;;  %1132 = vmatprep.subr.bf16.mxu0 %v1282_v16  ;;  %v1311_v43 = vld [vmem:[%s1663_s1 + $0x188] sm:$0xff]   ;;  %v1315_v47 = vld [vmem:[%s1663_s1 + $0x190] sm:$0xff]   ;;  %v1318_v50 = vld [vmem:[%s1663_s1 + $0x1d8] sm:$0xff]  }
  0x12   :  { %1160 = vmatprep.subr.bf16.mxu1 %v1283_v17  ;;  %v1319_v51 = vld [vmem:[%s1663_s1 + $0x198] sm:$0xff]   ;;  %v1320_v52 = vld [vmem:[%s1663_s1 + $0x160] sm:$0xff]   ;;  %v1324_v56 = vld [vmem:[%s1663_s1 + $0x168] sm:$0xff]  }
  0x13   :  { %v1321_v53 = vld [vmem:[%s1663_s1 + $0x120] sm:$0xff]   ;;  %v1325_v57 = vld [vmem:[%s1664_s0 + $0x4c] ss:$36 sps:$4 sm:$0xff]   ;;  %v1327_v58 = vld [vmem:[%s1664_s0 + $0x54] ss:$36 sps:$4 sm:$0xff]  }
  0x14   :  { %1133 = vmatpush3.bf16.msra.mxu0 %v1284_v18  ;;  %v1322_v54 = vld [vmem:[%s1663_s1 + $0x1e0] sm:$0xff]   ;;  %v1329_v59 = vld [vmem:[%s1663_s1 + $0x128] sm:$0xff]   ;;  %v1331_v61 = vld [vmem:[%s1664_s0 + $0x50] ss:$36 sps:$4 sm:$0xff]  }
  0x15   :  { %1161 = vmatpush3.bf16.msra.mxu1 %v1285_v19  ;;  %1134 = vmatprep.subr.bf16.mxu0 %v1286_v20  ;;  %v1323_v55 = vld [vmem:[%s1663_s1 + $0x1a0] sm:$0xff]   ;;  %v1330_v60 = vld [vmem:[%s1664_s0 + $0x48] ss:$36 sps:$4 sm:$0xff]   ;;  %v1334_v0 = vld [vmem:[%s1663_s1 + $0x170] sm:$0xff]  }
  0x16   :  { %1162 = vmatprep.subr.bf16.mxu1 %v1287_v21  ;;  %v1332_v62 = vld [vmem:[%s1663_s1 + $0x1e8] sm:$0xff]   ;;  %v1335_v1 = vld [vmem:[%s1663_s1 + $0x130] sm:$0xff]   ;;  %v1338_v4 = vld [vmem:[%s1663_s1 + $0x178] sm:$0xff]  }
  0x17   :  { %v1333_v63 = vld [vmem:[%s1663_s1 + $0x1a8] sm:$0xff]   ;;  %v1336_v2 = vld [vmem:[%s1663_s1 + $0x1f0] sm:$0xff]   ;;  %v1339_v5 = vld [vmem:[%s1663_s1 + $0x138] sm:$0xff]  }
  0x18   :  { %1135 = vmatpush3.bf16.msra.mxu0 %v1288_v22  ;;  %v1337_v3 = vld [vmem:[%s1663_s1 + $0x1b0] sm:$0xff]   ;;  %v1340_v6 = vld [vmem:[%s1663_s1 + $0x1f8] sm:$0xff]   ;;  %v1345_v10 = vld [vmem:[%s1663_s1 + $0x200] sm:$0xff]  }
  0x19   :  { %1163 = vmatpush3.bf16.msra.mxu1 %v1289_v23  ;;  %1136 = vmatprep.subr.bf16.mxu0 %v1290_v24  ;;  %v1341_v7 = vld [vmem:[%s1664_s0 + $0x10] ss:$36 sps:$4 sm:$0xff]   ;;  %v1344_v9 = vld [vmem:[%s1663_s1 + $0x1b8] sm:$0xff]   ;;  %v1349_v13 = vld [vmem:[%s1663_s1 + $0x208] sm:$0xff]  }
  0x1a   :  { %1164 = vmatprep.subr.bf16.mxu1 %v1291_v25  ;;  %v1343_v8 = vld [vmem:[%s1664_s0 + $0x14] ss:$36 sps:$4 sm:$0xff]   ;;  %v1348_v12 = vld [vmem:[%s1664_s0 + $0x1c] ss:$36 sps:$4 sm:$0xff]   ;;  %v1354_v17 = vld [vmem:[%s1664_s0 + $0x64] ss:$36 sps:$4 sm:$0xff]  }
  0x1b   :  { %v1346_v11 = vld [vmem:[%s1664_s0 + $0x18] ss:$36 sps:$4 sm:$0xff]   ;;  %v1353_v16 = vld [vmem:[%s1663_s1 + $0x210] sm:$0xff]   ;;  %v1356_v18 = vld [vmem:[%s1664_s0 + $0x60] ss:$36 sps:$4 sm:$0xff]  }
  0x1c   :  { %1137 = vmatpush3.bf16.msra.mxu0 %v1292_v26  ;;  %v1350_v14 = vld [vmem:[%s1664_s0 + $0x5c] ss:$36 sps:$4 sm:$0xff]   ;;  %v1359_v22 = vld [vmem:[%s1663_s1 + $0x228] sm:$0xff]   ;;  %v1360_v23 = vld [vmem:[%s1663_s1 + $0x230] sm:$0xff]  }
  0x1d   :  { %1165 = vmatpush3.bf16.msra.mxu1 %v1293_v27  ;;  %1138 = vmatprep.subr.bf16.mxu0 %v1294_v28  ;;  %v1352_v15 = vld [vmem:[%s1664_s0 + $0x58] ss:$36 sps:$4 sm:$0xff]   ;;  %v1358_v20 = vld [vmem:[%s1663_s1 + $0x220] sm:$0xff]   ;;  %v1363_v25 = vld [vmem:[%s1664_s0 + $0x68] ss:$36 sps:$4 sm:$0xff]  }
  0x1e   :  { %1166 = vmatprep.subr.bf16.mxu1 %v1295_v29  ;;  %v1357_v19 = vld [vmem:[%s1663_s1 + $0x218] sm:$0xff]   ;;  %v1362_v21 = vld [vmem:[%s1664_s0 + $0x20] ss:$36 sps:$4 sm:$0xff]  }
  0x1f   :  { %v1361_v24 = vld [vmem:[%s1663_s1 + $0x238] sm:$0xff]  }
  0x20   :  { %1139 = vmatpush3.bf16.msra.mxu0 %v1296_v30 }
  0x21   :  { %1167 = vmatpush3.bf16.msra.mxu1 %v1297_v31  ;;  %1180 = vmatprep.subr.bf16.mxu0 %v1304_v36 }
  0x22   :  { %1208 = vmatprep.subr.bf16.mxu1 %v1306_v38 }
  0x23   :  { %748 = vmatmul.mubr.bf16.vlgmr.msra.gmra.mrb[0].mxu0 %v1298_v32 }
  0x24   :  { %797 = vmatmul.mubr.bf16.vlgmr.msra.gmra.mrb[0].mxu1 %v1301_v34  ;;  %1181 = vmatpush3.bf16.msra.mxu0 %v1305_v37 }
  0x25   :  { %1209 = vmatpush3.bf16.msra.mxu1 %v1307_v39  ;;  %1182 = vmatprep.subr.bf16.mxu0 %v1308_v40 }
  0x26   :  { %1210 = vmatprep.subr.bf16.mxu1 %v1310_v42  ;;  %755 = vmatprep.mubr.bf16.mxu0 %v1325_v57 }
  0x27   :  { %804 = vmatprep.mubr.bf16.mxu1 %v1327_v58 }
  0x28   :  { %1183 = vmatpush3.bf16.msra.mxu0 %v1309_v41 }
  0x29   :  { %1211 = vmatpush3.bf16.msra.mxu1 %v1311_v43  ;;  %1184 = vmatprep.subr.bf16.mxu0 %v1312_v44 }
  0x2a   :  { %1212 = vmatprep.subr.bf16.mxu1 %v1314_v46 }
  0x2b   :  { %756 = vmatmul.mubr.bf16.gmra.mrb[4].mxu0 %v1330_v60 }
  0x2c   :  { %1185 = vmatpush3.bf16.msra.mxu0 %v1313_v45  ;;  %805 = vmatmul.mubr.bf16.gmra.mrb[4].mxu1 %v1331_v61 }
  0x2d   :  { %1213 = vmatpush3.bf16.msra.mxu1 %v1315_v47  ;;  %1186 = vmatprep.subr.bf16.mxu0 %v1316_v48 }
  0x2e   :  { %1214 = vmatprep.subr.bf16.mxu1 %v1318_v50  ;;  %845 = vmatprep.mubr.bf16.mxu0 %v1343_v8 }
  0x2f   :  { %894 = vmatprep.mubr.bf16.mxu1 %v1348_v12 }
  0x30   :  { %1187 = vmatpush3.bf16.msra.mxu0 %v1317_v49 }
  0x31   :  { %1215 = vmatpush3.bf16.msra.mxu1 %v1319_v51  ;;  %1188 = vmatprep.subr.bf16.mxu0 %v1320_v52 }
  0x32   :  { %1216 = vmatprep.subr.bf16.mxu1 %v1322_v54 }
  0x34   :  { %1189 = vmatpush3.bf16.msra.mxu0 %v1321_v53 }
  0x35   :  { %1217 = vmatpush3.bf16.msra.mxu1 %v1323_v55  ;;  %1190 = vmatprep.subr.bf16.mxu0 %v1324_v56 }
  0x36   :  { %1218 = vmatprep.subr.bf16.mxu1 %v1332_v62 }
  0x38   :  { %1191 = vmatpush3.bf16.msra.mxu0 %v1329_v59 }
  0x39   :  { %1219 = vmatpush3.bf16.msra.mxu1 %v1333_v63  ;;  %1192 = vmatprep.subr.bf16.mxu0 %v1334_v0 }
  0x3a   :  { %1220 = vmatprep.subr.bf16.mxu1 %v1336_v2 }
  0x3c   :  { %1193 = vmatpush3.bf16.msra.mxu0 %v1335_v1 }
  0x3d   :  { %1221 = vmatpush3.bf16.msra.mxu1 %v1337_v3  ;;  %1194 = vmatprep.subr.bf16.mxu0 %v1338_v4 }
  0x3e   :  { %1222 = vmatprep.subr.bf16.mxu1 %v1340_v6 }
  0x40   :  { %1195 = vmatpush3.bf16.msra.mxu0 %v1339_v5 }
  0x41   :  { %1223 = vmatpush3.bf16.msra.mxu1 %v1344_v9  ;;  %1246 = vmatprep.subr.bf16.mxu0 %v1345_v10 }
  0x43   :  { %846 = vmatmul.mubr.bf16.vlgmr.msra.gmra.mrb[8].mxu0 %v1341_v7 }
  0x44   :  { %1247 = vmatpush3.bf16.msra.mxu0 %v1345_v10  ;;  %895 = vmatmul.mubr.bf16.vlgmr.msra.gmra.mrb[8].mxu1 %v1346_v11 }
  0x45   :  { %1248 = vmatprep.subr.bf16.mxu0 %v1349_v13  ;;  %853 = vmatprep.mubr.bf16.mxu0 %v1350_v14 }
  0x46   :  { %902 = vmatprep.mubr.bf16.mxu1 %v1354_v17 }
  0x48   :  { %1249 = vmatpush3.bf16.msra.mxu0 %v1349_v13 }
  0x49   :  { %1250 = vmatprep.subr.bf16.mxu0 %v1353_v16 }
  0x4b   :  { %854 = vmatmul.mubr.bf16.gmra.mrb[12].mxu0 %v1352_v15 }
  0x4c   :  { %1251 = vmatpush3.bf16.msra.mxu0 %v1353_v16  ;;  %903 = vmatmul.mubr.bf16.gmra.mrb[12].mxu1 %v1356_v18 }
  0x4d   :  { %1252 = vmatprep.subr.bf16.mxu0 %v1357_v19  ;;  %1262 = vmatprep.mubr.bf16.mxu0 %v1362_v21 }
  0x50   :  { %1253 = vmatpush3.bf16.msra.mxu0 %v1357_v19 }
  0x51   :  { %1254 = vmatprep.subr.bf16.mxu0 %v1358_v20 }
  0x54   :  { %1255 = vmatpush3.bf16.msra.mxu0 %v1358_v20 }
  0x55   :  { %1256 = vmatprep.subr.bf16.mxu0 %v1359_v22 }
  0x58   :  { %1257 = vmatpush3.bf16.msra.mxu0 %v1359_v22 }
  0x59   :  { %1258 = vmatprep.subr.bf16.mxu0 %v1360_v23 }
  0x5c   :  { %1259 = vmatpush3.bf16.msra.mxu0 %v1360_v23  ;;  %v1104_v23 = vld [vmem:[%s1665_s2] ss:$0 sm:$0xff] }
  0x5d   :  { %1260 = vmatprep.subr.bf16.mxu0 %v1361_v24 }
  0x60   :  { %1261 = vmatpush3.bf16.msra.mxu0 %v1361_v24 }
  0x63   :  { %1263 = vmatmul.mubr.bf16.vlgmr.msra.gmra.mrb[16].mxu0 %v1363_v25 }
  0xf6   :  { %v1140_v26 = vpop.f32.mrb[0].mxu0 }
  0xf7   :  { %v1168_v27 = vpop.f32.mrb[0].mxu1  ;;  %v1141_v28 = vpop.f32.mrb[1].mxu0 }
  0xf8   :  { %v1142_v29 = vadd.f32 %v1141_v28, %v1140_v26  ;;  %v1169_v30 = vpop.f32.mrb[1].mxu1  ;;  %v1143_v31 = vpop.f32.mrb[2].mxu0 }
  0xf9   :  { %v1170_v32 = vadd.f32 %v1169_v30, %v1168_v27  ;;  %v1171_v33 = vpop.f32.mrb[2].mxu1  ;;  %v1144_v34 = vpop.f32.mrb[3].mxu0 }
  0xfa   :  { %v1145_v35 = vadd.f32 %v1144_v34, %v1143_v31  ;;  %v1172_v36 = vpop.f32.mrb[3].mxu1 }
  0xfb   :  { %v799_v37 = vadd.f32 %v1170_v32, %v1142_v29  ;;  %v1173_v38 = vadd.f32 %v1172_v36, %v1171_v33 }
  0xfd   :  { %v802_v39 = vadd.f32 %v1173_v38, %v1145_v35 }
  0xfe   :  { %v1146_v40 = vpop.f32.mrb[4].mxu0 }
  0xff   :  { %v1174_v41 = vpop.f32.mrb[4].mxu1  ;;  %v1147_v42 = vpop.f32.mrb[5].mxu0 }
 0x100   :  { %v1175_v43 = vpop.f32.mrb[5].mxu1  ;;  %v1148_v44 = vadd.f32 %v1147_v42, %v1146_v40  ;;  %v1149_v46 = vpop.f32.mrb[6].mxu0 }
 0x101   :  { %v1176_v45 = vadd.f32 %v1175_v43, %v1174_v41  ;;  %v1177_v47 = vpop.f32.mrb[6].mxu1  ;;  %v1150_v48 = vpop.f32.mrb[7].mxu0 }
 0x102   :  { %v1178_v49 = vpop.f32.mrb[7].mxu1  ;;  %v1151_v51 = vadd.f32 %v1150_v48, %v1149_v46 }
 0x103   :  { %v807_v50 = vadd.f32 %v1176_v45, %v1148_v44  ;;  %v1179_v52 = vadd.f32 %v1178_v49, %v1177_v47 }
 0x105   :  { %v810_v53 = vadd.f32 %v1179_v52, %v1151_v51 }
 0x116   :  { %v1196_v54 = vpop.f32.mrb[8].mxu0 }
 0x117   :  { %v1197_v55 = vpop.f32.mrb[9].mxu0  ;;  %v1224_v58 = vpop.f32.mrb[8].mxu1 }
 0x118   :  { %v1198_v56 = vadd.f32 %v1197_v55, %v1196_v54  ;;  %v1199_v57 = vpop.f32.mrb[10].mxu0  ;;  %v1225_v62 = vpop.f32.mrb[9].mxu1 }
 0x119   :  { %v1200_v59 = vpop.f32.mrb[11].mxu0  ;;  %v1226_v63 = vadd.f32 %v1225_v62, %v1224_v58  ;;  %v1227_v0 = vpop.f32.mrb[10].mxu1 }
 0x11a   :  { %v848_v60 = vadd.f32 %v1198_v56, %v799_v37  ;;  %v1201_v61 = vadd.f32 %v1200_v59, %v1199_v57  ;;  %v1228_v2 = vpop.f32.mrb[11].mxu1 }
 0x11b   :  { %v1229_v3 = vadd.f32 %v1228_v2, %v1227_v0 }
 0x11c   :  { %v851_v1 = vadd.f32 %v1201_v61, %v802_v39  ;;  %v897_v4 = vadd.f32 %v1226_v63, %v848_v60 }
 0x11e   :  { %v1202_v5 = vpop.f32.mrb[12].mxu0  ;;  %v900_v7 = vadd.f32 %v1229_v3, %v851_v1 }
 0x11f   :  { %v1203_v6 = vpop.f32.mrb[13].mxu0  ;;  %v1230_v10 = vpop.f32.mrb[12].mxu1 }
 0x120   :  { %v1204_v8 = vadd.f32 %v1203_v6, %v1202_v5  ;;  %v1205_v9 = vpop.f32.mrb[14].mxu0  ;;  %v1231_v14 = vpop.f32.mrb[13].mxu1 }
 0x121   :  { %v1206_v11 = vpop.f32.mrb[15].mxu0  ;;  %v1232_v15 = vadd.f32 %v1231_v14, %v1230_v10  ;;  %v1233_v16 = vpop.f32.mrb[14].mxu1 }
 0x122   :  { %v856_v12 = vadd.f32 %v1204_v8, %v807_v50  ;;  %v1207_v13 = vadd.f32 %v1206_v11, %v1205_v9  ;;  %v1234_v18 = vpop.f32.mrb[15].mxu1 }
 0x123   :  { %v1235_v19 = vadd.f32 %v1234_v18, %v1233_v16 }
 0x124   :  { %v859_v17 = vadd.f32 %v1207_v13, %v810_v53  ;;  %v905_v20 = vadd.f32 %v1232_v15, %v856_v12 }
 0x126   :  { %v908_v21 = vadd.f32 %v1235_v19, %v859_v17 }
 0x136   :  { %v1264_v22 = vpop.f32.mrb[16].mxu0 }
 0x137   :  { %v954_v24 = vadd.f32 %v1264_v22, %v905_v20  ;;  %v945_v25 = vpop.f32.mrb[17].mxu0 }
 0x138   :  { %v946_v26 = vadd.f32 %v945_v25, %v897_v4  ;;  %v1265_v27 = vpop.f32.mrb[18].mxu0 }
 0x139   :  { %v984_v28 = vadd.f32 %v1104_v23, %v954_v24  ;;  %v957_v29 = vadd.f32 %v1265_v27, %v908_v21  ;;  %v948_v30 = vpop.f32.mrb[19].mxu0 }
 0x13a   :  { %v982_v31 = vadd.f32 %v1104_v23, %v946_v26  ;;  %v949_v32 = vadd.f32 %v948_v30, %v900_v7 }
 0x13b   :  { %v985_v33 = vadd.f32 %v1104_v23, %v957_v29  ;;  %v988_v35 = vmax.f32 %v984_v28, 0.0 }
 0x13c   :  { %v983_v34 = vadd.f32 %v1104_v23, %v949_v32  ;;  %v986_v37 = vmax.f32 %v982_v31, 0.0 }
 0x13d   :  { %v989_v36 = vmax.f32 %v985_v33, 0.0 }
 0x13e   :  { %v987_v38 = vmax.f32 %v983_v34, 0.0 }
 0x13f   :  { %v1121_v39 = vpack.c.bf16 %v989_v36, %v988_v35 }
 0x140   :  { %v1116_v40 = vpack.c.bf16 %v987_v38, %v986_v37 }
 0x141   :  { %1123 = vst [vmem:[%s1666_s3 + $0x8] sm:$0xff] %v1121_v39  }
 0x142   :  { %1117 = vst [vmem:[%s1666_s3] sm:$0xff] %v1116_v40  }

// kernel: _lambda_.31
= control target key start
LH: loop header
LB: loop body
LE: loop exit
PB: predicated region body
PF: predicated region fallthrough
CT: control target
= control target key end

     0   :  { %s2034_s1 = inlined_call_operand.vmem [shape: bf16[1152,256], index: 1, kind: input, shape index: {}]   ;;  %s2035_s0 = inlined_call_operand.vmem [shape: bf16[8,1152], index: 0, kind: input, shape index: {}]   ;;  %s2036_s2 = inlined_call_operand.vmem [shape: f32[1,256], index: 2, kind: input, shape index: {}]   ;;  %s2037_s3 = inlined_call_operand.vmem [shape: bf16[8,256], index: 3, kind: output, shape index: {}]  }
   0x1   :  { %v1323_v0 = vld [vmem:[%s2034_s1 + $0x4] ss:$8 sps:$4 sm:$0xff]   ;;  %v1327_v2 = vld [vmem:[%s2034_s1] ss:$8 sps:$4 sm:$0xff]   ;;  %v1329_v4 = vld [vmem:[%s2034_s1 + $0x14] ss:$8 sps:$4 sm:$0xff]  }
   0x2   :  { %v1325_v1 = vld [vmem:[%s2034_s1 + $0x104] ss:$8 sps:$4 sm:$0xff]   ;;  %924 = vmatprep.subr.bf16.mxu0 %v1323_v0  ;;  %v1328_v3 = vld [vmem:[%s2034_s1 + $0x100] ss:$8 sps:$4 sm:$0xff]   ;;  %v1331_v5 = vld [vmem:[%s2034_s1 + $0x114] ss:$8 sps:$4 sm:$0xff]  }
   0x3   :  { %965 = vmatprep.subr.bf16.mxu1 %v1325_v1  ;;  %925 = vmatpush1.bf16.msra.mxu0 %v1327_v2  ;;  %v1333_v6 = vld [vmem:[%s2034_s1 + $0x10] ss:$8 sps:$4 sm:$0xff]   ;;  %v1335_v8 = vld [vmem:[%s2034_s1 + $0x24] ss:$8 sps:$4 sm:$0xff]   ;;  %v1339_v10 = vld [vmem:[%s2034_s1 + $0x20] ss:$8 sps:$4 sm:$0xff]  }
   0x4   :  { %966 = vmatpush1.bf16.msra.mxu1 %v1328_v3  ;;  %926 = vmatprep.subr.bf16.mxu0 %v1329_v4  ;;  %v1334_v7 = vld [vmem:[%s2034_s1 + $0x110] ss:$8 sps:$4 sm:$0xff]   ;;  %v1337_v9 = vld [vmem:[%s2034_s1 + $0x124] ss:$8 sps:$4 sm:$0xff]   ;;  %v1340_v11 = vld [vmem:[%s2034_s1 + $0x120] ss:$8 sps:$4 sm:$0xff]  }
   0x5   :  { %967 = vmatprep.subr.bf16.mxu1 %v1331_v5  ;;  %v1341_v12 = vld [vmem:[%s2034_s1 + $0x34] ss:$8 sps:$4 sm:$0xff]   ;;  %v1345_v14 = vld [vmem:[%s2034_s1 + $0x30] ss:$8 sps:$4 sm:$0xff]   ;;  %v1347_v16 = vld [vmem:[%s2034_s1 + $0x44] ss:$8 sps:$4 sm:$0xff]  }
   0x6   :  { %v1343_v13 = vld [vmem:[%s2034_s1 + $0x134] ss:$8 sps:$4 sm:$0xff]   ;;  %v1346_v15 = vld [vmem:[%s2034_s1 + $0x130] ss:$8 sps:$4 sm:$0xff]   ;;  %v1349_v17 = vld [vmem:[%s2034_s1 + $0x144] ss:$8 sps:$4 sm:$0xff]  }
   0x7   :  { %927 = vmatpush1.bf16.msra.mxu0 %v1333_v6  ;;  %v1351_v18 = vld [vmem:[%s2034_s1 + $0x40] ss:$8 sps:$4 sm:$0xff]   ;;  %v1353_v20 = vld [vmem:[%s2034_s1 + $0x54] ss:$8 sps:$4 sm:$0xff]   ;;  %v1357_v22 = vld [vmem:[%s2034_s1 + $0x50] ss:$8 sps:$4 sm:$0xff]  }
   0x8   :  { %968 = vmatpush1.bf16.msra.mxu1 %v1334_v7  ;;  %928 = vmatprep.subr.bf16.mxu0 %v1335_v8  ;;  %v1352_v19 = vld [vmem:[%s2034_s1 + $0x140] ss:$8 sps:$4 sm:$0xff]   ;;  %v1355_v21 = vld [vmem:[%s2034_s1 + $0x154] ss:$8 sps:$4 sm:$0xff]   ;;  %v1358_v23 = vld [vmem:[%s2034_s1 + $0x150] ss:$8 sps:$4 sm:$0xff]  }
   0x9   :  { %969 = vmatprep.subr.bf16.mxu1 %v1337_v9  ;;  %v1359_v24 = vld [vmem:[%s2034_s1 + $0x64] ss:$8 sps:$4 sm:$0xff]   ;;  %v1363_v26 = vld [vmem:[%s2034_s1 + $0x60] ss:$8 sps:$4 sm:$0xff]   ;;  %v1365_v28 = vld [vmem:[%s2034_s1 + $0x74] ss:$8 sps:$4 sm:$0xff]  }
   0xa   :  { %v1361_v25 = vld [vmem:[%s2034_s1 + $0x164] ss:$8 sps:$4 sm:$0xff]   ;;  %v1364_v27 = vld [vmem:[%s2034_s1 + $0x160] ss:$8 sps:$4 sm:$0xff]   ;;  %v1367_v29 = vld [vmem:[%s2034_s1 + $0x174] ss:$8 sps:$4 sm:$0xff]  }
   0xb   :  { %929 = vmatpush1.bf16.msra.mxu0 %v1339_v10  ;;  %v1369_v30 = vld [vmem:[%s2034_s1 + $0x70] ss:$8 sps:$4 sm:$0xff]   ;;  %v1371_v32 = vld [vmem:[%s2034_s1 + $0x84] ss:$8 sps:$4 sm:$0xff]   ;;  %v1375_v34 = vld [vmem:[%s2034_s1 + $0x80] ss:$8 sps:$4 sm:$0xff]  }
   0xc   :  { %970 = vmatpush1.bf16.msra.mxu1 %v1340_v11  ;;  %930 = vmatprep.subr.bf16.mxu0 %v1341_v12  ;;  %v1370_v31 = vld [vmem:[%s2034_s1 + $0x170] ss:$8 sps:$4 sm:$0xff]   ;;  %v1373_v33 = vld [vmem:[%s2034_s1 + $0x184] ss:$8 sps:$4 sm:$0xff]   ;;  %v1376_v35 = vld [vmem:[%s2034_s1 + $0x180] ss:$8 sps:$4 sm:$0xff]  }
   0xd   :  { %971 = vmatprep.subr.bf16.mxu1 %v1343_v13  ;;  %v1377_v36 = vld [vmem:[%s2034_s1 + $0x94] ss:$8 sps:$4 sm:$0xff]   ;;  %v1381_v38 = vld [vmem:[%s2034_s1 + $0x90] ss:$8 sps:$4 sm:$0xff]   ;;  %v1383_v40 = vld [vmem:[%s2034_s1 + $0xa4] ss:$8 sps:$4 sm:$0xff]  }
   0xe   :  { %v1379_v37 = vld [vmem:[%s2034_s1 + $0x194] ss:$8 sps:$4 sm:$0xff]   ;;  %v1382_v39 = vld [vmem:[%s2034_s1 + $0x190] ss:$8 sps:$4 sm:$0xff]   ;;  %v1385_v41 = vld [vmem:[%s2034_s1 + $0x1a4] ss:$8 sps:$4 sm:$0xff]  }
   0xf   :  { %931 = vmatpush1.bf16.msra.mxu0 %v1345_v14  ;;  %v1387_v42 = vld [vmem:[%s2034_s1 + $0xa0] ss:$8 sps:$4 sm:$0xff]   ;;  %v1389_v44 = vld [vmem:[%s2034_s1 + $0xb4] ss:$8 sps:$4 sm:$0xff]   ;;  %v1393_v49 = vld [vmem:[%s2034_s1 + $0xb0] ss:$8 sps:$4 sm:$0xff]  }
  0x10   :  { %972 = vmatpush1.bf16.msra.mxu1 %v1346_v15  ;;  %932 = vmatprep.subr.bf16.mxu0 %v1347_v16  ;;  %v1388_v43 = vld [vmem:[%s2034_s1 + $0x1a0] ss:$8 sps:$4 sm:$0xff]   ;;  %v1391_v45 = vld [vmem:[%s2034_s1 + $0x1b4] ss:$8 sps:$4 sm:$0xff]   ;;  %v1394_v50 = vld [vmem:[%s2034_s1 + $0x1b0] ss:$8 sps:$4 sm:$0xff]  }
  0x11   :  { %973 = vmatprep.subr.bf16.mxu1 %v1349_v17  ;;  %v23_v46 = vld [vmem:[%s2035_s0] sm:$0xff]  ;;  %v24_v48 = vld [vmem:[%s2035_s0 + $0x8] sm:$0xff]  ;;  %v1401_v56 = vld [vmem:[%s2034_s1 + $0xd4] ss:$8 sps:$4 sm:$0xff]  }
  0x12   :  { %v1168_v47 = vcombine.high %v23_v46, %v23_v46  ;;  %v1170_v51 = vcombine.high %v24_v48, %v24_v48  ;;  %v1395_v52 = vld [vmem:[%s2034_s1 + $0xc4] ss:$8 sps:$4 sm:$0xff]   ;;  %v1399_v54 = vld [vmem:[%s2034_s1 + $0xc0] ss:$8 sps:$4 sm:$0xff]   ;;  %v1403_v57 = vld [vmem:[%s2034_s1 + $0x1d4] ss:$8 sps:$4 sm:$0xff]   ;;  %v1167_v6 = vcombine.low %v23_v46, %v23_v46  ;;  %v1169_v7 = vcombine.low %v24_v48, %v24_v48 }
  0x13   :  { %933 = vmatpush1.bf16.msra.mxu0 %v1351_v18  ;;  %v1397_v53 = vld [vmem:[%s2034_s1 + $0x1c4] ss:$8 sps:$4 sm:$0xff]   ;;  %v1400_v55 = vld [vmem:[%s2034_s1 + $0x1c0] ss:$8 sps:$4 sm:$0xff]   ;;  %v1405_v58 = vld [vmem:[%s2034_s1 + $0xd0] ss:$8 sps:$4 sm:$0xff]  }
  0x14   :  { %974 = vmatpush1.bf16.msra.mxu1 %v1352_v19  ;;  %934 = vmatprep.subr.bf16.mxu0 %v1353_v20  ;;  %v1406_v59 = vld [vmem:[%s2034_s1 + $0x1d0] ss:$8 sps:$4 sm:$0xff]   ;;  %v1407_v60 = vld [vmem:[%s2034_s1 + $0xe4] ss:$8 sps:$4 sm:$0xff]   ;;  %v1411_v62 = vld [vmem:[%s2034_s1 + $0xe0] ss:$8 sps:$4 sm:$0xff]  }
  0x15   :  { %975 = vmatprep.subr.bf16.mxu1 %v1355_v21  ;;  %956 = vmatprep.mubr.bf16.mxu0 %v1168_v47  ;;  %v1409_v61 = vld [vmem:[%s2034_s1 + $0x1e4] ss:$8 sps:$4 sm:$0xff]   ;;  %v1412_v63 = vld [vmem:[%s2034_s1 + $0x1e0] ss:$8 sps:$4 sm:$0xff]   ;;  %v1413_v0 = vld [vmem:[%s2034_s1 + $0xf4] ss:$8 sps:$4 sm:$0xff]  }
  0x16   :  { %997 = vmatprep.mubr.bf16.mxu1 %v1170_v51  ;;  %v1415_v1 = vld [vmem:[%s2034_s1 + $0x1f4] ss:$8 sps:$4 sm:$0xff]   ;;  %v1417_v2 = vld [vmem:[%s2034_s1 + $0xf0] ss:$8 sps:$4 sm:$0xff]   ;;  %v1425_v4 = vld [vmem:[%s2034_s1 + $0x204] ss:$8 sps:$4 sm:$0xff]  }
  0x17   :  { %935 = vmatpush1.bf16.msra.mxu0 %v1357_v22  ;;  %v1418_v3 = vld [vmem:[%s2034_s1 + $0x1f0] ss:$8 sps:$4 sm:$0xff]   ;;  %v1428_v5 = vld [vmem:[%s2034_s1 + $0x304] ss:$8 sps:$4 sm:$0xff]   ;;  %v1423_v8 = vld [vmem:[%s2034_s1 + $0x200] ss:$8 sps:$4 sm:$0xff]  }
  0x18   :  { %976 = vmatpush1.bf16.msra.mxu1 %v1358_v23  ;;  %936 = vmatprep.subr.bf16.mxu0 %v1359_v24  ;;  %v1426_v9 = vld [vmem:[%s2034_s1 + $0x300] ss:$8 sps:$4 sm:$0xff]   ;;  %v1431_v10 = vld [vmem:[%s2034_s1 + $0x214] ss:$8 sps:$4 sm:$0xff]   ;;  %v1429_v12 = vld [vmem:[%s2034_s1 + $0x210] ss:$8 sps:$4 sm:$0xff]  }
  0x19   :  { %977 = vmatprep.subr.bf16.mxu1 %v1361_v25  ;;  %v1434_v11 = vld [vmem:[%s2034_s1 + $0x314] ss:$8 sps:$4 sm:$0xff]   ;;  %v1432_v13 = vld [vmem:[%s2034_s1 + $0x310] ss:$8 sps:$4 sm:$0xff]   ;;  %v1437_v14 = vld [vmem:[%s2034_s1 + $0x224] ss:$8 sps:$4 sm:$0xff]  }
  0x1a   :  { %v1440_v15 = vld [vmem:[%s2034_s1 + $0x324] ss:$8 sps:$4 sm:$0xff]   ;;  %v1435_v16 = vld [vmem:[%s2034_s1 + $0x220] ss:$8 sps:$4 sm:$0xff]   ;;  %v1443_v18 = vld [vmem:[%s2034_s1 + $0x234] ss:$8 sps:$4 sm:$0xff]  }
  0x1b   :  { %937 = vmatpush1.bf16.msra.mxu0 %v1363_v26  ;;  %v1438_v17 = vld [vmem:[%s2034_s1 + $0x320] ss:$8 sps:$4 sm:$0xff]   ;;  %v1446_v19 = vld [vmem:[%s2034_s1 + $0x334] ss:$8 sps:$4 sm:$0xff]   ;;  %v1441_v20 = vld [vmem:[%s2034_s1 + $0x230] ss:$8 sps:$4 sm:$0xff]  }
  0x1c   :  { %978 = vmatpush1.bf16.msra.mxu1 %v1364_v27  ;;  %938 = vmatprep.subr.bf16.mxu0 %v1365_v28  ;;  %v1444_v21 = vld [vmem:[%s2034_s1 + $0x330] ss:$8 sps:$4 sm:$0xff]   ;;  %v1449_v22 = vld [vmem:[%s2034_s1 + $0x244] ss:$8 sps:$4 sm:$0xff]   ;;  %v1447_v24 = vld [vmem:[%s2034_s1 + $0x240] ss:$8 sps:$4 sm:$0xff]  }
  0x1d   :  { %979 = vmatprep.subr.bf16.mxu1 %v1367_v29  ;;  %v1452_v23 = vld [vmem:[%s2034_s1 + $0x344] ss:$8 sps:$4 sm:$0xff]   ;;  %v1450_v25 = vld [vmem:[%s2034_s1 + $0x340] ss:$8 sps:$4 sm:$0xff]   ;;  %v1455_v26 = vld [vmem:[%s2034_s1 + $0x254] ss:$8 sps:$4 sm:$0xff]  }
  0x1e   :  { %v1458_v27 = vld [vmem:[%s2034_s1 + $0x354] ss:$8 sps:$4 sm:$0xff]   ;;  %v1453_v28 = vld [vmem:[%s2034_s1 + $0x250] ss:$8 sps:$4 sm:$0xff]   ;;  %v1488_v51 = vld [vmem:[%s2034_s1 + $0x3a4] ss:$8 sps:$4 sm:$0xff]  }
  0x1f   :  { %939 = vmatpush1.bf16.msra.mxu0 %v1369_v30  ;;  %v1456_v29 = vld [vmem:[%s2034_s1 + $0x350] ss:$8 sps:$4 sm:$0xff]   ;;  %v1461_v30 = vld [vmem:[%s2034_s1 + $0x264] ss:$8 sps:$4 sm:$0xff]   ;;  %v1479_v46 = vld [vmem:[%s2034_s1 + $0x294] ss:$8 sps:$4 sm:$0xff]  }
  0x20   :  { %980 = vmatpush1.bf16.msra.mxu1 %v1370_v31  ;;  %940 = vmatprep.subr.bf16.mxu0 %v1371_v32  ;;  %v1464_v31 = vld [vmem:[%s2034_s1 + $0x364] ss:$8 sps:$4 sm:$0xff]   ;;  %v1848_v32 = vld [vmem:[%s2035_s0 + $0x10] sm:$0xff] }
  0x21   :  { %981 = vmatprep.subr.bf16.mxu1 %v1373_v33  ;;  %v1459_v33 = vld [vmem:[%s2034_s1 + $0x260] ss:$8 sps:$4 sm:$0xff]   ;;  %v1482_v47 = vld [vmem:[%s2034_s1 + $0x394] ss:$8 sps:$4 sm:$0xff]   ;;  %v1477_v48 = vld [vmem:[%s2034_s1 + $0x290] ss:$8 sps:$4 sm:$0xff]  }
  0x23   :  { %941 = vmatpush1.bf16.msra.mxu0 %v1375_v34  ;;  %v1462_v34 = vld [vmem:[%s2034_s1 + $0x360] ss:$8 sps:$4 sm:$0xff]  }
  0x24   :  { %982 = vmatpush1.bf16.msra.mxu1 %v1376_v35  ;;  %942 = vmatprep.subr.bf16.mxu0 %v1377_v36  ;;  %v1172_v35 = vcombine.high %v1848_v32, %v1848_v32  ;;  %v1861_v36 = vld [vmem:[%s2035_s0 + $0x18] sm:$0xff] }
  0x25   :  { %983 = vmatprep.subr.bf16.mxu1 %v1379_v37  ;;  %v1467_v37 = vld [vmem:[%s2034_s1 + $0x274] ss:$8 sps:$4 sm:$0xff]  }
  0x27   :  { %943 = vmatpush1.bf16.msra.mxu0 %v1381_v38  ;;  %v1174_v38 = vcombine.high %v1861_v36, %v1861_v36 }
  0x28   :  { %984 = vmatpush1.bf16.msra.mxu1 %v1382_v39  ;;  %944 = vmatprep.subr.bf16.mxu0 %v1383_v40  ;;  %v1470_v39 = vld [vmem:[%s2034_s1 + $0x374] ss:$8 sps:$4 sm:$0xff]   ;;  %v1465_v40 = vld [vmem:[%s2034_s1 + $0x270] ss:$8 sps:$4 sm:$0xff]  }
  0x29   :  { %985 = vmatprep.subr.bf16.mxu1 %v1385_v41  ;;  %v1468_v41 = vld [vmem:[%s2034_s1 + $0x370] ss:$8 sps:$4 sm:$0xff]  }
  0x2b   :  { %945 = vmatpush1.bf16.msra.mxu0 %v1387_v42  ;;  %v1473_v42 = vld [vmem:[%s2034_s1 + $0x284] ss:$8 sps:$4 sm:$0xff]  }
  0x2c   :  { %986 = vmatpush1.bf16.msra.mxu1 %v1388_v43  ;;  %946 = vmatprep.subr.bf16.mxu0 %v1389_v44  ;;  %v1476_v43 = vld [vmem:[%s2034_s1 + $0x384] ss:$8 sps:$4 sm:$0xff]   ;;  %v1471_v44 = vld [vmem:[%s2034_s1 + $0x280] ss:$8 sps:$4 sm:$0xff]  }
  0x2d   :  { %987 = vmatprep.subr.bf16.mxu1 %v1391_v45  ;;  %v1474_v45 = vld [vmem:[%s2034_s1 + $0x380] ss:$8 sps:$4 sm:$0xff]  }
  0x2f   :  { %947 = vmatpush1.bf16.msra.mxu0 %v1393_v49  ;;  %v1480_v49 = vld [vmem:[%s2034_s1 + $0x390] ss:$8 sps:$4 sm:$0xff]  }
  0x30   :  { %988 = vmatpush1.bf16.msra.mxu1 %v1394_v50  ;;  %948 = vmatprep.subr.bf16.mxu0 %v1395_v52  ;;  %v1485_v50 = vld [vmem:[%s2034_s1 + $0x2a4] ss:$8 sps:$4 sm:$0xff]   ;;  %v1483_v52 = vld [vmem:[%s2034_s1 + $0x2a0] ss:$8 sps:$4 sm:$0xff]  }
  0x31   :  { %989 = vmatprep.subr.bf16.mxu1 %v1397_v53  ;;  %v1486_v53 = vld [vmem:[%s2034_s1 + $0x3a0] ss:$8 sps:$4 sm:$0xff]  }
  0x33   :  { %949 = vmatpush1.bf16.msra.mxu0 %v1399_v54  ;;  %v1491_v54 = vld [vmem:[%s2034_s1 + $0x2b4] ss:$8 sps:$4 sm:$0xff]  }
  0x34   :  { %990 = vmatpush1.bf16.msra.mxu1 %v1400_v55  ;;  %950 = vmatprep.subr.bf16.mxu0 %v1401_v56  ;;  %v1494_v55 = vld [vmem:[%s2034_s1 + $0x3b4] ss:$8 sps:$4 sm:$0xff]   ;;  %v1489_v56 = vld [vmem:[%s2034_s1 + $0x2b0] ss:$8 sps:$4 sm:$0xff]  }
  0x35   :  { %991 = vmatprep.subr.bf16.mxu1 %v1403_v57  ;;  %v1492_v57 = vld [vmem:[%s2034_s1 + $0x3b0] ss:$8 sps:$4 sm:$0xff]  }
  0x37   :  { %951 = vmatpush1.bf16.msra.mxu0 %v1405_v58  ;;  %v1497_v58 = vld [vmem:[%s2034_s1 + $0x2c4] ss:$8 sps:$4 sm:$0xff]  }
  0x38   :  { %992 = vmatpush1.bf16.msra.mxu1 %v1406_v59  ;;  %952 = vmatprep.subr.bf16.mxu0 %v1407_v60  ;;  %v1500_v59 = vld [vmem:[%s2034_s1 + $0x3c4] ss:$8 sps:$4 sm:$0xff]   ;;  %v1495_v60 = vld [vmem:[%s2034_s1 + $0x2c0] ss:$8 sps:$4 sm:$0xff]  }
  0x39   :  { %993 = vmatprep.subr.bf16.mxu1 %v1409_v61  ;;  %v1498_v61 = vld [vmem:[%s2034_s1 + $0x3c0] ss:$8 sps:$4 sm:$0xff]  }
  0x3b   :  { %953 = vmatpush1.bf16.msra.mxu0 %v1411_v62  ;;  %v1503_v62 = vld [vmem:[%s2034_s1 + $0x2d4] ss:$8 sps:$4 sm:$0xff]  }
  0x3c   :  { %994 = vmatpush1.bf16.msra.mxu1 %v1412_v63  ;;  %954 = vmatprep.subr.bf16.mxu0 %v1413_v0  ;;  %v1506_v63 = vld [vmem:[%s2034_s1 + $0x3d4] ss:$8 sps:$4 sm:$0xff]   ;;  %v1501_v0 = vld [vmem:[%s2034_s1 + $0x2d0] ss:$8 sps:$4 sm:$0xff]  }
  0x3d   :  { %995 = vmatprep.subr.bf16.mxu1 %v1415_v1  ;;  %v1504_v1 = vld [vmem:[%s2034_s1 + $0x3d0] ss:$8 sps:$4 sm:$0xff]  }
  0x3f   :  { %955 = vmatpush1.bf16.msra.mxu0 %v1417_v2  ;;  %v1509_v2 = vld [vmem:[%s2034_s1 + $0x2e4] ss:$8 sps:$4 sm:$0xff]  }
  0x40   :  { %996 = vmatpush1.bf16.msra.mxu1 %v1418_v3  ;;  %1006 = vmatprep.subr.bf16.mxu0 %v1425_v4  ;;  %v1512_v3 = vld [vmem:[%s2034_s1 + $0x3e4] ss:$8 sps:$4 sm:$0xff]   ;;  %v1507_v4 = vld [vmem:[%s2034_s1 + $0x2e0] ss:$8 sps:$4 sm:$0xff]  }
  0x41   :  { %1047 = vmatprep.subr.bf16.mxu1 %v1428_v5  ;;  %v1510_v5 = vld [vmem:[%s2034_s1 + $0x3e0] ss:$8 sps:$4 sm:$0xff]  }
  0x42   :  { %957 = vmatmul.mubr.bf16.vlgmr.msra.gmra.mrb[0].mxu0 %v1167_v6  ;;  %v1515_v6 = vld [vmem:[%s2034_s1 + $0x2f4] ss:$8 sps:$4 sm:$0xff]  }
  0x43   :  { %998 = vmatmul.mubr.bf16.vlgmr.msra.gmra.mrb[0].mxu1 %v1169_v7  ;;  %1007 = vmatpush1.bf16.msra.mxu0 %v1423_v8  ;;  %v1518_v7 = vld [vmem:[%s2034_s1 + $0x3f4] ss:$8 sps:$4 sm:$0xff]   ;;  %v1513_v8 = vld [vmem:[%s2034_s1 + $0x2f0] ss:$8 sps:$4 sm:$0xff]  }
  0x44   :  { %1048 = vmatpush1.bf16.msra.mxu1 %v1426_v9  ;;  %1008 = vmatprep.subr.bf16.mxu0 %v1431_v10  ;;  %v1516_v9 = vld [vmem:[%s2034_s1 + $0x3f0] ss:$8 sps:$4 sm:$0xff]   ;;  %v1523_v10 = vld [vmem:[%s2034_s1 + $0x404] ss:$8 sps:$4 sm:$0xff]  }
  0x45   :  { %1049 = vmatprep.subr.bf16.mxu1 %v1434_v11  ;;  %1038 = vmatprep.mubr.bf16.mxu0 %v1172_v35  ;;  %v1171_v11 = vcombine.low %v1848_v32, %v1848_v32 }
  0x46   :  { %1079 = vmatprep.mubr.bf16.mxu1 %v1174_v38 }
  0x47   :  { %1009 = vmatpush1.bf16.msra.mxu0 %v1429_v12  ;;  %v1173_v12 = vcombine.low %v1861_v36, %v1861_v36 }
  0x48   :  { %1050 = vmatpush1.bf16.msra.mxu1 %v1432_v13  ;;  %1010 = vmatprep.subr.bf16.mxu0 %v1437_v14  ;;  %v1521_v13 = vld [vmem:[%s2034_s1 + $0x400] ss:$8 sps:$4 sm:$0xff]   ;;  %v1528_v14 = vld [vmem:[%s2034_s1 + $0x414] ss:$8 sps:$4 sm:$0xff]  }
  0x49   :  { %1051 = vmatprep.subr.bf16.mxu1 %v1440_v15  ;;  %v1526_v15 = vld [vmem:[%s2034_s1 + $0x410] ss:$8 sps:$4 sm:$0xff]  }
  0x4b   :  { %1011 = vmatpush1.bf16.msra.mxu0 %v1435_v16  ;;  %v1548_v16 = vmov 0  }
  0x4c   :  { %1052 = vmatpush1.bf16.msra.mxu1 %v1438_v17  ;;  %1012 = vmatprep.subr.bf16.mxu0 %v1443_v18  ;;  %v1531_v17 = vld [vmem:[%s2034_s1 + $0x424] ss:$8 sps:$4 sm:$0xff]   ;;  %v1529_v18 = vld [vmem:[%s2034_s1 + $0x420] ss:$8 sps:$4 sm:$0xff]  }
  0x4d   :  { %1053 = vmatprep.subr.bf16.mxu1 %v1446_v19  ;;  %v1534_v19 = vld [vmem:[%s2034_s1 + $0x434] ss:$8 sps:$4 sm:$0xff]  }
  0x4f   :  { %1013 = vmatpush1.bf16.msra.mxu0 %v1441_v20  ;;  %v1532_v20 = vld [vmem:[%s2034_s1 + $0x430] ss:$8 sps:$4 sm:$0xff]  }
  0x50   :  { %1054 = vmatpush1.bf16.msra.mxu1 %v1444_v21  ;;  %1014 = vmatprep.subr.bf16.mxu0 %v1449_v22  ;;  %v1537_v21 = vld [vmem:[%s2034_s1 + $0x444] ss:$8 sps:$4 sm:$0xff]   ;;  %v1535_v22 = vld [vmem:[%s2034_s1 + $0x440] ss:$8 sps:$4 sm:$0xff]  }
  0x51   :  { %1055 = vmatprep.subr.bf16.mxu1 %v1452_v23  ;;  %v1540_v23 = vld [vmem:[%s2034_s1 + $0x454] ss:$8 sps:$4 sm:$0xff]  }
  0x53   :  { %1015 = vmatpush1.bf16.msra.mxu0 %v1447_v24  ;;  %v1538_v24 = vld [vmem:[%s2034_s1 + $0x450] ss:$8 sps:$4 sm:$0xff]  }
  0x54   :  { %1056 = vmatpush1.bf16.msra.mxu1 %v1450_v25  ;;  %1016 = vmatprep.subr.bf16.mxu0 %v1455_v26  ;;  %v1543_v25 = vld [vmem:[%s2034_s1 + $0x464] ss:$8 sps:$4 sm:$0xff]   ;;  %v1541_v26 = vld [vmem:[%s2034_s1 + $0x460] ss:$8 sps:$4 sm:$0xff]  }
  0x55   :  { %1057 = vmatprep.subr.bf16.mxu1 %v1458_v27  ;;  %v1546_v27 = vld [vmem:[%s2034_s1 + $0x474] ss:$8 sps:$4 sm:$0xff]  }
  0x57   :  { %1017 = vmatpush1.bf16.msra.mxu0 %v1453_v28  ;;  %v1544_v28 = vld [vmem:[%s2034_s1 + $0x470] ss:$8 sps:$4 sm:$0xff]  }
  0x58   :  { %1058 = vmatpush1.bf16.msra.mxu1 %v1456_v29  ;;  %1018 = vmatprep.subr.bf16.mxu0 %v1461_v30  ;;  %v1547_v29 = vld [vmem:[%s2035_s0 + $0x20] ss:$0 sps:$4 sm:$0xff]  }
  0x59   :  { %1059 = vmatprep.subr.bf16.mxu1 %v1464_v31 }
  0x5b   :  { %1019 = vmatpush1.bf16.msra.mxu0 %v1459_v33 }
  0x5c   :  { %1060 = vmatpush1.bf16.msra.mxu1 %v1462_v34  ;;  %1020 = vmatprep.subr.bf16.mxu0 %v1467_v37 }
  0x5d   :  { %1061 = vmatprep.subr.bf16.mxu1 %v1470_v39 }
  0x5f   :  { %1021 = vmatpush1.bf16.msra.mxu0 %v1465_v40 }
  0x60   :  { %1062 = vmatpush1.bf16.msra.mxu1 %v1468_v41  ;;  %1022 = vmatprep.subr.bf16.mxu0 %v1473_v42 }
  0x61   :  { %1063 = vmatprep.subr.bf16.mxu1 %v1476_v43 }
  0x63   :  { %1023 = vmatpush1.bf16.msra.mxu0 %v1471_v44 }
  0x64   :  { %1064 = vmatpush1.bf16.msra.mxu1 %v1474_v45  ;;  %1024 = vmatprep.subr.bf16.mxu0 %v1479_v46 }
  0x65   :  { %1065 = vmatprep.subr.bf16.mxu1 %v1482_v47 }
  0x67   :  { %1025 = vmatpush1.bf16.msra.mxu0 %v1477_v48 }
  0x68   :  { %1066 = vmatpush1.bf16.msra.mxu1 %v1480_v49  ;;  %1026 = vmatprep.subr.bf16.mxu0 %v1485_v50 }
  0x69   :  { %1067 = vmatprep.subr.bf16.mxu1 %v1488_v51 }
  0x6b   :  { %1027 = vmatpush1.bf16.msra.mxu0 %v1483_v52  ;;  %v1140_v52 = vlaneseq }
  0x6c   :  { %1068 = vmatpush1.bf16.msra.mxu1 %v1486_v53  ;;  %1028 = vmatprep.subr.bf16.mxu0 %v1491_v54 }
  0x6d   :  { %1069 = vmatprep.subr.bf16.mxu1 %v1494_v55  ;;  %v1141_v53 = vshrl.u32 %v1140_v52, 7  ;;  %v1138_v55 = vld [vmem:[%s2036_s2] sm:$0x3] }
  0x6f   :  { %1029 = vmatpush1.bf16.msra.mxu0 %v1489_v56  ;;  %v1142_v54 = vsub.s32 0, %v1141_v53  ;;  %v1146_v56 = vsub.s32 1, %v1141_v53 }
  0x70   :  { %1070 = vmatpush1.bf16.msra.mxu1 %v1492_v57  ;;  %1030 = vmatprep.subr.bf16.mxu0 %v1497_v58 }
  0x71   :  { %1071 = vmatprep.subr.bf16.mxu1 %v1500_v59  ;;  %v1143_v57 = vrot.slane %v1138_v55, %v1142_v54  ;;  %v1147_v59 = vrot.slane %v1138_v55, %v1146_v56 }
  0x73   :  { %1031 = vmatpush1.bf16.msra.mxu0 %v1495_v60 }
  0x74   :  { %1072 = vmatpush1.bf16.msra.mxu1 %v1498_v61  ;;  %1032 = vmatprep.subr.bf16.mxu0 %v1503_v62 }
  0x75   :  { %1073 = vmatprep.subr.bf16.mxu1 %v1506_v63 }
  0x77   :  { %1033 = vmatpush1.bf16.msra.mxu0 %v1501_v0 }
  0x78   :  { %1074 = vmatpush1.bf16.msra.mxu1 %v1504_v1  ;;  %1034 = vmatprep.subr.bf16.mxu0 %v1509_v2 }
  0x79   :  { %1075 = vmatprep.subr.bf16.mxu1 %v1512_v3 }
  0x7b   :  { %1035 = vmatpush1.bf16.msra.mxu0 %v1507_v4 }
  0x7c   :  { %1076 = vmatpush1.bf16.msra.mxu1 %v1510_v5  ;;  %1036 = vmatprep.subr.bf16.mxu0 %v1515_v6 }
  0x7d   :  { %1077 = vmatprep.subr.bf16.mxu1 %v1518_v7 }
  0x7f   :  { %1037 = vmatpush1.bf16.msra.mxu0 %v1513_v8 }
  0x80   :  { %1078 = vmatpush1.bf16.msra.mxu1 %v1516_v9  ;;  %1088 = vmatprep.subr.bf16.mxu0 %v1523_v10 }
  0x82   :  { %1039 = vmatmul.mubr.bf16.vlgmr.msra.gmra.mrb[4].mxu0 %v1171_v11 }
  0x83   :  { %1080 = vmatmul.mubr.bf16.vlgmr.msra.gmra.mrb[4].mxu1 %v1173_v12  ;;  %1089 = vmatpush1.bf16.msra.mxu0 %v1521_v13 }
  0x84   :  { %1120 = vmatprep.mubr.bf16.mxu0 %v1548_v16  ;;  %1090 = vmatprep.subr.bf16.mxu0 %v1528_v14 }
  0x87   :  { %1091 = vmatpush1.bf16.msra.mxu0 %v1526_v15 }
  0x88   :  { %1092 = vmatprep.subr.bf16.mxu0 %v1531_v17 }
  0x8b   :  { %1093 = vmatpush1.bf16.msra.mxu0 %v1529_v18 }
  0x8c   :  { %1094 = vmatprep.subr.bf16.mxu0 %v1534_v19 }
  0x8f   :  { %1095 = vmatpush1.bf16.msra.mxu0 %v1532_v20 }
  0x90   :  { %1096 = vmatprep.subr.bf16.mxu0 %v1537_v21 }
  0x93   :  { %1097 = vmatpush1.bf16.msra.mxu0 %v1535_v22 }
  0x94   :  { %1098 = vmatprep.subr.bf16.mxu0 %v1540_v23 }
  0x97   :  { %1099 = vmatpush1.bf16.msra.mxu0 %v1538_v24 }
  0x98   :  { %1100 = vmatprep.subr.bf16.mxu0 %v1543_v25 }
  0x9b   :  { %1101 = vmatpush1.bf16.msra.mxu0 %v1541_v26 }
  0x9c   :  { %1102 = vmatprep.subr.bf16.mxu0 %v1546_v27 }
  0x9f   :  { %1103 = vmatpush1.bf16.msra.mxu0 %v1544_v28 }
  0xa2   :  { %1121 = vmatmul.mubr.bf16.vlgmr.msra.gmra.mrb[8].mxu0 %v1547_v29 }
 0x115   :  { %v958_v30 = vpop.f32.mrb[0].mxu0 }
 0x116   :  { %v999_v31 = vpop.f32.mrb[0].mxu1  ;;  %v960_v33 = vpop.f32.mrb[1].mxu0 }
 0x117   :  { %v1000_v32 = vadd.f32 %v999_v31, %v958_v30  ;;  %v1001_v34 = vpop.f32.mrb[1].mxu1  ;;  %v962_v36 = vpop.f32.mrb[2].mxu0 }
 0x118   :  { %v1002_v35 = vadd.f32 %v1001_v34, %v960_v33  ;;  %v1003_v37 = vpop.f32.mrb[2].mxu1  ;;  %v963_v38 = vpop.f32.mrb[3].mxu0 }
 0x119   :  { %v1004_v39 = vpop.f32.mrb[3].mxu1 }
 0x155   :  { %v1040_v40 = vpop.f32.mrb[4].mxu0 }
 0x156   :  { %v1081_v41 = vpop.f32.mrb[4].mxu1  ;;  %v1041_v42 = vadd.f32 %v1040_v40, %v1000_v32  ;;  %v1042_v43 = vpop.f32.mrb[5].mxu0 }
 0x157   :  { %v1083_v44 = vpop.f32.mrb[5].mxu1  ;;  %v1043_v45 = vadd.f32 %v1042_v43, %v1002_v35  ;;  %v1044_v46 = vpop.f32.mrb[6].mxu0 }
 0x158   :  { %v1085_v47 = vpop.f32.mrb[6].mxu1  ;;  %v1082_v48 = vadd.f32 %v1081_v41, %v1041_v42  ;;  %v1045_v49 = vpop.f32.mrb[7].mxu0 }
 0x159   :  { %v1086_v50 = vpop.f32.mrb[7].mxu1  ;;  %v1084_v51 = vadd.f32 %v1083_v44, %v1043_v45 }
 0x175   :  { %v1122_v58 = vpop.f32.mrb[8].mxu0 }
 0x176   :  { %v1123_v60 = vadd.f32 %v1122_v58, %v1082_v48  ;;  %v1124_v61 = vpop.f32.mrb[9].mxu0 }
 0x177   :  { %v1125_v62 = vadd.f32 %v1124_v61, %v1084_v51  ;;  %v1126_v63 = vpop.f32.mrb[10].mxu0 }
 0x178   :  { %v1150_v0 = vadd.f32 %v1143_v57, %v1123_v60  ;;  %v1127_v1 = vpop.f32.mrb[11].mxu0 }
 0x179   :  { %v1151_v2 = vadd.f32 %v1147_v59, %v1125_v62 }
 0x17a   :  { %v1152_v3 = vmax.f32 %v1150_v0, 0.0 }
 0x17b   :  { %v1153_v4 = vmax.f32 %v1151_v2, 0.0 }
 0x17d   :  { %v1321_v5 = vpack.c.bf16 %v1153_v4, %v1152_v3 }
 0x17f   :  { %1162 = vst [vmem:[%s2037_s3] sm:$0xff] %v1321_v5 }

// kernel: _lambda_.33
= control target key start
LH: loop header
LB: loop body
LE: loop exit
PB: predicated region body
PF: predicated region fallthrough
CT: control target
= control target key end

     0   :  { %s946_s15 = smov 0   ;;  %s948_s16 = smov 0   ;;  %s1031_s0 = inlined_call_operand.vmem [shape: bf16[8,2304], index: 0, kind: input, shape index: {}]   ;;  %s1032_s1 = inlined_call_operand.vmem [shape: bf16[2304,256], index: 1, kind: input, shape index: {}]   ;;  %s1033_s2 = inlined_call_operand.vmem [shape: f32[1,256], index: 2, kind: input, shape index: {}]   ;;  %s1034_s3 = inlined_call_operand.vmem [shape: bf16[8,256], index: 3, kind: input, shape index: {}]   ;;  %s1035_s4 = inlined_call_operand.vmem [shape: bf16[8,256], index: 4, kind: output, shape index: {}]  }
   0x1   :  { %s950_s17 = smov 0  }
   0x2 LB: > { %s26_s18 = sadd.s32 1, %s914_s16  ;;  %p772_p0 = scmp.ge.s32.totalorder %s918_s17, 1  ;;  %s918_s17 = sphi %s950_s17, %s14_s17   ;;  %s914_s16 = sphi %s948_s16, %s1037_s16   ;;  %s910_s15 = sphi %s946_s15, %s1036_s15  }
   0x3   : > { %p27_p1 = scmp.ge.s32.totalorder %s26_s18, 9  ;;  %p236_p2 = scmp.lt.s32.totalorder %s918_s17, 10 }
   0x5   : > { %s1039_s18 = smov (%p27_p1, %s26_s18), 0  ;;  %p237_p3 = pnand %p772_p0, %p236_p2 }
   0x6   : > { %s773_s19 = sshll.u32 (!%p237_p3), %s910_s15, 1  ;;  %s775_s20 = sshll.u32 (!%p237_p3), %s910_s15, 5 }
   0x7   : > { %240 = sbr.rel (%p237_p3) target bundleno = 321 (0x141), region = 36  ;;  %p296_p4 = scmp.lt.s32.totalorder (!%p237_p3), %s773_s19, 17 }
   0x8   : > { %p305_p5 = scmp.lt.s32.totalorder (!%p237_p3), %s775_s20, 287  ;;  %p778_p6 = scmp.ne.s32.totalorder (!%p237_p3), %s910_s15, 0 }
   0xe   : > { %s1041_s19 = smov (!%p296_p4, %s773_s19), 17  ;;  %s1043_s20 = smov (!%p305_p5, %s775_s20), 287 }
   0xf   : > { %s774_s21 = sshll.u32 %s1041_s19, 2  ;;  %s819_s25 = sshll.u32 %s1043_s20, 3  ;;  %v920_v0 = vmov (!%p778_p6), 0.0  }
  0x10   : > { %s971_s24 = scalar_lea.vmem %s1031_s0, %s774_s21  ;;  %s976_s28 = scalar_lea.vmem %s1032_s1, %s819_s25  ;;  %344 = vst [vmem:[#allocation2] sm:$0xff] (!%p778_p6), %v920_v0  ;;  %345 = vst [vmem:[#allocation2 + $0x8] sm:$0xff] (!%p778_p6), %v920_v0 }
  0x11   : > { %343 = sbr.rel (%p778_p6) target bundleno = 24 (0x18), region = 40 }
  0x18 PF: > { %v846_v1 = vld [vmem:[%s976_s28 + $0x4] ss:$8 sps:$4 sm:$0xff]   ;;  %v848_v2 = vld [vmem:[%s976_s28] ss:$8 sps:$4 sm:$0xff]   ;;  %v849_v3 = vld [vmem:[%s976_s28 + $0x14] ss:$8 sps:$4 sm:$0xff]  }
  0x19   : > { %548 = vmatprep.subr.bf16.mxu0 %v846_v1  ;;  %v851_v4 = vld [vmem:[%s976_s28 + $0x10] ss:$8 sps:$4 sm:$0xff]   ;;  %v852_v5 = vld [vmem:[%s976_s28 + $0x24] ss:$8 sps:$4 sm:$0xff]   ;;  %v854_v6 = vld [vmem:[%s976_s28 + $0x20] ss:$8 sps:$4 sm:$0xff]  }
  0x1a   : > { %549 = vmatpush1.bf16.msra.mxu0 %v848_v2  ;;  %v855_v7 = vld [vmem:[%s976_s28 + $0x34] ss:$8 sps:$4 sm:$0xff]   ;;  %v857_v8 = vld [vmem:[%s976_s28 + $0x30] ss:$8 sps:$4 sm:$0xff]   ;;  %v858_v9 = vld [vmem:[%s976_s28 + $0x44] ss:$8 sps:$4 sm:$0xff]  }
  0x1b   : > { %550 = vmatprep.subr.bf16.mxu0 %v849_v3  ;;  %v860_v10 = vld [vmem:[%s976_s28 + $0x40] ss:$8 sps:$4 sm:$0xff]   ;;  %v861_v11 = vld [vmem:[%s976_s28 + $0x54] ss:$8 sps:$4 sm:$0xff]   ;;  %v863_v12 = vld [vmem:[%s976_s28 + $0x50] ss:$8 sps:$4 sm:$0xff]  }
  0x1c   : > { %v864_v13 = vld [vmem:[%s976_s28 + $0x64] ss:$8 sps:$4 sm:$0xff]   ;;  %v866_v16 = vld [vmem:[%s976_s28 + $0x60] ss:$8 sps:$4 sm:$0xff]   ;;  %v867_v17 = vld [vmem:[%s976_s28 + $0x74] ss:$8 sps:$4 sm:$0xff]  }
  0x1d   : > { %v348_v14 = vld [vmem:[%s971_s24] sm:$0xff]  ;;  %v869_v18 = vld [vmem:[%s976_s28 + $0x70] ss:$8 sps:$4 sm:$0xff]   ;;  %v873_v21 = vld [vmem:[%s976_s28 + $0x94] ss:$8 sps:$4 sm:$0xff]   ;;  %p813_p7 = scmp.ne.s32.totalorder %s910_s15, 8 }
  0x1e   : > { %551 = vmatpush1.bf16.msra.mxu0 %v851_v4  ;;  %v780_v15 = vcombine.high %v348_v14, %v348_v14  ;;  %v870_v19 = vld [vmem:[%s976_s28 + $0x84] ss:$8 sps:$4 sm:$0xff]   ;;  %v872_v20 = vld [vmem:[%s976_s28 + $0x80] ss:$8 sps:$4 sm:$0xff]   ;;  %v875_v22 = vld [vmem:[%s976_s28 + $0x90] ss:$8 sps:$4 sm:$0xff]   ;;  %v779_v35 = vcombine.low %v348_v14, %v348_v14  ;;  %v601_v44 = vlaneseq (!%p813_p7) }
  0x1f   : > { %552 = vmatprep.subr.bf16.mxu0 %v852_v5  ;;  %v876_v23 = vld [vmem:[%s976_s28 + $0xa4] ss:$8 sps:$4 sm:$0xff]   ;;  %v878_v24 = vld [vmem:[%s976_s28 + $0xa0] ss:$8 sps:$4 sm:$0xff]   ;;  %v879_v25 = vld [vmem:[%s976_s28 + $0xb4] ss:$8 sps:$4 sm:$0xff]  }
  0x20   : > { %580 = vmatprep.mubr.bf16.mxu0 %v780_v15  ;;  %v881_v26 = vld [vmem:[%s976_s28 + $0xb0] ss:$8 sps:$4 sm:$0xff]   ;;  %v882_v27 = vld [vmem:[%s976_s28 + $0xc4] ss:$8 sps:$4 sm:$0xff]   ;;  %v884_v28 = vld [vmem:[%s976_s28 + $0xc0] ss:$8 sps:$4 sm:$0xff]  }
  0x21   : > { %v885_v29 = vld [vmem:[%s976_s28 + $0xd4] ss:$8 sps:$4 sm:$0xff]   ;;  %v887_v30 = vld [vmem:[%s976_s28 + $0xd0] ss:$8 sps:$4 sm:$0xff]   ;;  %v888_v31 = vld [vmem:[%s976_s28 + $0xe4] ss:$8 sps:$4 sm:$0xff]  }
  0x22   : > { %553 = vmatpush1.bf16.msra.mxu0 %v854_v6  ;;  %v890_v32 = vld [vmem:[%s976_s28 + $0xe0] ss:$8 sps:$4 sm:$0xff]   ;;  %v891_v33 = vld [vmem:[%s976_s28 + $0xf4] ss:$8 sps:$4 sm:$0xff]   ;;  %v893_v34 = vld [vmem:[%s976_s28 + $0xf0] ss:$8 sps:$4 sm:$0xff]  }
  0x23   : > { %554 = vmatprep.subr.bf16.mxu0 %v855_v7  ;;  %v346_v36 = vld [vmem:[#allocation2] sm:$0xff]  ;;  %v347_v37 = vld [vmem:[#allocation2 + $0x8] sm:$0xff]  ;;  %v602_v45 = vshrl.u32 (!%p813_p7), %v601_v44, 7 }
  0x24   : > { %v599_v46 = vld [vmem:[%s1033_s2] sm:$0x3] (!%p813_p7) }
  0x25   : > { %v613_v47 = vld [vmem:[%s1034_s3] sm:$0xff] (!%p813_p7)  ;;  %v603_v48 = vsub.s32 (!%p813_p7), 0, %v602_v45  ;;  %v607_v49 = vsub.s32 (!%p813_p7), 1, %v602_v45 }
  0x26   : > { %555 = vmatpush1.bf16.msra.mxu0 %v857_v8  ;;  %v614_v54 = vunpack.c.l.bf16 (!%p813_p7), %v613_v47  ;;  %v615_v55 = vunpack.c.h.bf16 (!%p813_p7), %v613_v47 }
  0x27   : > { %556 = vmatprep.subr.bf16.mxu0 %v858_v9  ;;  %v604_v52 = vrot.slane (!%p813_p7), %v599_v46, %v603_v48  ;;  %v608_v53 = vrot.slane (!%p813_p7), %v599_v46, %v607_v49 }
  0x2a   : > { %557 = vmatpush1.bf16.msra.mxu0 %v860_v10 }
  0x2b   : > { %558 = vmatprep.subr.bf16.mxu0 %v861_v11 }
  0x2e   : > { %559 = vmatpush1.bf16.msra.mxu0 %v863_v12 }
  0x2f   : > { %560 = vmatprep.subr.bf16.mxu0 %v864_v13 }
  0x32   : > { %561 = vmatpush1.bf16.msra.mxu0 %v866_v16 }
  0x33   : > { %562 = vmatprep.subr.bf16.mxu0 %v867_v17 }
  0x36   : > { %563 = vmatpush1.bf16.msra.mxu0 %v869_v18 }
  0x37   : > { %564 = vmatprep.subr.bf16.mxu0 %v870_v19 }
  0x3a   : > { %565 = vmatpush1.bf16.msra.mxu0 %v872_v20 }
  0x3b   : > { %566 = vmatprep.subr.bf16.mxu0 %v873_v21 }
  0x3e   : > { %567 = vmatpush1.bf16.msra.mxu0 %v875_v22 }
  0x3f   : > { %568 = vmatprep.subr.bf16.mxu0 %v876_v23 }
  0x42   : > { %569 = vmatpush1.bf16.msra.mxu0 %v878_v24 }
  0x43   : > { %570 = vmatprep.subr.bf16.mxu0 %v879_v25 }
  0x46   : > { %571 = vmatpush1.bf16.msra.mxu0 %v881_v26 }
  0x47   : > { %572 = vmatprep.subr.bf16.mxu0 %v882_v27 }
  0x4a   : > { %573 = vmatpush1.bf16.msra.mxu0 %v884_v28 }
  0x4b   : > { %574 = vmatprep.subr.bf16.mxu0 %v885_v29 }
  0x4e   : > { %575 = vmatpush1.bf16.msra.mxu0 %v887_v30 }
  0x4f   : > { %576 = vmatprep.subr.bf16.mxu0 %v888_v31 }
  0x52   : > { %577 = vmatpush1.bf16.msra.mxu0 %v890_v32 }
  0x53   : > { %578 = vmatprep.subr.bf16.mxu0 %v891_v33 }
  0x56   : > { %579 = vmatpush1.bf16.msra.mxu0 %v893_v34 }
  0x59   : > { %581 = vmatmul.mubr.bf16.vlgmr.msra.gmra.mrb[0].mxu0 %v779_v35 }
 0x12a   : > { %596 = sbr.rel (%p813_p7) target bundleno = 321 (0x141), region = 44 }
 0x12c   : > { %v582_v38 = vpop.f32.mrb[0].mxu0 }
 0x12d   : > { %v589_v39 = vadd.f32 %v582_v38, %v346_v36  ;;  %v584_v40 = vpop.f32.mrb[1].mxu0 }
 0x12e   : > { %v590_v41 = vadd.f32 %v584_v40, %v347_v37  ;;  %v586_v42 = vpop.f32.mrb[2].mxu0 }
 0x12f   : > { %591 = vst [vmem:[#allocation2] sm:$0xff] %v589_v39  ;;  %v587_v43 = vpop.f32.mrb[3].mxu0 }
 0x130   : > { %592 = vst [vmem:[#allocation2 + $0x8] sm:$0xff] %v590_v41 }
 0x136   : > { %v597_v50 = vld [vmem:[#allocation2] sm:$0xff] }
 0x137   : > { %v598_v51 = vld [vmem:[#allocation2 + $0x8] sm:$0xff]  ;;  %v611_v56 = vadd.f32 %v604_v52, %v597_v50 }
 0x138   : > { %v612_v57 = vadd.f32 %v608_v53, %v598_v51 }
 0x139   : > { %v616_v58 = vadd.f32 %v614_v54, %v611_v56 }
 0x13a   : > { %v617_v59 = vadd.f32 %v615_v55, %v612_v57 }
 0x13b   : > { %v618_v60 = vmax.f32 %v616_v58, 0.0 }
 0x13c   : > { %v619_v61 = vmax.f32 %v617_v59, 0.0 }
 0x13e   : > { %v820_v62 = vpack.c.bf16 %v619_v61, %v618_v60 }
 0x140   : > { %628 = vst [vmem:[%s1035_s4] sm:$0xff] %v820_v62 }
 0x141 PF: > { %s14_s17 = sadd.s32 1, %s918_s17   ;;  %s1036_s15 = smov %s914_s16 }
 0x142   : > { %p11_p8 = scmp.ge.s32.totalorder %s14_s17, 11   ;;  %s1037_s16 = smov %s1039_s18 }
 0x144   :  { %13 = sbr.rel (!%p11_p8) target bundleno = 2 (0x2), region = 83 }

// kernel: _lambda_.32
= control target key start
LH: loop header
LB: loop body
LE: loop exit
PB: predicated region body
PF: predicated region fallthrough
CT: control target
= control target key end

     0   :  { %s2032_s1 = inlined_call_operand.vmem [shape: bf16[1152,256], index: 1, kind: input, shape index: {}]   ;;  %s2033_s0 = inlined_call_operand.vmem [shape: bf16[8,1152], index: 0, kind: input, shape index: {}]   ;;  %s2034_s2 = inlined_call_operand.vmem [shape: f32[1,256], index: 2, kind: input, shape index: {}]   ;;  %s2035_s3 = inlined_call_operand.vmem [shape: bf16[8,256], index: 3, kind: output, shape index: {}]  }
   0x1   :  { %v1321_v0 = vld [vmem:[%s2032_s1 + $0x4] ss:$8 sps:$4 sm:$0xff]   ;;  %v1325_v2 = vld [vmem:[%s2032_s1] ss:$8 sps:$4 sm:$0xff]   ;;  %v1327_v4 = vld [vmem:[%s2032_s1 + $0x14] ss:$8 sps:$4 sm:$0xff]  }
   0x2   :  { %v1323_v1 = vld [vmem:[%s2032_s1 + $0x104] ss:$8 sps:$4 sm:$0xff]   ;;  %924 = vmatprep.subr.bf16.mxu0 %v1321_v0  ;;  %v1326_v3 = vld [vmem:[%s2032_s1 + $0x100] ss:$8 sps:$4 sm:$0xff]   ;;  %v1329_v5 = vld [vmem:[%s2032_s1 + $0x114] ss:$8 sps:$4 sm:$0xff]  }
   0x3   :  { %965 = vmatprep.subr.bf16.mxu1 %v1323_v1  ;;  %925 = vmatpush1.bf16.msra.mxu0 %v1325_v2  ;;  %v1331_v6 = vld [vmem:[%s2032_s1 + $0x10] ss:$8 sps:$4 sm:$0xff]   ;;  %v1333_v8 = vld [vmem:[%s2032_s1 + $0x24] ss:$8 sps:$4 sm:$0xff]   ;;  %v1337_v10 = vld [vmem:[%s2032_s1 + $0x20] ss:$8 sps:$4 sm:$0xff]  }
   0x4   :  { %966 = vmatpush1.bf16.msra.mxu1 %v1326_v3  ;;  %926 = vmatprep.subr.bf16.mxu0 %v1327_v4  ;;  %v1332_v7 = vld [vmem:[%s2032_s1 + $0x110] ss:$8 sps:$4 sm:$0xff]   ;;  %v1335_v9 = vld [vmem:[%s2032_s1 + $0x124] ss:$8 sps:$4 sm:$0xff]   ;;  %v1338_v11 = vld [vmem:[%s2032_s1 + $0x120] ss:$8 sps:$4 sm:$0xff]  }
   0x5   :  { %967 = vmatprep.subr.bf16.mxu1 %v1329_v5  ;;  %v1339_v12 = vld [vmem:[%s2032_s1 + $0x34] ss:$8 sps:$4 sm:$0xff]   ;;  %v1343_v14 = vld [vmem:[%s2032_s1 + $0x30] ss:$8 sps:$4 sm:$0xff]   ;;  %v1345_v16 = vld [vmem:[%s2032_s1 + $0x44] ss:$8 sps:$4 sm:$0xff]  }
   0x6   :  { %v1341_v13 = vld [vmem:[%s2032_s1 + $0x134] ss:$8 sps:$4 sm:$0xff]   ;;  %v1344_v15 = vld [vmem:[%s2032_s1 + $0x130] ss:$8 sps:$4 sm:$0xff]   ;;  %v1347_v17 = vld [vmem:[%s2032_s1 + $0x144] ss:$8 sps:$4 sm:$0xff]  }
   0x7   :  { %927 = vmatpush1.bf16.msra.mxu0 %v1331_v6  ;;  %v1349_v18 = vld [vmem:[%s2032_s1 + $0x40] ss:$8 sps:$4 sm:$0xff]   ;;  %v1351_v20 = vld [vmem:[%s2032_s1 + $0x54] ss:$8 sps:$4 sm:$0xff]   ;;  %v1355_v22 = vld [vmem:[%s2032_s1 + $0x50] ss:$8 sps:$4 sm:$0xff]  }
   0x8   :  { %968 = vmatpush1.bf16.msra.mxu1 %v1332_v7  ;;  %928 = vmatprep.subr.bf16.mxu0 %v1333_v8  ;;  %v1350_v19 = vld [vmem:[%s2032_s1 + $0x140] ss:$8 sps:$4 sm:$0xff]   ;;  %v1353_v21 = vld [vmem:[%s2032_s1 + $0x154] ss:$8 sps:$4 sm:$0xff]   ;;  %v1356_v23 = vld [vmem:[%s2032_s1 + $0x150] ss:$8 sps:$4 sm:$0xff]  }
   0x9   :  { %969 = vmatprep.subr.bf16.mxu1 %v1335_v9  ;;  %v1357_v24 = vld [vmem:[%s2032_s1 + $0x64] ss:$8 sps:$4 sm:$0xff]   ;;  %v1361_v26 = vld [vmem:[%s2032_s1 + $0x60] ss:$8 sps:$4 sm:$0xff]   ;;  %v1363_v28 = vld [vmem:[%s2032_s1 + $0x74] ss:$8 sps:$4 sm:$0xff]  }
   0xa   :  { %v1359_v25 = vld [vmem:[%s2032_s1 + $0x164] ss:$8 sps:$4 sm:$0xff]   ;;  %v1362_v27 = vld [vmem:[%s2032_s1 + $0x160] ss:$8 sps:$4 sm:$0xff]   ;;  %v1365_v29 = vld [vmem:[%s2032_s1 + $0x174] ss:$8 sps:$4 sm:$0xff]  }
   0xb   :  { %929 = vmatpush1.bf16.msra.mxu0 %v1337_v10  ;;  %v1367_v30 = vld [vmem:[%s2032_s1 + $0x70] ss:$8 sps:$4 sm:$0xff]   ;;  %v1369_v32 = vld [vmem:[%s2032_s1 + $0x84] ss:$8 sps:$4 sm:$0xff]   ;;  %v1373_v34 = vld [vmem:[%s2032_s1 + $0x80] ss:$8 sps:$4 sm:$0xff]  }
   0xc   :  { %970 = vmatpush1.bf16.msra.mxu1 %v1338_v11  ;;  %930 = vmatprep.subr.bf16.mxu0 %v1339_v12  ;;  %v1368_v31 = vld [vmem:[%s2032_s1 + $0x170] ss:$8 sps:$4 sm:$0xff]   ;;  %v1371_v33 = vld [vmem:[%s2032_s1 + $0x184] ss:$8 sps:$4 sm:$0xff]   ;;  %v1374_v35 = vld [vmem:[%s2032_s1 + $0x180] ss:$8 sps:$4 sm:$0xff]  }
   0xd   :  { %971 = vmatprep.subr.bf16.mxu1 %v1341_v13  ;;  %v1375_v36 = vld [vmem:[%s2032_s1 + $0x94] ss:$8 sps:$4 sm:$0xff]   ;;  %v1379_v38 = vld [vmem:[%s2032_s1 + $0x90] ss:$8 sps:$4 sm:$0xff]   ;;  %v1381_v40 = vld [vmem:[%s2032_s1 + $0xa4] ss:$8 sps:$4 sm:$0xff]  }
   0xe   :  { %v1377_v37 = vld [vmem:[%s2032_s1 + $0x194] ss:$8 sps:$4 sm:$0xff]   ;;  %v1380_v39 = vld [vmem:[%s2032_s1 + $0x190] ss:$8 sps:$4 sm:$0xff]   ;;  %v1383_v41 = vld [vmem:[%s2032_s1 + $0x1a4] ss:$8 sps:$4 sm:$0xff]  }
   0xf   :  { %931 = vmatpush1.bf16.msra.mxu0 %v1343_v14  ;;  %v1385_v42 = vld [vmem:[%s2032_s1 + $0xa0] ss:$8 sps:$4 sm:$0xff]   ;;  %v1387_v44 = vld [vmem:[%s2032_s1 + $0xb4] ss:$8 sps:$4 sm:$0xff]   ;;  %v1391_v49 = vld [vmem:[%s2032_s1 + $0xb0] ss:$8 sps:$4 sm:$0xff]  }
  0x10   :  { %972 = vmatpush1.bf16.msra.mxu1 %v1344_v15  ;;  %932 = vmatprep.subr.bf16.mxu0 %v1345_v16  ;;  %v1386_v43 = vld [vmem:[%s2032_s1 + $0x1a0] ss:$8 sps:$4 sm:$0xff]   ;;  %v1389_v45 = vld [vmem:[%s2032_s1 + $0x1b4] ss:$8 sps:$4 sm:$0xff]   ;;  %v1392_v50 = vld [vmem:[%s2032_s1 + $0x1b0] ss:$8 sps:$4 sm:$0xff]  }
  0x11   :  { %973 = vmatprep.subr.bf16.mxu1 %v1347_v17  ;;  %v23_v46 = vld [vmem:[%s2033_s0] sm:$0xff]  ;;  %v24_v48 = vld [vmem:[%s2033_s0 + $0x8] sm:$0xff]  ;;  %v1399_v56 = vld [vmem:[%s2032_s1 + $0xd4] ss:$8 sps:$4 sm:$0xff]  }
  0x12   :  { %v1166_v47 = vcombine.high %v23_v46, %v23_v46  ;;  %v1168_v51 = vcombine.high %v24_v48, %v24_v48  ;;  %v1393_v52 = vld [vmem:[%s2032_s1 + $0xc4] ss:$8 sps:$4 sm:$0xff]   ;;  %v1397_v54 = vld [vmem:[%s2032_s1 + $0xc0] ss:$8 sps:$4 sm:$0xff]   ;;  %v1401_v57 = vld [vmem:[%s2032_s1 + $0x1d4] ss:$8 sps:$4 sm:$0xff]   ;;  %v1165_v6 = vcombine.low %v23_v46, %v23_v46  ;;  %v1167_v7 = vcombine.low %v24_v48, %v24_v48 }
  0x13   :  { %933 = vmatpush1.bf16.msra.mxu0 %v1349_v18  ;;  %v1395_v53 = vld [vmem:[%s2032_s1 + $0x1c4] ss:$8 sps:$4 sm:$0xff]   ;;  %v1398_v55 = vld [vmem:[%s2032_s1 + $0x1c0] ss:$8 sps:$4 sm:$0xff]   ;;  %v1403_v58 = vld [vmem:[%s2032_s1 + $0xd0] ss:$8 sps:$4 sm:$0xff]  }
  0x14   :  { %974 = vmatpush1.bf16.msra.mxu1 %v1350_v19  ;;  %934 = vmatprep.subr.bf16.mxu0 %v1351_v20  ;;  %v1404_v59 = vld [vmem:[%s2032_s1 + $0x1d0] ss:$8 sps:$4 sm:$0xff]   ;;  %v1405_v60 = vld [vmem:[%s2032_s1 + $0xe4] ss:$8 sps:$4 sm:$0xff]   ;;  %v1409_v62 = vld [vmem:[%s2032_s1 + $0xe0] ss:$8 sps:$4 sm:$0xff]  }
  0x15   :  { %975 = vmatprep.subr.bf16.mxu1 %v1353_v21  ;;  %956 = vmatprep.mubr.bf16.mxu0 %v1166_v47  ;;  %v1407_v61 = vld [vmem:[%s2032_s1 + $0x1e4] ss:$8 sps:$4 sm:$0xff]   ;;  %v1410_v63 = vld [vmem:[%s2032_s1 + $0x1e0] ss:$8 sps:$4 sm:$0xff]   ;;  %v1411_v0 = vld [vmem:[%s2032_s1 + $0xf4] ss:$8 sps:$4 sm:$0xff]  }
  0x16   :  { %997 = vmatprep.mubr.bf16.mxu1 %v1168_v51  ;;  %v1413_v1 = vld [vmem:[%s2032_s1 + $0x1f4] ss:$8 sps:$4 sm:$0xff]   ;;  %v1415_v2 = vld [vmem:[%s2032_s1 + $0xf0] ss:$8 sps:$4 sm:$0xff]   ;;  %v1423_v4 = vld [vmem:[%s2032_s1 + $0x204] ss:$8 sps:$4 sm:$0xff]  }
  0x17   :  { %935 = vmatpush1.bf16.msra.mxu0 %v1355_v22  ;;  %v1416_v3 = vld [vmem:[%s2032_s1 + $0x1f0] ss:$8 sps:$4 sm:$0xff]   ;;  %v1426_v5 = vld [vmem:[%s2032_s1 + $0x304] ss:$8 sps:$4 sm:$0xff]   ;;  %v1421_v8 = vld [vmem:[%s2032_s1 + $0x200] ss:$8 sps:$4 sm:$0xff]  }
  0x18   :  { %976 = vmatpush1.bf16.msra.mxu1 %v1356_v23  ;;  %936 = vmatprep.subr.bf16.mxu0 %v1357_v24  ;;  %v1424_v9 = vld [vmem:[%s2032_s1 + $0x300] ss:$8 sps:$4 sm:$0xff]   ;;  %v1429_v10 = vld [vmem:[%s2032_s1 + $0x214] ss:$8 sps:$4 sm:$0xff]   ;;  %v1427_v12 = vld [vmem:[%s2032_s1 + $0x210] ss:$8 sps:$4 sm:$0xff]  }
  0x19   :  { %977 = vmatprep.subr.bf16.mxu1 %v1359_v25  ;;  %v1432_v11 = vld [vmem:[%s2032_s1 + $0x314] ss:$8 sps:$4 sm:$0xff]   ;;  %v1430_v13 = vld [vmem:[%s2032_s1 + $0x310] ss:$8 sps:$4 sm:$0xff]   ;;  %v1435_v14 = vld [vmem:[%s2032_s1 + $0x224] ss:$8 sps:$4 sm:$0xff]  }
  0x1a   :  { %v1438_v15 = vld [vmem:[%s2032_s1 + $0x324] ss:$8 sps:$4 sm:$0xff]   ;;  %v1433_v16 = vld [vmem:[%s2032_s1 + $0x220] ss:$8 sps:$4 sm:$0xff]   ;;  %v1441_v18 = vld [vmem:[%s2032_s1 + $0x234] ss:$8 sps:$4 sm:$0xff]  }
  0x1b   :  { %937 = vmatpush1.bf16.msra.mxu0 %v1361_v26  ;;  %v1436_v17 = vld [vmem:[%s2032_s1 + $0x320] ss:$8 sps:$4 sm:$0xff]   ;;  %v1444_v19 = vld [vmem:[%s2032_s1 + $0x334] ss:$8 sps:$4 sm:$0xff]   ;;  %v1439_v20 = vld [vmem:[%s2032_s1 + $0x230] ss:$8 sps:$4 sm:$0xff]  }
  0x1c   :  { %978 = vmatpush1.bf16.msra.mxu1 %v1362_v27  ;;  %938 = vmatprep.subr.bf16.mxu0 %v1363_v28  ;;  %v1442_v21 = vld [vmem:[%s2032_s1 + $0x330] ss:$8 sps:$4 sm:$0xff]   ;;  %v1447_v22 = vld [vmem:[%s2032_s1 + $0x244] ss:$8 sps:$4 sm:$0xff]   ;;  %v1445_v24 = vld [vmem:[%s2032_s1 + $0x240] ss:$8 sps:$4 sm:$0xff]  }
  0x1d   :  { %979 = vmatprep.subr.bf16.mxu1 %v1365_v29  ;;  %v1450_v23 = vld [vmem:[%s2032_s1 + $0x344] ss:$8 sps:$4 sm:$0xff]   ;;  %v1448_v25 = vld [vmem:[%s2032_s1 + $0x340] ss:$8 sps:$4 sm:$0xff]   ;;  %v1453_v26 = vld [vmem:[%s2032_s1 + $0x254] ss:$8 sps:$4 sm:$0xff]  }
  0x1e   :  { %v1456_v27 = vld [vmem:[%s2032_s1 + $0x354] ss:$8 sps:$4 sm:$0xff]   ;;  %v1451_v28 = vld [vmem:[%s2032_s1 + $0x250] ss:$8 sps:$4 sm:$0xff]   ;;  %v1486_v51 = vld [vmem:[%s2032_s1 + $0x3a4] ss:$8 sps:$4 sm:$0xff]  }
  0x1f   :  { %939 = vmatpush1.bf16.msra.mxu0 %v1367_v30  ;;  %v1454_v29 = vld [vmem:[%s2032_s1 + $0x350] ss:$8 sps:$4 sm:$0xff]   ;;  %v1459_v30 = vld [vmem:[%s2032_s1 + $0x264] ss:$8 sps:$4 sm:$0xff]   ;;  %v1477_v46 = vld [vmem:[%s2032_s1 + $0x294] ss:$8 sps:$4 sm:$0xff]  }
  0x20   :  { %980 = vmatpush1.bf16.msra.mxu1 %v1368_v31  ;;  %940 = vmatprep.subr.bf16.mxu0 %v1369_v32  ;;  %v1462_v31 = vld [vmem:[%s2032_s1 + $0x364] ss:$8 sps:$4 sm:$0xff]   ;;  %v1846_v32 = vld [vmem:[%s2033_s0 + $0x10] sm:$0xff] }
  0x21   :  { %981 = vmatprep.subr.bf16.mxu1 %v1371_v33  ;;  %v1457_v33 = vld [vmem:[%s2032_s1 + $0x260] ss:$8 sps:$4 sm:$0xff]   ;;  %v1480_v47 = vld [vmem:[%s2032_s1 + $0x394] ss:$8 sps:$4 sm:$0xff]   ;;  %v1475_v48 = vld [vmem:[%s2032_s1 + $0x290] ss:$8 sps:$4 sm:$0xff]  }
  0x23   :  { %941 = vmatpush1.bf16.msra.mxu0 %v1373_v34  ;;  %v1460_v34 = vld [vmem:[%s2032_s1 + $0x360] ss:$8 sps:$4 sm:$0xff]  }
  0x24   :  { %982 = vmatpush1.bf16.msra.mxu1 %v1374_v35  ;;  %942 = vmatprep.subr.bf16.mxu0 %v1375_v36  ;;  %v1170_v35 = vcombine.high %v1846_v32, %v1846_v32  ;;  %v1859_v36 = vld [vmem:[%s2033_s0 + $0x18] sm:$0xff] }
  0x25   :  { %983 = vmatprep.subr.bf16.mxu1 %v1377_v37  ;;  %v1465_v37 = vld [vmem:[%s2032_s1 + $0x274] ss:$8 sps:$4 sm:$0xff]  }
  0x27   :  { %943 = vmatpush1.bf16.msra.mxu0 %v1379_v38  ;;  %v1172_v38 = vcombine.high %v1859_v36, %v1859_v36 }
  0x28   :  { %984 = vmatpush1.bf16.msra.mxu1 %v1380_v39  ;;  %944 = vmatprep.subr.bf16.mxu0 %v1381_v40  ;;  %v1468_v39 = vld [vmem:[%s2032_s1 + $0x374] ss:$8 sps:$4 sm:$0xff]   ;;  %v1463_v40 = vld [vmem:[%s2032_s1 + $0x270] ss:$8 sps:$4 sm:$0xff]  }
  0x29   :  { %985 = vmatprep.subr.bf16.mxu1 %v1383_v41  ;;  %v1466_v41 = vld [vmem:[%s2032_s1 + $0x370] ss:$8 sps:$4 sm:$0xff]  }
  0x2b   :  { %945 = vmatpush1.bf16.msra.mxu0 %v1385_v42  ;;  %v1471_v42 = vld [vmem:[%s2032_s1 + $0x284] ss:$8 sps:$4 sm:$0xff]  }
  0x2c   :  { %986 = vmatpush1.bf16.msra.mxu1 %v1386_v43  ;;  %946 = vmatprep.subr.bf16.mxu0 %v1387_v44  ;;  %v1474_v43 = vld [vmem:[%s2032_s1 + $0x384] ss:$8 sps:$4 sm:$0xff]   ;;  %v1469_v44 = vld [vmem:[%s2032_s1 + $0x280] ss:$8 sps:$4 sm:$0xff]  }
  0x2d   :  { %987 = vmatprep.subr.bf16.mxu1 %v1389_v45  ;;  %v1472_v45 = vld [vmem:[%s2032_s1 + $0x380] ss:$8 sps:$4 sm:$0xff]  }
  0x2f   :  { %947 = vmatpush1.bf16.msra.mxu0 %v1391_v49  ;;  %v1478_v49 = vld [vmem:[%s2032_s1 + $0x390] ss:$8 sps:$4 sm:$0xff]  }
  0x30   :  { %988 = vmatpush1.bf16.msra.mxu1 %v1392_v50  ;;  %948 = vmatprep.subr.bf16.mxu0 %v1393_v52  ;;  %v1483_v50 = vld [vmem:[%s2032_s1 + $0x2a4] ss:$8 sps:$4 sm:$0xff]   ;;  %v1481_v52 = vld [vmem:[%s2032_s1 + $0x2a0] ss:$8 sps:$4 sm:$0xff]  }
  0x31   :  { %989 = vmatprep.subr.bf16.mxu1 %v1395_v53  ;;  %v1484_v53 = vld [vmem:[%s2032_s1 + $0x3a0] ss:$8 sps:$4 sm:$0xff]  }
  0x33   :  { %949 = vmatpush1.bf16.msra.mxu0 %v1397_v54  ;;  %v1489_v54 = vld [vmem:[%s2032_s1 + $0x2b4] ss:$8 sps:$4 sm:$0xff]  }
  0x34   :  { %990 = vmatpush1.bf16.msra.mxu1 %v1398_v55  ;;  %950 = vmatprep.subr.bf16.mxu0 %v1399_v56  ;;  %v1492_v55 = vld [vmem:[%s2032_s1 + $0x3b4] ss:$8 sps:$4 sm:$0xff]   ;;  %v1487_v56 = vld [vmem:[%s2032_s1 + $0x2b0] ss:$8 sps:$4 sm:$0xff]  }
  0x35   :  { %991 = vmatprep.subr.bf16.mxu1 %v1401_v57  ;;  %v1490_v57 = vld [vmem:[%s2032_s1 + $0x3b0] ss:$8 sps:$4 sm:$0xff]  }
  0x37   :  { %951 = vmatpush1.bf16.msra.mxu0 %v1403_v58  ;;  %v1495_v58 = vld [vmem:[%s2032_s1 + $0x2c4] ss:$8 sps:$4 sm:$0xff]  }
  0x38   :  { %992 = vmatpush1.bf16.msra.mxu1 %v1404_v59  ;;  %952 = vmatprep.subr.bf16.mxu0 %v1405_v60  ;;  %v1498_v59 = vld [vmem:[%s2032_s1 + $0x3c4] ss:$8 sps:$4 sm:$0xff]   ;;  %v1493_v60 = vld [vmem:[%s2032_s1 + $0x2c0] ss:$8 sps:$4 sm:$0xff]  }
  0x39   :  { %993 = vmatprep.subr.bf16.mxu1 %v1407_v61  ;;  %v1496_v61 = vld [vmem:[%s2032_s1 + $0x3c0] ss:$8 sps:$4 sm:$0xff]  }
  0x3b   :  { %953 = vmatpush1.bf16.msra.mxu0 %v1409_v62  ;;  %v1501_v62 = vld [vmem:[%s2032_s1 + $0x2d4] ss:$8 sps:$4 sm:$0xff]  }
  0x3c   :  { %994 = vmatpush1.bf16.msra.mxu1 %v1410_v63  ;;  %954 = vmatprep.subr.bf16.mxu0 %v1411_v0  ;;  %v1504_v63 = vld [vmem:[%s2032_s1 + $0x3d4] ss:$8 sps:$4 sm:$0xff]   ;;  %v1499_v0 = vld [vmem:[%s2032_s1 + $0x2d0] ss:$8 sps:$4 sm:$0xff]  }
  0x3d   :  { %995 = vmatprep.subr.bf16.mxu1 %v1413_v1  ;;  %v1502_v1 = vld [vmem:[%s2032_s1 + $0x3d0] ss:$8 sps:$4 sm:$0xff]  }
  0x3f   :  { %955 = vmatpush1.bf16.msra.mxu0 %v1415_v2  ;;  %v1507_v2 = vld [vmem:[%s2032_s1 + $0x2e4] ss:$8 sps:$4 sm:$0xff]  }
  0x40   :  { %996 = vmatpush1.bf16.msra.mxu1 %v1416_v3  ;;  %1006 = vmatprep.subr.bf16.mxu0 %v1423_v4  ;;  %v1510_v3 = vld [vmem:[%s2032_s1 + $0x3e4] ss:$8 sps:$4 sm:$0xff]   ;;  %v1505_v4 = vld [vmem:[%s2032_s1 + $0x2e0] ss:$8 sps:$4 sm:$0xff]  }
  0x41   :  { %1047 = vmatprep.subr.bf16.mxu1 %v1426_v5  ;;  %v1508_v5 = vld [vmem:[%s2032_s1 + $0x3e0] ss:$8 sps:$4 sm:$0xff]  }
  0x42   :  { %957 = vmatmul.mubr.bf16.vlgmr.msra.gmra.mrb[0].mxu0 %v1165_v6  ;;  %v1513_v6 = vld [vmem:[%s2032_s1 + $0x2f4] ss:$8 sps:$4 sm:$0xff]  }
  0x43   :  { %998 = vmatmul.mubr.bf16.vlgmr.msra.gmra.mrb[0].mxu1 %v1167_v7  ;;  %1007 = vmatpush1.bf16.msra.mxu0 %v1421_v8  ;;  %v1516_v7 = vld [vmem:[%s2032_s1 + $0x3f4] ss:$8 sps:$4 sm:$0xff]   ;;  %v1511_v8 = vld [vmem:[%s2032_s1 + $0x2f0] ss:$8 sps:$4 sm:$0xff]  }
  0x44   :  { %1048 = vmatpush1.bf16.msra.mxu1 %v1424_v9  ;;  %1008 = vmatprep.subr.bf16.mxu0 %v1429_v10  ;;  %v1514_v9 = vld [vmem:[%s2032_s1 + $0x3f0] ss:$8 sps:$4 sm:$0xff]   ;;  %v1521_v10 = vld [vmem:[%s2032_s1 + $0x404] ss:$8 sps:$4 sm:$0xff]  }
  0x45   :  { %1049 = vmatprep.subr.bf16.mxu1 %v1432_v11  ;;  %1038 = vmatprep.mubr.bf16.mxu0 %v1170_v35  ;;  %v1169_v11 = vcombine.low %v1846_v32, %v1846_v32 }
  0x46   :  { %1079 = vmatprep.mubr.bf16.mxu1 %v1172_v38 }
  0x47   :  { %1009 = vmatpush1.bf16.msra.mxu0 %v1427_v12  ;;  %v1171_v12 = vcombine.low %v1859_v36, %v1859_v36 }
  0x48   :  { %1050 = vmatpush1.bf16.msra.mxu1 %v1430_v13  ;;  %1010 = vmatprep.subr.bf16.mxu0 %v1435_v14  ;;  %v1519_v13 = vld [vmem:[%s2032_s1 + $0x400] ss:$8 sps:$4 sm:$0xff]   ;;  %v1526_v14 = vld [vmem:[%s2032_s1 + $0x414] ss:$8 sps:$4 sm:$0xff]  }
  0x49   :  { %1051 = vmatprep.subr.bf16.mxu1 %v1438_v15  ;;  %v1524_v15 = vld [vmem:[%s2032_s1 + $0x410] ss:$8 sps:$4 sm:$0xff]  }
  0x4b   :  { %1011 = vmatpush1.bf16.msra.mxu0 %v1433_v16  ;;  %v1546_v16 = vmov 0  }
  0x4c   :  { %1052 = vmatpush1.bf16.msra.mxu1 %v1436_v17  ;;  %1012 = vmatprep.subr.bf16.mxu0 %v1441_v18  ;;  %v1529_v17 = vld [vmem:[%s2032_s1 + $0x424] ss:$8 sps:$4 sm:$0xff]   ;;  %v1527_v18 = vld [vmem:[%s2032_s1 + $0x420] ss:$8 sps:$4 sm:$0xff]  }
  0x4d   :  { %1053 = vmatprep.subr.bf16.mxu1 %v1444_v19  ;;  %v1532_v19 = vld [vmem:[%s2032_s1 + $0x434] ss:$8 sps:$4 sm:$0xff]  }
  0x4f   :  { %1013 = vmatpush1.bf16.msra.mxu0 %v1439_v20  ;;  %v1530_v20 = vld [vmem:[%s2032_s1 + $0x430] ss:$8 sps:$4 sm:$0xff]  }
  0x50   :  { %1054 = vmatpush1.bf16.msra.mxu1 %v1442_v21  ;;  %1014 = vmatprep.subr.bf16.mxu0 %v1447_v22  ;;  %v1535_v21 = vld [vmem:[%s2032_s1 + $0x444] ss:$8 sps:$4 sm:$0xff]   ;;  %v1533_v22 = vld [vmem:[%s2032_s1 + $0x440] ss:$8 sps:$4 sm:$0xff]  }
  0x51   :  { %1055 = vmatprep.subr.bf16.mxu1 %v1450_v23  ;;  %v1538_v23 = vld [vmem:[%s2032_s1 + $0x454] ss:$8 sps:$4 sm:$0xff]  }
  0x53   :  { %1015 = vmatpush1.bf16.msra.mxu0 %v1445_v24  ;;  %v1536_v24 = vld [vmem:[%s2032_s1 + $0x450] ss:$8 sps:$4 sm:$0xff]  }
  0x54   :  { %1056 = vmatpush1.bf16.msra.mxu1 %v1448_v25  ;;  %1016 = vmatprep.subr.bf16.mxu0 %v1453_v26  ;;  %v1541_v25 = vld [vmem:[%s2032_s1 + $0x464] ss:$8 sps:$4 sm:$0xff]   ;;  %v1539_v26 = vld [vmem:[%s2032_s1 + $0x460] ss:$8 sps:$4 sm:$0xff]  }
  0x55   :  { %1057 = vmatprep.subr.bf16.mxu1 %v1456_v27  ;;  %v1544_v27 = vld [vmem:[%s2032_s1 + $0x474] ss:$8 sps:$4 sm:$0xff]  }
  0x57   :  { %1017 = vmatpush1.bf16.msra.mxu0 %v1451_v28  ;;  %v1542_v28 = vld [vmem:[%s2032_s1 + $0x470] ss:$8 sps:$4 sm:$0xff]  }
  0x58   :  { %1058 = vmatpush1.bf16.msra.mxu1 %v1454_v29  ;;  %1018 = vmatprep.subr.bf16.mxu0 %v1459_v30  ;;  %v1545_v29 = vld [vmem:[%s2033_s0 + $0x20] ss:$0 sps:$4 sm:$0xff]  }
  0x59   :  { %1059 = vmatprep.subr.bf16.mxu1 %v1462_v31 }
  0x5b   :  { %1019 = vmatpush1.bf16.msra.mxu0 %v1457_v33 }
  0x5c   :  { %1060 = vmatpush1.bf16.msra.mxu1 %v1460_v34  ;;  %1020 = vmatprep.subr.bf16.mxu0 %v1465_v37 }
  0x5d   :  { %1061 = vmatprep.subr.bf16.mxu1 %v1468_v39 }
  0x5f   :  { %1021 = vmatpush1.bf16.msra.mxu0 %v1463_v40 }
  0x60   :  { %1062 = vmatpush1.bf16.msra.mxu1 %v1466_v41  ;;  %1022 = vmatprep.subr.bf16.mxu0 %v1471_v42 }
  0x61   :  { %1063 = vmatprep.subr.bf16.mxu1 %v1474_v43 }
  0x63   :  { %1023 = vmatpush1.bf16.msra.mxu0 %v1469_v44 }
  0x64   :  { %1064 = vmatpush1.bf16.msra.mxu1 %v1472_v45  ;;  %1024 = vmatprep.subr.bf16.mxu0 %v1477_v46 }
  0x65   :  { %1065 = vmatprep.subr.bf16.mxu1 %v1480_v47 }
  0x67   :  { %1025 = vmatpush1.bf16.msra.mxu0 %v1475_v48 }
  0x68   :  { %1066 = vmatpush1.bf16.msra.mxu1 %v1478_v49  ;;  %1026 = vmatprep.subr.bf16.mxu0 %v1483_v50 }
  0x69   :  { %1067 = vmatprep.subr.bf16.mxu1 %v1486_v51 }
  0x6b   :  { %1027 = vmatpush1.bf16.msra.mxu0 %v1481_v52  ;;  %v1140_v52 = vlaneseq }
  0x6c   :  { %1068 = vmatpush1.bf16.msra.mxu1 %v1484_v53  ;;  %1028 = vmatprep.subr.bf16.mxu0 %v1489_v54 }
  0x6d   :  { %1069 = vmatprep.subr.bf16.mxu1 %v1492_v55  ;;  %v1141_v53 = vshrl.u32 %v1140_v52, 7  ;;  %v1138_v55 = vld [vmem:[%s2034_s2] sm:$0x3] }
  0x6f   :  { %1029 = vmatpush1.bf16.msra.mxu0 %v1487_v56  ;;  %v1142_v54 = vsub.s32 0, %v1141_v53  ;;  %v1146_v56 = vsub.s32 1, %v1141_v53 }
  0x70   :  { %1070 = vmatpush1.bf16.msra.mxu1 %v1490_v57  ;;  %1030 = vmatprep.subr.bf16.mxu0 %v1495_v58 }
  0x71   :  { %1071 = vmatprep.subr.bf16.mxu1 %v1498_v59  ;;  %v1143_v57 = vrot.slane %v1138_v55, %v1142_v54  ;;  %v1147_v59 = vrot.slane %v1138_v55, %v1146_v56 }
  0x73   :  { %1031 = vmatpush1.bf16.msra.mxu0 %v1493_v60 }
  0x74   :  { %1072 = vmatpush1.bf16.msra.mxu1 %v1496_v61  ;;  %1032 = vmatprep.subr.bf16.mxu0 %v1501_v62 }
  0x75   :  { %1073 = vmatprep.subr.bf16.mxu1 %v1504_v63 }
  0x77   :  { %1033 = vmatpush1.bf16.msra.mxu0 %v1499_v0 }
  0x78   :  { %1074 = vmatpush1.bf16.msra.mxu1 %v1502_v1  ;;  %1034 = vmatprep.subr.bf16.mxu0 %v1507_v2 }
  0x79   :  { %1075 = vmatprep.subr.bf16.mxu1 %v1510_v3 }
  0x7b   :  { %1035 = vmatpush1.bf16.msra.mxu0 %v1505_v4 }
  0x7c   :  { %1076 = vmatpush1.bf16.msra.mxu1 %v1508_v5  ;;  %1036 = vmatprep.subr.bf16.mxu0 %v1513_v6 }
  0x7d   :  { %1077 = vmatprep.subr.bf16.mxu1 %v1516_v7 }
  0x7f   :  { %1037 = vmatpush1.bf16.msra.mxu0 %v1511_v8 }
  0x80   :  { %1078 = vmatpush1.bf16.msra.mxu1 %v1514_v9  ;;  %1088 = vmatprep.subr.bf16.mxu0 %v1521_v10 }
  0x82   :  { %1039 = vmatmul.mubr.bf16.vlgmr.msra.gmra.mrb[4].mxu0 %v1169_v11 }
  0x83   :  { %1080 = vmatmul.mubr.bf16.vlgmr.msra.gmra.mrb[4].mxu1 %v1171_v12  ;;  %1089 = vmatpush1.bf16.msra.mxu0 %v1519_v13 }
  0x84   :  { %1120 = vmatprep.mubr.bf16.mxu0 %v1546_v16  ;;  %1090 = vmatprep.subr.bf16.mxu0 %v1526_v14 }
  0x87   :  { %1091 = vmatpush1.bf16.msra.mxu0 %v1524_v15 }
  0x88   :  { %1092 = vmatprep.subr.bf16.mxu0 %v1529_v17 }
  0x8b   :  { %1093 = vmatpush1.bf16.msra.mxu0 %v1527_v18 }
  0x8c   :  { %1094 = vmatprep.subr.bf16.mxu0 %v1532_v19 }
  0x8f   :  { %1095 = vmatpush1.bf16.msra.mxu0 %v1530_v20 }
  0x90   :  { %1096 = vmatprep.subr.bf16.mxu0 %v1535_v21 }
  0x93   :  { %1097 = vmatpush1.bf16.msra.mxu0 %v1533_v22 }
  0x94   :  { %1098 = vmatprep.subr.bf16.mxu0 %v1538_v23 }
  0x97   :  { %1099 = vmatpush1.bf16.msra.mxu0 %v1536_v24 }
  0x98   :  { %1100 = vmatprep.subr.bf16.mxu0 %v1541_v25 }
  0x9b   :  { %1101 = vmatpush1.bf16.msra.mxu0 %v1539_v26 }
  0x9c   :  { %1102 = vmatprep.subr.bf16.mxu0 %v1544_v27 }
  0x9f   :  { %1103 = vmatpush1.bf16.msra.mxu0 %v1542_v28 }
  0xa2   :  { %1121 = vmatmul.mubr.bf16.vlgmr.msra.gmra.mrb[8].mxu0 %v1545_v29 }
 0x115   :  { %v958_v30 = vpop.f32.mrb[0].mxu0 }
 0x116   :  { %v999_v31 = vpop.f32.mrb[0].mxu1  ;;  %v960_v33 = vpop.f32.mrb[1].mxu0 }
 0x117   :  { %v1000_v32 = vadd.f32 %v999_v31, %v958_v30  ;;  %v1001_v34 = vpop.f32.mrb[1].mxu1  ;;  %v962_v36 = vpop.f32.mrb[2].mxu0 }
 0x118   :  { %v1002_v35 = vadd.f32 %v1001_v34, %v960_v33  ;;  %v1003_v37 = vpop.f32.mrb[2].mxu1  ;;  %v963_v38 = vpop.f32.mrb[3].mxu0 }
 0x119   :  { %v1004_v39 = vpop.f32.mrb[3].mxu1 }
 0x155   :  { %v1040_v40 = vpop.f32.mrb[4].mxu0 }
 0x156   :  { %v1081_v41 = vpop.f32.mrb[4].mxu1  ;;  %v1041_v42 = vadd.f32 %v1040_v40, %v1000_v32  ;;  %v1042_v43 = vpop.f32.mrb[5].mxu0 }
 0x157   :  { %v1083_v44 = vpop.f32.mrb[5].mxu1  ;;  %v1043_v45 = vadd.f32 %v1042_v43, %v1002_v35  ;;  %v1044_v46 = vpop.f32.mrb[6].mxu0 }
 0x158   :  { %v1085_v47 = vpop.f32.mrb[6].mxu1  ;;  %v1082_v48 = vadd.f32 %v1081_v41, %v1041_v42  ;;  %v1045_v49 = vpop.f32.mrb[7].mxu0 }
 0x159   :  { %v1086_v50 = vpop.f32.mrb[7].mxu1  ;;  %v1084_v51 = vadd.f32 %v1083_v44, %v1043_v45 }
 0x175   :  { %v1122_v58 = vpop.f32.mrb[8].mxu0 }
 0x176   :  { %v1123_v60 = vadd.f32 %v1122_v58, %v1082_v48  ;;  %v1124_v61 = vpop.f32.mrb[9].mxu0 }
 0x177   :  { %v1125_v62 = vadd.f32 %v1124_v61, %v1084_v51  ;;  %v1126_v63 = vpop.f32.mrb[10].mxu0 }
 0x178   :  { %v1150_v0 = vadd.f32 %v1143_v57, %v1123_v60  ;;  %v1127_v1 = vpop.f32.mrb[11].mxu0 }
 0x179   :  { %v1151_v2 = vadd.f32 %v1147_v59, %v1125_v62 }
 0x17b   :  { %v1319_v3 = vpack.c.bf16 %v1151_v2, %v1150_v0 }
 0x17d   :  { %1160 = vst [vmem:[%s2035_s3] sm:$0xff] %v1319_v3 }

// kernel: _lambda_.34
= control target key start
LH: loop header
LB: loop body
LE: loop exit
PB: predicated region body
PF: predicated region fallthrough
CT: control target
= control target key end

     0   :  { %s851_s12 = smov 0   ;;  %s853_s13 = smov 0   ;;  %s933_s0 = inlined_call_operand.vmem [shape: bf16[8,2304], index: 0, kind: input, shape index: {}]   ;;  %s934_s1 = inlined_call_operand.vmem [shape: bf16[2304,256], index: 1, kind: input, shape index: {}]   ;;  %s935_s2 = inlined_call_operand.vmem [shape: f32[1,256], index: 2, kind: input, shape index: {}]   ;;  %s936_s3 = inlined_call_operand.vmem [shape: bf16[8,256], index: 3, kind: output, shape index: {}]  }
   0x1   :  { %s855_s14 = smov 0  }
   0x2 LB: > { %s25_s15 = sadd.s32 1, %s824_s13  ;;  %p682_p0 = scmp.ge.s32.totalorder %s828_s14, 1  ;;  %s828_s14 = sphi %s855_s14, %s13_s14   ;;  %s824_s13 = sphi %s853_s13, %s938_s13   ;;  %s820_s12 = sphi %s851_s12, %s937_s12  }
   0x3   : > { %p26_p1 = scmp.ge.s32.totalorder %s25_s15, 9  ;;  %p194_p2 = scmp.lt.s32.totalorder %s828_s14, 10 }
   0x5   : > { %s940_s15 = smov (%p26_p1, %s25_s15), 0  ;;  %p195_p3 = pnand %p682_p0, %p194_p2 }
   0x6   : > { %s683_s16 = sshll.u32 (!%p195_p3), %s820_s12, 1  ;;  %s685_s17 = sshll.u32 (!%p195_p3), %s820_s12, 5 }
   0x7   : > { %198 = sbr.rel (%p195_p3) target bundleno = 319 (0x13f), region = 32  ;;  %p243_p4 = scmp.lt.s32.totalorder (!%p195_p3), %s683_s16, 17 }
   0x8   : > { %p252_p5 = scmp.lt.s32.totalorder (!%p195_p3), %s685_s17, 287  ;;  %p688_p6 = scmp.ne.s32.totalorder (!%p195_p3), %s820_s12, 0 }
   0xe   : > { %s942_s16 = smov (!%p243_p4, %s683_s16), 17  ;;  %s944_s17 = smov (!%p252_p5, %s685_s17), 287 }
   0xf   : > { %s684_s18 = sshll.u32 %s942_s16, 2  ;;  %s729_s22 = sshll.u32 %s944_s17, 3  ;;  %v830_v0 = vmov (!%p688_p6), 0.0  }
  0x10   : > { %s876_s21 = scalar_lea.vmem %s933_s0, %s684_s18  ;;  %s881_s25 = scalar_lea.vmem %s934_s1, %s729_s22  ;;  %281 = vst [vmem:[#allocation2] sm:$0xff] (!%p688_p6), %v830_v0  ;;  %282 = vst [vmem:[#allocation2 + $0x8] sm:$0xff] (!%p688_p6), %v830_v0 }
  0x11   : > { %280 = sbr.rel (%p688_p6) target bundleno = 24 (0x18), region = 36 }
  0x18 PF: > { %v756_v1 = vld [vmem:[%s881_s25 + $0x4] ss:$8 sps:$4 sm:$0xff]   ;;  %v758_v2 = vld [vmem:[%s881_s25] ss:$8 sps:$4 sm:$0xff]   ;;  %v759_v3 = vld [vmem:[%s881_s25 + $0x14] ss:$8 sps:$4 sm:$0xff]  }
  0x19   : > { %485 = vmatprep.subr.bf16.mxu0 %v756_v1  ;;  %v761_v4 = vld [vmem:[%s881_s25 + $0x10] ss:$8 sps:$4 sm:$0xff]   ;;  %v762_v5 = vld [vmem:[%s881_s25 + $0x24] ss:$8 sps:$4 sm:$0xff]   ;;  %v764_v6 = vld [vmem:[%s881_s25 + $0x20] ss:$8 sps:$4 sm:$0xff]  }
  0x1a   : > { %486 = vmatpush1.bf16.msra.mxu0 %v758_v2  ;;  %v765_v7 = vld [vmem:[%s881_s25 + $0x34] ss:$8 sps:$4 sm:$0xff]   ;;  %v767_v8 = vld [vmem:[%s881_s25 + $0x30] ss:$8 sps:$4 sm:$0xff]   ;;  %v768_v9 = vld [vmem:[%s881_s25 + $0x44] ss:$8 sps:$4 sm:$0xff]  }
  0x1b   : > { %487 = vmatprep.subr.bf16.mxu0 %v759_v3  ;;  %v770_v10 = vld [vmem:[%s881_s25 + $0x40] ss:$8 sps:$4 sm:$0xff]   ;;  %v771_v11 = vld [vmem:[%s881_s25 + $0x54] ss:$8 sps:$4 sm:$0xff]   ;;  %v773_v12 = vld [vmem:[%s881_s25 + $0x50] ss:$8 sps:$4 sm:$0xff]  }
  0x1c   : > { %v774_v13 = vld [vmem:[%s881_s25 + $0x64] ss:$8 sps:$4 sm:$0xff]   ;;  %v776_v16 = vld [vmem:[%s881_s25 + $0x60] ss:$8 sps:$4 sm:$0xff]   ;;  %v777_v17 = vld [vmem:[%s881_s25 + $0x74] ss:$8 sps:$4 sm:$0xff]  }
  0x1d   : > { %v285_v14 = vld [vmem:[%s876_s21] sm:$0xff]  ;;  %v779_v18 = vld [vmem:[%s881_s25 + $0x70] ss:$8 sps:$4 sm:$0xff]   ;;  %v783_v21 = vld [vmem:[%s881_s25 + $0x94] ss:$8 sps:$4 sm:$0xff]   ;;  %p723_p7 = scmp.ne.s32.totalorder %s820_s12, 8 }
  0x1e   : > { %488 = vmatpush1.bf16.msra.mxu0 %v761_v4  ;;  %v690_v15 = vcombine.high %v285_v14, %v285_v14  ;;  %v780_v19 = vld [vmem:[%s881_s25 + $0x84] ss:$8 sps:$4 sm:$0xff]   ;;  %v782_v20 = vld [vmem:[%s881_s25 + $0x80] ss:$8 sps:$4 sm:$0xff]   ;;  %v785_v22 = vld [vmem:[%s881_s25 + $0x90] ss:$8 sps:$4 sm:$0xff]   ;;  %v689_v35 = vcombine.low %v285_v14, %v285_v14  ;;  %v538_v44 = vlaneseq (!%p723_p7) }
  0x1f   : > { %489 = vmatprep.subr.bf16.mxu0 %v762_v5  ;;  %v786_v23 = vld [vmem:[%s881_s25 + $0xa4] ss:$8 sps:$4 sm:$0xff]   ;;  %v788_v24 = vld [vmem:[%s881_s25 + $0xa0] ss:$8 sps:$4 sm:$0xff]   ;;  %v789_v25 = vld [vmem:[%s881_s25 + $0xb4] ss:$8 sps:$4 sm:$0xff]  }
  0x20   : > { %517 = vmatprep.mubr.bf16.mxu0 %v690_v15  ;;  %v791_v26 = vld [vmem:[%s881_s25 + $0xb0] ss:$8 sps:$4 sm:$0xff]   ;;  %v792_v27 = vld [vmem:[%s881_s25 + $0xc4] ss:$8 sps:$4 sm:$0xff]   ;;  %v794_v28 = vld [vmem:[%s881_s25 + $0xc0] ss:$8 sps:$4 sm:$0xff]  }
  0x21   : > { %v795_v29 = vld [vmem:[%s881_s25 + $0xd4] ss:$8 sps:$4 sm:$0xff]   ;;  %v797_v30 = vld [vmem:[%s881_s25 + $0xd0] ss:$8 sps:$4 sm:$0xff]   ;;  %v798_v31 = vld [vmem:[%s881_s25 + $0xe4] ss:$8 sps:$4 sm:$0xff]  }
  0x22   : > { %490 = vmatpush1.bf16.msra.mxu0 %v764_v6  ;;  %v800_v32 = vld [vmem:[%s881_s25 + $0xe0] ss:$8 sps:$4 sm:$0xff]   ;;  %v801_v33 = vld [vmem:[%s881_s25 + $0xf4] ss:$8 sps:$4 sm:$0xff]   ;;  %v803_v34 = vld [vmem:[%s881_s25 + $0xf0] ss:$8 sps:$4 sm:$0xff]  }
  0x23   : > { %491 = vmatprep.subr.bf16.mxu0 %v765_v7  ;;  %v283_v36 = vld [vmem:[#allocation2] sm:$0xff]  ;;  %v284_v37 = vld [vmem:[#allocation2 + $0x8] sm:$0xff]  ;;  %v539_v45 = vshrl.u32 (!%p723_p7), %v538_v44, 7 }
  0x24   : > { %v536_v46 = vld [vmem:[%s935_s2] sm:$0x3] (!%p723_p7) }
  0x25   : > { %v540_v47 = vsub.s32 (!%p723_p7), 0, %v539_v45  ;;  %v544_v48 = vsub.s32 (!%p723_p7), 1, %v539_v45 }
  0x26   : > { %492 = vmatpush1.bf16.msra.mxu0 %v767_v8 }
  0x27   : > { %493 = vmatprep.subr.bf16.mxu0 %v768_v9  ;;  %v541_v51 = vrot.slane (!%p723_p7), %v536_v46, %v540_v47  ;;  %v545_v52 = vrot.slane (!%p723_p7), %v536_v46, %v544_v48 }
  0x2a   : > { %494 = vmatpush1.bf16.msra.mxu0 %v770_v10 }
  0x2b   : > { %495 = vmatprep.subr.bf16.mxu0 %v771_v11 }
  0x2e   : > { %496 = vmatpush1.bf16.msra.mxu0 %v773_v12 }
  0x2f   : > { %497 = vmatprep.subr.bf16.mxu0 %v774_v13 }
  0x32   : > { %498 = vmatpush1.bf16.msra.mxu0 %v776_v16 }
  0x33   : > { %499 = vmatprep.subr.bf16.mxu0 %v777_v17 }
  0x36   : > { %500 = vmatpush1.bf16.msra.mxu0 %v779_v18 }
  0x37   : > { %501 = vmatprep.subr.bf16.mxu0 %v780_v19 }
  0x3a   : > { %502 = vmatpush1.bf16.msra.mxu0 %v782_v20 }
  0x3b   : > { %503 = vmatprep.subr.bf16.mxu0 %v783_v21 }
  0x3e   : > { %504 = vmatpush1.bf16.msra.mxu0 %v785_v22 }
  0x3f   : > { %505 = vmatprep.subr.bf16.mxu0 %v786_v23 }
  0x42   : > { %506 = vmatpush1.bf16.msra.mxu0 %v788_v24 }
  0x43   : > { %507 = vmatprep.subr.bf16.mxu0 %v789_v25 }
  0x46   : > { %508 = vmatpush1.bf16.msra.mxu0 %v791_v26 }
  0x47   : > { %509 = vmatprep.subr.bf16.mxu0 %v792_v27 }
  0x4a   : > { %510 = vmatpush1.bf16.msra.mxu0 %v794_v28 }
  0x4b   : > { %511 = vmatprep.subr.bf16.mxu0 %v795_v29 }
  0x4e   : > { %512 = vmatpush1.bf16.msra.mxu0 %v797_v30 }
  0x4f   : > { %513 = vmatprep.subr.bf16.mxu0 %v798_v31 }
  0x52   : > { %514 = vmatpush1.bf16.msra.mxu0 %v800_v32 }
  0x53   : > { %515 = vmatprep.subr.bf16.mxu0 %v801_v33 }
  0x56   : > { %516 = vmatpush1.bf16.msra.mxu0 %v803_v34 }
  0x59   : > { %518 = vmatmul.mubr.bf16.vlgmr.msra.gmra.mrb[0].mxu0 %v689_v35 }
 0x12a   : > { %533 = sbr.rel (%p723_p7) target bundleno = 319 (0x13f), region = 40 }
 0x12c   : > { %v519_v38 = vpop.f32.mrb[0].mxu0 }
 0x12d   : > { %v526_v39 = vadd.f32 %v519_v38, %v283_v36  ;;  %v521_v40 = vpop.f32.mrb[1].mxu0 }
 0x12e   : > { %v527_v41 = vadd.f32 %v521_v40, %v284_v37  ;;  %v523_v42 = vpop.f32.mrb[2].mxu0 }
 0x12f   : > { %528 = vst [vmem:[#allocation2] sm:$0xff] %v526_v39  ;;  %v524_v43 = vpop.f32.mrb[3].mxu0 }
 0x130   : > { %529 = vst [vmem:[#allocation2 + $0x8] sm:$0xff] %v527_v41 }
 0x136   : > { %v534_v49 = vld [vmem:[#allocation2] sm:$0xff] }
 0x137   : > { %v535_v50 = vld [vmem:[#allocation2 + $0x8] sm:$0xff]  ;;  %v548_v53 = vadd.f32 %v541_v51, %v534_v49 }
 0x138   : > { %v549_v54 = vadd.f32 %v545_v52, %v535_v50 }
 0x139   : > { %v550_v55 = vmax.f32 %v548_v53, 0.0 }
 0x13a   : > { %v551_v56 = vmax.f32 %v549_v54, 0.0 }
 0x13c   : > { %v730_v57 = vpack.c.bf16 %v551_v56, %v550_v55 }
 0x13e   : > { %560 = vst [vmem:[%s936_s3] sm:$0xff] %v730_v57 }
 0x13f PF: > { %s13_s14 = sadd.s32 1, %s828_s14   ;;  %s937_s12 = smov %s824_s13 }
 0x140   : > { %p10_p8 = scmp.ge.s32.totalorder %s13_s14, 11   ;;  %s938_s13 = smov %s940_s15 }
 0x142   :  { %12 = sbr.rel (!%p10_p8) target bundleno = 2 (0x2), region = 76 }

// kernel: _lambda_.36
= control target key start
LH: loop header
LB: loop body
LE: loop exit
PB: predicated region body
PF: predicated region fallthrough
CT: control target
= control target key end

     0   :  { %s1070_s12 = smov 0   ;;  %s1072_s13 = smov 0   ;;  %s1284_s0 = inlined_call_operand.vmem [shape: bf16[8,2304], index: 0, kind: input, shape index: {}]   ;;  %s1285_s1 = inlined_call_operand.vmem [shape: bf16[2304,512], index: 1, kind: input, shape index: {}]   ;;  %s1286_s2 = inlined_call_operand.vmem [shape: f32[1,512], index: 2, kind: input, shape index: {}]   ;;  %s1287_s3 = inlined_call_operand.vmem [shape: bf16[8,512], index: 3, kind: output, shape index: {}]  }
   0x1   :  { %s1074_s14 = smov 0   ;;  %s1076_s15 = smov 0  }
   0x2   :  { %s1078_s16 = smov 0   ;;  %s1080_s17 = smov 0  }
   0x3   :  { %s1082_s18 = smov 0  }
   0x4 LB: > { %s25_s19 = sadd.s32 1, %s1039_s16  ;;  %s28_s20 = sadd.s32 1, %s1043_s17  ;;  %s1047_s18 = sphi %s1082_s18, %s13_s18   ;;  %s1043_s17 = sphi %s1080_s17, %s1293_s17   ;;  %s1039_s16 = sphi %s1078_s16, %s1292_s16   ;;  %s1035_s15 = sphi %s1076_s15, %s1291_s15   ;;  %s1031_s14 = sphi %s1074_s14, %s1290_s14   ;;  %s1027_s13 = sphi %s1072_s13, %s1289_s13   ;;  %s1023_s12 = sphi %s1070_s12, %s1288_s12  }
   0x5   : > { %p26_p0 = scmp.ge.s32.totalorder %s25_s19, 9  ;;  %p76_p1 = scmp.ne.s32.totalorder %s1027_s13, %s1023_s12 }
   0x6   : > { %p77_p2 = scmp.eq.s32.totalorder %s1047_s18, 0  ;;  %s69_s24 = sadd.s32 1, %s1027_s13 }
   0x7   : > { %s1295_s19 = smov (%p26_p0, %s25_s19), 0  ;;  %s1297_s20 = smov (!%p26_p0, %s28_s20), %s1043_s17 }
   0x8   : > { %p78_p3 = por %p77_p2, %p76_p1  ;;  %p30_p4 = scmp.ge.s32.totalorder %s1297_s20, 2 }
   0x9   : > { %s64_s21 = ssub.s32 %s1039_s16, %s1295_s19  ;;  %p832_p6 = scmp.ge.s32.totalorder %s1047_s18, 18 }
   0xa   : > { %s1299_s20 = smov (%p30_p4, %s1297_s20), 0 }
   0xb   : > { %s65_s22 = ssub.s32 %s1043_s17, %s1299_s20  ;;  %156 = sbr.rel (%p832_p6) target bundleno = 41 (0x29), region = 16 }
   0xc   : > { %s66_s23 = sor.u32 %s65_s22, %s64_s21 }
   0xd   : > { %p67_p5 = scmp.eq.s32.totalorder %s66_s23, 0 }
   0xf   : > { %s1121_s25 = scalar_select %p67_p5, %s1027_s13, %s69_s24  }
  0x12   : > { %172 = sbr.rel (!%p78_p3) target bundleno = 41 (0x29), region = 24  ;;  %s174_s26 = sand.u32 (%p78_p3), 1, %s1027_s13  }
  0x13   : > { %s835_s27 = sshll.u32 (%p78_p3), %s1043_s17, 1  ;;  %s833_s28 = sshll.u32 (%p78_p3), %s174_s26, 8 }
  0x14   : > { %s884_s29 = sshll.u32 (%p78_p3), %s1039_s16, 7  ;;  %s1135_s8 = scalar_lea.vmem (%p78_p3), [#allocation3], %s833_s28 }
  0x15   : > { %s180_s30 = sadd.s32 (%p78_p3), %s884_s29, %s835_s27 }
  0x16   : > { %s837_s4 = sshll.u32 (%p78_p3), %s180_s30, 2 }
  0x17   : > { %s1130_s7 = scalar_lea.vmem (%p78_p3), %s1285_s1, %s837_s4 }
  0x18   : > { %v272_v0 = vld [vmem:[%s1130_s7] sm:$0xff] (%p78_p3)  ;;  %v274_v1 = vld [vmem:[%s1130_s7 + $0x10] sm:$0xff] (%p78_p3) }
  0x19   : > { %v276_v2 = vld [vmem:[%s1130_s7 + $0x20] sm:$0xff]  ;;  %273 = vst [vmem:[%s1135_s8] sm:$0xff] %v272_v0  ;;  %275 = vst [vmem:[%s1135_s8 + $0x8] sm:$0xff] %v274_v1  ;;  %v278_v3 = vld [vmem:[%s1130_s7 + $0x30] sm:$0xff] }
  0x1a   : > { %277 = vst [vmem:[%s1135_s8 + $0x10] sm:$0xff] %v276_v2  ;;  %v280_v4 = vld [vmem:[%s1130_s7 + $0x40] sm:$0xff]  ;;  %v282_v5 = vld [vmem:[%s1130_s7 + $0x50] sm:$0xff]  ;;  %279 = vst [vmem:[%s1135_s8 + $0x18] sm:$0xff] %v278_v3 }
  0x1b   : > { %281 = vst [vmem:[%s1135_s8 + $0x20] sm:$0xff] %v280_v4  ;;  %283 = vst [vmem:[%s1135_s8 + $0x28] sm:$0xff] %v282_v5  ;;  %v284_v6 = vld [vmem:[%s1130_s7 + $0x60] sm:$0xff]  ;;  %v286_v7 = vld [vmem:[%s1130_s7 + $0x70] sm:$0xff] }
  0x1c   : > { %v288_v8 = vld [vmem:[%s1130_s7 + $0x80] sm:$0xff]  ;;  %285 = vst [vmem:[%s1135_s8 + $0x30] sm:$0xff] %v284_v6  ;;  %287 = vst [vmem:[%s1135_s8 + $0x38] sm:$0xff] %v286_v7  ;;  %v290_v9 = vld [vmem:[%s1130_s7 + $0x90] sm:$0xff] }
  0x1d   : > { %289 = vst [vmem:[%s1135_s8 + $0x40] sm:$0xff] %v288_v8  ;;  %v292_v10 = vld [vmem:[%s1130_s7 + $0xa0] sm:$0xff]  ;;  %v294_v11 = vld [vmem:[%s1130_s7 + $0xb0] sm:$0xff]  ;;  %291 = vst [vmem:[%s1135_s8 + $0x48] sm:$0xff] %v290_v9 }
  0x1e   : > { %293 = vst [vmem:[%s1135_s8 + $0x50] sm:$0xff] %v292_v10  ;;  %295 = vst [vmem:[%s1135_s8 + $0x58] sm:$0xff] %v294_v11  ;;  %v296_v12 = vld [vmem:[%s1130_s7 + $0xc0] sm:$0xff]  ;;  %v298_v13 = vld [vmem:[%s1130_s7 + $0xd0] sm:$0xff] }
  0x1f   : > { %v300_v14 = vld [vmem:[%s1130_s7 + $0xe0] sm:$0xff]  ;;  %297 = vst [vmem:[%s1135_s8 + $0x60] sm:$0xff] %v296_v12  ;;  %299 = vst [vmem:[%s1135_s8 + $0x68] sm:$0xff] %v298_v13  ;;  %v302_v15 = vld [vmem:[%s1130_s7 + $0xf0] sm:$0xff] }
  0x20   : > { %301 = vst [vmem:[%s1135_s8 + $0x70] sm:$0xff] %v300_v14  ;;  %v304_v16 = vld [vmem:[%s1130_s7 + $0x100] sm:$0xff]  ;;  %v306_v17 = vld [vmem:[%s1130_s7 + $0x110] sm:$0xff]  ;;  %303 = vst [vmem:[%s1135_s8 + $0x78] sm:$0xff] %v302_v15 }
  0x21   : > { %305 = vst [vmem:[%s1135_s8 + $0x80] sm:$0xff] %v304_v16  ;;  %307 = vst [vmem:[%s1135_s8 + $0x88] sm:$0xff] %v306_v17  ;;  %v308_v18 = vld [vmem:[%s1130_s7 + $0x120] sm:$0xff]  ;;  %v310_v19 = vld [vmem:[%s1130_s7 + $0x130] sm:$0xff] }
  0x22   : > { %v312_v20 = vld [vmem:[%s1130_s7 + $0x140] sm:$0xff]  ;;  %309 = vst [vmem:[%s1135_s8 + $0x90] sm:$0xff] %v308_v18  ;;  %311 = vst [vmem:[%s1135_s8 + $0x98] sm:$0xff] %v310_v19  ;;  %v314_v21 = vld [vmem:[%s1130_s7 + $0x150] sm:$0xff] }
  0x23   : > { %313 = vst [vmem:[%s1135_s8 + $0xa0] sm:$0xff] %v312_v20  ;;  %v316_v22 = vld [vmem:[%s1130_s7 + $0x160] sm:$0xff]  ;;  %v318_v23 = vld [vmem:[%s1130_s7 + $0x170] sm:$0xff]  ;;  %315 = vst [vmem:[%s1135_s8 + $0xa8] sm:$0xff] %v314_v21 }
  0x24   : > { %317 = vst [vmem:[%s1135_s8 + $0xb0] sm:$0xff] %v316_v22  ;;  %319 = vst [vmem:[%s1135_s8 + $0xb8] sm:$0xff] %v318_v23  ;;  %v320_v24 = vld [vmem:[%s1130_s7 + $0x180] sm:$0xff]  ;;  %v322_v25 = vld [vmem:[%s1130_s7 + $0x190] sm:$0xff] }
  0x25   : > { %v324_v26 = vld [vmem:[%s1130_s7 + $0x1a0] sm:$0xff]  ;;  %321 = vst [vmem:[%s1135_s8 + $0xc0] sm:$0xff] %v320_v24  ;;  %323 = vst [vmem:[%s1135_s8 + $0xc8] sm:$0xff] %v322_v25  ;;  %v326_v27 = vld [vmem:[%s1130_s7 + $0x1b0] sm:$0xff] }
  0x26   : > { %325 = vst [vmem:[%s1135_s8 + $0xd0] sm:$0xff] %v324_v26  ;;  %v328_v28 = vld [vmem:[%s1130_s7 + $0x1c0] sm:$0xff]  ;;  %v330_v29 = vld [vmem:[%s1130_s7 + $0x1d0] sm:$0xff]  ;;  %327 = vst [vmem:[%s1135_s8 + $0xd8] sm:$0xff] %v326_v27 }
  0x27   : > { %329 = vst [vmem:[%s1135_s8 + $0xe0] sm:$0xff] %v328_v28  ;;  %331 = vst [vmem:[%s1135_s8 + $0xe8] sm:$0xff] %v330_v29  ;;  %v332_v30 = vld [vmem:[%s1130_s7 + $0x1e0] sm:$0xff]  ;;  %v334_v31 = vld [vmem:[%s1130_s7 + $0x1f0] sm:$0xff] }
  0x28   : > { %333 = vst [vmem:[%s1135_s8 + $0xf0] sm:$0xff] %v332_v30  ;;  %335 = vst [vmem:[%s1135_s8 + $0xf8] sm:$0xff] %v334_v31 }
  0x29 PF: > { %p838_p7 = scmp.ge.s32.totalorder %s1047_s18, 1  ;;  %p348_p8 = scmp.lt.s32.totalorder %s1047_s18, 19 }
  0x2b   : > { %p349_p9 = pnand %p838_p7, %p348_p8 }
  0x2c   : > { %s355_s9 = sand.u32 (!%p349_p9), 1, %s1023_s12   ;;  %s840_s10 = sshll.u32 (!%p349_p9), %s1031_s14, 1 }
  0x2d   : > { %352 = sbr.rel (%p349_p9) target bundleno = 357 (0x165), region = 66  ;;  %s839_s11 = sshll.u32 (!%p349_p9), %s355_s9, 8 }
  0x2e   : > { %p398_p10 = scmp.lt.s32.totalorder (!%p349_p9), %s840_s10, 17  ;;  %s842_s21 = sshll.u32 (!%p349_p9), %s1035_s15, 1 }
  0x2f   : > { %p408_p11 = scmp.lt.s32.totalorder (!%p349_p9), %s842_s21, 3  ;;  %s1220_s5 = scalar_lea.vmem (!%p349_p9), [#allocation3], %s839_s11 }
  0x30   : > { %p845_p12 = scmp.ne.s32.totalorder (!%p349_p9), %s1031_s14, 0 }
  0x34   : > { %s1301_s10 = smov (!%p398_p10, %s840_s10), 17  ;;  %s1303_s21 = smov (!%p408_p11, %s842_s21), 3 }
  0x35   : > { %s841_s22 = sshll.u32 %s1301_s10, 2  ;;  %s410_s12 = scalar_lea.vmem %s1286_s2, %s1303_s21  ;;  %v1049_v32 = vmov (!%p845_p12), 0.0  }
  0x36   : > { %s1206_s26 = scalar_lea.vmem %s1284_s0, %s841_s22  ;;  %s844_s29 = sshll.u32 %s1303_s21, 2  ;;  %426 = vst [vmem:[#allocation2] sm:$0xff] (!%p845_p12), %v1049_v32  ;;  %427 = vst [vmem:[#allocation2 + $0x8] sm:$0xff] (!%p845_p12), %v1049_v32 }
  0x37   : > { %s1218_s15 = scalar_lea.vmem %s1287_s3, %s844_s29  ;;  %425 = sbr.rel (%p845_p12) target bundleno = 62 (0x3e), region = 74 }
  0x3e PF: > { %v943_v33 = vld [vmem:[%s1220_s5 + $0x4] ss:$8 sps:$4 sm:$0xff]   ;;  %v945_v34 = vld [vmem:[%s1220_s5] ss:$8 sps:$4 sm:$0xff]   ;;  %v946_v35 = vld [vmem:[%s1220_s5 + $0x14] ss:$8 sps:$4 sm:$0xff]  }
  0x3f   : > { %630 = vmatprep.subr.bf16.mxu0 %v943_v33  ;;  %v948_v36 = vld [vmem:[%s1220_s5 + $0x10] ss:$8 sps:$4 sm:$0xff]   ;;  %v949_v37 = vld [vmem:[%s1220_s5 + $0x24] ss:$8 sps:$4 sm:$0xff]   ;;  %v951_v38 = vld [vmem:[%s1220_s5 + $0x20] ss:$8 sps:$4 sm:$0xff]  }
  0x40   : > { %631 = vmatpush1.bf16.msra.mxu0 %v945_v34  ;;  %v952_v39 = vld [vmem:[%s1220_s5 + $0x34] ss:$8 sps:$4 sm:$0xff]   ;;  %v954_v40 = vld [vmem:[%s1220_s5 + $0x30] ss:$8 sps:$4 sm:$0xff]   ;;  %v955_v41 = vld [vmem:[%s1220_s5 + $0x44] ss:$8 sps:$4 sm:$0xff]  }
  0x41   : > { %632 = vmatprep.subr.bf16.mxu0 %v946_v35  ;;  %v957_v42 = vld [vmem:[%s1220_s5 + $0x40] ss:$8 sps:$4 sm:$0xff]   ;;  %v958_v43 = vld [vmem:[%s1220_s5 + $0x54] ss:$8 sps:$4 sm:$0xff]   ;;  %v960_v44 = vld [vmem:[%s1220_s5 + $0x50] ss:$8 sps:$4 sm:$0xff]  }
  0x42   : > { %v961_v45 = vld [vmem:[%s1220_s5 + $0x64] ss:$8 sps:$4 sm:$0xff]   ;;  %v430_v46 = vld [vmem:[%s1206_s26] sm:$0xff]  ;;  %v963_v48 = vld [vmem:[%s1220_s5 + $0x60] ss:$8 sps:$4 sm:$0xff]   ;;  %p880_p13 = scmp.ne.s32.totalorder %s1031_s14, 8 }
  0x43   : > { %v847_v47 = vcombine.high %v430_v46, %v430_v46  ;;  %v964_v49 = vld [vmem:[%s1220_s5 + $0x74] ss:$8 sps:$4 sm:$0xff]   ;;  %v966_v50 = vld [vmem:[%s1220_s5 + $0x70] ss:$8 sps:$4 sm:$0xff]   ;;  %v967_v51 = vld [vmem:[%s1220_s5 + $0x84] ss:$8 sps:$4 sm:$0xff]   ;;  %v846_v3 = vcombine.low %v430_v46, %v430_v46  ;;  %v683_v12 = vlaneseq (!%p880_p13) }
  0x44   : > { %633 = vmatpush1.bf16.msra.mxu0 %v948_v36  ;;  %v969_v52 = vld [vmem:[%s1220_s5 + $0x80] ss:$8 sps:$4 sm:$0xff]   ;;  %v970_v53 = vld [vmem:[%s1220_s5 + $0x94] ss:$8 sps:$4 sm:$0xff]   ;;  %v972_v54 = vld [vmem:[%s1220_s5 + $0x90] ss:$8 sps:$4 sm:$0xff]  }
  0x45   : > { %634 = vmatprep.subr.bf16.mxu0 %v949_v37  ;;  %662 = vmatprep.mubr.bf16.mxu0 %v847_v47  ;;  %v973_v55 = vld [vmem:[%s1220_s5 + $0xa4] ss:$8 sps:$4 sm:$0xff]   ;;  %v975_v56 = vld [vmem:[%s1220_s5 + $0xa0] ss:$8 sps:$4 sm:$0xff]   ;;  %v976_v57 = vld [vmem:[%s1220_s5 + $0xb4] ss:$8 sps:$4 sm:$0xff]  }
  0x46   : > { %v978_v58 = vld [vmem:[%s1220_s5 + $0xb0] ss:$8 sps:$4 sm:$0xff]   ;;  %v979_v59 = vld [vmem:[%s1220_s5 + $0xc4] ss:$8 sps:$4 sm:$0xff]   ;;  %v981_v60 = vld [vmem:[%s1220_s5 + $0xc0] ss:$8 sps:$4 sm:$0xff]  }
  0x47   : > { %v982_v61 = vld [vmem:[%s1220_s5 + $0xd4] ss:$8 sps:$4 sm:$0xff]   ;;  %v984_v62 = vld [vmem:[%s1220_s5 + $0xd0] ss:$8 sps:$4 sm:$0xff]   ;;  %v985_v63 = vld [vmem:[%s1220_s5 + $0xe4] ss:$8 sps:$4 sm:$0xff]  }
  0x48   : > { %635 = vmatpush1.bf16.msra.mxu0 %v951_v38  ;;  %v987_v0 = vld [vmem:[%s1220_s5 + $0xe0] ss:$8 sps:$4 sm:$0xff]   ;;  %v988_v1 = vld [vmem:[%s1220_s5 + $0xf4] ss:$8 sps:$4 sm:$0xff]   ;;  %v990_v2 = vld [vmem:[%s1220_s5 + $0xf0] ss:$8 sps:$4 sm:$0xff]  }
  0x49   : > { %636 = vmatprep.subr.bf16.mxu0 %v952_v39  ;;  %v428_v4 = vld [vmem:[#allocation2] sm:$0xff]  ;;  %v429_v5 = vld [vmem:[#allocation2 + $0x8] sm:$0xff]  ;;  %v684_v13 = vshrl.u32 (!%p880_p13), %v683_v12, 7 }
  0x4a   : > { %v681_v14 = vld [vmem:[%s410_s12] sm:$0x3] (!%p880_p13) }
  0x4b   : > { %v685_v15 = vsub.s32 (!%p880_p13), 0, %v684_v13  ;;  %v689_v16 = vsub.s32 (!%p880_p13), 1, %v684_v13 }
  0x4c   : > { %637 = vmatpush1.bf16.msra.mxu0 %v954_v40 }
  0x4d   : > { %638 = vmatprep.subr.bf16.mxu0 %v955_v41  ;;  %v686_v19 = vrot.slane (!%p880_p13), %v681_v14, %v685_v15  ;;  %v690_v20 = vrot.slane (!%p880_p13), %v681_v14, %v689_v16 }
  0x50   : > { %639 = vmatpush1.bf16.msra.mxu0 %v957_v42 }
  0x51   : > { %640 = vmatprep.subr.bf16.mxu0 %v958_v43 }
  0x54   : > { %641 = vmatpush1.bf16.msra.mxu0 %v960_v44 }
  0x55   : > { %642 = vmatprep.subr.bf16.mxu0 %v961_v45 }
  0x58   : > { %643 = vmatpush1.bf16.msra.mxu0 %v963_v48 }
  0x59   : > { %644 = vmatprep.subr.bf16.mxu0 %v964_v49 }
  0x5c   : > { %645 = vmatpush1.bf16.msra.mxu0 %v966_v50 }
  0x5d   : > { %646 = vmatprep.subr.bf16.mxu0 %v967_v51 }
  0x60   : > { %647 = vmatpush1.bf16.msra.mxu0 %v969_v52 }
  0x61   : > { %648 = vmatprep.subr.bf16.mxu0 %v970_v53 }
  0x64   : > { %649 = vmatpush1.bf16.msra.mxu0 %v972_v54 }
  0x65   : > { %650 = vmatprep.subr.bf16.mxu0 %v973_v55 }
  0x68   : > { %651 = vmatpush1.bf16.msra.mxu0 %v975_v56 }
  0x69   : > { %652 = vmatprep.subr.bf16.mxu0 %v976_v57 }
  0x6c   : > { %653 = vmatpush1.bf16.msra.mxu0 %v978_v58 }
  0x6d   : > { %654 = vmatprep.subr.bf16.mxu0 %v979_v59 }
  0x70   : > { %655 = vmatpush1.bf16.msra.mxu0 %v981_v60 }
  0x71   : > { %656 = vmatprep.subr.bf16.mxu0 %v982_v61 }
  0x74   : > { %657 = vmatpush1.bf16.msra.mxu0 %v984_v62 }
  0x75   : > { %658 = vmatprep.subr.bf16.mxu0 %v985_v63 }
  0x78   : > { %659 = vmatpush1.bf16.msra.mxu0 %v987_v0 }
  0x79   : > { %660 = vmatprep.subr.bf16.mxu0 %v988_v1 }
  0x7c   : > { %661 = vmatpush1.bf16.msra.mxu0 %v990_v2 }
  0x7f   : > { %663 = vmatmul.mubr.bf16.vlgmr.msra.gmra.mrb[0].mxu0 %v846_v3 }
 0x150   : > { %678 = sbr.rel (%p880_p13) target bundleno = 357 (0x165), region = 78 }
 0x152   : > { %v664_v6 = vpop.f32.mrb[0].mxu0 }
 0x153   : > { %v671_v7 = vadd.f32 %v664_v6, %v428_v4  ;;  %v666_v8 = vpop.f32.mrb[1].mxu0 }
 0x154   : > { %v672_v9 = vadd.f32 %v666_v8, %v429_v5  ;;  %v668_v10 = vpop.f32.mrb[2].mxu0 }
 0x155   : > { %673 = vst [vmem:[#allocation2] sm:$0xff] %v671_v7  ;;  %v669_v11 = vpop.f32.mrb[3].mxu0 }
 0x156   : > { %674 = vst [vmem:[#allocation2 + $0x8] sm:$0xff] %v672_v9 }
 0x15c   : > { %v679_v17 = vld [vmem:[#allocation2] sm:$0xff] }
 0x15d   : > { %v680_v18 = vld [vmem:[#allocation2 + $0x8] sm:$0xff]  ;;  %v693_v21 = vadd.f32 %v686_v19, %v679_v17 }
 0x15e   : > { %v694_v22 = vadd.f32 %v690_v20, %v680_v18 }
 0x15f   : > { %v695_v23 = vmax.f32 %v693_v21, 0.0 }
 0x160   : > { %v696_v24 = vmax.f32 %v694_v22, 0.0 }
 0x162   : > { %v885_v25 = vpack.c.bf16 %v696_v24, %v695_v23 }
 0x164   : > { %705 = vst [vmem:[%s1218_s15] sm:$0xff] %v885_v25 }
 0x165 PF: > { %s13_s18 = sadd.s32 1, %s1047_s18   ;;  %s1288_s12 = smov %s1027_s13 }
 0x166   : > { %p10_p0 = scmp.ge.s32.totalorder %s13_s18, 20   ;;  %s1289_s13 = smov %s1121_s25 }
 0x167   : > { %s1290_s14 = smov %s1039_s16  ;;  %s1291_s15 = smov %s1043_s17 }
 0x168   : > { %s1292_s16 = smov %s1295_s19  ;;  %s1293_s17 = smov %s1299_s20 }
 0x169   :  { %12 = sbr.rel (!%p10_p0) target bundleno = 4 (0x4), region = 119 }

// kernel: _lambda_.37
= control target key start
LH: loop header
LB: loop body
LE: loop exit
PB: predicated region body
PF: predicated region fallthrough
CT: control target
= control target key end

     0   :  { %s1068_s12 = smov 0   ;;  %s1070_s13 = smov 0   ;;  %s1282_s0 = inlined_call_operand.vmem [shape: bf16[8,2304], index: 0, kind: input, shape index: {}]   ;;  %s1283_s1 = inlined_call_operand.vmem [shape: bf16[2304,512], index: 1, kind: input, shape index: {}]   ;;  %s1284_s2 = inlined_call_operand.vmem [shape: f32[1,512], index: 2, kind: input, shape index: {}]   ;;  %s1285_s3 = inlined_call_operand.vmem [shape: bf16[8,512], index: 3, kind: output, shape index: {}]  }
   0x1   :  { %s1072_s14 = smov 0   ;;  %s1074_s15 = smov 0  }
   0x2   :  { %s1076_s16 = smov 0   ;;  %s1078_s17 = smov 0  }
   0x3   :  { %s1080_s18 = smov 0  }
   0x4 LB: > { %s25_s19 = sadd.s32 1, %s1037_s16  ;;  %s28_s20 = sadd.s32 1, %s1041_s17  ;;  %s1045_s18 = sphi %s1080_s18, %s13_s18   ;;  %s1041_s17 = sphi %s1078_s17, %s1291_s17   ;;  %s1037_s16 = sphi %s1076_s16, %s1290_s16   ;;  %s1033_s15 = sphi %s1074_s15, %s1289_s15   ;;  %s1029_s14 = sphi %s1072_s14, %s1288_s14   ;;  %s1025_s13 = sphi %s1070_s13, %s1287_s13   ;;  %s1021_s12 = sphi %s1068_s12, %s1286_s12  }
   0x5   : > { %p26_p0 = scmp.ge.s32.totalorder %s25_s19, 9  ;;  %p76_p1 = scmp.ne.s32.totalorder %s1025_s13, %s1021_s12 }
   0x6   : > { %p77_p2 = scmp.eq.s32.totalorder %s1045_s18, 0  ;;  %s69_s24 = sadd.s32 1, %s1025_s13 }
   0x7   : > { %s1293_s19 = smov (%p26_p0, %s25_s19), 0  ;;  %s1295_s20 = smov (!%p26_p0, %s28_s20), %s1041_s17 }
   0x8   : > { %p78_p3 = por %p77_p2, %p76_p1  ;;  %p30_p4 = scmp.ge.s32.totalorder %s1295_s20, 2 }
   0x9   : > { %s64_s21 = ssub.s32 %s1037_s16, %s1293_s19  ;;  %p830_p6 = scmp.ge.s32.totalorder %s1045_s18, 18 }
   0xa   : > { %s1297_s20 = smov (%p30_p4, %s1295_s20), 0 }
   0xb   : > { %s65_s22 = ssub.s32 %s1041_s17, %s1297_s20  ;;  %156 = sbr.rel (%p830_p6) target bundleno = 41 (0x29), region = 16 }
   0xc   : > { %s66_s23 = sor.u32 %s65_s22, %s64_s21 }
   0xd   : > { %p67_p5 = scmp.eq.s32.totalorder %s66_s23, 0 }
   0xf   : > { %s1119_s25 = scalar_select %p67_p5, %s1025_s13, %s69_s24  }
  0x12   : > { %172 = sbr.rel (!%p78_p3) target bundleno = 41 (0x29), region = 24  ;;  %s174_s26 = sand.u32 (%p78_p3), 1, %s1025_s13  }
  0x13   : > { %s833_s27 = sshll.u32 (%p78_p3), %s1041_s17, 1  ;;  %s831_s28 = sshll.u32 (%p78_p3), %s174_s26, 8 }
  0x14   : > { %s882_s29 = sshll.u32 (%p78_p3), %s1037_s16, 7  ;;  %s1133_s8 = scalar_lea.vmem (%p78_p3), [#allocation3], %s831_s28 }
  0x15   : > { %s180_s30 = sadd.s32 (%p78_p3), %s882_s29, %s833_s27 }
  0x16   : > { %s835_s4 = sshll.u32 (%p78_p3), %s180_s30, 2 }
  0x17   : > { %s1128_s7 = scalar_lea.vmem (%p78_p3), %s1283_s1, %s835_s4 }
  0x18   : > { %v272_v0 = vld [vmem:[%s1128_s7] sm:$0xff] (%p78_p3)  ;;  %v274_v1 = vld [vmem:[%s1128_s7 + $0x10] sm:$0xff] (%p78_p3) }
  0x19   : > { %v276_v2 = vld [vmem:[%s1128_s7 + $0x20] sm:$0xff]  ;;  %273 = vst [vmem:[%s1133_s8] sm:$0xff] %v272_v0  ;;  %275 = vst [vmem:[%s1133_s8 + $0x8] sm:$0xff] %v274_v1  ;;  %v278_v3 = vld [vmem:[%s1128_s7 + $0x30] sm:$0xff] }
  0x1a   : > { %277 = vst [vmem:[%s1133_s8 + $0x10] sm:$0xff] %v276_v2  ;;  %v280_v4 = vld [vmem:[%s1128_s7 + $0x40] sm:$0xff]  ;;  %v282_v5 = vld [vmem:[%s1128_s7 + $0x50] sm:$0xff]  ;;  %279 = vst [vmem:[%s1133_s8 + $0x18] sm:$0xff] %v278_v3 }
  0x1b   : > { %281 = vst [vmem:[%s1133_s8 + $0x20] sm:$0xff] %v280_v4  ;;  %283 = vst [vmem:[%s1133_s8 + $0x28] sm:$0xff] %v282_v5  ;;  %v284_v6 = vld [vmem:[%s1128_s7 + $0x60] sm:$0xff]  ;;  %v286_v7 = vld [vmem:[%s1128_s7 + $0x70] sm:$0xff] }
  0x1c   : > { %v288_v8 = vld [vmem:[%s1128_s7 + $0x80] sm:$0xff]  ;;  %285 = vst [vmem:[%s1133_s8 + $0x30] sm:$0xff] %v284_v6  ;;  %287 = vst [vmem:[%s1133_s8 + $0x38] sm:$0xff] %v286_v7  ;;  %v290_v9 = vld [vmem:[%s1128_s7 + $0x90] sm:$0xff] }
  0x1d   : > { %289 = vst [vmem:[%s1133_s8 + $0x40] sm:$0xff] %v288_v8  ;;  %v292_v10 = vld [vmem:[%s1128_s7 + $0xa0] sm:$0xff]  ;;  %v294_v11 = vld [vmem:[%s1128_s7 + $0xb0] sm:$0xff]  ;;  %291 = vst [vmem:[%s1133_s8 + $0x48] sm:$0xff] %v290_v9 }
  0x1e   : > { %293 = vst [vmem:[%s1133_s8 + $0x50] sm:$0xff] %v292_v10  ;;  %295 = vst [vmem:[%s1133_s8 + $0x58] sm:$0xff] %v294_v11  ;;  %v296_v12 = vld [vmem:[%s1128_s7 + $0xc0] sm:$0xff]  ;;  %v298_v13 = vld [vmem:[%s1128_s7 + $0xd0] sm:$0xff] }
  0x1f   : > { %v300_v14 = vld [vmem:[%s1128_s7 + $0xe0] sm:$0xff]  ;;  %297 = vst [vmem:[%s1133_s8 + $0x60] sm:$0xff] %v296_v12  ;;  %299 = vst [vmem:[%s1133_s8 + $0x68] sm:$0xff] %v298_v13  ;;  %v302_v15 = vld [vmem:[%s1128_s7 + $0xf0] sm:$0xff] }
  0x20   : > { %301 = vst [vmem:[%s1133_s8 + $0x70] sm:$0xff] %v300_v14  ;;  %v304_v16 = vld [vmem:[%s1128_s7 + $0x100] sm:$0xff]  ;;  %v306_v17 = vld [vmem:[%s1128_s7 + $0x110] sm:$0xff]  ;;  %303 = vst [vmem:[%s1133_s8 + $0x78] sm:$0xff] %v302_v15 }
  0x21   : > { %305 = vst [vmem:[%s1133_s8 + $0x80] sm:$0xff] %v304_v16  ;;  %307 = vst [vmem:[%s1133_s8 + $0x88] sm:$0xff] %v306_v17  ;;  %v308_v18 = vld [vmem:[%s1128_s7 + $0x120] sm:$0xff]  ;;  %v310_v19 = vld [vmem:[%s1128_s7 + $0x130] sm:$0xff] }
  0x22   : > { %v312_v20 = vld [vmem:[%s1128_s7 + $0x140] sm:$0xff]  ;;  %309 = vst [vmem:[%s1133_s8 + $0x90] sm:$0xff] %v308_v18  ;;  %311 = vst [vmem:[%s1133_s8 + $0x98] sm:$0xff] %v310_v19  ;;  %v314_v21 = vld [vmem:[%s1128_s7 + $0x150] sm:$0xff] }
  0x23   : > { %313 = vst [vmem:[%s1133_s8 + $0xa0] sm:$0xff] %v312_v20  ;;  %v316_v22 = vld [vmem:[%s1128_s7 + $0x160] sm:$0xff]  ;;  %v318_v23 = vld [vmem:[%s1128_s7 + $0x170] sm:$0xff]  ;;  %315 = vst [vmem:[%s1133_s8 + $0xa8] sm:$0xff] %v314_v21 }
  0x24   : > { %317 = vst [vmem:[%s1133_s8 + $0xb0] sm:$0xff] %v316_v22  ;;  %319 = vst [vmem:[%s1133_s8 + $0xb8] sm:$0xff] %v318_v23  ;;  %v320_v24 = vld [vmem:[%s1128_s7 + $0x180] sm:$0xff]  ;;  %v322_v25 = vld [vmem:[%s1128_s7 + $0x190] sm:$0xff] }
  0x25   : > { %v324_v26 = vld [vmem:[%s1128_s7 + $0x1a0] sm:$0xff]  ;;  %321 = vst [vmem:[%s1133_s8 + $0xc0] sm:$0xff] %v320_v24  ;;  %323 = vst [vmem:[%s1133_s8 + $0xc8] sm:$0xff] %v322_v25  ;;  %v326_v27 = vld [vmem:[%s1128_s7 + $0x1b0] sm:$0xff] }
  0x26   : > { %325 = vst [vmem:[%s1133_s8 + $0xd0] sm:$0xff] %v324_v26  ;;  %v328_v28 = vld [vmem:[%s1128_s7 + $0x1c0] sm:$0xff]  ;;  %v330_v29 = vld [vmem:[%s1128_s7 + $0x1d0] sm:$0xff]  ;;  %327 = vst [vmem:[%s1133_s8 + $0xd8] sm:$0xff] %v326_v27 }
  0x27   : > { %329 = vst [vmem:[%s1133_s8 + $0xe0] sm:$0xff] %v328_v28  ;;  %331 = vst [vmem:[%s1133_s8 + $0xe8] sm:$0xff] %v330_v29  ;;  %v332_v30 = vld [vmem:[%s1128_s7 + $0x1e0] sm:$0xff]  ;;  %v334_v31 = vld [vmem:[%s1128_s7 + $0x1f0] sm:$0xff] }
  0x28   : > { %333 = vst [vmem:[%s1133_s8 + $0xf0] sm:$0xff] %v332_v30  ;;  %335 = vst [vmem:[%s1133_s8 + $0xf8] sm:$0xff] %v334_v31 }
  0x29 PF: > { %p836_p7 = scmp.ge.s32.totalorder %s1045_s18, 1  ;;  %p348_p8 = scmp.lt.s32.totalorder %s1045_s18, 19 }
  0x2b   : > { %p349_p9 = pnand %p836_p7, %p348_p8 }
  0x2c   : > { %s355_s9 = sand.u32 (!%p349_p9), 1, %s1021_s12   ;;  %s838_s10 = sshll.u32 (!%p349_p9), %s1029_s14, 1 }
  0x2d   : > { %352 = sbr.rel (%p349_p9) target bundleno = 355 (0x163), region = 66  ;;  %s837_s11 = sshll.u32 (!%p349_p9), %s355_s9, 8 }
  0x2e   : > { %p398_p10 = scmp.lt.s32.totalorder (!%p349_p9), %s838_s10, 17  ;;  %s840_s21 = sshll.u32 (!%p349_p9), %s1033_s15, 1 }
  0x2f   : > { %p408_p11 = scmp.lt.s32.totalorder (!%p349_p9), %s840_s21, 3  ;;  %s1218_s5 = scalar_lea.vmem (!%p349_p9), [#allocation3], %s837_s11 }
  0x30   : > { %p843_p12 = scmp.ne.s32.totalorder (!%p349_p9), %s1029_s14, 0 }
  0x34   : > { %s1299_s10 = smov (!%p398_p10, %s838_s10), 17  ;;  %s1301_s21 = smov (!%p408_p11, %s840_s21), 3 }
  0x35   : > { %s839_s22 = sshll.u32 %s1299_s10, 2  ;;  %s410_s12 = scalar_lea.vmem %s1284_s2, %s1301_s21  ;;  %v1047_v32 = vmov (!%p843_p12), 0.0  }
  0x36   : > { %s1204_s26 = scalar_lea.vmem %s1282_s0, %s839_s22  ;;  %s842_s29 = sshll.u32 %s1301_s21, 2  ;;  %426 = vst [vmem:[#allocation2] sm:$0xff] (!%p843_p12), %v1047_v32  ;;  %427 = vst [vmem:[#allocation2 + $0x8] sm:$0xff] (!%p843_p12), %v1047_v32 }
  0x37   : > { %s1216_s15 = scalar_lea.vmem %s1285_s3, %s842_s29  ;;  %425 = sbr.rel (%p843_p12) target bundleno = 62 (0x3e), region = 74 }
  0x3e PF: > { %v941_v33 = vld [vmem:[%s1218_s5 + $0x4] ss:$8 sps:$4 sm:$0xff]   ;;  %v943_v34 = vld [vmem:[%s1218_s5] ss:$8 sps:$4 sm:$0xff]   ;;  %v944_v35 = vld [vmem:[%s1218_s5 + $0x14] ss:$8 sps:$4 sm:$0xff]  }
  0x3f   : > { %630 = vmatprep.subr.bf16.mxu0 %v941_v33  ;;  %v946_v36 = vld [vmem:[%s1218_s5 + $0x10] ss:$8 sps:$4 sm:$0xff]   ;;  %v947_v37 = vld [vmem:[%s1218_s5 + $0x24] ss:$8 sps:$4 sm:$0xff]   ;;  %v949_v38 = vld [vmem:[%s1218_s5 + $0x20] ss:$8 sps:$4 sm:$0xff]  }
  0x40   : > { %631 = vmatpush1.bf16.msra.mxu0 %v943_v34  ;;  %v950_v39 = vld [vmem:[%s1218_s5 + $0x34] ss:$8 sps:$4 sm:$0xff]   ;;  %v952_v40 = vld [vmem:[%s1218_s5 + $0x30] ss:$8 sps:$4 sm:$0xff]   ;;  %v953_v41 = vld [vmem:[%s1218_s5 + $0x44] ss:$8 sps:$4 sm:$0xff]  }
  0x41   : > { %632 = vmatprep.subr.bf16.mxu0 %v944_v35  ;;  %v955_v42 = vld [vmem:[%s1218_s5 + $0x40] ss:$8 sps:$4 sm:$0xff]   ;;  %v956_v43 = vld [vmem:[%s1218_s5 + $0x54] ss:$8 sps:$4 sm:$0xff]   ;;  %v958_v44 = vld [vmem:[%s1218_s5 + $0x50] ss:$8 sps:$4 sm:$0xff]  }
  0x42   : > { %v959_v45 = vld [vmem:[%s1218_s5 + $0x64] ss:$8 sps:$4 sm:$0xff]   ;;  %v430_v46 = vld [vmem:[%s1204_s26] sm:$0xff]  ;;  %v961_v48 = vld [vmem:[%s1218_s5 + $0x60] ss:$8 sps:$4 sm:$0xff]   ;;  %p878_p13 = scmp.ne.s32.totalorder %s1029_s14, 8 }
  0x43   : > { %v845_v47 = vcombine.high %v430_v46, %v430_v46  ;;  %v962_v49 = vld [vmem:[%s1218_s5 + $0x74] ss:$8 sps:$4 sm:$0xff]   ;;  %v964_v50 = vld [vmem:[%s1218_s5 + $0x70] ss:$8 sps:$4 sm:$0xff]   ;;  %v965_v51 = vld [vmem:[%s1218_s5 + $0x84] ss:$8 sps:$4 sm:$0xff]   ;;  %v844_v3 = vcombine.low %v430_v46, %v430_v46  ;;  %v683_v12 = vlaneseq (!%p878_p13) }
  0x44   : > { %633 = vmatpush1.bf16.msra.mxu0 %v946_v36  ;;  %v967_v52 = vld [vmem:[%s1218_s5 + $0x80] ss:$8 sps:$4 sm:$0xff]   ;;  %v968_v53 = vld [vmem:[%s1218_s5 + $0x94] ss:$8 sps:$4 sm:$0xff]   ;;  %v970_v54 = vld [vmem:[%s1218_s5 + $0x90] ss:$8 sps:$4 sm:$0xff]  }
  0x45   : > { %634 = vmatprep.subr.bf16.mxu0 %v947_v37  ;;  %662 = vmatprep.mubr.bf16.mxu0 %v845_v47  ;;  %v971_v55 = vld [vmem:[%s1218_s5 + $0xa4] ss:$8 sps:$4 sm:$0xff]   ;;  %v973_v56 = vld [vmem:[%s1218_s5 + $0xa0] ss:$8 sps:$4 sm:$0xff]   ;;  %v974_v57 = vld [vmem:[%s1218_s5 + $0xb4] ss:$8 sps:$4 sm:$0xff]  }
  0x46   : > { %v976_v58 = vld [vmem:[%s1218_s5 + $0xb0] ss:$8 sps:$4 sm:$0xff]   ;;  %v977_v59 = vld [vmem:[%s1218_s5 + $0xc4] ss:$8 sps:$4 sm:$0xff]   ;;  %v979_v60 = vld [vmem:[%s1218_s5 + $0xc0] ss:$8 sps:$4 sm:$0xff]  }
  0x47   : > { %v980_v61 = vld [vmem:[%s1218_s5 + $0xd4] ss:$8 sps:$4 sm:$0xff]   ;;  %v982_v62 = vld [vmem:[%s1218_s5 + $0xd0] ss:$8 sps:$4 sm:$0xff]   ;;  %v983_v63 = vld [vmem:[%s1218_s5 + $0xe4] ss:$8 sps:$4 sm:$0xff]  }
  0x48   : > { %635 = vmatpush1.bf16.msra.mxu0 %v949_v38  ;;  %v985_v0 = vld [vmem:[%s1218_s5 + $0xe0] ss:$8 sps:$4 sm:$0xff]   ;;  %v986_v1 = vld [vmem:[%s1218_s5 + $0xf4] ss:$8 sps:$4 sm:$0xff]   ;;  %v988_v2 = vld [vmem:[%s1218_s5 + $0xf0] ss:$8 sps:$4 sm:$0xff]  }
  0x49   : > { %636 = vmatprep.subr.bf16.mxu0 %v950_v39  ;;  %v428_v4 = vld [vmem:[#allocation2] sm:$0xff]  ;;  %v429_v5 = vld [vmem:[#allocation2 + $0x8] sm:$0xff]  ;;  %v684_v13 = vshrl.u32 (!%p878_p13), %v683_v12, 7 }
  0x4a   : > { %v681_v14 = vld [vmem:[%s410_s12] sm:$0x3] (!%p878_p13) }
  0x4b   : > { %v685_v15 = vsub.s32 (!%p878_p13), 0, %v684_v13  ;;  %v689_v16 = vsub.s32 (!%p878_p13), 1, %v684_v13 }
  0x4c   : > { %637 = vmatpush1.bf16.msra.mxu0 %v952_v40 }
  0x4d   : > { %638 = vmatprep.subr.bf16.mxu0 %v953_v41  ;;  %v686_v19 = vrot.slane (!%p878_p13), %v681_v14, %v685_v15  ;;  %v690_v20 = vrot.slane (!%p878_p13), %v681_v14, %v689_v16 }
  0x50   : > { %639 = vmatpush1.bf16.msra.mxu0 %v955_v42 }
  0x51   : > { %640 = vmatprep.subr.bf16.mxu0 %v956_v43 }
  0x54   : > { %641 = vmatpush1.bf16.msra.mxu0 %v958_v44 }
  0x55   : > { %642 = vmatprep.subr.bf16.mxu0 %v959_v45 }
  0x58   : > { %643 = vmatpush1.bf16.msra.mxu0 %v961_v48 }
  0x59   : > { %644 = vmatprep.subr.bf16.mxu0 %v962_v49 }
  0x5c   : > { %645 = vmatpush1.bf16.msra.mxu0 %v964_v50 }
  0x5d   : > { %646 = vmatprep.subr.bf16.mxu0 %v965_v51 }
  0x60   : > { %647 = vmatpush1.bf16.msra.mxu0 %v967_v52 }
  0x61   : > { %648 = vmatprep.subr.bf16.mxu0 %v968_v53 }
  0x64   : > { %649 = vmatpush1.bf16.msra.mxu0 %v970_v54 }
  0x65   : > { %650 = vmatprep.subr.bf16.mxu0 %v971_v55 }
  0x68   : > { %651 = vmatpush1.bf16.msra.mxu0 %v973_v56 }
  0x69   : > { %652 = vmatprep.subr.bf16.mxu0 %v974_v57 }
  0x6c   : > { %653 = vmatpush1.bf16.msra.mxu0 %v976_v58 }
  0x6d   : > { %654 = vmatprep.subr.bf16.mxu0 %v977_v59 }
  0x70   : > { %655 = vmatpush1.bf16.msra.mxu0 %v979_v60 }
  0x71   : > { %656 = vmatprep.subr.bf16.mxu0 %v980_v61 }
  0x74   : > { %657 = vmatpush1.bf16.msra.mxu0 %v982_v62 }
  0x75   : > { %658 = vmatprep.subr.bf16.mxu0 %v983_v63 }
  0x78   : > { %659 = vmatpush1.bf16.msra.mxu0 %v985_v0 }
  0x79   : > { %660 = vmatprep.subr.bf16.mxu0 %v986_v1 }
  0x7c   : > { %661 = vmatpush1.bf16.msra.mxu0 %v988_v2 }
  0x7f   : > { %663 = vmatmul.mubr.bf16.vlgmr.msra.gmra.mrb[0].mxu0 %v844_v3 }
 0x150   : > { %678 = sbr.rel (%p878_p13) target bundleno = 355 (0x163), region = 78 }
 0x152   : > { %v664_v6 = vpop.f32.mrb[0].mxu0 }
 0x153   : > { %v671_v7 = vadd.f32 %v664_v6, %v428_v4  ;;  %v666_v8 = vpop.f32.mrb[1].mxu0 }
 0x154   : > { %v672_v9 = vadd.f32 %v666_v8, %v429_v5  ;;  %v668_v10 = vpop.f32.mrb[2].mxu0 }
 0x155   : > { %673 = vst [vmem:[#allocation2] sm:$0xff] %v671_v7  ;;  %v669_v11 = vpop.f32.mrb[3].mxu0 }
 0x156   : > { %674 = vst [vmem:[#allocation2 + $0x8] sm:$0xff] %v672_v9 }
 0x15c   : > { %v679_v17 = vld [vmem:[#allocation2] sm:$0xff] }
 0x15d   : > { %v680_v18 = vld [vmem:[#allocation2 + $0x8] sm:$0xff]  ;;  %v693_v21 = vadd.f32 %v686_v19, %v679_v17 }
 0x15e   : > { %v694_v22 = vadd.f32 %v690_v20, %v680_v18 }
 0x160   : > { %v883_v23 = vpack.c.bf16 %v694_v22, %v693_v21 }
 0x162   : > { %703 = vst [vmem:[%s1216_s15] sm:$0xff] %v883_v23 }
 0x163 PF: > { %s13_s18 = sadd.s32 1, %s1045_s18   ;;  %s1286_s12 = smov %s1025_s13 }
 0x164   : > { %p10_p0 = scmp.ge.s32.totalorder %s13_s18, 20   ;;  %s1287_s13 = smov %s1119_s25 }
 0x165   : > { %s1288_s14 = smov %s1037_s16  ;;  %s1289_s15 = smov %s1041_s17 }
 0x166   : > { %s1290_s16 = smov %s1293_s19  ;;  %s1291_s17 = smov %s1297_s20 }
 0x167   :  { %12 = sbr.rel (!%p10_p0) target bundleno = 4 (0x4), region = 119 }

// kernel: _lambda_.38
= control target key start
LH: loop header
LB: loop body
LE: loop exit
PB: predicated region body
PF: predicated region fallthrough
CT: control target
= control target key end

     0   :  { %s1616_s15 = smov 0   ;;  %s1618_s16 = smov 0   ;;  %s1933_s0 = inlined_call_operand.vmem [shape: bf16[8,4608], index: 0, kind: input, shape index: {}]   ;;  %s1934_s1 = inlined_call_operand.vmem [shape: bf16[4608,512], index: 1, kind: input, shape index: {}]   ;;  %s1935_s2 = inlined_call_operand.vmem [shape: f32[1,512], index: 2, kind: input, shape index: {}]   ;;  %s1936_s3 = inlined_call_operand.vmem [shape: bf16[8,512], index: 3, kind: input, shape index: {}]   ;;  %s1937_s4 = inlined_call_operand.vmem [shape: bf16[8,512], index: 4, kind: output, shape index: {}]  }
   0x1   :  { %s1620_s17 = smov 0   ;;  %s1622_s18 = smov 0  }
   0x2   :  { %s1624_s19 = smov 0   ;;  %s1626_s20 = smov 0  }
   0x3   :  { %s1628_s21 = smov 0  }
   0x4 LB: > { %s26_s22 = sadd.s32 1, %s1580_s19  ;;  %s29_s23 = sadd.s32 1, %s1584_s20  ;;  %s1588_s21 = sphi %s1628_s21, %s14_s21   ;;  %s1584_s20 = sphi %s1626_s20, %s1943_s20   ;;  %s1580_s19 = sphi %s1624_s19, %s1942_s19   ;;  %s1576_s18 = sphi %s1622_s18, %s1941_s18   ;;  %s1572_s17 = sphi %s1620_s17, %s1940_s17   ;;  %s1568_s16 = sphi %s1618_s16, %s1939_s16   ;;  %s1564_s15 = sphi %s1616_s15, %s1938_s15  }
   0x5   : > { %p27_p0 = scmp.ge.s32.totalorder %s26_s22, 9  ;;  %p77_p1 = scmp.ne.s32.totalorder %s1568_s16, %s1564_s15 }
   0x6   : > { %p78_p2 = scmp.eq.s32.totalorder %s1588_s21, 0  ;;  %s70_s27 = sadd.s32 1, %s1568_s16 }
   0x7   : > { %s1945_s22 = smov (%p27_p0, %s26_s22), 0  ;;  %s1947_s23 = smov (!%p27_p0, %s29_s23), %s1584_s20 }
   0x8   : > { %p79_p3 = por %p78_p2, %p77_p1  ;;  %p31_p4 = scmp.ge.s32.totalorder %s1947_s23, 2 }
   0x9   : > { %s65_s24 = ssub.s32 %s1580_s19, %s1945_s22  ;;  %p1287_p6 = scmp.ge.s32.totalorder %s1588_s21, 18 }
   0xa   : > { %s1949_s23 = smov (%p31_p4, %s1947_s23), 0 }
   0xb   : > { %s66_s25 = ssub.s32 %s1584_s20, %s1949_s23  ;;  %185 = sbr.rel (%p1287_p6) target bundleno = 57 (0x39), region = 16 }
   0xc   : > { %s67_s26 = sor.u32 %s66_s25, %s65_s24 }
   0xd   : > { %p68_p5 = scmp.eq.s32.totalorder %s67_s26, 0 }
   0xf   : > { %s1667_s28 = scalar_select %p68_p5, %s1568_s16, %s70_s27  }
  0x12   : > { %201 = sbr.rel (!%p79_p3) target bundleno = 57 (0x39), region = 24  ;;  %s203_s29 = sand.u32 (%p79_p3), 1, %s1568_s16  }
  0x13   : > { %s1290_s30 = sshll.u32 (%p79_p3), %s1584_s20, 1  ;;  %s1288_s5 = sshll.u32 (%p79_p3), %s203_s29, 9 }
  0x14   : > { %s1375_s6 = sshll.u32 (%p79_p3), %s1580_s19, 8  ;;  %s1681_s12 = scalar_lea.vmem (%p79_p3), [#allocation3], %s1288_s5 }
  0x15   : > { %s209_s7 = sadd.s32 (%p79_p3), %s1375_s6, %s1290_s30 }
  0x16   : > { %s1292_s8 = sshll.u32 (%p79_p3), %s209_s7, 2 }
  0x17   : > { %s1676_s11 = scalar_lea.vmem (%p79_p3), %s1934_s1, %s1292_s8 }
  0x18   : > { %v365_v0 = vld [vmem:[%s1676_s11] sm:$0xff] (%p79_p3)  ;;  %v367_v1 = vld [vmem:[%s1676_s11 + $0x10] sm:$0xff] (%p79_p3) }
  0x19   : > { %v369_v2 = vld [vmem:[%s1676_s11 + $0x20] sm:$0xff]  ;;  %366 = vst [vmem:[%s1681_s12] sm:$0xff] %v365_v0  ;;  %368 = vst [vmem:[%s1681_s12 + $0x8] sm:$0xff] %v367_v1  ;;  %v371_v3 = vld [vmem:[%s1676_s11 + $0x30] sm:$0xff] }
  0x1a   : > { %370 = vst [vmem:[%s1681_s12 + $0x10] sm:$0xff] %v369_v2  ;;  %v373_v4 = vld [vmem:[%s1676_s11 + $0x40] sm:$0xff]  ;;  %v375_v5 = vld [vmem:[%s1676_s11 + $0x50] sm:$0xff]  ;;  %372 = vst [vmem:[%s1681_s12 + $0x18] sm:$0xff] %v371_v3 }
  0x1b   : > { %374 = vst [vmem:[%s1681_s12 + $0x20] sm:$0xff] %v373_v4  ;;  %376 = vst [vmem:[%s1681_s12 + $0x28] sm:$0xff] %v375_v5  ;;  %v377_v6 = vld [vmem:[%s1676_s11 + $0x60] sm:$0xff]  ;;  %v379_v7 = vld [vmem:[%s1676_s11 + $0x70] sm:$0xff] }
  0x1c   : > { %v381_v8 = vld [vmem:[%s1676_s11 + $0x80] sm:$0xff]  ;;  %378 = vst [vmem:[%s1681_s12 + $0x30] sm:$0xff] %v377_v6  ;;  %380 = vst [vmem:[%s1681_s12 + $0x38] sm:$0xff] %v379_v7  ;;  %v383_v9 = vld [vmem:[%s1676_s11 + $0x90] sm:$0xff] }
  0x1d   : > { %382 = vst [vmem:[%s1681_s12 + $0x40] sm:$0xff] %v381_v8  ;;  %v385_v10 = vld [vmem:[%s1676_s11 + $0xa0] sm:$0xff]  ;;  %v387_v11 = vld [vmem:[%s1676_s11 + $0xb0] sm:$0xff]  ;;  %384 = vst [vmem:[%s1681_s12 + $0x48] sm:$0xff] %v383_v9 }
  0x1e   : > { %386 = vst [vmem:[%s1681_s12 + $0x50] sm:$0xff] %v385_v10  ;;  %388 = vst [vmem:[%s1681_s12 + $0x58] sm:$0xff] %v387_v11  ;;  %v389_v12 = vld [vmem:[%s1676_s11 + $0xc0] sm:$0xff]  ;;  %v391_v13 = vld [vmem:[%s1676_s11 + $0xd0] sm:$0xff] }
  0x1f   : > { %v393_v14 = vld [vmem:[%s1676_s11 + $0xe0] sm:$0xff]  ;;  %390 = vst [vmem:[%s1681_s12 + $0x60] sm:$0xff] %v389_v12  ;;  %392 = vst [vmem:[%s1681_s12 + $0x68] sm:$0xff] %v391_v13  ;;  %v395_v15 = vld [vmem:[%s1676_s11 + $0xf0] sm:$0xff] }
  0x20   : > { %394 = vst [vmem:[%s1681_s12 + $0x70] sm:$0xff] %v393_v14  ;;  %v397_v16 = vld [vmem:[%s1676_s11 + $0x100] sm:$0xff]  ;;  %v399_v17 = vld [vmem:[%s1676_s11 + $0x110] sm:$0xff]  ;;  %396 = vst [vmem:[%s1681_s12 + $0x78] sm:$0xff] %v395_v15 }
  0x21   : > { %398 = vst [vmem:[%s1681_s12 + $0x80] sm:$0xff] %v397_v16  ;;  %400 = vst [vmem:[%s1681_s12 + $0x88] sm:$0xff] %v399_v17  ;;  %v401_v18 = vld [vmem:[%s1676_s11 + $0x120] sm:$0xff]  ;;  %v403_v19 = vld [vmem:[%s1676_s11 + $0x130] sm:$0xff] }
  0x22   : > { %v405_v20 = vld [vmem:[%s1676_s11 + $0x140] sm:$0xff]  ;;  %402 = vst [vmem:[%s1681_s12 + $0x90] sm:$0xff] %v401_v18  ;;  %404 = vst [vmem:[%s1681_s12 + $0x98] sm:$0xff] %v403_v19  ;;  %v407_v21 = vld [vmem:[%s1676_s11 + $0x150] sm:$0xff] }
  0x23   : > { %406 = vst [vmem:[%s1681_s12 + $0xa0] sm:$0xff] %v405_v20  ;;  %v409_v22 = vld [vmem:[%s1676_s11 + $0x160] sm:$0xff]  ;;  %v411_v23 = vld [vmem:[%s1676_s11 + $0x170] sm:$0xff]  ;;  %408 = vst [vmem:[%s1681_s12 + $0xa8] sm:$0xff] %v407_v21 }
  0x24   : > { %410 = vst [vmem:[%s1681_s12 + $0xb0] sm:$0xff] %v409_v22  ;;  %412 = vst [vmem:[%s1681_s12 + $0xb8] sm:$0xff] %v411_v23  ;;  %v413_v24 = vld [vmem:[%s1676_s11 + $0x180] sm:$0xff]  ;;  %v415_v25 = vld [vmem:[%s1676_s11 + $0x190] sm:$0xff] }
  0x25   : > { %v417_v26 = vld [vmem:[%s1676_s11 + $0x1a0] sm:$0xff]  ;;  %414 = vst [vmem:[%s1681_s12 + $0xc0] sm:$0xff] %v413_v24  ;;  %416 = vst [vmem:[%s1681_s12 + $0xc8] sm:$0xff] %v415_v25  ;;  %v419_v27 = vld [vmem:[%s1676_s11 + $0x1b0] sm:$0xff] }
  0x26   : > { %418 = vst [vmem:[%s1681_s12 + $0xd0] sm:$0xff] %v417_v26  ;;  %v421_v28 = vld [vmem:[%s1676_s11 + $0x1c0] sm:$0xff]  ;;  %v423_v29 = vld [vmem:[%s1676_s11 + $0x1d0] sm:$0xff]  ;;  %420 = vst [vmem:[%s1681_s12 + $0xd8] sm:$0xff] %v419_v27 }
  0x27   : > { %422 = vst [vmem:[%s1681_s12 + $0xe0] sm:$0xff] %v421_v28  ;;  %424 = vst [vmem:[%s1681_s12 + $0xe8] sm:$0xff] %v423_v29  ;;  %v425_v30 = vld [vmem:[%s1676_s11 + $0x1e0] sm:$0xff]  ;;  %v427_v31 = vld [vmem:[%s1676_s11 + $0x1f0] sm:$0xff] }
  0x28   : > { %v429_v32 = vld [vmem:[%s1676_s11 + $0x200] sm:$0xff]  ;;  %426 = vst [vmem:[%s1681_s12 + $0xf0] sm:$0xff] %v425_v30  ;;  %428 = vst [vmem:[%s1681_s12 + $0xf8] sm:$0xff] %v427_v31  ;;  %v431_v33 = vld [vmem:[%s1676_s11 + $0x210] sm:$0xff] }
  0x29   : > { %430 = vst [vmem:[%s1681_s12 + $0x100] sm:$0xff] %v429_v32  ;;  %v433_v34 = vld [vmem:[%s1676_s11 + $0x220] sm:$0xff]  ;;  %v435_v35 = vld [vmem:[%s1676_s11 + $0x230] sm:$0xff]  ;;  %432 = vst [vmem:[%s1681_s12 + $0x108] sm:$0xff] %v431_v33 }
  0x2a   : > { %434 = vst [vmem:[%s1681_s12 + $0x110] sm:$0xff] %v433_v34  ;;  %436 = vst [vmem:[%s1681_s12 + $0x118] sm:$0xff] %v435_v35  ;;  %v437_v36 = vld [vmem:[%s1676_s11 + $0x240] sm:$0xff]  ;;  %v439_v37 = vld [vmem:[%s1676_s11 + $0x250] sm:$0xff] }
  0x2b   : > { %v441_v38 = vld [vmem:[%s1676_s11 + $0x260] sm:$0xff]  ;;  %438 = vst [vmem:[%s1681_s12 + $0x120] sm:$0xff] %v437_v36  ;;  %440 = vst [vmem:[%s1681_s12 + $0x128] sm:$0xff] %v439_v37  ;;  %v443_v39 = vld [vmem:[%s1676_s11 + $0x270] sm:$0xff] }
  0x2c   : > { %442 = vst [vmem:[%s1681_s12 + $0x130] sm:$0xff] %v441_v38  ;;  %v445_v40 = vld [vmem:[%s1676_s11 + $0x280] sm:$0xff]  ;;  %v447_v41 = vld [vmem:[%s1676_s11 + $0x290] sm:$0xff]  ;;  %444 = vst [vmem:[%s1681_s12 + $0x138] sm:$0xff] %v443_v39 }
  0x2d   : > { %446 = vst [vmem:[%s1681_s12 + $0x140] sm:$0xff] %v445_v40  ;;  %448 = vst [vmem:[%s1681_s12 + $0x148] sm:$0xff] %v447_v41  ;;  %v449_v42 = vld [vmem:[%s1676_s11 + $0x2a0] sm:$0xff]  ;;  %v451_v43 = vld [vmem:[%s1676_s11 + $0x2b0] sm:$0xff] }
  0x2e   : > { %v453_v44 = vld [vmem:[%s1676_s11 + $0x2c0] sm:$0xff]  ;;  %450 = vst [vmem:[%s1681_s12 + $0x150] sm:$0xff] %v449_v42  ;;  %452 = vst [vmem:[%s1681_s12 + $0x158] sm:$0xff] %v451_v43  ;;  %v455_v45 = vld [vmem:[%s1676_s11 + $0x2d0] sm:$0xff] }
  0x2f   : > { %454 = vst [vmem:[%s1681_s12 + $0x160] sm:$0xff] %v453_v44  ;;  %v457_v46 = vld [vmem:[%s1676_s11 + $0x2e0] sm:$0xff]  ;;  %v459_v47 = vld [vmem:[%s1676_s11 + $0x2f0] sm:$0xff]  ;;  %456 = vst [vmem:[%s1681_s12 + $0x168] sm:$0xff] %v455_v45 }
  0x30   : > { %458 = vst [vmem:[%s1681_s12 + $0x170] sm:$0xff] %v457_v46  ;;  %460 = vst [vmem:[%s1681_s12 + $0x178] sm:$0xff] %v459_v47  ;;  %v461_v48 = vld [vmem:[%s1676_s11 + $0x300] sm:$0xff]  ;;  %v463_v49 = vld [vmem:[%s1676_s11 + $0x310] sm:$0xff] }
  0x31   : > { %v465_v50 = vld [vmem:[%s1676_s11 + $0x320] sm:$0xff]  ;;  %462 = vst [vmem:[%s1681_s12 + $0x180] sm:$0xff] %v461_v48  ;;  %464 = vst [vmem:[%s1681_s12 + $0x188] sm:$0xff] %v463_v49  ;;  %v467_v51 = vld [vmem:[%s1676_s11 + $0x330] sm:$0xff] }
  0x32   : > { %466 = vst [vmem:[%s1681_s12 + $0x190] sm:$0xff] %v465_v50  ;;  %v469_v52 = vld [vmem:[%s1676_s11 + $0x340] sm:$0xff]  ;;  %v471_v53 = vld [vmem:[%s1676_s11 + $0x350] sm:$0xff]  ;;  %468 = vst [vmem:[%s1681_s12 + $0x198] sm:$0xff] %v467_v51 }
  0x33   : > { %470 = vst [vmem:[%s1681_s12 + $0x1a0] sm:$0xff] %v469_v52  ;;  %472 = vst [vmem:[%s1681_s12 + $0x1a8] sm:$0xff] %v471_v53  ;;  %v473_v54 = vld [vmem:[%s1676_s11 + $0x360] sm:$0xff]  ;;  %v475_v55 = vld [vmem:[%s1676_s11 + $0x370] sm:$0xff] }
  0x34   : > { %v477_v56 = vld [vmem:[%s1676_s11 + $0x380] sm:$0xff]  ;;  %474 = vst [vmem:[%s1681_s12 + $0x1b0] sm:$0xff] %v473_v54  ;;  %476 = vst [vmem:[%s1681_s12 + $0x1b8] sm:$0xff] %v475_v55  ;;  %v479_v57 = vld [vmem:[%s1676_s11 + $0x390] sm:$0xff] }
  0x35   : > { %478 = vst [vmem:[%s1681_s12 + $0x1c0] sm:$0xff] %v477_v56  ;;  %v481_v58 = vld [vmem:[%s1676_s11 + $0x3a0] sm:$0xff]  ;;  %v483_v59 = vld [vmem:[%s1676_s11 + $0x3b0] sm:$0xff]  ;;  %480 = vst [vmem:[%s1681_s12 + $0x1c8] sm:$0xff] %v479_v57 }
  0x36   : > { %482 = vst [vmem:[%s1681_s12 + $0x1d0] sm:$0xff] %v481_v58  ;;  %484 = vst [vmem:[%s1681_s12 + $0x1d8] sm:$0xff] %v483_v59  ;;  %v485_v60 = vld [vmem:[%s1676_s11 + $0x3c0] sm:$0xff]  ;;  %v487_v61 = vld [vmem:[%s1676_s11 + $0x3d0] sm:$0xff] }
  0x37   : > { %v489_v62 = vld [vmem:[%s1676_s11 + $0x3e0] sm:$0xff]  ;;  %486 = vst [vmem:[%s1681_s12 + $0x1e0] sm:$0xff] %v485_v60  ;;  %488 = vst [vmem:[%s1681_s12 + $0x1e8] sm:$0xff] %v487_v61  ;;  %v491_v63 = vld [vmem:[%s1676_s11 + $0x3f0] sm:$0xff] }
  0x38   : > { %490 = vst [vmem:[%s1681_s12 + $0x1f0] sm:$0xff] %v489_v62  ;;  %492 = vst [vmem:[%s1681_s12 + $0x1f8] sm:$0xff] %v491_v63 }
  0x39 PF: > { %p1293_p7 = scmp.ge.s32.totalorder %s1588_s21, 1  ;;  %p518_p8 = scmp.lt.s32.totalorder %s1588_s21, 19 }
  0x3b   : > { %p519_p9 = pnand %p1293_p7, %p518_p8 }
  0x3c   : > { %s525_s13 = sand.u32 (!%p519_p9), 1, %s1564_s15   ;;  %s1295_s14 = sshll.u32 (!%p519_p9), %s1572_s17, 2 }
  0x3d   : > { %522 = sbr.rel (%p519_p9) target bundleno = 379 (0x17b), region = 70  ;;  %s1294_s24 = sshll.u32 (!%p519_p9), %s525_s13, 9 }
  0x3e   : > { %p579_p10 = scmp.lt.s32.totalorder (!%p519_p9), %s1295_s14, 35  ;;  %s1297_s25 = sshll.u32 (!%p519_p9), %s1576_s18, 1 }
  0x3f   : > { %p589_p11 = scmp.lt.s32.totalorder (!%p519_p9), %s1297_s25, 3  ;;  %s1835_s13 = scalar_lea.vmem (!%p519_p9), [#allocation3], %s1294_s24 }
  0x40   : > { %p1302_p12 = scmp.ne.s32.totalorder (!%p519_p9), %s1572_s17, 0 }
  0x44   : > { %s1951_s14 = smov (!%p579_p10, %s1295_s14), 35  ;;  %s1953_s25 = smov (!%p589_p11, %s1297_s25), 3 }
  0x45   : > { %s1296_s26 = sshll.u32 %s1951_s14, 2  ;;  %s591_s15 = scalar_lea.vmem %s1935_s2, %s1953_s25  ;;  %v1590_v0 = vmov (!%p1302_p12), 0.0  }
  0x46   : > { %s1816_s30 = scalar_lea.vmem %s1933_s0, %s1296_s26  ;;  %s1299_s7 = sshll.u32 %s1953_s25, 2  ;;  %617 = vst [vmem:[#allocation2] sm:$0xff] (!%p1302_p12), %v1590_v0  ;;  %618 = vst [vmem:[#allocation2 + $0x8] sm:$0xff] (!%p1302_p12), %v1590_v0 }
  0x47   : > { %s1828_s18 = scalar_lea.vmem %s1936_s3, %s1299_s7  ;;  %s1833_s12 = scalar_lea.vmem %s1937_s4, %s1299_s7 }
  0x48   : > { %616 = sbr.rel (%p1302_p12) target bundleno = 79 (0x4f), region = 78 }
  0x4f PF: > { %v1434_v1 = vld [vmem:[%s1835_s13 + $0x4] ss:$8 sps:$4 sm:$0xff]   ;;  %v1438_v3 = vld [vmem:[%s1835_s13] ss:$8 sps:$4 sm:$0xff]   ;;  %v1440_v5 = vld [vmem:[%s1835_s13 + $0x14] ss:$8 sps:$4 sm:$0xff]  }
  0x50   : > { %v1436_v2 = vld [vmem:[%s1835_s13 + $0x104] ss:$8 sps:$4 sm:$0xff]   ;;  %1021 = vmatprep.subr.bf16.mxu0 %v1434_v1  ;;  %v1439_v4 = vld [vmem:[%s1835_s13 + $0x100] ss:$8 sps:$4 sm:$0xff]   ;;  %v1442_v6 = vld [vmem:[%s1835_s13 + $0x114] ss:$8 sps:$4 sm:$0xff]  }
  0x51   : > { %1062 = vmatprep.subr.bf16.mxu1 %v1436_v2  ;;  %1022 = vmatpush1.bf16.msra.mxu0 %v1438_v3  ;;  %v1444_v7 = vld [vmem:[%s1835_s13 + $0x10] ss:$8 sps:$4 sm:$0xff]   ;;  %v1446_v9 = vld [vmem:[%s1835_s13 + $0x24] ss:$8 sps:$4 sm:$0xff]   ;;  %v1450_v11 = vld [vmem:[%s1835_s13 + $0x20] ss:$8 sps:$4 sm:$0xff]  }
  0x52   : > { %1063 = vmatpush1.bf16.msra.mxu1 %v1439_v4  ;;  %1023 = vmatprep.subr.bf16.mxu0 %v1440_v5  ;;  %v1445_v8 = vld [vmem:[%s1835_s13 + $0x110] ss:$8 sps:$4 sm:$0xff]   ;;  %v1448_v10 = vld [vmem:[%s1835_s13 + $0x124] ss:$8 sps:$4 sm:$0xff]   ;;  %v1451_v12 = vld [vmem:[%s1835_s13 + $0x120] ss:$8 sps:$4 sm:$0xff]  }
  0x53   : > { %1064 = vmatprep.subr.bf16.mxu1 %v1442_v6  ;;  %v1452_v13 = vld [vmem:[%s1835_s13 + $0x34] ss:$8 sps:$4 sm:$0xff]   ;;  %v1456_v15 = vld [vmem:[%s1835_s13 + $0x30] ss:$8 sps:$4 sm:$0xff]   ;;  %v1458_v17 = vld [vmem:[%s1835_s13 + $0x44] ss:$8 sps:$4 sm:$0xff]  }
  0x54   : > { %v1454_v14 = vld [vmem:[%s1835_s13 + $0x134] ss:$8 sps:$4 sm:$0xff]   ;;  %v1457_v16 = vld [vmem:[%s1835_s13 + $0x130] ss:$8 sps:$4 sm:$0xff]   ;;  %v1460_v18 = vld [vmem:[%s1835_s13 + $0x144] ss:$8 sps:$4 sm:$0xff]  }
  0x55   : > { %1024 = vmatpush1.bf16.msra.mxu0 %v1444_v7  ;;  %v1462_v19 = vld [vmem:[%s1835_s13 + $0x40] ss:$8 sps:$4 sm:$0xff]   ;;  %v1464_v21 = vld [vmem:[%s1835_s13 + $0x54] ss:$8 sps:$4 sm:$0xff]   ;;  %v1468_v23 = vld [vmem:[%s1835_s13 + $0x50] ss:$8 sps:$4 sm:$0xff]  }
  0x56   : > { %1065 = vmatpush1.bf16.msra.mxu1 %v1445_v8  ;;  %1025 = vmatprep.subr.bf16.mxu0 %v1446_v9  ;;  %v1463_v20 = vld [vmem:[%s1835_s13 + $0x140] ss:$8 sps:$4 sm:$0xff]   ;;  %v1466_v22 = vld [vmem:[%s1835_s13 + $0x154] ss:$8 sps:$4 sm:$0xff]   ;;  %v1469_v24 = vld [vmem:[%s1835_s13 + $0x150] ss:$8 sps:$4 sm:$0xff]  }
  0x57   : > { %1066 = vmatprep.subr.bf16.mxu1 %v1448_v10  ;;  %v1470_v25 = vld [vmem:[%s1835_s13 + $0x64] ss:$8 sps:$4 sm:$0xff]   ;;  %v1474_v27 = vld [vmem:[%s1835_s13 + $0x60] ss:$8 sps:$4 sm:$0xff]   ;;  %v1476_v29 = vld [vmem:[%s1835_s13 + $0x74] ss:$8 sps:$4 sm:$0xff]  }
  0x58   : > { %v1472_v26 = vld [vmem:[%s1835_s13 + $0x164] ss:$8 sps:$4 sm:$0xff]   ;;  %v1475_v28 = vld [vmem:[%s1835_s13 + $0x160] ss:$8 sps:$4 sm:$0xff]   ;;  %v1478_v30 = vld [vmem:[%s1835_s13 + $0x174] ss:$8 sps:$4 sm:$0xff]  }
  0x59   : > { %1026 = vmatpush1.bf16.msra.mxu0 %v1450_v11  ;;  %v1480_v31 = vld [vmem:[%s1835_s13 + $0x70] ss:$8 sps:$4 sm:$0xff]   ;;  %v1482_v33 = vld [vmem:[%s1835_s13 + $0x84] ss:$8 sps:$4 sm:$0xff]   ;;  %v1486_v35 = vld [vmem:[%s1835_s13 + $0x80] ss:$8 sps:$4 sm:$0xff]  }
  0x5a   : > { %1067 = vmatpush1.bf16.msra.mxu1 %v1451_v12  ;;  %1027 = vmatprep.subr.bf16.mxu0 %v1452_v13  ;;  %v1481_v32 = vld [vmem:[%s1835_s13 + $0x170] ss:$8 sps:$4 sm:$0xff]   ;;  %v1484_v34 = vld [vmem:[%s1835_s13 + $0x184] ss:$8 sps:$4 sm:$0xff]   ;;  %v1487_v36 = vld [vmem:[%s1835_s13 + $0x180] ss:$8 sps:$4 sm:$0xff]  }
  0x5b   : > { %1068 = vmatprep.subr.bf16.mxu1 %v1454_v14  ;;  %v1488_v37 = vld [vmem:[%s1835_s13 + $0x94] ss:$8 sps:$4 sm:$0xff]   ;;  %v1492_v39 = vld [vmem:[%s1835_s13 + $0x90] ss:$8 sps:$4 sm:$0xff]   ;;  %v1494_v41 = vld [vmem:[%s1835_s13 + $0xa4] ss:$8 sps:$4 sm:$0xff]  }
  0x5c   : > { %v1490_v38 = vld [vmem:[%s1835_s13 + $0x194] ss:$8 sps:$4 sm:$0xff]   ;;  %v1493_v40 = vld [vmem:[%s1835_s13 + $0x190] ss:$8 sps:$4 sm:$0xff]   ;;  %v1496_v42 = vld [vmem:[%s1835_s13 + $0x1a4] ss:$8 sps:$4 sm:$0xff]  }
  0x5d   : > { %1028 = vmatpush1.bf16.msra.mxu0 %v1456_v15  ;;  %v1498_v43 = vld [vmem:[%s1835_s13 + $0xa0] ss:$8 sps:$4 sm:$0xff]   ;;  %v1500_v45 = vld [vmem:[%s1835_s13 + $0xb4] ss:$8 sps:$4 sm:$0xff]   ;;  %v1504_v50 = vld [vmem:[%s1835_s13 + $0xb0] ss:$8 sps:$4 sm:$0xff]  }
  0x5e   : > { %1069 = vmatpush1.bf16.msra.mxu1 %v1457_v16  ;;  %1029 = vmatprep.subr.bf16.mxu0 %v1458_v17  ;;  %v1499_v44 = vld [vmem:[%s1835_s13 + $0x1a0] ss:$8 sps:$4 sm:$0xff]   ;;  %v1502_v46 = vld [vmem:[%s1835_s13 + $0x1b4] ss:$8 sps:$4 sm:$0xff]   ;;  %v1505_v51 = vld [vmem:[%s1835_s13 + $0x1b0] ss:$8 sps:$4 sm:$0xff]  }
  0x5f   : > { %1070 = vmatprep.subr.bf16.mxu1 %v1460_v18  ;;  %v621_v47 = vld [vmem:[%s1816_s30] sm:$0xff]  ;;  %v622_v49 = vld [vmem:[%s1816_s30 + $0x8] sm:$0xff]  ;;  %v1506_v53 = vld [vmem:[%s1835_s13 + $0xc4] ss:$8 sps:$4 sm:$0xff]   ;;  %p1371_p13 = scmp.ne.s32.totalorder %s1572_s17, 8 }
  0x60   : > { %v1304_v48 = vcombine.high %v621_v47, %v621_v47  ;;  %v1306_v52 = vcombine.high %v622_v49, %v622_v49  ;;  %v1508_v54 = vld [vmem:[%s1835_s13 + $0x1c4] ss:$8 sps:$4 sm:$0xff]   ;;  %v1510_v55 = vld [vmem:[%s1835_s13 + $0xc0] ss:$8 sps:$4 sm:$0xff]   ;;  %v1512_v57 = vld [vmem:[%s1835_s13 + $0xd4] ss:$8 sps:$4 sm:$0xff]   ;;  %v1303_v5 = vcombine.low %v621_v47, %v621_v47  ;;  %v1305_v6 = vcombine.low %v622_v49, %v622_v49 }
  0x61   : > { %1030 = vmatpush1.bf16.msra.mxu0 %v1462_v19  ;;  %v1511_v56 = vld [vmem:[%s1835_s13 + $0x1c0] ss:$8 sps:$4 sm:$0xff]   ;;  %v1514_v58 = vld [vmem:[%s1835_s13 + $0x1d4] ss:$8 sps:$4 sm:$0xff]   ;;  %v1516_v59 = vld [vmem:[%s1835_s13 + $0xd0] ss:$8 sps:$4 sm:$0xff]  }
  0x62   : > { %1071 = vmatpush1.bf16.msra.mxu1 %v1463_v20  ;;  %1031 = vmatprep.subr.bf16.mxu0 %v1464_v21  ;;  %v1517_v60 = vld [vmem:[%s1835_s13 + $0x1d0] ss:$8 sps:$4 sm:$0xff]   ;;  %v1518_v61 = vld [vmem:[%s1835_s13 + $0xe4] ss:$8 sps:$4 sm:$0xff]   ;;  %v1522_v63 = vld [vmem:[%s1835_s13 + $0xe0] ss:$8 sps:$4 sm:$0xff]   ;;  %v1115_v21 = vlaneseq (!%p1371_p13) }
  0x63   : > { %1072 = vmatprep.subr.bf16.mxu1 %v1466_v22  ;;  %1053 = vmatprep.mubr.bf16.mxu0 %v1304_v48  ;;  %v1520_v62 = vld [vmem:[%s1835_s13 + $0x1e4] ss:$8 sps:$4 sm:$0xff]   ;;  %v1523_v0 = vld [vmem:[%s1835_s13 + $0x1e0] ss:$8 sps:$4 sm:$0xff]   ;;  %v1524_v1 = vld [vmem:[%s1835_s13 + $0xf4] ss:$8 sps:$4 sm:$0xff]  }
  0x64   : > { %1094 = vmatprep.mubr.bf16.mxu1 %v1306_v52  ;;  %v1526_v2 = vld [vmem:[%s1835_s13 + $0x1f4] ss:$8 sps:$4 sm:$0xff]   ;;  %v1528_v3 = vld [vmem:[%s1835_s13 + $0xf0] ss:$8 sps:$4 sm:$0xff]   ;;  %v1116_v22 = vshrl.u32 (!%p1371_p13), %v1115_v21, 7 }
  0x65   : > { %1032 = vmatpush1.bf16.msra.mxu0 %v1468_v23  ;;  %v1529_v4 = vld [vmem:[%s1835_s13 + $0x1f0] ss:$8 sps:$4 sm:$0xff]  }
  0x66   : > { %1073 = vmatpush1.bf16.msra.mxu1 %v1469_v24  ;;  %1033 = vmatprep.subr.bf16.mxu0 %v1470_v25  ;;  %v619_v8 = vld [vmem:[#allocation2] sm:$0xff]  ;;  %v620_v12 = vld [vmem:[#allocation2 + $0x8] sm:$0xff]  ;;  %v1117_v25 = vsub.s32 (!%p1371_p13), 0, %v1116_v22 }
  0x67   : > { %1074 = vmatprep.subr.bf16.mxu1 %v1472_v26  ;;  %v1113_v23 = vld [vmem:[%s591_s15] sm:$0x3] (!%p1371_p13)  ;;  %v1121_v26 = vsub.s32 (!%p1371_p13), 1, %v1116_v22 }
  0x68   : > { %v1127_v24 = vld [vmem:[%s1828_s18] sm:$0xff] (!%p1371_p13) }
  0x69   : > { %1034 = vmatpush1.bf16.msra.mxu0 %v1474_v27 }
  0x6a   : > { %1075 = vmatpush1.bf16.msra.mxu1 %v1475_v28  ;;  %1035 = vmatprep.subr.bf16.mxu0 %v1476_v29  ;;  %v1118_v29 = vrot.slane (!%p1371_p13), %v1113_v23, %v1117_v25 }
  0x6b   : > { %1076 = vmatprep.subr.bf16.mxu1 %v1478_v30  ;;  %v1122_v30 = vrot.slane (!%p1371_p13), %v1113_v23, %v1121_v26 }
  0x6d   : > { %1036 = vmatpush1.bf16.msra.mxu0 %v1480_v31  ;;  %v1128_v31 = vunpack.c.l.bf16 (!%p1371_p13), %v1127_v24 }
  0x6e   : > { %1077 = vmatpush1.bf16.msra.mxu1 %v1481_v32  ;;  %1037 = vmatprep.subr.bf16.mxu0 %v1482_v33  ;;  %v1129_v32 = vunpack.c.h.bf16 (!%p1371_p13), %v1127_v24 }
  0x6f   : > { %1078 = vmatprep.subr.bf16.mxu1 %v1484_v34 }
  0x71   : > { %1038 = vmatpush1.bf16.msra.mxu0 %v1486_v35 }
  0x72   : > { %1079 = vmatpush1.bf16.msra.mxu1 %v1487_v36  ;;  %1039 = vmatprep.subr.bf16.mxu0 %v1488_v37 }
  0x73   : > { %1080 = vmatprep.subr.bf16.mxu1 %v1490_v38 }
  0x75   : > { %1040 = vmatpush1.bf16.msra.mxu0 %v1492_v39 }
  0x76   : > { %1081 = vmatpush1.bf16.msra.mxu1 %v1493_v40  ;;  %1041 = vmatprep.subr.bf16.mxu0 %v1494_v41 }
  0x77   : > { %1082 = vmatprep.subr.bf16.mxu1 %v1496_v42 }
  0x79   : > { %1042 = vmatpush1.bf16.msra.mxu0 %v1498_v43 }
  0x7a   : > { %1083 = vmatpush1.bf16.msra.mxu1 %v1499_v44  ;;  %1043 = vmatprep.subr.bf16.mxu0 %v1500_v45 }
  0x7b   : > { %1084 = vmatprep.subr.bf16.mxu1 %v1502_v46 }
  0x7d   : > { %1044 = vmatpush1.bf16.msra.mxu0 %v1504_v50 }
  0x7e   : > { %1085 = vmatpush1.bf16.msra.mxu1 %v1505_v51  ;;  %1045 = vmatprep.subr.bf16.mxu0 %v1506_v53 }
  0x7f   : > { %1086 = vmatprep.subr.bf16.mxu1 %v1508_v54 }
  0x81   : > { %1046 = vmatpush1.bf16.msra.mxu0 %v1510_v55 }
  0x82   : > { %1087 = vmatpush1.bf16.msra.mxu1 %v1511_v56  ;;  %1047 = vmatprep.subr.bf16.mxu0 %v1512_v57 }
  0x83   : > { %1088 = vmatprep.subr.bf16.mxu1 %v1514_v58 }
  0x85   : > { %1048 = vmatpush1.bf16.msra.mxu0 %v1516_v59 }
  0x86   : > { %1089 = vmatpush1.bf16.msra.mxu1 %v1517_v60  ;;  %1049 = vmatprep.subr.bf16.mxu0 %v1518_v61 }
  0x87   : > { %1090 = vmatprep.subr.bf16.mxu1 %v1520_v62 }
  0x89   : > { %1050 = vmatpush1.bf16.msra.mxu0 %v1522_v63 }
  0x8a   : > { %1091 = vmatpush1.bf16.msra.mxu1 %v1523_v0  ;;  %1051 = vmatprep.subr.bf16.mxu0 %v1524_v1 }
  0x8b   : > { %1092 = vmatprep.subr.bf16.mxu1 %v1526_v2 }
  0x8d   : > { %1052 = vmatpush1.bf16.msra.mxu0 %v1528_v3 }
  0x8e   : > { %1093 = vmatpush1.bf16.msra.mxu1 %v1529_v4 }
  0x90   : > { %1054 = vmatmul.mubr.bf16.vlgmr.msra.gmra.mrb[0].mxu0 %v1303_v5 }
  0x91   : > { %1095 = vmatmul.mubr.bf16.vlgmr.msra.gmra.mrb[0].mxu1 %v1305_v6 }
 0x163   : > { %v1055_v7 = vpop.f32.mrb[0].mxu0 }
 0x164   : > { %v1096_v9 = vpop.f32.mrb[0].mxu1  ;;  %v1057_v11 = vpop.f32.mrb[1].mxu0  ;;  %1110 = sbr.rel (%p1371_p13) target bundleno = 379 (0x17b), region = 82 }
 0x165   : > { %v1097_v10 = vadd.f32 %v1096_v9, %v1055_v7  ;;  %v1098_v13 = vpop.f32.mrb[1].mxu1  ;;  %v1059_v15 = vpop.f32.mrb[2].mxu0 }
 0x166   : > { %v1099_v14 = vadd.f32 %v1098_v13, %v1057_v11  ;;  %v1100_v16 = vpop.f32.mrb[2].mxu1  ;;  %v1060_v18 = vpop.f32.mrb[3].mxu0 }
 0x167   : > { %v1103_v17 = vadd.f32 %v1097_v10, %v619_v8  ;;  %v1101_v19 = vpop.f32.mrb[3].mxu1 }
 0x168   : > { %v1104_v20 = vadd.f32 %v1099_v14, %v620_v12 }
 0x169   : > { %1105 = vst [vmem:[#allocation2] sm:$0xff] %v1103_v17 }
 0x16a   : > { %1106 = vst [vmem:[#allocation2 + $0x8] sm:$0xff] %v1104_v20 }
 0x170   : > { %v1111_v27 = vld [vmem:[#allocation2] sm:$0xff] }
 0x171   : > { %v1112_v28 = vld [vmem:[#allocation2 + $0x8] sm:$0xff]  ;;  %v1125_v33 = vadd.f32 %v1118_v29, %v1111_v27 }
 0x172   : > { %v1126_v34 = vadd.f32 %v1122_v30, %v1112_v28 }
 0x173   : > { %v1130_v35 = vadd.f32 %v1128_v31, %v1125_v33 }
 0x174   : > { %v1131_v36 = vadd.f32 %v1129_v32, %v1126_v34 }
 0x175   : > { %v1132_v37 = vmax.f32 %v1130_v35, 0.0 }
 0x176   : > { %v1133_v38 = vmax.f32 %v1131_v36, 0.0 }
 0x178   : > { %v1376_v39 = vpack.c.bf16 %v1133_v38, %v1132_v37 }
 0x17a   : > { %1142 = vst [vmem:[%s1833_s12] sm:$0xff] %v1376_v39 }
 0x17b PF: > { %s14_s21 = sadd.s32 1, %s1588_s21   ;;  %s1938_s15 = smov %s1568_s16 }
 0x17c   : > { %p11_p0 = scmp.ge.s32.totalorder %s14_s21, 20   ;;  %s1939_s16 = smov %s1667_s28 }
 0x17d   : > { %s1940_s17 = smov %s1580_s19  ;;  %s1941_s18 = smov %s1584_s20 }
 0x17e   : > { %s1942_s19 = smov %s1945_s22  ;;  %s1943_s20 = smov %s1949_s23 }
 0x17f   :  { %13 = sbr.rel (!%p11_p0) target bundleno = 4 (0x4), region = 126 }

// kernel: _lambda_.39
= control target key start
LH: loop header
LB: loop body
LE: loop exit
PB: predicated region body
PF: predicated region fallthrough
CT: control target
= control target key end

     0   :  { %s1523_s12 = smov 0   ;;  %s1525_s13 = smov 0   ;;  %s1834_s0 = inlined_call_operand.vmem [shape: bf16[8,4608], index: 0, kind: input, shape index: {}]   ;;  %s1835_s1 = inlined_call_operand.vmem [shape: bf16[4608,512], index: 1, kind: input, shape index: {}]   ;;  %s1836_s2 = inlined_call_operand.vmem [shape: f32[1,512], index: 2, kind: input, shape index: {}]   ;;  %s1837_s3 = inlined_call_operand.vmem [shape: bf16[8,512], index: 3, kind: output, shape index: {}]  }
   0x1   :  { %s1527_s14 = smov 0   ;;  %s1529_s15 = smov 0  }
   0x2   :  { %s1531_s16 = smov 0   ;;  %s1533_s17 = smov 0  }
   0x3   :  { %s1535_s18 = smov 0  }
   0x4 LB: > { %s25_s19 = sadd.s32 1, %s1492_s16  ;;  %s28_s20 = sadd.s32 1, %s1496_s17  ;;  %s1500_s18 = sphi %s1535_s18, %s13_s18   ;;  %s1496_s17 = sphi %s1533_s17, %s1843_s17   ;;  %s1492_s16 = sphi %s1531_s16, %s1842_s16   ;;  %s1488_s15 = sphi %s1529_s15, %s1841_s15   ;;  %s1484_s14 = sphi %s1527_s14, %s1840_s14   ;;  %s1480_s13 = sphi %s1525_s13, %s1839_s13   ;;  %s1476_s12 = sphi %s1523_s12, %s1838_s12  }
   0x5   : > { %p26_p0 = scmp.ge.s32.totalorder %s25_s19, 9  ;;  %p76_p1 = scmp.ne.s32.totalorder %s1480_s13, %s1476_s12 }
   0x6   : > { %p77_p2 = scmp.eq.s32.totalorder %s1500_s18, 0  ;;  %s69_s24 = sadd.s32 1, %s1480_s13 }
   0x7   : > { %s1845_s19 = smov (%p26_p0, %s25_s19), 0  ;;  %s1847_s20 = smov (!%p26_p0, %s28_s20), %s1496_s17 }
   0x8   : > { %p78_p3 = por %p77_p2, %p76_p1  ;;  %p30_p4 = scmp.ge.s32.totalorder %s1847_s20, 2 }
   0x9   : > { %s64_s21 = ssub.s32 %s1492_s16, %s1845_s19  ;;  %p1201_p6 = scmp.ge.s32.totalorder %s1500_s18, 18 }
   0xa   : > { %s1849_s20 = smov (%p30_p4, %s1847_s20), 0 }
   0xb   : > { %s65_s22 = ssub.s32 %s1496_s17, %s1849_s20  ;;  %156 = sbr.rel (%p1201_p6) target bundleno = 57 (0x39), region = 16 }
   0xc   : > { %s66_s23 = sor.u32 %s65_s22, %s64_s21 }
   0xd   : > { %p67_p5 = scmp.eq.s32.totalorder %s66_s23, 0 }
   0xf   : > { %s1574_s25 = scalar_select %p67_p5, %s1480_s13, %s69_s24  }
  0x12   : > { %172 = sbr.rel (!%p78_p3) target bundleno = 57 (0x39), region = 24  ;;  %s174_s26 = sand.u32 (%p78_p3), 1, %s1480_s13  }
  0x13   : > { %s1204_s27 = sshll.u32 (%p78_p3), %s1496_s17, 1  ;;  %s1202_s28 = sshll.u32 (%p78_p3), %s174_s26, 9 }
  0x14   : > { %s1287_s29 = sshll.u32 (%p78_p3), %s1492_s16, 8  ;;  %s1588_s8 = scalar_lea.vmem (%p78_p3), [#allocation3], %s1202_s28 }
  0x15   : > { %s180_s30 = sadd.s32 (%p78_p3), %s1287_s29, %s1204_s27 }
  0x16   : > { %s1206_s4 = sshll.u32 (%p78_p3), %s180_s30, 2 }
  0x17   : > { %s1583_s7 = scalar_lea.vmem (%p78_p3), %s1835_s1, %s1206_s4 }
  0x18   : > { %v336_v0 = vld [vmem:[%s1583_s7] sm:$0xff] (%p78_p3)  ;;  %v338_v1 = vld [vmem:[%s1583_s7 + $0x10] sm:$0xff] (%p78_p3) }
  0x19   : > { %v340_v2 = vld [vmem:[%s1583_s7 + $0x20] sm:$0xff]  ;;  %337 = vst [vmem:[%s1588_s8] sm:$0xff] %v336_v0  ;;  %339 = vst [vmem:[%s1588_s8 + $0x8] sm:$0xff] %v338_v1  ;;  %v342_v3 = vld [vmem:[%s1583_s7 + $0x30] sm:$0xff] }
  0x1a   : > { %341 = vst [vmem:[%s1588_s8 + $0x10] sm:$0xff] %v340_v2  ;;  %v344_v4 = vld [vmem:[%s1583_s7 + $0x40] sm:$0xff]  ;;  %v346_v5 = vld [vmem:[%s1583_s7 + $0x50] sm:$0xff]  ;;  %343 = vst [vmem:[%s1588_s8 + $0x18] sm:$0xff] %v342_v3 }
  0x1b   : > { %345 = vst [vmem:[%s1588_s8 + $0x20] sm:$0xff] %v344_v4  ;;  %347 = vst [vmem:[%s1588_s8 + $0x28] sm:$0xff] %v346_v5  ;;  %v348_v6 = vld [vmem:[%s1583_s7 + $0x60] sm:$0xff]  ;;  %v350_v7 = vld [vmem:[%s1583_s7 + $0x70] sm:$0xff] }
  0x1c   : > { %v352_v8 = vld [vmem:[%s1583_s7 + $0x80] sm:$0xff]  ;;  %349 = vst [vmem:[%s1588_s8 + $0x30] sm:$0xff] %v348_v6  ;;  %351 = vst [vmem:[%s1588_s8 + $0x38] sm:$0xff] %v350_v7  ;;  %v354_v9 = vld [vmem:[%s1583_s7 + $0x90] sm:$0xff] }
  0x1d   : > { %353 = vst [vmem:[%s1588_s8 + $0x40] sm:$0xff] %v352_v8  ;;  %v356_v10 = vld [vmem:[%s1583_s7 + $0xa0] sm:$0xff]  ;;  %v358_v11 = vld [vmem:[%s1583_s7 + $0xb0] sm:$0xff]  ;;  %355 = vst [vmem:[%s1588_s8 + $0x48] sm:$0xff] %v354_v9 }
  0x1e   : > { %357 = vst [vmem:[%s1588_s8 + $0x50] sm:$0xff] %v356_v10  ;;  %359 = vst [vmem:[%s1588_s8 + $0x58] sm:$0xff] %v358_v11  ;;  %v360_v12 = vld [vmem:[%s1583_s7 + $0xc0] sm:$0xff]  ;;  %v362_v13 = vld [vmem:[%s1583_s7 + $0xd0] sm:$0xff] }
  0x1f   : > { %v364_v14 = vld [vmem:[%s1583_s7 + $0xe0] sm:$0xff]  ;;  %361 = vst [vmem:[%s1588_s8 + $0x60] sm:$0xff] %v360_v12  ;;  %363 = vst [vmem:[%s1588_s8 + $0x68] sm:$0xff] %v362_v13  ;;  %v366_v15 = vld [vmem:[%s1583_s7 + $0xf0] sm:$0xff] }
  0x20   : > { %365 = vst [vmem:[%s1588_s8 + $0x70] sm:$0xff] %v364_v14  ;;  %v368_v16 = vld [vmem:[%s1583_s7 + $0x100] sm:$0xff]  ;;  %v370_v17 = vld [vmem:[%s1583_s7 + $0x110] sm:$0xff]  ;;  %367 = vst [vmem:[%s1588_s8 + $0x78] sm:$0xff] %v366_v15 }
  0x21   : > { %369 = vst [vmem:[%s1588_s8 + $0x80] sm:$0xff] %v368_v16  ;;  %371 = vst [vmem:[%s1588_s8 + $0x88] sm:$0xff] %v370_v17  ;;  %v372_v18 = vld [vmem:[%s1583_s7 + $0x120] sm:$0xff]  ;;  %v374_v19 = vld [vmem:[%s1583_s7 + $0x130] sm:$0xff] }
  0x22   : > { %v376_v20 = vld [vmem:[%s1583_s7 + $0x140] sm:$0xff]  ;;  %373 = vst [vmem:[%s1588_s8 + $0x90] sm:$0xff] %v372_v18  ;;  %375 = vst [vmem:[%s1588_s8 + $0x98] sm:$0xff] %v374_v19  ;;  %v378_v21 = vld [vmem:[%s1583_s7 + $0x150] sm:$0xff] }
  0x23   : > { %377 = vst [vmem:[%s1588_s8 + $0xa0] sm:$0xff] %v376_v20  ;;  %v380_v22 = vld [vmem:[%s1583_s7 + $0x160] sm:$0xff]  ;;  %v382_v23 = vld [vmem:[%s1583_s7 + $0x170] sm:$0xff]  ;;  %379 = vst [vmem:[%s1588_s8 + $0xa8] sm:$0xff] %v378_v21 }
  0x24   : > { %381 = vst [vmem:[%s1588_s8 + $0xb0] sm:$0xff] %v380_v22  ;;  %383 = vst [vmem:[%s1588_s8 + $0xb8] sm:$0xff] %v382_v23  ;;  %v384_v24 = vld [vmem:[%s1583_s7 + $0x180] sm:$0xff]  ;;  %v386_v25 = vld [vmem:[%s1583_s7 + $0x190] sm:$0xff] }
  0x25   : > { %v388_v26 = vld [vmem:[%s1583_s7 + $0x1a0] sm:$0xff]  ;;  %385 = vst [vmem:[%s1588_s8 + $0xc0] sm:$0xff] %v384_v24  ;;  %387 = vst [vmem:[%s1588_s8 + $0xc8] sm:$0xff] %v386_v25  ;;  %v390_v27 = vld [vmem:[%s1583_s7 + $0x1b0] sm:$0xff] }
  0x26   : > { %389 = vst [vmem:[%s1588_s8 + $0xd0] sm:$0xff] %v388_v26  ;;  %v392_v28 = vld [vmem:[%s1583_s7 + $0x1c0] sm:$0xff]  ;;  %v394_v29 = vld [vmem:[%s1583_s7 + $0x1d0] sm:$0xff]  ;;  %391 = vst [vmem:[%s1588_s8 + $0xd8] sm:$0xff] %v390_v27 }
  0x27   : > { %393 = vst [vmem:[%s1588_s8 + $0xe0] sm:$0xff] %v392_v28  ;;  %395 = vst [vmem:[%s1588_s8 + $0xe8] sm:$0xff] %v394_v29  ;;  %v396_v30 = vld [vmem:[%s1583_s7 + $0x1e0] sm:$0xff]  ;;  %v398_v31 = vld [vmem:[%s1583_s7 + $0x1f0] sm:$0xff] }
  0x28   : > { %v400_v32 = vld [vmem:[%s1583_s7 + $0x200] sm:$0xff]  ;;  %397 = vst [vmem:[%s1588_s8 + $0xf0] sm:$0xff] %v396_v30  ;;  %399 = vst [vmem:[%s1588_s8 + $0xf8] sm:$0xff] %v398_v31  ;;  %v402_v33 = vld [vmem:[%s1583_s7 + $0x210] sm:$0xff] }
  0x29   : > { %401 = vst [vmem:[%s1588_s8 + $0x100] sm:$0xff] %v400_v32  ;;  %v404_v34 = vld [vmem:[%s1583_s7 + $0x220] sm:$0xff]  ;;  %v406_v35 = vld [vmem:[%s1583_s7 + $0x230] sm:$0xff]  ;;  %403 = vst [vmem:[%s1588_s8 + $0x108] sm:$0xff] %v402_v33 }
  0x2a   : > { %405 = vst [vmem:[%s1588_s8 + $0x110] sm:$0xff] %v404_v34  ;;  %407 = vst [vmem:[%s1588_s8 + $0x118] sm:$0xff] %v406_v35  ;;  %v408_v36 = vld [vmem:[%s1583_s7 + $0x240] sm:$0xff]  ;;  %v410_v37 = vld [vmem:[%s1583_s7 + $0x250] sm:$0xff] }
  0x2b   : > { %v412_v38 = vld [vmem:[%s1583_s7 + $0x260] sm:$0xff]  ;;  %409 = vst [vmem:[%s1588_s8 + $0x120] sm:$0xff] %v408_v36  ;;  %411 = vst [vmem:[%s1588_s8 + $0x128] sm:$0xff] %v410_v37  ;;  %v414_v39 = vld [vmem:[%s1583_s7 + $0x270] sm:$0xff] }
  0x2c   : > { %413 = vst [vmem:[%s1588_s8 + $0x130] sm:$0xff] %v412_v38  ;;  %v416_v40 = vld [vmem:[%s1583_s7 + $0x280] sm:$0xff]  ;;  %v418_v41 = vld [vmem:[%s1583_s7 + $0x290] sm:$0xff]  ;;  %415 = vst [vmem:[%s1588_s8 + $0x138] sm:$0xff] %v414_v39 }
  0x2d   : > { %417 = vst [vmem:[%s1588_s8 + $0x140] sm:$0xff] %v416_v40  ;;  %419 = vst [vmem:[%s1588_s8 + $0x148] sm:$0xff] %v418_v41  ;;  %v420_v42 = vld [vmem:[%s1583_s7 + $0x2a0] sm:$0xff]  ;;  %v422_v43 = vld [vmem:[%s1583_s7 + $0x2b0] sm:$0xff] }
  0x2e   : > { %v424_v44 = vld [vmem:[%s1583_s7 + $0x2c0] sm:$0xff]  ;;  %421 = vst [vmem:[%s1588_s8 + $0x150] sm:$0xff] %v420_v42  ;;  %423 = vst [vmem:[%s1588_s8 + $0x158] sm:$0xff] %v422_v43  ;;  %v426_v45 = vld [vmem:[%s1583_s7 + $0x2d0] sm:$0xff] }
  0x2f   : > { %425 = vst [vmem:[%s1588_s8 + $0x160] sm:$0xff] %v424_v44  ;;  %v428_v46 = vld [vmem:[%s1583_s7 + $0x2e0] sm:$0xff]  ;;  %v430_v47 = vld [vmem:[%s1583_s7 + $0x2f0] sm:$0xff]  ;;  %427 = vst [vmem:[%s1588_s8 + $0x168] sm:$0xff] %v426_v45 }
  0x30   : > { %429 = vst [vmem:[%s1588_s8 + $0x170] sm:$0xff] %v428_v46  ;;  %431 = vst [vmem:[%s1588_s8 + $0x178] sm:$0xff] %v430_v47  ;;  %v432_v48 = vld [vmem:[%s1583_s7 + $0x300] sm:$0xff]  ;;  %v434_v49 = vld [vmem:[%s1583_s7 + $0x310] sm:$0xff] }
  0x31   : > { %v436_v50 = vld [vmem:[%s1583_s7 + $0x320] sm:$0xff]  ;;  %433 = vst [vmem:[%s1588_s8 + $0x180] sm:$0xff] %v432_v48  ;;  %435 = vst [vmem:[%s1588_s8 + $0x188] sm:$0xff] %v434_v49  ;;  %v438_v51 = vld [vmem:[%s1583_s7 + $0x330] sm:$0xff] }
  0x32   : > { %437 = vst [vmem:[%s1588_s8 + $0x190] sm:$0xff] %v436_v50  ;;  %v440_v52 = vld [vmem:[%s1583_s7 + $0x340] sm:$0xff]  ;;  %v442_v53 = vld [vmem:[%s1583_s7 + $0x350] sm:$0xff]  ;;  %439 = vst [vmem:[%s1588_s8 + $0x198] sm:$0xff] %v438_v51 }
  0x33   : > { %441 = vst [vmem:[%s1588_s8 + $0x1a0] sm:$0xff] %v440_v52  ;;  %443 = vst [vmem:[%s1588_s8 + $0x1a8] sm:$0xff] %v442_v53  ;;  %v444_v54 = vld [vmem:[%s1583_s7 + $0x360] sm:$0xff]  ;;  %v446_v55 = vld [vmem:[%s1583_s7 + $0x370] sm:$0xff] }
  0x34   : > { %v448_v56 = vld [vmem:[%s1583_s7 + $0x380] sm:$0xff]  ;;  %445 = vst [vmem:[%s1588_s8 + $0x1b0] sm:$0xff] %v444_v54  ;;  %447 = vst [vmem:[%s1588_s8 + $0x1b8] sm:$0xff] %v446_v55  ;;  %v450_v57 = vld [vmem:[%s1583_s7 + $0x390] sm:$0xff] }
  0x35   : > { %449 = vst [vmem:[%s1588_s8 + $0x1c0] sm:$0xff] %v448_v56  ;;  %v452_v58 = vld [vmem:[%s1583_s7 + $0x3a0] sm:$0xff]  ;;  %v454_v59 = vld [vmem:[%s1583_s7 + $0x3b0] sm:$0xff]  ;;  %451 = vst [vmem:[%s1588_s8 + $0x1c8] sm:$0xff] %v450_v57 }
  0x36   : > { %453 = vst [vmem:[%s1588_s8 + $0x1d0] sm:$0xff] %v452_v58  ;;  %455 = vst [vmem:[%s1588_s8 + $0x1d8] sm:$0xff] %v454_v59  ;;  %v456_v60 = vld [vmem:[%s1583_s7 + $0x3c0] sm:$0xff]  ;;  %v458_v61 = vld [vmem:[%s1583_s7 + $0x3d0] sm:$0xff] }
  0x37   : > { %v460_v62 = vld [vmem:[%s1583_s7 + $0x3e0] sm:$0xff]  ;;  %457 = vst [vmem:[%s1588_s8 + $0x1e0] sm:$0xff] %v456_v60  ;;  %459 = vst [vmem:[%s1588_s8 + $0x1e8] sm:$0xff] %v458_v61  ;;  %v462_v63 = vld [vmem:[%s1583_s7 + $0x3f0] sm:$0xff] }
  0x38   : > { %461 = vst [vmem:[%s1588_s8 + $0x1f0] sm:$0xff] %v460_v62  ;;  %463 = vst [vmem:[%s1588_s8 + $0x1f8] sm:$0xff] %v462_v63 }
  0x39 PF: > { %p1207_p7 = scmp.ge.s32.totalorder %s1500_s18, 1  ;;  %p476_p8 = scmp.lt.s32.totalorder %s1500_s18, 19 }
  0x3b   : > { %p477_p9 = pnand %p1207_p7, %p476_p8 }
  0x3c   : > { %s483_s9 = sand.u32 (!%p477_p9), 1, %s1476_s12   ;;  %s1209_s10 = sshll.u32 (!%p477_p9), %s1484_s14, 2 }
  0x3d   : > { %480 = sbr.rel (%p477_p9) target bundleno = 376 (0x178), region = 66  ;;  %s1208_s11 = sshll.u32 (!%p477_p9), %s483_s9, 9 }
  0x3e   : > { %p526_p10 = scmp.lt.s32.totalorder (!%p477_p9), %s1209_s10, 35  ;;  %s1211_s21 = sshll.u32 (!%p477_p9), %s1488_s15, 1 }
  0x3f   : > { %p536_p11 = scmp.lt.s32.totalorder (!%p477_p9), %s1211_s21, 3  ;;  %s1737_s5 = scalar_lea.vmem (!%p477_p9), [#allocation3], %s1208_s11 }
  0x40   : > { %p1214_p12 = scmp.ne.s32.totalorder (!%p477_p9), %s1484_s14, 0 }
  0x44   : > { %s1851_s10 = smov (!%p526_p10, %s1209_s10), 35  ;;  %s1853_s21 = smov (!%p536_p11, %s1211_s21), 3 }
  0x45   : > { %s1210_s22 = sshll.u32 %s1851_s10, 2  ;;  %s538_s12 = scalar_lea.vmem %s1836_s2, %s1853_s21  ;;  %v1502_v0 = vmov (!%p1214_p12), 0.0  }
  0x46   : > { %s1723_s26 = scalar_lea.vmem %s1834_s0, %s1210_s22  ;;  %s1213_s29 = sshll.u32 %s1853_s21, 2  ;;  %554 = vst [vmem:[#allocation2] sm:$0xff] (!%p1214_p12), %v1502_v0  ;;  %555 = vst [vmem:[#allocation2 + $0x8] sm:$0xff] (!%p1214_p12), %v1502_v0 }
  0x47   : > { %s1735_s15 = scalar_lea.vmem %s1837_s3, %s1213_s29  ;;  %553 = sbr.rel (%p1214_p12) target bundleno = 78 (0x4e), region = 74 }
  0x4e PF: > { %v1346_v1 = vld [vmem:[%s1737_s5 + $0x4] ss:$8 sps:$4 sm:$0xff]   ;;  %v1350_v3 = vld [vmem:[%s1737_s5] ss:$8 sps:$4 sm:$0xff]   ;;  %v1352_v5 = vld [vmem:[%s1737_s5 + $0x14] ss:$8 sps:$4 sm:$0xff]  }
  0x4f   : > { %v1348_v2 = vld [vmem:[%s1737_s5 + $0x104] ss:$8 sps:$4 sm:$0xff]   ;;  %958 = vmatprep.subr.bf16.mxu0 %v1346_v1  ;;  %v1351_v4 = vld [vmem:[%s1737_s5 + $0x100] ss:$8 sps:$4 sm:$0xff]   ;;  %v1354_v6 = vld [vmem:[%s1737_s5 + $0x114] ss:$8 sps:$4 sm:$0xff]  }
  0x50   : > { %999 = vmatprep.subr.bf16.mxu1 %v1348_v2  ;;  %959 = vmatpush1.bf16.msra.mxu0 %v1350_v3  ;;  %v1356_v7 = vld [vmem:[%s1737_s5 + $0x10] ss:$8 sps:$4 sm:$0xff]   ;;  %v1358_v9 = vld [vmem:[%s1737_s5 + $0x24] ss:$8 sps:$4 sm:$0xff]   ;;  %v1362_v11 = vld [vmem:[%s1737_s5 + $0x20] ss:$8 sps:$4 sm:$0xff]  }
  0x51   : > { %1000 = vmatpush1.bf16.msra.mxu1 %v1351_v4  ;;  %960 = vmatprep.subr.bf16.mxu0 %v1352_v5  ;;  %v1357_v8 = vld [vmem:[%s1737_s5 + $0x110] ss:$8 sps:$4 sm:$0xff]   ;;  %v1360_v10 = vld [vmem:[%s1737_s5 + $0x124] ss:$8 sps:$4 sm:$0xff]   ;;  %v1363_v12 = vld [vmem:[%s1737_s5 + $0x120] ss:$8 sps:$4 sm:$0xff]  }
  0x52   : > { %1001 = vmatprep.subr.bf16.mxu1 %v1354_v6  ;;  %v1364_v13 = vld [vmem:[%s1737_s5 + $0x34] ss:$8 sps:$4 sm:$0xff]   ;;  %v1368_v15 = vld [vmem:[%s1737_s5 + $0x30] ss:$8 sps:$4 sm:$0xff]   ;;  %v1370_v17 = vld [vmem:[%s1737_s5 + $0x44] ss:$8 sps:$4 sm:$0xff]  }
  0x53   : > { %v1366_v14 = vld [vmem:[%s1737_s5 + $0x134] ss:$8 sps:$4 sm:$0xff]   ;;  %v1369_v16 = vld [vmem:[%s1737_s5 + $0x130] ss:$8 sps:$4 sm:$0xff]   ;;  %v1372_v18 = vld [vmem:[%s1737_s5 + $0x144] ss:$8 sps:$4 sm:$0xff]  }
  0x54   : > { %961 = vmatpush1.bf16.msra.mxu0 %v1356_v7  ;;  %v1374_v19 = vld [vmem:[%s1737_s5 + $0x40] ss:$8 sps:$4 sm:$0xff]   ;;  %v1376_v21 = vld [vmem:[%s1737_s5 + $0x54] ss:$8 sps:$4 sm:$0xff]   ;;  %v1380_v23 = vld [vmem:[%s1737_s5 + $0x50] ss:$8 sps:$4 sm:$0xff]  }
  0x55   : > { %1002 = vmatpush1.bf16.msra.mxu1 %v1357_v8  ;;  %962 = vmatprep.subr.bf16.mxu0 %v1358_v9  ;;  %v1375_v20 = vld [vmem:[%s1737_s5 + $0x140] ss:$8 sps:$4 sm:$0xff]   ;;  %v1378_v22 = vld [vmem:[%s1737_s5 + $0x154] ss:$8 sps:$4 sm:$0xff]   ;;  %v1381_v24 = vld [vmem:[%s1737_s5 + $0x150] ss:$8 sps:$4 sm:$0xff]  }
  0x56   : > { %1003 = vmatprep.subr.bf16.mxu1 %v1360_v10  ;;  %v1382_v25 = vld [vmem:[%s1737_s5 + $0x64] ss:$8 sps:$4 sm:$0xff]   ;;  %v1386_v27 = vld [vmem:[%s1737_s5 + $0x60] ss:$8 sps:$4 sm:$0xff]   ;;  %v1388_v29 = vld [vmem:[%s1737_s5 + $0x74] ss:$8 sps:$4 sm:$0xff]  }
  0x57   : > { %v1384_v26 = vld [vmem:[%s1737_s5 + $0x164] ss:$8 sps:$4 sm:$0xff]   ;;  %v1387_v28 = vld [vmem:[%s1737_s5 + $0x160] ss:$8 sps:$4 sm:$0xff]   ;;  %v1390_v30 = vld [vmem:[%s1737_s5 + $0x174] ss:$8 sps:$4 sm:$0xff]  }
  0x58   : > { %963 = vmatpush1.bf16.msra.mxu0 %v1362_v11  ;;  %v1392_v31 = vld [vmem:[%s1737_s5 + $0x70] ss:$8 sps:$4 sm:$0xff]   ;;  %v1394_v33 = vld [vmem:[%s1737_s5 + $0x84] ss:$8 sps:$4 sm:$0xff]   ;;  %v1398_v35 = vld [vmem:[%s1737_s5 + $0x80] ss:$8 sps:$4 sm:$0xff]  }
  0x59   : > { %1004 = vmatpush1.bf16.msra.mxu1 %v1363_v12  ;;  %964 = vmatprep.subr.bf16.mxu0 %v1364_v13  ;;  %v1393_v32 = vld [vmem:[%s1737_s5 + $0x170] ss:$8 sps:$4 sm:$0xff]   ;;  %v1396_v34 = vld [vmem:[%s1737_s5 + $0x184] ss:$8 sps:$4 sm:$0xff]   ;;  %v1399_v36 = vld [vmem:[%s1737_s5 + $0x180] ss:$8 sps:$4 sm:$0xff]  }
  0x5a   : > { %1005 = vmatprep.subr.bf16.mxu1 %v1366_v14  ;;  %v1400_v37 = vld [vmem:[%s1737_s5 + $0x94] ss:$8 sps:$4 sm:$0xff]   ;;  %v1404_v39 = vld [vmem:[%s1737_s5 + $0x90] ss:$8 sps:$4 sm:$0xff]   ;;  %v1406_v41 = vld [vmem:[%s1737_s5 + $0xa4] ss:$8 sps:$4 sm:$0xff]  }
  0x5b   : > { %v1402_v38 = vld [vmem:[%s1737_s5 + $0x194] ss:$8 sps:$4 sm:$0xff]   ;;  %v1405_v40 = vld [vmem:[%s1737_s5 + $0x190] ss:$8 sps:$4 sm:$0xff]   ;;  %v1408_v42 = vld [vmem:[%s1737_s5 + $0x1a4] ss:$8 sps:$4 sm:$0xff]  }
  0x5c   : > { %965 = vmatpush1.bf16.msra.mxu0 %v1368_v15  ;;  %v1410_v43 = vld [vmem:[%s1737_s5 + $0xa0] ss:$8 sps:$4 sm:$0xff]   ;;  %v1412_v45 = vld [vmem:[%s1737_s5 + $0xb4] ss:$8 sps:$4 sm:$0xff]   ;;  %v1416_v50 = vld [vmem:[%s1737_s5 + $0xb0] ss:$8 sps:$4 sm:$0xff]  }
  0x5d   : > { %1006 = vmatpush1.bf16.msra.mxu1 %v1369_v16  ;;  %966 = vmatprep.subr.bf16.mxu0 %v1370_v17  ;;  %v1411_v44 = vld [vmem:[%s1737_s5 + $0x1a0] ss:$8 sps:$4 sm:$0xff]   ;;  %v1414_v46 = vld [vmem:[%s1737_s5 + $0x1b4] ss:$8 sps:$4 sm:$0xff]   ;;  %v1417_v51 = vld [vmem:[%s1737_s5 + $0x1b0] ss:$8 sps:$4 sm:$0xff]  }
  0x5e   : > { %1007 = vmatprep.subr.bf16.mxu1 %v1372_v18  ;;  %v558_v47 = vld [vmem:[%s1723_s26] sm:$0xff]  ;;  %v559_v49 = vld [vmem:[%s1723_s26 + $0x8] sm:$0xff]  ;;  %v1418_v53 = vld [vmem:[%s1737_s5 + $0xc4] ss:$8 sps:$4 sm:$0xff]   ;;  %p1283_p13 = scmp.ne.s32.totalorder %s1484_s14, 8 }
  0x5f   : > { %v1216_v48 = vcombine.high %v558_v47, %v558_v47  ;;  %v1218_v52 = vcombine.high %v559_v49, %v559_v49  ;;  %v1420_v54 = vld [vmem:[%s1737_s5 + $0x1c4] ss:$8 sps:$4 sm:$0xff]   ;;  %v1422_v55 = vld [vmem:[%s1737_s5 + $0xc0] ss:$8 sps:$4 sm:$0xff]   ;;  %v1424_v57 = vld [vmem:[%s1737_s5 + $0xd4] ss:$8 sps:$4 sm:$0xff]   ;;  %v1215_v5 = vcombine.low %v558_v47, %v558_v47  ;;  %v1217_v6 = vcombine.low %v559_v49, %v559_v49 }
  0x60   : > { %967 = vmatpush1.bf16.msra.mxu0 %v1374_v19  ;;  %v1423_v56 = vld [vmem:[%s1737_s5 + $0x1c0] ss:$8 sps:$4 sm:$0xff]   ;;  %v1426_v58 = vld [vmem:[%s1737_s5 + $0x1d4] ss:$8 sps:$4 sm:$0xff]   ;;  %v1428_v59 = vld [vmem:[%s1737_s5 + $0xd0] ss:$8 sps:$4 sm:$0xff]  }
  0x61   : > { %1008 = vmatpush1.bf16.msra.mxu1 %v1375_v20  ;;  %968 = vmatprep.subr.bf16.mxu0 %v1376_v21  ;;  %v1429_v60 = vld [vmem:[%s1737_s5 + $0x1d0] ss:$8 sps:$4 sm:$0xff]   ;;  %v1430_v61 = vld [vmem:[%s1737_s5 + $0xe4] ss:$8 sps:$4 sm:$0xff]   ;;  %v1434_v63 = vld [vmem:[%s1737_s5 + $0xe0] ss:$8 sps:$4 sm:$0xff]   ;;  %v1052_v21 = vlaneseq (!%p1283_p13) }
  0x62   : > { %1009 = vmatprep.subr.bf16.mxu1 %v1378_v22  ;;  %990 = vmatprep.mubr.bf16.mxu0 %v1216_v48  ;;  %v1432_v62 = vld [vmem:[%s1737_s5 + $0x1e4] ss:$8 sps:$4 sm:$0xff]   ;;  %v1435_v0 = vld [vmem:[%s1737_s5 + $0x1e0] ss:$8 sps:$4 sm:$0xff]   ;;  %v1436_v1 = vld [vmem:[%s1737_s5 + $0xf4] ss:$8 sps:$4 sm:$0xff]  }
  0x63   : > { %1031 = vmatprep.mubr.bf16.mxu1 %v1218_v52  ;;  %v1438_v2 = vld [vmem:[%s1737_s5 + $0x1f4] ss:$8 sps:$4 sm:$0xff]   ;;  %v1440_v3 = vld [vmem:[%s1737_s5 + $0xf0] ss:$8 sps:$4 sm:$0xff]   ;;  %v1053_v22 = vshrl.u32 (!%p1283_p13), %v1052_v21, 7 }
  0x64   : > { %969 = vmatpush1.bf16.msra.mxu0 %v1380_v23  ;;  %v1441_v4 = vld [vmem:[%s1737_s5 + $0x1f0] ss:$8 sps:$4 sm:$0xff]  }
  0x65   : > { %1010 = vmatpush1.bf16.msra.mxu1 %v1381_v24  ;;  %970 = vmatprep.subr.bf16.mxu0 %v1382_v25  ;;  %v556_v8 = vld [vmem:[#allocation2] sm:$0xff]  ;;  %v557_v12 = vld [vmem:[#allocation2 + $0x8] sm:$0xff]  ;;  %v1054_v24 = vsub.s32 (!%p1283_p13), 0, %v1053_v22  ;;  %v1058_v25 = vsub.s32 (!%p1283_p13), 1, %v1053_v22 }
  0x66   : > { %1011 = vmatprep.subr.bf16.mxu1 %v1384_v26  ;;  %v1050_v23 = vld [vmem:[%s538_s12] sm:$0x3] (!%p1283_p13) }
  0x68   : > { %971 = vmatpush1.bf16.msra.mxu0 %v1386_v27 }
  0x69   : > { %1012 = vmatpush1.bf16.msra.mxu1 %v1387_v28  ;;  %972 = vmatprep.subr.bf16.mxu0 %v1388_v29  ;;  %v1055_v28 = vrot.slane (!%p1283_p13), %v1050_v23, %v1054_v24  ;;  %v1059_v29 = vrot.slane (!%p1283_p13), %v1050_v23, %v1058_v25 }
  0x6a   : > { %1013 = vmatprep.subr.bf16.mxu1 %v1390_v30 }
  0x6c   : > { %973 = vmatpush1.bf16.msra.mxu0 %v1392_v31 }
  0x6d   : > { %1014 = vmatpush1.bf16.msra.mxu1 %v1393_v32  ;;  %974 = vmatprep.subr.bf16.mxu0 %v1394_v33 }
  0x6e   : > { %1015 = vmatprep.subr.bf16.mxu1 %v1396_v34 }
  0x70   : > { %975 = vmatpush1.bf16.msra.mxu0 %v1398_v35 }
  0x71   : > { %1016 = vmatpush1.bf16.msra.mxu1 %v1399_v36  ;;  %976 = vmatprep.subr.bf16.mxu0 %v1400_v37 }
  0x72   : > { %1017 = vmatprep.subr.bf16.mxu1 %v1402_v38 }
  0x74   : > { %977 = vmatpush1.bf16.msra.mxu0 %v1404_v39 }
  0x75   : > { %1018 = vmatpush1.bf16.msra.mxu1 %v1405_v40  ;;  %978 = vmatprep.subr.bf16.mxu0 %v1406_v41 }
  0x76   : > { %1019 = vmatprep.subr.bf16.mxu1 %v1408_v42 }
  0x78   : > { %979 = vmatpush1.bf16.msra.mxu0 %v1410_v43 }
  0x79   : > { %1020 = vmatpush1.bf16.msra.mxu1 %v1411_v44  ;;  %980 = vmatprep.subr.bf16.mxu0 %v1412_v45 }
  0x7a   : > { %1021 = vmatprep.subr.bf16.mxu1 %v1414_v46 }
  0x7c   : > { %981 = vmatpush1.bf16.msra.mxu0 %v1416_v50 }
  0x7d   : > { %1022 = vmatpush1.bf16.msra.mxu1 %v1417_v51  ;;  %982 = vmatprep.subr.bf16.mxu0 %v1418_v53 }
  0x7e   : > { %1023 = vmatprep.subr.bf16.mxu1 %v1420_v54 }
  0x80   : > { %983 = vmatpush1.bf16.msra.mxu0 %v1422_v55 }
  0x81   : > { %1024 = vmatpush1.bf16.msra.mxu1 %v1423_v56  ;;  %984 = vmatprep.subr.bf16.mxu0 %v1424_v57 }
  0x82   : > { %1025 = vmatprep.subr.bf16.mxu1 %v1426_v58 }
  0x84   : > { %985 = vmatpush1.bf16.msra.mxu0 %v1428_v59 }
  0x85   : > { %1026 = vmatpush1.bf16.msra.mxu1 %v1429_v60  ;;  %986 = vmatprep.subr.bf16.mxu0 %v1430_v61 }
  0x86   : > { %1027 = vmatprep.subr.bf16.mxu1 %v1432_v62 }
  0x88   : > { %987 = vmatpush1.bf16.msra.mxu0 %v1434_v63 }
  0x89   : > { %1028 = vmatpush1.bf16.msra.mxu1 %v1435_v0  ;;  %988 = vmatprep.subr.bf16.mxu0 %v1436_v1 }
  0x8a   : > { %1029 = vmatprep.subr.bf16.mxu1 %v1438_v2 }
  0x8c   : > { %989 = vmatpush1.bf16.msra.mxu0 %v1440_v3 }
  0x8d   : > { %1030 = vmatpush1.bf16.msra.mxu1 %v1441_v4 }
  0x8f   : > { %991 = vmatmul.mubr.bf16.vlgmr.msra.gmra.mrb[0].mxu0 %v1215_v5 }
  0x90   : > { %1032 = vmatmul.mubr.bf16.vlgmr.msra.gmra.mrb[0].mxu1 %v1217_v6 }
 0x162   : > { %v992_v7 = vpop.f32.mrb[0].mxu0 }
 0x163   : > { %v1033_v9 = vpop.f32.mrb[0].mxu1  ;;  %v994_v11 = vpop.f32.mrb[1].mxu0  ;;  %1047 = sbr.rel (%p1283_p13) target bundleno = 376 (0x178), region = 78 }
 0x164   : > { %v1034_v10 = vadd.f32 %v1033_v9, %v992_v7  ;;  %v1035_v13 = vpop.f32.mrb[1].mxu1  ;;  %v996_v15 = vpop.f32.mrb[2].mxu0 }
 0x165   : > { %v1036_v14 = vadd.f32 %v1035_v13, %v994_v11  ;;  %v1037_v16 = vpop.f32.mrb[2].mxu1  ;;  %v997_v18 = vpop.f32.mrb[3].mxu0 }
 0x166   : > { %v1040_v17 = vadd.f32 %v1034_v10, %v556_v8  ;;  %v1038_v19 = vpop.f32.mrb[3].mxu1 }
 0x167   : > { %v1041_v20 = vadd.f32 %v1036_v14, %v557_v12 }
 0x168   : > { %1042 = vst [vmem:[#allocation2] sm:$0xff] %v1040_v17 }
 0x169   : > { %1043 = vst [vmem:[#allocation2 + $0x8] sm:$0xff] %v1041_v20 }
 0x16f   : > { %v1048_v26 = vld [vmem:[#allocation2] sm:$0xff] }
 0x170   : > { %v1049_v27 = vld [vmem:[#allocation2 + $0x8] sm:$0xff]  ;;  %v1062_v30 = vadd.f32 %v1055_v28, %v1048_v26 }
 0x171   : > { %v1063_v31 = vadd.f32 %v1059_v29, %v1049_v27 }
 0x172   : > { %v1064_v32 = vmax.f32 %v1062_v30, 0.0 }
 0x173   : > { %v1065_v33 = vmax.f32 %v1063_v31, 0.0 }
 0x175   : > { %v1288_v34 = vpack.c.bf16 %v1065_v33, %v1064_v32 }
 0x177   : > { %1074 = vst [vmem:[%s1735_s15] sm:$0xff] %v1288_v34 }
 0x178 PF: > { %s13_s18 = sadd.s32 1, %s1500_s18   ;;  %s1838_s12 = smov %s1480_s13 }
 0x179   : > { %p10_p0 = scmp.ge.s32.totalorder %s13_s18, 20   ;;  %s1839_s13 = smov %s1574_s25 }
 0x17a   : > { %s1840_s14 = smov %s1492_s16  ;;  %s1841_s15 = smov %s1496_s17 }
 0x17b   : > { %s1842_s16 = smov %s1845_s19  ;;  %s1843_s17 = smov %s1849_s20 }
 0x17c   :  { %12 = sbr.rel (!%p10_p0) target bundleno = 4 (0x4), region = 119 }

// kernel: _lambda_.41
= control target key start
LH: loop header
LB: loop body
LE: loop exit
PB: predicated region body
PF: predicated region fallthrough
CT: control target
= control target key end

     0   :  { %s637_s1 = inlined_call_operand.vmem [shape: bf16[512,128], index: 1, kind: input, shape index: {}]   ;;  %s638_s0 = inlined_call_operand.vmem [shape: bf16[8,512], index: 0, kind: input, shape index: {}]   ;;  %s639_s2 = inlined_call_operand.vmem [shape: f32[1,128], index: 2, kind: input, shape index: {}]   ;;  %s640_s3 = inlined_call_operand.vmem [shape: f32[8,128], index: 3, kind: output, shape index: {}]  }
   0x1   :  { %v473_v0 = vld [vmem:[%s637_s1 + $0x40] sm:$0xff]   ;;  %v477_v4 = vld [vmem:[%s637_s1 + $0x48] sm:$0xff]   ;;  %v481_v8 = vld [vmem:[%s637_s1 + $0x50] sm:$0xff]  }
   0x2   :  { %v474_v1 = vld [vmem:[%s637_s1 + $0xc0] sm:$0xff]   ;;  %429 = vmatprep.subr.bf16.mxu0 %v473_v0  ;;  %v478_v5 = vld [vmem:[%s637_s1 + $0xc8] sm:$0xff]   ;;  %v482_v9 = vld [vmem:[%s637_s1 + $0xd0] sm:$0xff]  }
   0x3   :  { %v475_v2 = vld [vmem:[%s637_s1] sm:$0xff]   ;;  %451 = vmatprep.subr.bf16.mxu1 %v474_v1  ;;  %v479_v6 = vld [vmem:[%s637_s1 + $0x8] sm:$0xff]   ;;  %v483_v10 = vld [vmem:[%s637_s1 + $0x10] sm:$0xff]  }
   0x4   :  { %v476_v3 = vld [vmem:[%s637_s1 + $0x80] sm:$0xff]   ;;  %430 = vmatpush3.bf16.msra.mxu0 %v475_v2  ;;  %v480_v7 = vld [vmem:[%s637_s1 + $0x88] sm:$0xff]   ;;  %v484_v11 = vld [vmem:[%s637_s1 + $0x90] sm:$0xff]  }
   0x5   :  { %452 = vmatpush3.bf16.msra.mxu1 %v476_v3  ;;  %431 = vmatprep.subr.bf16.mxu0 %v477_v4  ;;  %v485_v12 = vld [vmem:[%s637_s1 + $0x58] sm:$0xff]   ;;  %v489_v16 = vld [vmem:[%s637_s1 + $0x60] sm:$0xff]   ;;  %v493_v20 = vld [vmem:[%s637_s1 + $0x68] sm:$0xff]  }
   0x6   :  { %453 = vmatprep.subr.bf16.mxu1 %v478_v5  ;;  %v486_v13 = vld [vmem:[%s637_s1 + $0xd8] sm:$0xff]   ;;  %v490_v17 = vld [vmem:[%s637_s1 + $0xe0] sm:$0xff]   ;;  %v494_v21 = vld [vmem:[%s637_s1 + $0xe8] sm:$0xff]  }
   0x7   :  { %v487_v14 = vld [vmem:[%s637_s1 + $0x18] sm:$0xff]   ;;  %v491_v18 = vld [vmem:[%s637_s1 + $0x20] sm:$0xff]   ;;  %v495_v22 = vld [vmem:[%s637_s1 + $0x28] sm:$0xff]  }
   0x8   :  { %432 = vmatpush3.bf16.msra.mxu0 %v479_v6  ;;  %v488_v15 = vld [vmem:[%s637_s1 + $0x98] sm:$0xff]   ;;  %v492_v19 = vld [vmem:[%s637_s1 + $0xa0] sm:$0xff]   ;;  %v496_v23 = vld [vmem:[%s637_s1 + $0xa8] sm:$0xff]  }
   0x9   :  { %454 = vmatpush3.bf16.msra.mxu1 %v480_v7  ;;  %433 = vmatprep.subr.bf16.mxu0 %v481_v8  ;;  %v497_v24 = vld [vmem:[%s637_s1 + $0x70] sm:$0xff]   ;;  %v501_v28 = vld [vmem:[%s637_s1 + $0x78] sm:$0xff]   ;;  %v21_v32 = vld [vmem:[%s638_s0] sm:$0xff] }
   0xa   :  { %455 = vmatprep.subr.bf16.mxu1 %v482_v9  ;;  %v498_v25 = vld [vmem:[%s637_s1 + $0xf0] sm:$0xff]   ;;  %v502_v29 = vld [vmem:[%s637_s1 + $0xf8] sm:$0xff]   ;;  %v22_v33 = vld [vmem:[%s638_s0 + $0x8] sm:$0xff]  ;;  %v392_v34 = vcombine.low %v21_v32, %v21_v32  ;;  %v393_v35 = vcombine.high %v21_v32, %v21_v32 }
   0xb   :  { %v499_v26 = vld [vmem:[%s637_s1 + $0x30] sm:$0xff]   ;;  %v503_v30 = vld [vmem:[%s637_s1 + $0x38] sm:$0xff]   ;;  %v394_v36 = vcombine.low %v22_v33, %v22_v33  ;;  %v395_v37 = vcombine.high %v22_v33, %v22_v33  ;;  %v428_v46 = vld [vmem:[%s639_s2] ss:$0 sm:$0xff] }
   0xc   :  { %434 = vmatpush3.bf16.msra.mxu0 %v483_v10  ;;  %v500_v27 = vld [vmem:[%s637_s1 + $0xb0] sm:$0xff]   ;;  %v504_v31 = vld [vmem:[%s637_s1 + $0xb8] sm:$0xff]   ;;  %325 = vmatprep.mubr.bf16.mxu0 %v393_v35 }
   0xd   :  { %456 = vmatpush3.bf16.msra.mxu1 %v484_v11  ;;  %435 = vmatprep.subr.bf16.mxu0 %v485_v12 }
   0xe   :  { %457 = vmatprep.subr.bf16.mxu1 %v486_v13  ;;  %365 = vmatprep.mubr.bf16.mxu1 %v395_v37 }
  0x10   :  { %436 = vmatpush3.bf16.msra.mxu0 %v487_v14 }
  0x11   :  { %458 = vmatpush3.bf16.msra.mxu1 %v488_v15  ;;  %437 = vmatprep.subr.bf16.mxu0 %v489_v16 }
  0x12   :  { %459 = vmatprep.subr.bf16.mxu1 %v490_v17 }
  0x14   :  { %438 = vmatpush3.bf16.msra.mxu0 %v491_v18 }
  0x15   :  { %460 = vmatpush3.bf16.msra.mxu1 %v492_v19  ;;  %439 = vmatprep.subr.bf16.mxu0 %v493_v20 }
  0x16   :  { %461 = vmatprep.subr.bf16.mxu1 %v494_v21 }
  0x18   :  { %440 = vmatpush3.bf16.msra.mxu0 %v495_v22 }
  0x19   :  { %462 = vmatpush3.bf16.msra.mxu1 %v496_v23  ;;  %441 = vmatprep.subr.bf16.mxu0 %v497_v24 }
  0x1a   :  { %463 = vmatprep.subr.bf16.mxu1 %v498_v25 }
  0x1c   :  { %442 = vmatpush3.bf16.msra.mxu0 %v499_v26 }
  0x1d   :  { %464 = vmatpush3.bf16.msra.mxu1 %v500_v27  ;;  %443 = vmatprep.subr.bf16.mxu0 %v501_v28 }
  0x1e   :  { %465 = vmatprep.subr.bf16.mxu1 %v502_v29 }
  0x20   :  { %444 = vmatpush3.bf16.msra.mxu0 %v503_v30 }
  0x21   :  { %466 = vmatpush3.bf16.msra.mxu1 %v504_v31 }
  0x23   :  { %326 = vmatmul.mubr.bf16.vlgmr.msra.gmra.mrb[0].mxu0 %v392_v34 }
  0x24   :  { %366 = vmatmul.mubr.bf16.vlgmr.msra.gmra.mrb[0].mxu1 %v394_v36 }
  0xf6   :  { %v445_v38 = vpop.f32.mrb[0].mxu0 }
  0xf7   :  { %v467_v39 = vpop.f32.mrb[0].mxu1  ;;  %v446_v40 = vpop.f32.mrb[1].mxu0 }
  0xf8   :  { %v468_v41 = vpop.f32.mrb[1].mxu1  ;;  %v447_v42 = vadd.f32 %v446_v40, %v445_v38  ;;  %v448_v44 = vpop.f32.mrb[2].mxu0 }
  0xf9   :  { %v469_v43 = vadd.f32 %v468_v41, %v467_v39  ;;  %v470_v45 = vpop.f32.mrb[2].mxu1  ;;  %v449_v47 = vpop.f32.mrb[3].mxu0 }
  0xfa   :  { %v471_v48 = vpop.f32.mrb[3].mxu1 }
  0xfb   :  { %v368_v49 = vadd.f32 %v469_v43, %v447_v42 }
  0xfd   :  { %v386_v50 = vadd.f32 %v428_v46, %v368_v49 }
  0xff   :  { %387 = vst [vmem:[%s640_s3] sm:$0xff] %v386_v50 }

</bundles_post_ra>
